<compile_context>
chip_gen: v6e
topology: v6e:2x2x1
jax: 0.10.0
libtpu: 0.0.40
codegen_flags: <defaults>
</compile_context>

<pallas_src>
import functools

import jax
import jax.numpy as jnp
from jax import lax
from jax.experimental import pallas as pl
from jax.experimental.pallas import tpu as pltpu

EPS = 1e-5


def _round_up(v, m):
    return ((v + m - 1) // m) * m


# --------------------------------------------------------------------------
# In-kernel helpers
# --------------------------------------------------------------------------
def _conv3x3_flat(xpf_ref, w_ref, m_ref, *, H, W, pad):
    """3x3 stride-1 SAME conv on a flattened, row-padded image.

    xpf_ref: (pad + H*W + pad, C_in) bf16 scratch; rows [pad, pad+H*W) hold
             the image in h*W + w order, the pad rows before/after are zero.
    w_ref  : (9, C_in, C_out) bf16, tap t = ky*3 + kx.
    m_ref  : (H*W, 2) f32 edge masks (col 0: zero at w==0, col 1: zero at
             w==W-1) correcting the horizontal wrap of the +/-1 column taps.
    Returns (H*W, C_out) f32.
    """
    HW = H * W
    acc_by_kx = []
    for kx in range(3):
        a = None
        for ky in range(3):
            off = pad + (ky - 1) * W + (kx - 1)
            win = xpf_ref[off:off + HW, :]                    # static slice, no copy slab
            p = jnp.dot(win, w_ref[ky * 3 + kx],
                        preferred_element_type=jnp.float32)   # bf16 MXU, f32 acc
            a = p if a is None else a + p
        acc_by_kx.append(a)
    m = m_ref[...]
    return acc_by_kx[0] * m[:, 0:1] + acc_by_kx[1] + acc_by_kx[2] * m[:, 1:2]


def _zero_halo_and_fill(xpf_ref, interior_bf16, *, HW, pad, C):
    # Zero only the halo rows (tiny), every step: the interior is fully
    # rewritten each step, and zeroing only at program_id==0 would break when
    # the parallel grid is sharded across TensorCores (v7x megacore).
    zeros = jnp.zeros((pad, C), jnp.bfloat16)
    xpf_ref[0:pad, :] = zeros
    xpf_ref[pad + HW:2 * pad + HW, :] = zeros
    xpf_ref[pad:pad + HW, :] = interior_bf16                  # aligned dense store


def _partial_bn_stats(acc, st_ref, inv_n):
    # Per-image (mean, M2) partials; pivoted sum-of-squares avoids the
    # E[x^2]-E[x]^2 cancellation.  Merged across images in the wrapper.
    mu = jnp.sum(acc, axis=0, keepdims=True) * inv_n
    d = acc - mu
    st_ref[0, 0:1, :] = mu
    st_ref[0, 1:2, :] = jnp.sum(d * d, axis=0, keepdims=True)


# --------------------------------------------------------------------------
# Kernels
# --------------------------------------------------------------------------
def _conv1_stats_kernel(x_ref, w_ref, m_ref, y_ref, st_ref, xpf_ref,
                        *, H, W, C_in, pad):
    HW = H * W
    _zero_halo_and_fill(xpf_ref, x_ref[0], HW=HW, pad=pad, C=C_in)
    acc = _conv3x3_flat(xpf_ref, w_ref, m_ref, H=H, W=W, pad=pad)
    _partial_bn_stats(acc, st_ref, 1.0 / HW)
    y_ref[0] = acc.astype(y_ref.dtype)


def _bn_relu_conv2_stats_kernel(y1_ref, sc_ref, sh_ref, w_ref, m_ref,
                                y2_ref, st_ref, xpf_ref, *, H, W, C, pad):
    HW = H * W
    # bn1 + ReLU as a single fused multiply-add (scale/shift folded in wrapper).
    z = jnp.maximum(y1_ref[0].astype(jnp.float32) * sc_ref[...] + sh_ref[...], 0.0)
    _zero_halo_and_fill(xpf_ref, z.astype(jnp.bfloat16), HW=HW, pad=pad, C=C)
    acc = _conv3x3_flat(xpf_ref, w_ref, m_ref, H=H, W=W, pad=pad)
    _partial_bn_stats(acc, st_ref, 1.0 / HW)
    y2_ref[0] = acc.astype(y2_ref.dtype)


def _bn_add_relu_kernel(y2_ref, sc_ref, sh_ref, xres_ref, o_ref):
    h = (y2_ref[0].astype(jnp.float32) * sc_ref[...] + sh_ref[...]
         + xres_ref[0].astype(jnp.float32))
    o_ref[0] = jnp.maximum(h, 0.0).astype(o_ref.dtype)


# --------------------------------------------------------------------------
# Wrapper
# --------------------------------------------------------------------------
def _merge_stats(st, gamma, beta, n_per_image):
    """Welford merge of per-image (mean, M2) -> per-channel scale/shift."""
    mu_i = st[:, 0, :]                              # (N, C)
    m2_i = st[:, 1, :]                              # (N, C)
    n_img = st.shape[0]
    mean = jnp.mean(mu_i, axis=0)
    m2 = jnp.sum(m2_i, axis=0) + n_per_image * jnp.sum((mu_i - mean) ** 2, axis=0)
    var = m2 / (n_per_image * n_img)                # biased variance (BatchNorm2d)
    scale = gamma.reshape(-1) * lax.rsqrt(var + EPS)
    shift = beta.reshape(-1) - mean * scale
    return scale.reshape(1, -1), shift.reshape(1, -1)


def _vmem_limit(block_bytes, scratch_bytes, temp_bytes):
    # blocks are double-buffered by the pipeline; 2x headroom for temporaries.
    est = 2 * block_bytes + scratch_bytes + temp_bytes
    return int(min(max(2 * est, 16 * 2**20), 64 * 2**20))


def basic_block_forward(x_nchw, params):
    """BasicBlock forward. x_nchw: [N, C, H, W] float32 (PyTorch layout)."""
    N, Cin, H, W = x_nchw.shape
    w1 = params["w1"]                               # [3, 3, Cin, planes] (HWIO)
    w2 = params["w2"]                               # [3, 3, planes, planes]
    planes = w1.shape[-1]
    assert Cin == planes, "downsample=None requires inplanes==planes, stride==1"
    HW = H * W
    pad = _round_up(W + 1, 8)                       # halo rows; multiple of 8 keeps
                                                    # the interior store aligned

    # NCHW -> (N, H*W, C) fused with the f32->bf16 cast (one XLA pass, half the
    # write traffic of a separate f32 transpose); also reused as the residual.
    # TODO(synk): keep NHWC end-to-end at the model level and emit NCHW from
    #             pass 3 directly to remove the remaining exit transpose.
    x2d = jnp.transpose(x_nchw, (0, 2, 3, 1)).astype(jnp.bfloat16).reshape(N, HW, Cin)

    w1c = w1.reshape(9, Cin, planes).astype(jnp.bfloat16)      # tap-major weights
    w2c = w2.reshape(9, planes, planes).astype(jnp.bfloat16)

    # Edge-column masks for the flattened-conv wrap correction (shared by both
    # conv passes).
    col = jnp.arange(HW, dtype=jnp.int32) % W
    edge_mask = jnp.stack([(col != 0), (col != W - 1)], axis=-1).astype(jnp.float32)

    csem = ("parallel",)
    conv_flops = 2 * N * HW * 9 * Cin * planes

    # ---- pass 1: conv1 + per-image BN partials ---------------------------
    blk1 = (HW * Cin * 2 + 9 * Cin * planes * 2 + HW * 2 * 4
            + HW * planes * 2 + 2 * planes * 4)
    scr1 = (2 * pad + HW) * Cin * 2
    y1, st1 = pl.pallas_call(
        functools.partial(_conv1_stats_kernel, H=H, W=W, C_in=Cin, pad=pad),
        grid=(N,),
        in_specs=[
            pl.BlockSpec((1, HW, Cin), lambda n: (n, 0, 0)),
            pl.BlockSpec((9, Cin, planes), lambda n: (0, 0, 0)),
            pl.BlockSpec((HW, 2), lambda n: (0, 0)),
        ],
        out_specs=[
            pl.BlockSpec((1, HW, planes), lambda n: (n, 0, 0)),
            pl.BlockSpec((1, 2, planes), lambda n: (n, 0, 0)),
        ],
        out_shape=[
            jax.ShapeDtypeStruct((N, HW, planes), jnp.bfloat16),
            jax.ShapeDtypeStruct((N, 2, planes), jnp.float32),
        ],
        scratch_shapes=[pltpu.VMEM((2 * pad + HW, Cin), jnp.bfloat16)],
        compiler_params=pltpu.CompilerParams(
            dimension_semantics=csem,
            vmem_limit_bytes=_vmem_limit(blk1, scr1, 10 * HW * planes * 4)),
        cost_estimate=pl.CostEstimate(
            flops=conv_flops, transcendentals=0,
            bytes_accessed=N * HW * Cin * 2 + 9 * Cin * planes * 2
            + N * HW * planes * 2 + N * 2 * planes * 4),
    )(x2d, w1c, edge_mask)

    sc1, sh1 = _merge_stats(st1, params["gamma1"], params["beta1"], HW)

    # ---- pass 2: bn1 + ReLU + conv2 + per-image BN partials --------------
    blk2 = (2 * HW * planes * 2 + 9 * planes * planes * 2 + HW * 2 * 4
            + 4 * planes * 4)
    scr2 = (2 * pad + HW) * planes * 2
    y2, st2 = pl.pallas_call(
        functools.partial(_bn_relu_conv2_stats_kernel, H=H, W=W, C=planes, pad=pad),
        grid=(N,),
        in_specs=[
            pl.BlockSpec((1, HW, planes), lambda n: (n, 0, 0)),
            pl.BlockSpec((1, planes), lambda n: (0, 0)),
            pl.BlockSpec((1, planes), lambda n: (0, 0)),
            pl.BlockSpec((9, planes, planes), lambda n: (0, 0, 0)),
            pl.BlockSpec((HW, 2), lambda n: (0, 0)),
        ],
        out_specs=[
            pl.BlockSpec((1, HW, planes), lambda n: (n, 0, 0)),
            pl.BlockSpec((1, 2, planes), lambda n: (n, 0, 0)),
        ],
        out_shape=[
            jax.ShapeDtypeStruct((N, HW, planes), jnp.bfloat16),
            jax.ShapeDtypeStruct((N, 2, planes), jnp.float32),
        ],
        scratch_shapes=[pltpu.VMEM((2 * pad + HW, planes), jnp.bfloat16)],
        compiler_params=pltpu.CompilerParams(
            dimension_semantics=csem,
            vmem_limit_bytes=_vmem_limit(blk2, scr2, 12 * HW * planes * 4)),
        cost_estimate=pl.CostEstimate(
            flops=2 * N * HW * 9 * planes * planes, transcendentals=0,
            bytes_accessed=2 * N * HW * planes * 2 + 9 * planes * planes * 2
            + N * 2 * planes * 4),
    )(y1, sc1, sh1, w2c, edge_mask)

    sc2, sh2 = _merge_stats(st2, params["gamma2"], params["beta2"], HW)

    # ---- pass 3: bn2 + residual add + ReLU --------------------------------
    blk3 = 2 * HW * planes * 2 + HW * planes * 4 + 4 * planes * 4
    out2d = pl.pallas_call(
        _bn_add_relu_kernel,
        grid=(N,),
        in_specs=[
            pl.BlockSpec((1, HW, planes), lambda n: (n, 0, 0)),
            pl.BlockSpec((1, planes), lambda n: (0, 0)),
            pl.BlockSpec((1, planes), lambda n: (0, 0)),
            pl.BlockSpec((1, HW, planes), lambda n: (n, 0, 0)),
        ],
        out_specs=pl.BlockSpec((1, HW, planes), lambda n: (n, 0, 0)),
        out_shape=jax.ShapeDtypeStruct((N, HW, planes), jnp.float32),
        compiler_params=pltpu.CompilerParams(
            dimension_semantics=csem,
            vmem_limit_bytes=_vmem_limit(blk3, 0, 4 * HW * planes * 4)),
        cost_estimate=pl.CostEstimate(
            flops=4 * N * HW * planes, transcendentals=0,
            bytes_accessed=N * HW * planes * (2 + 2 + 4) + 4 * planes * 4),
    )(y2, sc2, sh2, x2d)

    out = out2d.reshape(N, H, W, planes)
    # TODO(synk): fold this exit transpose into pass 3 (store NCHW directly)
    #             to remove one full f32 HBM round trip.
    return jnp.transpose(out, (0, 3, 1, 2))


# --------------------------------------------------------------------------
# Params / references
# --------------------------------------------------------------------------
def init_params(key, inplanes, planes):
    k1, k2, k3, k4, k5, k6 = jax.random.split(key, 6)
    # conv weights stored HWIO: [kh, kw, Cin, Cout]
    w1 = jax.random.normal(k1, (3, 3, inplanes, planes), jnp.float32) * 0.1
    w2 = jax.random.normal(k2, (3, 3, planes, planes), jnp.float32) * 0.1
    gamma1 = 1.0 + 0.1 * jax.random.normal(k3, (planes,), jnp.float32)
    beta1 = 0.1 * jax.random.normal(k4, (planes,), jnp.float32)
    gamma2 = 1.0 + 0.1 * jax.random.normal(k5, (planes,), jnp.float32)
    beta2 = 0.1 * jax.random.normal(k6, (planes,), jnp.float32)
    return dict(w1=w1, w2=w2, gamma1=gamma1, beta1=beta1, gamma2=gamma2, beta2=beta2)


def ref_forward_f32(x_nchw, params):
    """Pure-JAX f32 reference (matches the PyTorch module)."""
    x = jnp.transpose(x_nchw, (0, 2, 3, 1)).astype(jnp.float32)

    def conv(h, w):
        return lax.conv_general_dilated(
            h, w, window_strides=(1, 1), padding="SAME",
            dimension_numbers=("NHWC", "HWIO", "NHWC"),
            precision=lax.Precision.HIGHEST)

    def bn(h, g, b):
        mean = jnp.mean(h, axis=(0, 1, 2), keepdims=True)
        var = jnp.mean((h - mean) ** 2, axis=(0, 1, 2), keepdims=True)
        return (h - mean) * lax.rsqrt(var + EPS) * g.reshape(1, 1, 1, -1) + b.reshape(1, 1, 1, -1)

    h = jax.nn.relu(bn(conv(x, params["w1"]), params["gamma1"], params["beta1"]))
    h = bn(conv(h, params["w2"]), params["gamma2"], params["beta2"])
    out = jax.nn.relu(h + x)
    return jnp.transpose(out, (0, 3, 1, 2))


def ref_forward_bf16matched(x_nchw, params):
    """Reference with the same bf16 quantization points as the Pallas kernels
    (bf16 MXU operands, f32 accumulation, bf16 intermediates, bf16 residual)."""
    x = jnp.transpose(x_nchw, (0, 2, 3, 1)).astype(jnp.float32)
    xq = x.astype(jnp.bfloat16)   # kernel keeps a single bf16 NHWC copy of x

    def conv_bf16(h_bf16, w):
        return lax.conv_general_dilated(
            h_bf16, w.astype(jnp.bfloat16),
            window_strides=(1, 1), padding="SAME",
            dimension_numbers=("NHWC", "HWIO", "NHWC"),
            preferred_element_type=jnp.float32)

    def scale_shift(y, gamma, beta):
        mean = jnp.mean(y, axis=(0, 1, 2))
        var = jnp.var(y, axis=(0, 1, 2))
        s = gamma.reshape(-1) * lax.rsqrt(var + EPS)
        return s, beta.reshape(-1) - mean * s

    y1 = conv_bf16(xq, params["w1"])
    s1, b1 = scale_shift(y1, params["gamma1"], params["beta1"])
    z = jnp.maximum(y1.astype(jnp.bfloat16).astype(jnp.float32) * s1 + b1, 0.0)
    y2 = conv_bf16(z.astype(jnp.bfloat16), params["w2"])
    s2, b2 = scale_shift(y2, params["gamma2"], params["beta2"])
    out = jnp.maximum(y2.astype(jnp.bfloat16).astype(jnp.float32) * s2 + b2
                      + xq.astype(jnp.float32), 0.0)
    return jnp.transpose(out, (0, 3, 1, 2))


# --------------------------------------------------------------------------
if __name__ == "__main__":
    key = jax.random.PRNGKey(0)
    kx_, kp = jax.random.split(key)

    N, C, H, W = 2, 8, 16, 16       # inplanes == planes, stride=1, no downsample
    x = jax.random.normal(kx_, (N, C, H, W), jnp.float32)
    params = init_params(kp, inplanes=C, planes=C)

    fwd = jax.jit(basic_block_forward)
    out = jax.block_until_ready(fwd(x, params))
    assert out.shape == (N, C, H, W) and out.dtype == jnp.float32

    # Check against a reference with identical bf16 quantization points.
    # (Tolerance covers independent bf16 rounding of intermediates: kernel MXU
    #  vs XLA conv may round a borderline value to different bf16 neighbors.)
    ref_q = jax.block_until_ready(ref_forward_bf16matched(x, params))
    err_q = float(jnp.max(jnp.abs(out - ref_q)))
    assert jnp.allclose(out, ref_q, atol=5e-3, rtol=5e-3), err_q

    # Looser sanity check against the full-f32 (PyTorch-equivalent) reference.
    ref_f = jax.block_until_ready(ref_forward_f32(x, params))
    err_f = float(jnp.max(jnp.abs(out - ref_f)))
    assert jnp.allclose(out, ref_f, atol=1e-1, rtol=1e-1), err_f

    print("KERNEL_OK")
</pallas_src>

<mosaic_0001>
module attributes {stable_mosaic.version = 11 : i64} {
  func.func @_conv1_stats_kernel(%arg0: i32, %arg1: memref<1x256x8xbf16, #tpu.memory_space<vmem>>, %arg2: memref<9x8x8xbf16, #tpu.memory_space<vmem>>, %arg3: memref<256x2xf32, #tpu.memory_space<vmem>>, %arg4: memref<1x256x8xbf16, #tpu.memory_space<vmem>>, %arg5: memref<1x2x8xf32, #tpu.memory_space<vmem>>, %arg6: memref<304x8xbf16, #tpu.memory_space<vmem>>) attributes {dimension_semantics = [#tpu.dimension_semantics<parallel>], iteration_bounds = array<i64: 2>, scalar_prefetch = 0 : i64, scratch_operands = 1 : i64, tpu.core_type = #tpu.core_type<tc>, window_params = [{transform_indices = @transform_0, window_bounds = array<i64: 1, 256, 8>}, {pipeline_mode = #tpu.pipeline_mode<synchronous>, transform_indices = @transform_1, window_bounds = array<i64: 9, 8, 8>}, {pipeline_mode = #tpu.pipeline_mode<synchronous>, transform_indices = @transform_2, window_bounds = array<i64: 256, 2>}, {transform_indices = @transform_3, window_bounds = array<i64: 1, 256, 8>}, {transform_indices = @transform_4, window_bounds = array<i64: 1, 2, 8>}]} {
    %c0 = arith.constant 0 : index
    %c0_0 = arith.constant 0 : index
    %c0_1 = arith.constant 0 : index
    %0 = vector.load %arg1[%c0, %c0_0, %c0_1] : memref<1x256x8xbf16, #tpu.memory_space<vmem>>, vector<1x256x8xbf16>
    %1 = vector.shape_cast %0 : vector<1x256x8xbf16> to vector<256x8xbf16>
    %cst = arith.constant 0.000000e+00 : bf16
    %2 = vector.broadcast %cst : bf16 to vector<24x8xbf16>
    %c0_2 = arith.constant 0 : index
    %c0_3 = arith.constant 0 : index
    %3 = vector.load %arg6[%c0_2, %c0_3] : memref<304x8xbf16, #tpu.memory_space<vmem>>, vector<24x8xbf16>
    tpu.vector_store %arg6[%c0_2, %c0_3], %2 {strides = array<i32>} : memref<304x8xbf16, #tpu.memory_space<vmem>>, vector<24x8xbf16>,
    %c280 = arith.constant 280 : index
    %c0_4 = arith.constant 0 : index
    %4 = vector.load %arg6[%c280, %c0_4] : memref<304x8xbf16, #tpu.memory_space<vmem>>, vector<24x8xbf16>
    tpu.vector_store %arg6[%c280, %c0_4], %2 {strides = array<i32>} : memref<304x8xbf16, #tpu.memory_space<vmem>>, vector<24x8xbf16>,
    %c24 = arith.constant 24 : index
    %c0_5 = arith.constant 0 : index
    %5 = vector.load %arg6[%c24, %c0_5] : memref<304x8xbf16, #tpu.memory_space<vmem>>, vector<256x8xbf16>
    tpu.vector_store %arg6[%c24, %c0_5], %1 {strides = array<i32>} : memref<304x8xbf16, #tpu.memory_space<vmem>>, vector<256x8xbf16>,
    %c7 = arith.constant 7 : index
    %c0_6 = arith.constant 0 : index
    %6 = vector.load %arg6[%c7, %c0_6] : memref<304x8xbf16, #tpu.memory_space<vmem>>, vector<256x8xbf16>
    %c0_7 = arith.constant 0 : index
    %c0_8 = arith.constant 0 : index
    %c0_9 = arith.constant 0 : index
    %7 = vector.load %arg2[%c0_7, %c0_8, %c0_9] : memref<9x8x8xbf16, #tpu.memory_space<vmem>>, vector<1x8x8xbf16>
    %8 = vector.shape_cast %7 : vector<1x8x8xbf16> to vector<8x8xbf16>
    %cst_10 = arith.constant dense<0.000000e+00> : vector<256x8xf32>
    %9 = tpu.matmul %6, %8, %cst_10 {dimension_numbers = #tpu.dot_dimension_numbers<[1], [0], [0], [1], [0, 0, 1, 1], [], []>} : vector<256x8xbf16>, vector<8x8xbf16>, vector<256x8xf32> -> vector<256x8xf32>
    %c23 = arith.constant 23 : index
    %c0_11 = arith.constant 0 : index
    %10 = vector.load %arg6[%c23, %c0_11] : memref<304x8xbf16, #tpu.memory_space<vmem>>, vector<256x8xbf16>
    %c3 = arith.constant 3 : index
    %c0_12 = arith.constant 0 : index
    %c0_13 = arith.constant 0 : index
    %11 = vector.load %arg2[%c3, %c0_12, %c0_13] : memref<9x8x8xbf16, #tpu.memory_space<vmem>>, vector<1x8x8xbf16>
    %12 = vector.shape_cast %11 : vector<1x8x8xbf16> to vector<8x8xbf16>
    %cst_14 = arith.constant dense<0.000000e+00> : vector<256x8xf32>
    %13 = tpu.matmul %10, %12, %cst_14 {dimension_numbers = #tpu.dot_dimension_numbers<[1], [0], [0], [1], [0, 0, 1, 1], [], []>} : vector<256x8xbf16>, vector<8x8xbf16>, vector<256x8xf32> -> vector<256x8xf32>
    %14 = arith.addf %9, %13 : vector<256x8xf32>
    %c39 = arith.constant 39 : index
    %c0_15 = arith.constant 0 : index
    %15 = vector.load %arg6[%c39, %c0_15] : memref<304x8xbf16, #tpu.memory_space<vmem>>, vector<256x8xbf16>
    %c6 = arith.constant 6 : index
    %c0_16 = arith.constant 0 : index
    %c0_17 = arith.constant 0 : index
    %16 = vector.load %arg2[%c6, %c0_16, %c0_17] : memref<9x8x8xbf16, #tpu.memory_space<vmem>>, vector<1x8x8xbf16>
    %17 = vector.shape_cast %16 : vector<1x8x8xbf16> to vector<8x8xbf16>
    %cst_18 = arith.constant dense<0.000000e+00> : vector<256x8xf32>
    %18 = tpu.matmul %15, %17, %cst_18 {dimension_numbers = #tpu.dot_dimension_numbers<[1], [0], [0], [1], [0, 0, 1, 1], [], []>} : vector<256x8xbf16>, vector<8x8xbf16>, vector<256x8xf32> -> vector<256x8xf32>
    %19 = arith.addf %14, %18 : vector<256x8xf32>
    %c8 = arith.constant 8 : index
    %c0_19 = arith.constant 0 : index
    %20 = vector.load %arg6[%c8, %c0_19] : memref<304x8xbf16, #tpu.memory_space<vmem>>, vector<256x8xbf16>
    %c1 = arith.constant 1 : index
    %c0_20 = arith.constant 0 : index
    %c0_21 = arith.constant 0 : index
    %21 = vector.load %arg2[%c1, %c0_20, %c0_21] : memref<9x8x8xbf16, #tpu.memory_space<vmem>>, vector<1x8x8xbf16>
    %22 = vector.shape_cast %21 : vector<1x8x8xbf16> to vector<8x8xbf16>
    %cst_22 = arith.constant dense<0.000000e+00> : vector<256x8xf32>
    %23 = tpu.matmul %20, %22, %cst_22 {dimension_numbers = #tpu.dot_dimension_numbers<[1], [0], [0], [1], [0, 0, 1, 1], [], []>} : vector<256x8xbf16>, vector<8x8xbf16>, vector<256x8xf32> -> vector<256x8xf32>
    %c24_23 = arith.constant 24 : index
    %c0_24 = arith.constant 0 : index
    %24 = vector.load %arg6[%c24_23, %c0_24] : memref<304x8xbf16, #tpu.memory_space<vmem>>, vector<256x8xbf16>
    %c4 = arith.constant 4 : index
    %c0_25 = arith.constant 0 : index
    %c0_26 = arith.constant 0 : index
    %25 = vector.load %arg2[%c4, %c0_25, %c0_26] : memref<9x8x8xbf16, #tpu.memory_space<vmem>>, vector<1x8x8xbf16>
    %26 = vector.shape_cast %25 : vector<1x8x8xbf16> to vector<8x8xbf16>
    %cst_27 = arith.constant dense<0.000000e+00> : vector<256x8xf32>
    %27 = tpu.matmul %24, %26, %cst_27 {dimension_numbers = #tpu.dot_dimension_numbers<[1], [0], [0], [1], [0, 0, 1, 1], [], []>} : vector<256x8xbf16>, vector<8x8xbf16>, vector<256x8xf32> -> vector<256x8xf32>
    %28 = arith.addf %23, %27 : vector<256x8xf32>
    %c40 = arith.constant 40 : index
    %c0_28 = arith.constant 0 : index
    %29 = vector.load %arg6[%c40, %c0_28] : memref<304x8xbf16, #tpu.memory_space<vmem>>, vector<256x8xbf16>
    %c7_29 = arith.constant 7 : index
    %c0_30 = arith.constant 0 : index
    %c0_31 = arith.constant 0 : index
    %30 = vector.load %arg2[%c7_29, %c0_30, %c0_31] : memref<9x8x8xbf16, #tpu.memory_space<vmem>>, vector<1x8x8xbf16>
    %31 = vector.shape_cast %30 : vector<1x8x8xbf16> to vector<8x8xbf16>
    %cst_32 = arith.constant dense<0.000000e+00> : vector<256x8xf32>
    %32 = tpu.matmul %29, %31, %cst_32 {dimension_numbers = #tpu.dot_dimension_numbers<[1], [0], [0], [1], [0, 0, 1, 1], [], []>} : vector<256x8xbf16>, vector<8x8xbf16>, vector<256x8xf32> -> vector<256x8xf32>
    %33 = arith.addf %28, %32 : vector<256x8xf32>
    %c9 = arith.constant 9 : index
    %c0_33 = arith.constant 0 : index
    %34 = vector.load %arg6[%c9, %c0_33] : memref<304x8xbf16, #tpu.memory_space<vmem>>, vector<256x8xbf16>
    %c2 = arith.constant 2 : index
    %c0_34 = arith.constant 0 : index
    %c0_35 = arith.constant 0 : index
    %35 = vector.load %arg2[%c2, %c0_34, %c0_35] : memref<9x8x8xbf16, #tpu.memory_space<vmem>>, vector<1x8x8xbf16>
    %36 = vector.shape_cast %35 : vector<1x8x8xbf16> to vector<8x8xbf16>
    %cst_36 = arith.constant dense<0.000000e+00> : vector<256x8xf32>
    %37 = tpu.matmul %34, %36, %cst_36 {dimension_numbers = #tpu.dot_dimension_numbers<[1], [0], [0], [1], [0, 0, 1, 1], [], []>} : vector<256x8xbf16>, vector<8x8xbf16>, vector<256x8xf32> -> vector<256x8xf32>
    %c25 = arith.constant 25 : index
    %c0_37 = arith.constant 0 : index
    %38 = vector.load %arg6[%c25, %c0_37] : memref<304x8xbf16, #tpu.memory_space<vmem>>, vector<256x8xbf16>
    %c5 = arith.constant 5 : index
    %c0_38 = arith.constant 0 : index
    %c0_39 = arith.constant 0 : index
    %39 = vector.load %arg2[%c5, %c0_38, %c0_39] : memref<9x8x8xbf16, #tpu.memory_space<vmem>>, vector<1x8x8xbf16>
    %40 = vector.shape_cast %39 : vector<1x8x8xbf16> to vector<8x8xbf16>
    %cst_40 = arith.constant dense<0.000000e+00> : vector<256x8xf32>
    %41 = tpu.matmul %38, %40, %cst_40 {dimension_numbers = #tpu.dot_dimension_numbers<[1], [0], [0], [1], [0, 0, 1, 1], [], []>} : vector<256x8xbf16>, vector<8x8xbf16>, vector<256x8xf32> -> vector<256x8xf32>
    %42 = arith.addf %37, %41 : vector<256x8xf32>
    %c41 = arith.constant 41 : index
    %c0_41 = arith.constant 0 : index
    %43 = vector.load %arg6[%c41, %c0_41] : memref<304x8xbf16, #tpu.memory_space<vmem>>, vector<256x8xbf16>
    %c8_42 = arith.constant 8 : index
    %c0_43 = arith.constant 0 : index
    %c0_44 = arith.constant 0 : index
    %44 = vector.load %arg2[%c8_42, %c0_43, %c0_44] : memref<9x8x8xbf16, #tpu.memory_space<vmem>>, vector<1x8x8xbf16>
    %45 = vector.shape_cast %44 : vector<1x8x8xbf16> to vector<8x8xbf16>
    %cst_45 = arith.constant dense<0.000000e+00> : vector<256x8xf32>
    %46 = tpu.matmul %43, %45, %cst_45 {dimension_numbers = #tpu.dot_dimension_numbers<[1], [0], [0], [1], [0, 0, 1, 1], [], []>} : vector<256x8xbf16>, vector<8x8xbf16>, vector<256x8xf32> -> vector<256x8xf32>
    %47 = arith.addf %42, %46 : vector<256x8xf32>
    %c0_46 = arith.constant 0 : index
    %c0_47 = arith.constant 0 : index
    %48 = vector.load %arg3[%c0_46, %c0_47] : memref<256x2xf32, #tpu.memory_space<vmem>>, vector<256x2xf32>
    %49 = vector.extract_strided_slice %48 {offsets = [0, 0], sizes = [256, 1], strides = [1, 1]} : vector<256x2xf32> to vector<256x1xf32>
    %50 = vector.broadcast %49 : vector<256x1xf32> to vector<256x8xf32>
    %51 = arith.mulf %19, %50 : vector<256x8xf32>
    %52 = arith.addf %51, %33 : vector<256x8xf32>
    %53 = vector.extract_strided_slice %48 {offsets = [0, 1], sizes = [256, 1], strides = [1, 1]} : vector<256x2xf32> to vector<256x1xf32>
    %54 = vector.broadcast %53 : vector<256x1xf32> to vector<256x8xf32>
    %55 = arith.mulf %47, %54 : vector<256x8xf32>
    %56 = arith.addf %52, %55 : vector<256x8xf32>
    %cst_48 = arith.constant dense<0.000000e+00> : vector<8xf32>
    %57 = vector.multi_reduction <add>, %56, %cst_48 [0] : vector<256x8xf32> to vector<8xf32>
    %58 = vector.shape_cast %57 : vector<8xf32> to vector<1x8xf32>
    %cst_49 = arith.constant 3.906250e-03 : f32
    %59 = vector.broadcast %cst_49 : f32 to vector<1x8xf32>
    %60 = arith.mulf %58, %59 : vector<1x8xf32>
    %61 = vector.broadcast %60 : vector<1x8xf32> to vector<256x8xf32>
    %62 = arith.subf %56, %61 : vector<256x8xf32>
    %c0_50 = arith.constant 0 : index
    %c0_51 = arith.constant 0 : index
    %c0_52 = arith.constant 0 : index
    %63 = vector.load %arg5[%c0_50, %c0_51, %c0_52] : memref<1x2x8xf32, #tpu.memory_space<vmem>>, vector<1x1x8xf32>
    %64 = vector.shape_cast %63 : vector<1x1x8xf32> to vector<1x8xf32>
    %65 = vector.shape_cast %60 : vector<1x8xf32> to vector<1x1x8xf32>
    tpu.vector_store %arg5[%c0_50, %c0_51, %c0_52], %65 {strides = array<i32>} : memref<1x2x8xf32, #tpu.memory_space<vmem>>, vector<1x1x8xf32>,
    %66 = arith.mulf %62, %62 : vector<256x8xf32>
    %cst_53 = arith.constant dense<0.000000e+00> : vector<8xf32>
    %67 = vector.multi_reduction <add>, %66, %cst_53 [0] : vector<256x8xf32> to vector<8xf32>
    %68 = vector.shape_cast %67 : vector<8xf32> to vector<1x8xf32>
    %c0_54 = arith.constant 0 : index
    %c1_55 = arith.constant 1 : index
    %c0_56 = arith.constant 0 : index
    %69 = vector.load %arg5[%c0_54, %c1_55, %c0_56] : memref<1x2x8xf32, #tpu.memory_space<vmem>>, vector<1x1x8xf32>
    %70 = vector.shape_cast %69 : vector<1x1x8xf32> to vector<1x8xf32>
    %71 = vector.shape_cast %68 : vector<1x8xf32> to vector<1x1x8xf32>
    tpu.vector_store %arg5[%c0_54, %c1_55, %c0_56], %71 {strides = array<i32>} : memref<1x2x8xf32, #tpu.memory_space<vmem>>, vector<1x1x8xf32>,
    %72 = arith.truncf %56 : vector<256x8xf32> to vector<256x8xbf16>
    %c0_57 = arith.constant 0 : index
    %c0_58 = arith.constant 0 : index
    %c0_59 = arith.constant 0 : index
    %73 = vector.load %arg4[%c0_57, %c0_58, %c0_59] : memref<1x256x8xbf16, #tpu.memory_space<vmem>>, vector<1x256x8xbf16>
    %74 = vector.shape_cast %73 : vector<1x256x8xbf16> to vector<256x8xbf16>
    %75 = vector.shape_cast %72 : vector<256x8xbf16> to vector<1x256x8xbf16>
    tpu.vector_store %arg4[%c0_57, %c0_58, %c0_59], %75 {strides = array<i32>} : memref<1x256x8xbf16, #tpu.memory_space<vmem>>, vector<1x256x8xbf16>,
    return
  }
  func.func @transform_0(%arg0: i32) -> (i32, i32, i32) {
    %c0_i32 = arith.constant 0 : i32
    %c0_i32_0 = arith.constant 0 : i32
    %c0_i32_1 = arith.constant 0 : i32
    return %arg0, %c0_i32, %c0_i32_0 : i32, i32, i32
  }
  func.func @transform_1(%arg0: i32) -> (i32, i32, i32) {
    %c0_i32 = arith.constant 0 : i32
    %c0_i32_0 = arith.constant 0 : i32
    %c0_i32_1 = arith.constant 0 : i32
    %c0_i32_2 = arith.constant 0 : i32
    return %c0_i32, %c0_i32_0, %c0_i32_1 : i32, i32, i32
  }
  func.func @transform_2(%arg0: i32) -> (i32, i32) {
    %c0_i32 = arith.constant 0 : i32
    %c0_i32_0 = arith.constant 0 : i32
    %c0_i32_1 = arith.constant 0 : i32
    return %c0_i32, %c0_i32_0 : i32, i32
  }
  func.func @transform_3(%arg0: i32) -> (i32, i32, i32) {
    %c0_i32 = arith.constant 0 : i32
    %c0_i32_0 = arith.constant 0 : i32
    %c0_i32_1 = arith.constant 0 : i32
    return %arg0, %c0_i32, %c0_i32_0 : i32, i32, i32
  }
  func.func @transform_4(%arg0: i32) -> (i32, i32, i32) {
    %c0_i32 = arith.constant 0 : i32
    %c0_i32_0 = arith.constant 0 : i32
    %c0_i32_1 = arith.constant 0 : i32
    return %arg0, %c0_i32, %c0_i32_0 : i32, i32, i32
  }
}

module attributes {stable_mosaic.version = 11 : i64} {
  func.func @_bn_add_relu_kernel(%arg0: i32, %arg1: memref<1x256x8xbf16, #tpu.memory_space<vmem>>, %arg2: memref<1x8xf32, #tpu.memory_space<vmem>>, %arg3: memref<1x8xf32, #tpu.memory_space<vmem>>, %arg4: memref<1x256x8xbf16, #tpu.memory_space<vmem>>, %arg5: memref<1x256x8xf32, #tpu.memory_space<vmem>>) attributes {dimension_semantics = [#tpu.dimension_semantics<parallel>], iteration_bounds = array<i64: 2>, scalar_prefetch = 0 : i64, scratch_operands = 0 : i64, tpu.core_type = #tpu.core_type<tc>, window_params = [{transform_indices = @transform_0, window_bounds = array<i64: 1, 256, 8>}, {pipeline_mode = #tpu.pipeline_mode<synchronous>, transform_indices = @transform_1, window_bounds = array<i64: 1, 8>}, {pipeline_mode = #tpu.pipeline_mode<synchronous>, transform_indices = @transform_2, window_bounds = array<i64: 1, 8>}, {transform_indices = @transform_3, window_bounds = array<i64: 1, 256, 8>}, {transform_indices = @transform_4, window_bounds = array<i64: 1, 256, 8>}]} {
    %c0 = arith.constant 0 : index
    %c0_0 = arith.constant 0 : index
    %c0_1 = arith.constant 0 : index
    %0 = vector.load %arg1[%c0, %c0_0, %c0_1] : memref<1x256x8xbf16, #tpu.memory_space<vmem>>, vector<1x256x8xbf16>
    %1 = vector.shape_cast %0 : vector<1x256x8xbf16> to vector<256x8xbf16>
    %2 = arith.extf %1 : vector<256x8xbf16> to vector<256x8xf32>
    %c0_2 = arith.constant 0 : index
    %c0_3 = arith.constant 0 : index
    %3 = vector.load %arg2[%c0_2, %c0_3] : memref<1x8xf32, #tpu.memory_space<vmem>>, vector<1x8xf32>
    %4 = vector.broadcast %3 : vector<1x8xf32> to vector<256x8xf32>
    %5 = arith.mulf %2, %4 : vector<256x8xf32>
    %c0_4 = arith.constant 0 : index
    %c0_5 = arith.constant 0 : index
    %6 = vector.load %arg3[%c0_4, %c0_5] : memref<1x8xf32, #tpu.memory_space<vmem>>, vector<1x8xf32>
    %7 = vector.broadcast %6 : vector<1x8xf32> to vector<256x8xf32>
    %8 = arith.addf %5, %7 : vector<256x8xf32>
    %c0_6 = arith.constant 0 : index
    %c0_7 = arith.constant 0 : index
    %c0_8 = arith.constant 0 : index
    %9 = vector.load %arg4[%c0_6, %c0_7, %c0_8] : memref<1x256x8xbf16, #tpu.memory_space<vmem>>, vector<1x256x8xbf16>
    %10 = vector.shape_cast %9 : vector<1x256x8xbf16> to vector<256x8xbf16>
    %11 = arith.extf %10 : vector<256x8xbf16> to vector<256x8xf32>
    %12 = arith.addf %8, %11 : vector<256x8xf32>
    %cst = arith.constant 0.000000e+00 : f32
    %13 = vector.broadcast %cst : f32 to vector<256x8xf32>
    %14 = arith.maximumf %12, %13 : vector<256x8xf32>
    %c0_9 = arith.constant 0 : index
    %c0_10 = arith.constant 0 : index
    %c0_11 = arith.constant 0 : index
    %15 = vector.load %arg5[%c0_9, %c0_10, %c0_11] : memref<1x256x8xf32, #tpu.memory_space<vmem>>, vector<1x256x8xf32>
    %16 = vector.shape_cast %15 : vector<1x256x8xf32> to vector<256x8xf32>
    %17 = vector.shape_cast %14 : vector<256x8xf32> to vector<1x256x8xf32>
    tpu.vector_store %arg5[%c0_9, %c0_10, %c0_11], %17 {strides = array<i32>} : memref<1x256x8xf32, #tpu.memory_space<vmem>>, vector<1x256x8xf32>,
    return
  }
  func.func @transform_0(%arg0: i32) -> (i32, i32, i32) {
    %c0_i32 = arith.constant 0 : i32
    %c0_i32_0 = arith.constant 0 : i32
    %c0_i32_1 = arith.constant 0 : i32
    return %arg0, %c0_i32, %c0_i32_0 : i32, i32, i32
  }
  func.func @transform_1(%arg0: i32) -> (i32, i32) {
    %c0_i32 = arith.constant 0 : i32
    %c0_i32_0 = arith.constant 0 : i32
    %c0_i32_1 = arith.constant 0 : i32
    return %c0_i32, %c0_i32_0 : i32, i32
  }
  func.func @transform_2(%arg0: i32) -> (i32, i32) {
    %c0_i32 = arith.constant 0 : i32
    %c0_i32_0 = arith.constant 0 : i32
    %c0_i32_1 = arith.constant 0 : i32
    return %c0_i32, %c0_i32_0 : i32, i32
  }
  func.func @transform_3(%arg0: i32) -> (i32, i32, i32) {
    %c0_i32 = arith.constant 0 : i32
    %c0_i32_0 = arith.constant 0 : i32
    %c0_i32_1 = arith.constant 0 : i32
    return %arg0, %c0_i32, %c0_i32_0 : i32, i32, i32
  }
  func.func @transform_4(%arg0: i32) -> (i32, i32, i32) {
    %c0_i32 = arith.constant 0 : i32
    %c0_i32_0 = arith.constant 0 : i32
    %c0_i32_1 = arith.constant 0 : i32
    return %arg0, %c0_i32, %c0_i32_0 : i32, i32, i32
  }
}

module attributes {stable_mosaic.version = 11 : i64} {
  func.func @_bn_relu_conv2_stats_kernel(%arg0: i32, %arg1: memref<1x256x8xbf16, #tpu.memory_space<vmem>>, %arg2: memref<1x8xf32, #tpu.memory_space<vmem>>, %arg3: memref<1x8xf32, #tpu.memory_space<vmem>>, %arg4: memref<9x8x8xbf16, #tpu.memory_space<vmem>>, %arg5: memref<256x2xf32, #tpu.memory_space<vmem>>, %arg6: memref<1x256x8xbf16, #tpu.memory_space<vmem>>, %arg7: memref<1x2x8xf32, #tpu.memory_space<vmem>>, %arg8: memref<304x8xbf16, #tpu.memory_space<vmem>>) attributes {dimension_semantics = [#tpu.dimension_semantics<parallel>], iteration_bounds = array<i64: 2>, scalar_prefetch = 0 : i64, scratch_operands = 1 : i64, tpu.core_type = #tpu.core_type<tc>, window_params = [{transform_indices = @transform_0, window_bounds = array<i64: 1, 256, 8>}, {pipeline_mode = #tpu.pipeline_mode<synchronous>, transform_indices = @transform_1, window_bounds = array<i64: 1, 8>}, {pipeline_mode = #tpu.pipeline_mode<synchronous>, transform_indices = @transform_2, window_bounds = array<i64: 1, 8>}, {pipeline_mode = #tpu.pipeline_mode<synchronous>, transform_indices = @transform_3, window_bounds = array<i64: 9, 8, 8>}, {pipeline_mode = #tpu.pipeline_mode<synchronous>, transform_indices = @transform_4, window_bounds = array<i64: 256, 2>}, {transform_indices = @transform_5, window_bounds = array<i64: 1, 256, 8>}, {transform_indices = @transform_6, window_bounds = array<i64: 1, 2, 8>}]} {
    %c0 = arith.constant 0 : index
    %c0_0 = arith.constant 0 : index
    %c0_1 = arith.constant 0 : index
    %0 = vector.load %arg1[%c0, %c0_0, %c0_1] : memref<1x256x8xbf16, #tpu.memory_space<vmem>>, vector<1x256x8xbf16>
    %1 = vector.shape_cast %0 : vector<1x256x8xbf16> to vector<256x8xbf16>
    %2 = arith.extf %1 : vector<256x8xbf16> to vector<256x8xf32>
    %c0_2 = arith.constant 0 : index
    %c0_3 = arith.constant 0 : index
    %3 = vector.load %arg2[%c0_2, %c0_3] : memref<1x8xf32, #tpu.memory_space<vmem>>, vector<1x8xf32>
    %4 = vector.broadcast %3 : vector<1x8xf32> to vector<256x8xf32>
    %5 = arith.mulf %2, %4 : vector<256x8xf32>
    %c0_4 = arith.constant 0 : index
    %c0_5 = arith.constant 0 : index
    %6 = vector.load %arg3[%c0_4, %c0_5] : memref<1x8xf32, #tpu.memory_space<vmem>>, vector<1x8xf32>
    %7 = vector.broadcast %6 : vector<1x8xf32> to vector<256x8xf32>
    %8 = arith.addf %5, %7 : vector<256x8xf32>
    %cst = arith.constant 0.000000e+00 : f32
    %9 = vector.broadcast %cst : f32 to vector<256x8xf32>
    %10 = arith.maximumf %8, %9 : vector<256x8xf32>
    %11 = arith.truncf %10 : vector<256x8xf32> to vector<256x8xbf16>
    %cst_6 = arith.constant 0.000000e+00 : bf16
    %12 = vector.broadcast %cst_6 : bf16 to vector<24x8xbf16>
    %c0_7 = arith.constant 0 : index
    %c0_8 = arith.constant 0 : index
    %13 = vector.load %arg8[%c0_7, %c0_8] : memref<304x8xbf16, #tpu.memory_space<vmem>>, vector<24x8xbf16>
    tpu.vector_store %arg8[%c0_7, %c0_8], %12 {strides = array<i32>} : memref<304x8xbf16, #tpu.memory_space<vmem>>, vector<24x8xbf16>,
    %c280 = arith.constant 280 : index
    %c0_9 = arith.constant 0 : index
    %14 = vector.load %arg8[%c280, %c0_9] : memref<304x8xbf16, #tpu.memory_space<vmem>>, vector<24x8xbf16>
    tpu.vector_store %arg8[%c280, %c0_9], %12 {strides = array<i32>} : memref<304x8xbf16, #tpu.memory_space<vmem>>, vector<24x8xbf16>,
    %c24 = arith.constant 24 : index
    %c0_10 = arith.constant 0 : index
    %15 = vector.load %arg8[%c24, %c0_10] : memref<304x8xbf16, #tpu.memory_space<vmem>>, vector<256x8xbf16>
    tpu.vector_store %arg8[%c24, %c0_10], %11 {strides = array<i32>} : memref<304x8xbf16, #tpu.memory_space<vmem>>, vector<256x8xbf16>,
    %c7 = arith.constant 7 : index
    %c0_11 = arith.constant 0 : index
    %16 = vector.load %arg8[%c7, %c0_11] : memref<304x8xbf16, #tpu.memory_space<vmem>>, vector<256x8xbf16>
    %c0_12 = arith.constant 0 : index
    %c0_13 = arith.constant 0 : index
    %c0_14 = arith.constant 0 : index
    %17 = vector.load %arg4[%c0_12, %c0_13, %c0_14] : memref<9x8x8xbf16, #tpu.memory_space<vmem>>, vector<1x8x8xbf16>
    %18 = vector.shape_cast %17 : vector<1x8x8xbf16> to vector<8x8xbf16>
    %cst_15 = arith.constant dense<0.000000e+00> : vector<256x8xf32>
    %19 = tpu.matmul %16, %18, %cst_15 {dimension_numbers = #tpu.dot_dimension_numbers<[1], [0], [0], [1], [0, 0, 1, 1], [], []>} : vector<256x8xbf16>, vector<8x8xbf16>, vector<256x8xf32> -> vector<256x8xf32>
    %c23 = arith.constant 23 : index
    %c0_16 = arith.constant 0 : index
    %20 = vector.load %arg8[%c23, %c0_16] : memref<304x8xbf16, #tpu.memory_space<vmem>>, vector<256x8xbf16>
    %c3 = arith.constant 3 : index
    %c0_17 = arith.constant 0 : index
    %c0_18 = arith.constant 0 : index
    %21 = vector.load %arg4[%c3, %c0_17, %c0_18] : memref<9x8x8xbf16, #tpu.memory_space<vmem>>, vector<1x8x8xbf16>
    %22 = vector.shape_cast %21 : vector<1x8x8xbf16> to vector<8x8xbf16>
    %cst_19 = arith.constant dense<0.000000e+00> : vector<256x8xf32>
    %23 = tpu.matmul %20, %22, %cst_19 {dimension_numbers = #tpu.dot_dimension_numbers<[1], [0], [0], [1], [0, 0, 1, 1], [], []>} : vector<256x8xbf16>, vector<8x8xbf16>, vector<256x8xf32> -> vector<256x8xf32>
    %24 = arith.addf %19, %23 : vector<256x8xf32>
    %c39 = arith.constant 39 : index
    %c0_20 = arith.constant 0 : index
    %25 = vector.load %arg8[%c39, %c0_20] : memref<304x8xbf16, #tpu.memory_space<vmem>>, vector<256x8xbf16>
    %c6 = arith.constant 6 : index
    %c0_21 = arith.constant 0 : index
    %c0_22 = arith.constant 0 : index
    %26 = vector.load %arg4[%c6, %c0_21, %c0_22] : memref<9x8x8xbf16, #tpu.memory_space<vmem>>, vector<1x8x8xbf16>
    %27 = vector.shape_cast %26 : vector<1x8x8xbf16> to vector<8x8xbf16>
    %cst_23 = arith.constant dense<0.000000e+00> : vector<256x8xf32>
    %28 = tpu.matmul %25, %27, %cst_23 {dimension_numbers = #tpu.dot_dimension_numbers<[1], [0], [0], [1], [0, 0, 1, 1], [], []>} : vector<256x8xbf16>, vector<8x8xbf16>, vector<256x8xf32> -> vector<256x8xf32>
    %29 = arith.addf %24, %28 : vector<256x8xf32>
    %c8 = arith.constant 8 : index
    %c0_24 = arith.constant 0 : index
    %30 = vector.load %arg8[%c8, %c0_24] : memref<304x8xbf16, #tpu.memory_space<vmem>>, vector<256x8xbf16>
    %c1 = arith.constant 1 : index
    %c0_25 = arith.constant 0 : index
    %c0_26 = arith.constant 0 : index
    %31 = vector.load %arg4[%c1, %c0_25, %c0_26] : memref<9x8x8xbf16, #tpu.memory_space<vmem>>, vector<1x8x8xbf16>
    %32 = vector.shape_cast %31 : vector<1x8x8xbf16> to vector<8x8xbf16>
    %cst_27 = arith.constant dense<0.000000e+00> : vector<256x8xf32>
    %33 = tpu.matmul %30, %32, %cst_27 {dimension_numbers = #tpu.dot_dimension_numbers<[1], [0], [0], [1], [0, 0, 1, 1], [], []>} : vector<256x8xbf16>, vector<8x8xbf16>, vector<256x8xf32> -> vector<256x8xf32>
    %c24_28 = arith.constant 24 : index
    %c0_29 = arith.constant 0 : index
    %34 = vector.load %arg8[%c24_28, %c0_29] : memref<304x8xbf16, #tpu.memory_space<vmem>>, vector<256x8xbf16>
    %c4 = arith.constant 4 : index
    %c0_30 = arith.constant 0 : index
    %c0_31 = arith.constant 0 : index
    %35 = vector.load %arg4[%c4, %c0_30, %c0_31] : memref<9x8x8xbf16, #tpu.memory_space<vmem>>, vector<1x8x8xbf16>
    %36 = vector.shape_cast %35 : vector<1x8x8xbf16> to vector<8x8xbf16>
    %cst_32 = arith.constant dense<0.000000e+00> : vector<256x8xf32>
    %37 = tpu.matmul %34, %36, %cst_32 {dimension_numbers = #tpu.dot_dimension_numbers<[1], [0], [0], [1], [0, 0, 1, 1], [], []>} : vector<256x8xbf16>, vector<8x8xbf16>, vector<256x8xf32> -> vector<256x8xf32>
    %38 = arith.addf %33, %37 : vector<256x8xf32>
    %c40 = arith.constant 40 : index
    %c0_33 = arith.constant 0 : index
    %39 = vector.load %arg8[%c40, %c0_33] : memref<304x8xbf16, #tpu.memory_space<vmem>>, vector<256x8xbf16>
    %c7_34 = arith.constant 7 : index
    %c0_35 = arith.constant 0 : index
    %c0_36 = arith.constant 0 : index
    %40 = vector.load %arg4[%c7_34, %c0_35, %c0_36] : memref<9x8x8xbf16, #tpu.memory_space<vmem>>, vector<1x8x8xbf16>
    %41 = vector.shape_cast %40 : vector<1x8x8xbf16> to vector<8x8xbf16>
    %cst_37 = arith.constant dense<0.000000e+00> : vector<256x8xf32>
    %42 = tpu.matmul %39, %41, %cst_37 {dimension_numbers = #tpu.dot_dimension_numbers<[1], [0], [0], [1], [0, 0, 1, 1], [], []>} : vector<256x8xbf16>, vector<8x8xbf16>, vector<256x8xf32> -> vector<256x8xf32>
    %43 = arith.addf %38, %42 : vector<256x8xf32>
    %c9 = arith.constant 9 : index
    %c0_38 = arith.constant 0 : index
    %44 = vector.load %arg8[%c9, %c0_38] : memref<304x8xbf16, #tpu.memory_space<vmem>>, vector<256x8xbf16>
    %c2 = arith.constant 2 : index
    %c0_39 = arith.constant 0 : index
    %c0_40 = arith.constant 0 : index
    %45 = vector.load %arg4[%c2, %c0_39, %c0_40] : memref<9x8x8xbf16, #tpu.memory_space<vmem>>, vector<1x8x8xbf16>
    %46 = vector.shape_cast %45 : vector<1x8x8xbf16> to vector<8x8xbf16>
    %cst_41 = arith.constant dense<0.000000e+00> : vector<256x8xf32>
    %47 = tpu.matmul %44, %46, %cst_41 {dimension_numbers = #tpu.dot_dimension_numbers<[1], [0], [0], [1], [0, 0, 1, 1], [], []>} : vector<256x8xbf16>, vector<8x8xbf16>, vector<256x8xf32> -> vector<256x8xf32>
    %c25 = arith.constant 25 : index
    %c0_42 = arith.constant 0 : index
    %48 = vector.load %arg8[%c25, %c0_42] : memref<304x8xbf16, #tpu.memory_space<vmem>>, vector<256x8xbf16>
    %c5 = arith.constant 5 : index
    %c0_43 = arith.constant 0 : index
    %c0_44 = arith.constant 0 : index
    %49 = vector.load %arg4[%c5, %c0_43, %c0_44] : memref<9x8x8xbf16, #tpu.memory_space<vmem>>, vector<1x8x8xbf16>
    %50 = vector.shape_cast %49 : vector<1x8x8xbf16> to vector<8x8xbf16>
    %cst_45 = arith.constant dense<0.000000e+00> : vector<256x8xf32>
    %51 = tpu.matmul %48, %50, %cst_45 {dimension_numbers = #tpu.dot_dimension_numbers<[1], [0], [0], [1], [0, 0, 1, 1], [], []>} : vector<256x8xbf16>, vector<8x8xbf16>, vector<256x8xf32> -> vector<256x8xf32>
    %52 = arith.addf %47, %51 : vector<256x8xf32>
    %c41 = arith.constant 41 : index
    %c0_46 = arith.constant 0 : index
    %53 = vector.load %arg8[%c41, %c0_46] : memref<304x8xbf16, #tpu.memory_space<vmem>>, vector<256x8xbf16>
    %c8_47 = arith.constant 8 : index
    %c0_48 = arith.constant 0 : index
    %c0_49 = arith.constant 0 : index
    %54 = vector.load %arg4[%c8_47, %c0_48, %c0_49] : memref<9x8x8xbf16, #tpu.memory_space<vmem>>, vector<1x8x8xbf16>
    %55 = vector.shape_cast %54 : vector<1x8x8xbf16> to vector<8x8xbf16>
    %cst_50 = arith.constant dense<0.000000e+00> : vector<256x8xf32>
    %56 = tpu.matmul %53, %55, %cst_50 {dimension_numbers = #tpu.dot_dimension_numbers<[1], [0], [0], [1], [0, 0, 1, 1], [], []>} : vector<256x8xbf16>, vector<8x8xbf16>, vector<256x8xf32> -> vector<256x8xf32>
    %57 = arith.addf %52, %56 : vector<256x8xf32>
    %c0_51 = arith.constant 0 : index
    %c0_52 = arith.constant 0 : index
    %58 = vector.load %arg5[%c0_51, %c0_52] : memref<256x2xf32, #tpu.memory_space<vmem>>, vector<256x2xf32>
    %59 = vector.extract_strided_slice %58 {offsets = [0, 0], sizes = [256, 1], strides = [1, 1]} : vector<256x2xf32> to vector<256x1xf32>
    %60 = vector.broadcast %59 : vector<256x1xf32> to vector<256x8xf32>
    %61 = arith.mulf %29, %60 : vector<256x8xf32>
    %62 = arith.addf %61, %43 : vector<256x8xf32>
    %63 = vector.extract_strided_slice %58 {offsets = [0, 1], sizes = [256, 1], strides = [1, 1]} : vector<256x2xf32> to vector<256x1xf32>
    %64 = vector.broadcast %63 : vector<256x1xf32> to vector<256x8xf32>
    %65 = arith.mulf %57, %64 : vector<256x8xf32>
    %66 = arith.addf %62, %65 : vector<256x8xf32>
    %cst_53 = arith.constant dense<0.000000e+00> : vector<8xf32>
    %67 = vector.multi_reduction <add>, %66, %cst_53 [0] : vector<256x8xf32> to vector<8xf32>
    %68 = vector.shape_cast %67 : vector<8xf32> to vector<1x8xf32>
    %cst_54 = arith.constant 3.906250e-03 : f32
    %69 = vector.broadcast %cst_54 : f32 to vector<1x8xf32>
    %70 = arith.mulf %68, %69 : vector<1x8xf32>
    %71 = vector.broadcast %70 : vector<1x8xf32> to vector<256x8xf32>
    %72 = arith.subf %66, %71 : vector<256x8xf32>
    %c0_55 = arith.constant 0 : index
    %c0_56 = arith.constant 0 : index
    %c0_57 = arith.constant 0 : index
    %73 = vector.load %arg7[%c0_55, %c0_56, %c0_57] : memref<1x2x8xf32, #tpu.memory_space<vmem>>, vector<1x1x8xf32>
    %74 = vector.shape_cast %73 : vector<1x1x8xf32> to vector<1x8xf32>
    %75 = vector.shape_cast %70 : vector<1x8xf32> to vector<1x1x8xf32>
    tpu.vector_store %arg7[%c0_55, %c0_56, %c0_57], %75 {strides = array<i32>} : memref<1x2x8xf32, #tpu.memory_space<vmem>>, vector<1x1x8xf32>,
    %76 = arith.mulf %72, %72 : vector<256x8xf32>
    %cst_58 = arith.constant dense<0.000000e+00> : vector<8xf32>
    %77 = vector.multi_reduction <add>, %76, %cst_58 [0] : vector<256x8xf32> to vector<8xf32>
    %78 = vector.shape_cast %77 : vector<8xf32> to vector<1x8xf32>
    %c0_59 = arith.constant 0 : index
    %c1_60 = arith.constant 1 : index
    %c0_61 = arith.constant 0 : index
    %79 = vector.load %arg7[%c0_59, %c1_60, %c0_61] : memref<1x2x8xf32, #tpu.memory_space<vmem>>, vector<1x1x8xf32>
    %80 = vector.shape_cast %79 : vector<1x1x8xf32> to vector<1x8xf32>
    %81 = vector.shape_cast %78 : vector<1x8xf32> to vector<1x1x8xf32>
    tpu.vector_store %arg7[%c0_59, %c1_60, %c0_61], %81 {strides = array<i32>} : memref<1x2x8xf32, #tpu.memory_space<vmem>>, vector<1x1x8xf32>,
    %82 = arith.truncf %66 : vector<256x8xf32> to vector<256x8xbf16>
    %c0_62 = arith.constant 0 : index
    %c0_63 = arith.constant 0 : index
    %c0_64 = arith.constant 0 : index
    %83 = vector.load %arg6[%c0_62, %c0_63, %c0_64] : memref<1x256x8xbf16, #tpu.memory_space<vmem>>, vector<1x256x8xbf16>
    %84 = vector.shape_cast %83 : vector<1x256x8xbf16> to vector<256x8xbf16>
    %85 = vector.shape_cast %82 : vector<256x8xbf16> to vector<1x256x8xbf16>
    tpu.vector_store %arg6[%c0_62, %c0_63, %c0_64], %85 {strides = array<i32>} : memref<1x256x8xbf16, #tpu.memory_space<vmem>>, vector<1x256x8xbf16>,
    return
  }
  func.func @transform_0(%arg0: i32) -> (i32, i32, i32) {
    %c0_i32 = arith.constant 0 : i32
    %c0_i32_0 = arith.constant 0 : i32
    %c0_i32_1 = arith.constant 0 : i32
    return %arg0, %c0_i32, %c0_i32_0 : i32, i32, i32
  }
  func.func @transform_1(%arg0: i32) -> (i32, i32) {
    %c0_i32 = arith.constant 0 : i32
    %c0_i32_0 = arith.constant 0 : i32
    %c0_i32_1 = arith.constant 0 : i32
    return %c0_i32, %c0_i32_0 : i32, i32
  }
  func.func @transform_2(%arg0: i32) -> (i32, i32) {
    %c0_i32 = arith.constant 0 : i32
    %c0_i32_0 = arith.constant 0 : i32
    %c0_i32_1 = arith.constant 0 : i32
    return %c0_i32, %c0_i32_0 : i32, i32
  }
  func.func @transform_3(%arg0: i32) -> (i32, i32, i32) {
    %c0_i32 = arith.constant 0 : i32
    %c0_i32_0 = arith.constant 0 : i32
    %c0_i32_1 = arith.constant 0 : i32
    %c0_i32_2 = arith.constant 0 : i32
    return %c0_i32, %c0_i32_0, %c0_i32_1 : i32, i32, i32
  }
  func.func @transform_4(%arg0: i32) -> (i32, i32) {
    %c0_i32 = arith.constant 0 : i32
    %c0_i32_0 = arith.constant 0 : i32
    %c0_i32_1 = arith.constant 0 : i32
    return %c0_i32, %c0_i32_0 : i32, i32
  }
  func.func @transform_5(%arg0: i32) -> (i32, i32, i32) {
    %c0_i32 = arith.constant 0 : i32
    %c0_i32_0 = arith.constant 0 : i32
    %c0_i32_1 = arith.constant 0 : i32
    return %arg0, %c0_i32, %c0_i32_0 : i32, i32, i32
  }
  func.func @transform_6(%arg0: i32) -> (i32, i32, i32) {
    %c0_i32 = arith.constant 0 : i32
    %c0_i32_0 = arith.constant 0 : i32
    %c0_i32_1 = arith.constant 0 : i32
    return %arg0, %c0_i32, %c0_i32_0 : i32, i32, i32
  }
}

</mosaic_0001>

<bundles_post_ra>
// kernel: basic_block_forward.5
= control target key start
LH: loop header
LB: loop body
LE: loop exit
PB: predicated region body
PF: predicated region fallthrough
CT: control target
= control target key end

     0   :  { %s805_s15 = smov 0   ;;  %s1005_s0 = inlined_call_operand.vmem [shape: bf16[2,256,8], index: 0, kind: input, shape index: {}]   ;;  %s1006_s1 = inlined_call_operand.vmem [shape: f32[1,8], index: 1, kind: input, shape index: {}]   ;;  %s1007_s2 = inlined_call_operand.vmem [shape: f32[1,8], index: 2, kind: input, shape index: {}]   ;;  %s1008_s3 = inlined_call_operand.vmem [shape: bf16[2,256,8], index: 3, kind: input, shape index: {}]   ;;  %s1009_s4 = inlined_call_operand.vmem [shape: f32[2,256,8], index: 4, kind: output, shape index: {}]  }
   0x1 LB: > { %s588_s16 = sadd.s32 4294967295, %s778_s15   ;;  %p592_p0 = scmp.ge.s32.totalorder %s778_s15, 1  ;;  %s778_s15 = sphi %s805_s15, %s14_s15  }
   0x2   : > { %p172_p1 = scmp.lt.s32.totalorder %s778_s15, 3 }
   0x4   : > { %p173_p2 = pnand %p592_p0, %p172_p1 }
   0x5   : > { %p203_p3 = scmp.lt.s32.totalorder (!%p173_p2), %s588_s16, 1 }
   0x6   : > { %176 = sbr.rel (%p173_p2) target bundleno = 69 (0x45), region = 36 }
   0xb   : > { %s1011_s16 = smov (!%p203_p3, %s588_s16), 1  ;;  %v829_v0 = vld [vmem:[%s1006_s1] ss:$0 sm:$0xff]  ;;  %vm488_vm0 = vcmask 64512  }
   0xc   : > { %s603_s17 = sshll.u32 %s1011_s16, 7  ;;  %v840_v11 = vld [vmem:[%s1007_s2] ss:$0 sm:$0xff]  ;;  %s605_s28 = sshll.u32 %s1011_s16, 8 }
   0xd   : > { %s819_s20 = scalar_lea.vmem %s1005_s0, %s603_s17  ;;  %s824_s23 = scalar_lea.vmem %s1008_s3, %s603_s17 }
   0xe   : > { %v607_v1 = vld [vmem:[%s819_s20] sm:$0xff]   ;;  %v734_v3 = vld [vmem:[%s819_s20 + $0x8] sm:$0xff]   ;;  %v735_v9 = vld [vmem:[%s819_s20 + $0x10] sm:$0xff]   ;;  %s860_s5 = scalar_lea.vmem %s1009_s4, %s605_s28 }
   0xf   : > { %v671_v2 = vld [vmem:[%s824_s23] sm:$0xff]   ;;  %v608_v4 = vunpack.c.l.bf16 %v607_v1  ;;  %v609_v6 = vunpack.c.h.bf16 %v607_v1  ;;  %v749_v8 = vld [vmem:[%s824_s23 + $0x8] sm:$0xff]   ;;  %v750_v10 = vld [vmem:[%s824_s23 + $0x10] sm:$0xff]   ;;  %v612_v12 = vunpack.c.l.bf16 %v734_v3  ;;  %v613_v14 = vunpack.c.h.bf16 %v734_v3 }
  0x10   : > { %v672_v5 = vunpack.c.l.bf16 %v671_v2  ;;  %v673_v7 = vunpack.c.h.bf16 %v671_v2  ;;  %v676_v13 = vunpack.c.l.bf16 %v749_v8  ;;  %v677_v15 = vunpack.c.h.bf16 %v749_v8  ;;  %v736_v16 = vld [vmem:[%s819_s20 + $0x18] sm:$0xff]   ;;  %v737_v42 = vld [vmem:[%s819_s20 + $0x20] sm:$0xff]   ;;  %v738_v52 = vld [vmem:[%s819_s20 + $0x28] sm:$0xff]  }
  0x11   : > { %v289_v17 = vmul.f32 %v608_v4, %v829_v0  ;;  %v290_v18 = vmul.f32 %v609_v6, %v829_v0  ;;  %v616_v19 = vunpack.c.l.bf16 %v735_v9  ;;  %v680_v20 = vunpack.c.l.bf16 %v750_v10  ;;  %v751_v21 = vld [vmem:[%s824_s23 + $0x18] sm:$0xff]   ;;  %v752_v47 = vld [vmem:[%s824_s23 + $0x20] sm:$0xff]   ;;  %v753_v57 = vld [vmem:[%s824_s23 + $0x28] sm:$0xff]  }
  0x12   : > { %v291_v22 = vmul.f32 %v612_v12, %v829_v0  ;;  %v292_v23 = vmul.f32 %v613_v14, %v829_v0  ;;  %v617_v24 = vunpack.c.h.bf16 %v735_v9  ;;  %v681_v25 = vunpack.c.h.bf16 %v750_v10  ;;  %v739_v62 = vld [vmem:[%s819_s20 + $0x30] sm:$0xff]   ;;  %v740_v14 = vld [vmem:[%s819_s20 + $0x38] sm:$0xff]  }
  0x13   : > { %v328_v26 = vadd.f32 %v840_v11, %v289_v17  ;;  %v329_v27 = vadd.f32 %v840_v11, %v290_v18  ;;  %v293_v28 = vmul.f32 %v616_v19, %v829_v0  ;;  %v620_v29 = vunpack.c.l.bf16 %v736_v16  ;;  %v754_v4 = vld [vmem:[%s824_s23 + $0x30] sm:$0xff]  }
  0x14   : > { %v330_v30 = vadd.f32 %v840_v11, %v291_v22  ;;  %v331_v31 = vadd.f32 %v840_v11, %v292_v23  ;;  %v294_v32 = vmul.f32 %v617_v24, %v829_v0  ;;  %v684_v33 = vunpack.c.l.bf16 %v751_v21  ;;  %v755_v23 = vld [vmem:[%s824_s23 + $0x38] sm:$0xff]  }
  0x15   : > { %v424_v34 = vadd.f32 %v672_v5, %v328_v26  ;;  %v425_v35 = vadd.f32 %v673_v7, %v329_v27  ;;  %v332_v36 = vadd.f32 %v840_v11, %v293_v28  ;;  %v295_v37 = vmul.f32 %v620_v29, %v829_v0 }
  0x16   : > { %v426_v38 = vadd.f32 %v676_v13, %v330_v30  ;;  %v427_v39 = vadd.f32 %v677_v15, %v331_v31  ;;  %v333_v40 = vadd.f32 %v840_v11, %v294_v32  ;;  %v621_v41 = vunpack.c.h.bf16 %v736_v16  ;;  %v741_v32 = vld [vmem:[%s819_s20 + $0x40] sm:$0xff]  }
  0x17   : > { %v456_v43 = vmax.f32 %v424_v34, 0.0  ;;  %v457_v44 = vmax.f32 %v425_v35, 0.0  ;;  %v428_v45 = vadd.f32 %v680_v20, %v332_v36  ;;  %v334_v46 = vadd.f32 %v840_v11, %v295_v37  ;;  %v756_v37 = vld [vmem:[%s824_s23 + $0x40] sm:$0xff]  }
  0x18   : > { %v458_v48 = vmax.f32 %v426_v38, 0.0  ;;  %v459_v49 = vmax.f32 %v427_v39, 0.0  ;;  %v429_v50 = vadd.f32 %v681_v25, %v333_v40  ;;  %v296_v51 = vmul.f32 %v621_v41, %v829_v0 }
  0x19   : > { %489 = vst.msk [vmem:[%s860_s5] sm:$0xff] %vm488_vm0, %v456_v43  ;;  %490 = vst.msk [vmem:[%s860_s5 + $0x8] sm:$0xff] %vm488_vm0, %v457_v44  ;;  %v460_v53 = vmax.f32 %v428_v45, 0.0  ;;  %v430_v54 = vadd.f32 %v684_v33, %v334_v46  ;;  %v685_v55 = vunpack.c.h.bf16 %v751_v21  ;;  %v624_v56 = vunpack.c.l.bf16 %v737_v42  ;;  %v742_v46 = vld [vmem:[%s819_s20 + $0x48] sm:$0xff]  }
  0x1a   : > { %491 = vst.msk [vmem:[%s860_s5 + $0x10] sm:$0xff] %vm488_vm0, %v458_v48  ;;  %492 = vst.msk [vmem:[%s860_s5 + $0x18] sm:$0xff] %vm488_vm0, %v459_v49  ;;  %v461_v58 = vmax.f32 %v429_v50, 0.0  ;;  %v335_v59 = vadd.f32 %v840_v11, %v296_v51  ;;  %v688_v60 = vunpack.c.l.bf16 %v752_v47  ;;  %v625_v61 = vunpack.c.h.bf16 %v737_v42 }
  0x1b   : > { %493 = vst.msk [vmem:[%s860_s5 + $0x20] sm:$0xff] %vm488_vm0, %v460_v53  ;;  %v462_v63 = vmax.f32 %v430_v54, 0.0  ;;  %v297_v1 = vmul.f32 %v624_v56, %v829_v0  ;;  %v689_v2 = vunpack.c.h.bf16 %v752_v47  ;;  %v628_v3 = vunpack.c.l.bf16 %v738_v52  ;;  %v757_v47 = vld [vmem:[%s824_s23 + $0x48] sm:$0xff]   ;;  %v743_v56 = vld [vmem:[%s819_s20 + $0x50] sm:$0xff]  }
  0x1c   : > { %494 = vst.msk [vmem:[%s860_s5 + $0x28] sm:$0xff] %vm488_vm0, %v461_v58  ;;  %v431_v5 = vadd.f32 %v685_v55, %v335_v59  ;;  %v298_v6 = vmul.f32 %v625_v61, %v829_v0  ;;  %v692_v7 = vunpack.c.l.bf16 %v753_v57  ;;  %v629_v8 = vunpack.c.h.bf16 %v738_v52  ;;  %v758_v61 = vld [vmem:[%s824_s23 + $0x50] sm:$0xff]  }
  0x1d   : > { %495 = vst.msk [vmem:[%s860_s5 + $0x30] sm:$0xff] %vm488_vm0, %v462_v63  ;;  %v336_v9 = vadd.f32 %v840_v11, %v297_v1  ;;  %v299_v10 = vmul.f32 %v628_v3, %v829_v0  ;;  %v693_v12 = vunpack.c.h.bf16 %v753_v57  ;;  %v632_v13 = vunpack.c.l.bf16 %v739_v62 }
  0x1e   : > { %v463_v15 = vmax.f32 %v431_v5, 0.0  ;;  %v337_v16 = vadd.f32 %v840_v11, %v298_v6  ;;  %v300_v17 = vmul.f32 %v629_v8, %v829_v0  ;;  %v696_v18 = vunpack.c.l.bf16 %v754_v4 }
  0x1f   : > { %v432_v19 = vadd.f32 %v688_v60, %v336_v9  ;;  %v338_v20 = vadd.f32 %v840_v11, %v299_v10  ;;  %v301_v21 = vmul.f32 %v632_v13, %v829_v0  ;;  %v633_v22 = vunpack.c.h.bf16 %v739_v62 }
  0x20   : > { %496 = vst.msk [vmem:[%s860_s5 + $0x38] sm:$0xff] %vm488_vm0, %v463_v15  ;;  %v433_v24 = vadd.f32 %v689_v2, %v337_v16  ;;  %v339_v25 = vadd.f32 %v840_v11, %v300_v17  ;;  %v697_v26 = vunpack.c.h.bf16 %v754_v4  ;;  %v636_v27 = vunpack.c.l.bf16 %v740_v14  ;;  %v759_v17 = vld [vmem:[%s824_s23 + $0x58] sm:$0xff]  }
  0x21   : > { %v464_v28 = vmax.f32 %v432_v19, 0.0  ;;  %v434_v29 = vadd.f32 %v692_v7, %v338_v20  ;;  %v340_v30 = vadd.f32 %v840_v11, %v301_v21  ;;  %v302_v31 = vmul.f32 %v633_v22, %v829_v0 }
  0x22   : > { %v465_v33 = vmax.f32 %v433_v24, 0.0  ;;  %v435_v34 = vadd.f32 %v693_v12, %v339_v25  ;;  %v303_v35 = vmul.f32 %v636_v27, %v829_v0  ;;  %v700_v36 = vunpack.c.l.bf16 %v755_v23  ;;  %v744_v12 = vld [vmem:[%s819_s20 + $0x58] sm:$0xff]  }
  0x23   : > { %497 = vst.msk [vmem:[%s860_s5 + $0x40] sm:$0xff] %vm488_vm0, %v464_v28  ;;  %v466_v38 = vmax.f32 %v434_v29, 0.0  ;;  %v436_v39 = vadd.f32 %v696_v18, %v340_v30  ;;  %v341_v40 = vadd.f32 %v840_v11, %v302_v31  ;;  %v637_v41 = vunpack.c.h.bf16 %v740_v14  ;;  %v760_v31 = vld [vmem:[%s824_s23 + $0x60] sm:$0xff]  }
  0x24   : > { %498 = vst.msk [vmem:[%s860_s5 + $0x48] sm:$0xff] %vm488_vm0, %v465_v33  ;;  %v467_v42 = vmax.f32 %v435_v34, 0.0  ;;  %v342_v43 = vadd.f32 %v840_v11, %v303_v35  ;;  %v701_v44 = vunpack.c.h.bf16 %v755_v23  ;;  %v640_v45 = vunpack.c.l.bf16 %v741_v32 }
  0x25   : > { %499 = vst.msk [vmem:[%s860_s5 + $0x50] sm:$0xff] %vm488_vm0, %v466_v38  ;;  %v468_v48 = vmax.f32 %v436_v39, 0.0  ;;  %v437_v49 = vadd.f32 %v697_v26, %v341_v40  ;;  %v304_v50 = vmul.f32 %v637_v41, %v829_v0  ;;  %v704_v51 = vunpack.c.l.bf16 %v756_v37  ;;  %v745_v26 = vld [vmem:[%s819_s20 + $0x60] sm:$0xff]   ;;  %v746_v40 = vld [vmem:[%s819_s20 + $0x68] sm:$0xff]  }
  0x26   : > { %500 = vst.msk [vmem:[%s860_s5 + $0x58] sm:$0xff] %vm488_vm0, %v467_v42  ;;  %v438_v52 = vadd.f32 %v700_v36, %v342_v43  ;;  %v305_v53 = vmul.f32 %v640_v45, %v829_v0  ;;  %v641_v54 = vunpack.c.h.bf16 %v741_v32  ;;  %v705_v55 = vunpack.c.h.bf16 %v756_v37  ;;  %v761_v41 = vld [vmem:[%s824_s23 + $0x68] sm:$0xff]  }
  0x27   : > { %501 = vst.msk [vmem:[%s860_s5 + $0x60] sm:$0xff] %vm488_vm0, %v468_v48  ;;  %v469_v57 = vmax.f32 %v437_v49, 0.0  ;;  %v343_v58 = vadd.f32 %v840_v11, %v304_v50  ;;  %v644_v59 = vunpack.c.l.bf16 %v742_v46  ;;  %v708_v60 = vunpack.c.l.bf16 %v757_v47  ;;  %v747_v50 = vld [vmem:[%s819_s20 + $0x70] sm:$0xff]  }
  0x28   : > { %v470_v62 = vmax.f32 %v438_v52, 0.0  ;;  %v344_v63 = vadd.f32 %v840_v11, %v305_v53  ;;  %v306_v1 = vmul.f32 %v641_v54, %v829_v0  ;;  %v645_v2 = vunpack.c.h.bf16 %v742_v46 }
  0x29   : > { %502 = vst.msk [vmem:[%s860_s5 + $0x68] sm:$0xff] %vm488_vm0, %v469_v57  ;;  %v439_v3 = vadd.f32 %v701_v44, %v343_v58  ;;  %v307_v4 = vmul.f32 %v644_v59, %v829_v0  ;;  %v709_v5 = vunpack.c.h.bf16 %v757_v47  ;;  %v648_v6 = vunpack.c.l.bf16 %v743_v56  ;;  %v762_v59 = vld [vmem:[%s824_s23 + $0x70] sm:$0xff]  }
  0x2a   : > { %503 = vst.msk [vmem:[%s860_s5 + $0x70] sm:$0xff] %vm488_vm0, %v470_v62  ;;  %v440_v7 = vadd.f32 %v704_v51, %v344_v63  ;;  %v345_v8 = vadd.f32 %v840_v11, %v306_v1  ;;  %v308_v9 = vmul.f32 %v645_v2, %v829_v0  ;;  %v712_v10 = vunpack.c.l.bf16 %v758_v61 }
  0x2b   : > { %v471_v13 = vmax.f32 %v439_v3, 0.0  ;;  %v346_v14 = vadd.f32 %v840_v11, %v307_v4  ;;  %v309_v15 = vmul.f32 %v648_v6, %v829_v0  ;;  %v649_v16 = vunpack.c.h.bf16 %v743_v56 }
  0x2c   : > { %v472_v18 = vmax.f32 %v440_v7, 0.0  ;;  %v441_v19 = vadd.f32 %v705_v55, %v345_v8  ;;  %v347_v20 = vadd.f32 %v840_v11, %v308_v9  ;;  %v713_v21 = vunpack.c.h.bf16 %v758_v61 }
  0x2d   : > { %504 = vst.msk [vmem:[%s860_s5 + $0x78] sm:$0xff] %vm488_vm0, %v471_v13  ;;  %v442_v22 = vadd.f32 %v708_v60, %v346_v14  ;;  %v348_v23 = vadd.f32 %v840_v11, %v309_v15  ;;  %v310_v24 = vmul.f32 %v649_v16, %v829_v0  ;;  %v652_v25 = vunpack.c.l.bf16 %v744_v12 }
  0x2e   : > { %505 = vst.msk [vmem:[%s860_s5 + $0x80] sm:$0xff] %vm488_vm0, %v472_v18  ;;  %v473_v27 = vmax.f32 %v441_v19, 0.0  ;;  %v443_v28 = vadd.f32 %v709_v5, %v347_v20  ;;  %v716_v29 = vunpack.c.l.bf16 %v759_v17  ;;  %v653_v30 = vunpack.c.h.bf16 %v744_v12  ;;  %v748_v5 = vld [vmem:[%s819_s20 + $0x78] sm:$0xff]  }
  0x2f   : > { %v474_v32 = vmax.f32 %v442_v22, 0.0  ;;  %v444_v33 = vadd.f32 %v712_v10, %v348_v23  ;;  %v349_v34 = vadd.f32 %v840_v11, %v310_v24  ;;  %v311_v35 = vmul.f32 %v652_v25, %v829_v0  ;;  %v763_v10 = vld [vmem:[%s824_s23 + $0x78] sm:$0xff]  }
  0x30   : > { %506 = vst.msk [vmem:[%s860_s5 + $0x88] sm:$0xff] %vm488_vm0, %v473_v27  ;;  %v475_v36 = vmax.f32 %v443_v28, 0.0  ;;  %v312_v37 = vmul.f32 %v653_v30, %v829_v0  ;;  %v717_v38 = vunpack.c.h.bf16 %v759_v17  ;;  %v656_v39 = vunpack.c.l.bf16 %v745_v26 }
  0x31   : > { %507 = vst.msk [vmem:[%s860_s5 + $0x90] sm:$0xff] %vm488_vm0, %v474_v32  ;;  %v476_v42 = vmax.f32 %v444_v33, 0.0  ;;  %v445_v43 = vadd.f32 %v713_v21, %v349_v34  ;;  %v350_v44 = vadd.f32 %v840_v11, %v311_v35  ;;  %v720_v45 = vunpack.c.l.bf16 %v760_v31 }
  0x32   : > { %508 = vst.msk [vmem:[%s860_s5 + $0x98] sm:$0xff] %vm488_vm0, %v475_v36  ;;  %v351_v46 = vadd.f32 %v840_v11, %v312_v37  ;;  %v313_v47 = vmul.f32 %v656_v39, %v829_v0  ;;  %v657_v48 = vunpack.c.h.bf16 %v745_v26  ;;  %v721_v49 = vunpack.c.h.bf16 %v760_v31 }
  0x33   : > { %509 = vst.msk [vmem:[%s860_s5 + $0xa0] sm:$0xff] %vm488_vm0, %v476_v42  ;;  %v477_v51 = vmax.f32 %v445_v43, 0.0  ;;  %v446_v52 = vadd.f32 %v716_v29, %v350_v44  ;;  %v660_v53 = vunpack.c.l.bf16 %v746_v40  ;;  %v724_v54 = vunpack.c.l.bf16 %v761_v41 }
  0x34   : > { %v447_v55 = vadd.f32 %v717_v38, %v351_v46  ;;  %v352_v56 = vadd.f32 %v840_v11, %v313_v47  ;;  %v314_v57 = vmul.f32 %v657_v48, %v829_v0  ;;  %v661_v58 = vunpack.c.h.bf16 %v746_v40 }
  0x35   : > { %510 = vst.msk [vmem:[%s860_s5 + $0xa8] sm:$0xff] %vm488_vm0, %v477_v51  ;;  %v478_v60 = vmax.f32 %v446_v52, 0.0  ;;  %v315_v61 = vmul.f32 %v660_v53, %v829_v0  ;;  %v725_v62 = vunpack.c.h.bf16 %v761_v41  ;;  %v664_v63 = vunpack.c.l.bf16 %v747_v50 }
  0x36   : > { %v479_v1 = vmax.f32 %v447_v55, 0.0  ;;  %v448_v2 = vadd.f32 %v720_v45, %v352_v56  ;;  %v353_v3 = vadd.f32 %v840_v11, %v314_v57  ;;  %v316_v4 = vmul.f32 %v661_v58, %v829_v0 }
  0x37   : > { %511 = vst.msk [vmem:[%s860_s5 + $0xb0] sm:$0xff] %vm488_vm0, %v478_v60  ;;  %v354_v6 = vadd.f32 %v840_v11, %v315_v61  ;;  %v317_v7 = vmul.f32 %v664_v63, %v829_v0  ;;  %v728_v8 = vunpack.c.l.bf16 %v762_v59  ;;  %v665_v9 = vunpack.c.h.bf16 %v747_v50 }
  0x38   : > { %512 = vst.msk [vmem:[%s860_s5 + $0xb8] sm:$0xff] %vm488_vm0, %v479_v1  ;;  %v480_v12 = vmax.f32 %v448_v2, 0.0  ;;  %v449_v13 = vadd.f32 %v721_v49, %v353_v3  ;;  %v355_v14 = vadd.f32 %v840_v11, %v316_v4  ;;  %v729_v15 = vunpack.c.h.bf16 %v762_v59 }
  0x39   : > { %v450_v16 = vadd.f32 %v724_v54, %v354_v6  ;;  %v356_v17 = vadd.f32 %v840_v11, %v317_v7  ;;  %v318_v18 = vmul.f32 %v665_v9, %v829_v0  ;;  %v668_v19 = vunpack.c.l.bf16 %v748_v5 }
  0x3a   : > { %513 = vst.msk [vmem:[%s860_s5 + $0xc0] sm:$0xff] %vm488_vm0, %v480_v12  ;;  %v481_v20 = vmax.f32 %v449_v13, 0.0  ;;  %v451_v21 = vadd.f32 %v725_v62, %v355_v14  ;;  %v732_v22 = vunpack.c.l.bf16 %v763_v10  ;;  %v669_v23 = vunpack.c.h.bf16 %v748_v5 }
  0x3b   : > { %v482_v24 = vmax.f32 %v450_v16, 0.0  ;;  %v452_v25 = vadd.f32 %v728_v8, %v356_v17  ;;  %v357_v26 = vadd.f32 %v840_v11, %v318_v18  ;;  %v319_v27 = vmul.f32 %v668_v19, %v829_v0 }
  0x3c   : > { %514 = vst.msk [vmem:[%s860_s5 + $0xc8] sm:$0xff] %vm488_vm0, %v481_v20  ;;  %v483_v28 = vmax.f32 %v451_v21, 0.0  ;;  %v320_v29 = vmul.f32 %v669_v23, %v829_v0  ;;  %v733_v30 = vunpack.c.h.bf16 %v763_v10 }
  0x3d   : > { %515 = vst.msk [vmem:[%s860_s5 + $0xd0] sm:$0xff] %vm488_vm0, %v482_v24  ;;  %v484_v31 = vmax.f32 %v452_v25, 0.0  ;;  %v453_v32 = vadd.f32 %v729_v15, %v357_v26  ;;  %v358_v33 = vadd.f32 %v840_v11, %v319_v27 }
  0x3e   : > { %516 = vst.msk [vmem:[%s860_s5 + $0xd8] sm:$0xff] %vm488_vm0, %v483_v28  ;;  %v359_v34 = vadd.f32 %v840_v11, %v320_v29 }
  0x3f   : > { %517 = vst.msk [vmem:[%s860_s5 + $0xe0] sm:$0xff] %vm488_vm0, %v484_v31  ;;  %v485_v35 = vmax.f32 %v453_v32, 0.0  ;;  %v454_v36 = vadd.f32 %v732_v22, %v358_v33 }
  0x40   : > { %v455_v37 = vadd.f32 %v733_v30, %v359_v34 }
  0x41   : > { %518 = vst.msk [vmem:[%s860_s5 + $0xe8] sm:$0xff] %vm488_vm0, %v485_v35  ;;  %v486_v0 = vmax.f32 %v454_v36, 0.0 }
  0x42   : > { %v487_v38 = vmax.f32 %v455_v37, 0.0 }
  0x43   : > { %519 = vst.msk [vmem:[%s860_s5 + $0xf0] sm:$0xff] %vm488_vm0, %v486_v0 }
  0x44   : > { %520 = vst.msk [vmem:[%s860_s5 + $0xf8] sm:$0xff] %vm488_vm0, %v487_v38 }
  0x45 PF: > { %s14_s15 = sadd.s32 1, %s778_s15  }
  0x46   : > { %p11_p4 = scmp.ge.s32.totalorder %s14_s15, 4  }
  0x48   :  { %13 = sbr.rel (!%p11_p4) target bundleno = 1 (0x1), region = 69 }

// kernel: basic_block_forward.3
= control target key start
LH: loop header
LB: loop body
LE: loop exit
PB: predicated region body
PF: predicated region fallthrough
CT: control target
= control target key end

     0   :  { %s5175_s15 = smov 0   ;;  %s7263_s0 = inlined_call_operand.vmem [shape: bf16[2,256,8], index: 0, kind: input, shape index: {}]   ;;  %s7264_s1 = inlined_call_operand.vmem [shape: bf16[9,8,8], index: 1, kind: input, shape index: {}]   ;;  %s7265_s2 = inlined_call_operand.vmem [shape: f32[256,2], index: 2, kind: input, shape index: {}]   ;;  %s7266_s3 = inlined_call_operand.vmem [shape: bf16[2,256,8], index: 3, kind: output, shape index: {0}]   ;;  %s7267_s4 = inlined_call_operand.vmem [shape: f32[2,2,8], index: 4, kind: output, shape index: {1}]  }
   0x1 LB: > { %s4208_s16 = sadd.s32 4294967295, %s5146_s15   ;;  %p4212_p0 = scmp.ge.s32.totalorder %s5146_s15, 1  ;;  %s5146_s15 = sphi %s5175_s15, %s15_s15  }
   0x2   : > { %p165_p1 = scmp.lt.s32.totalorder %s5146_s15, 3 }
   0x4   : > { %p166_p2 = pnand %p4212_p0, %p165_p1 }
   0x6   : > { %169 = sbr.rel (%p166_p2) target bundleno = 648 (0x288), region = 32 }
   0xb   : > { %v4218_v0 = vld [vmem:[%s7264_s1 + $0xc] sm:$0xf]  ;;  %vm605_vm0 = vcmask 1043456   ;;  %v5189_v1 = vld [vmem:[%s7265_s2 + $0x10] sm:$0xff]  ;;  %p195_p3 = scmp.lt.s32.totalorder %s4208_s16, 1  ;;  %vm242_vm1 = vcmask 60416  }
   0xc   : > { %5006 = vmatprep.subr.msk.bf16.mxu1 %vm605_vm0, %v4218_v0  ;;  %5005 = vmatprep.subr.msk.bf16.mxu0 %vm605_vm0, %v4218_v0  ;;  %v607_v2 = vsel %vm605_vm0, %v4218_v0, 0  ;;  %v7270_v3 = vmov 0   ;;  %v314_v4 = vld [vmem:[%s7264_s1] sm:$0xf]  ;;  %v4271_v5 = vld [vmem:[%s7264_s1 + $0x18] sm:$0xf] }
   0xd   : > { %5004 = vmatpush3.bf16.msra.mxu1 %v607_v2  ;;  %5026 = vset.pattern.permute.xlu1 %v7270_v3  ;;  %s7580_s16 = smov (!%p195_p3, %s4208_s16), 1  ;;  %245 = vst.msk [vmem:[#allocation2 + $0x8] sm:$0xf] %vm242_vm1, %v7270_v3  ;;  %243 = vst.msk [vmem:[#allocation2] sm:$0xf] %vm242_vm1, %v7270_v3  ;;  %v5222_v6 = vld [vmem:[%s7265_s2 + $0x18] sm:$0xff] }
   0xe   : > { %244 = vst.msk [vmem:[#allocation2 + $0x4] sm:$0xf] %vm242_vm1, %v7270_v3  ;;  %246 = vst.msk [vmem:[#allocation2 + $0x8c] sm:$0xf] %vm242_vm1, %v7270_v3  ;;  %4698 = vmatpush3.bf16.msra.mxu0 %v607_v2  ;;  %3352 = vperm.xlu1 %5026, %v5189_v1   ;;  %s4510_s25 = sshll.u32 %s7580_s16, 7  ;;  %v5232_v7 = vsel %vm605_vm0, %v314_v4, 0 }
   0xf   : > { %247 = vst.msk [vmem:[#allocation2 + $0x90] sm:$0xf] %vm242_vm1, %v7270_v3  ;;  %248 = vst.msk [vmem:[#allocation2 + $0x94] sm:$0xf] %vm242_vm1, %v7270_v3  ;;  %5007 = vmatprep.subr.msk.bf16.mxu1 %vm605_vm0, %v314_v4  ;;  %5008 = vmatprep.subr.msk.bf16.mxu0 %vm605_vm0, %v4271_v5  ;;  %s5229_s30 = scalar_lea.vmem %s7263_s0, %s4510_s25  ;;  %v5237_v8 = vld [vmem:[%s7265_s2] sm:$0xff]  ;;  %v5246_v12 = vld [vmem:[%s7265_s2 + $0x28] sm:$0xff]  ;;  %s6791_s10 = scalar_lea.vmem %s7266_s3, %s4510_s25 }
  0x10   : > { %5025 = vset.pattern.permute.xlu0 %v7270_v3  ;;  %v210_v9 = vld [vmem:[%s5229_s30] sm:$0xf]  ;;  %v211_v10 = vld [vmem:[%s5229_s30 + $0x4] sm:$0xf]  ;;  %v212_v11 = vld [vmem:[%s5229_s30 + $0x8] sm:$0xf] }
  0x11   : > { %3342 = vperm.xlu0 %5025, %v5237_v8   ;;  %v213_v13 = vld [vmem:[%s5229_s30 + $0xc] sm:$0xf]  ;;  %249 = vst.msk [vmem:[#allocation2 + $0xc] sm:$0xf] %vm242_vm1, %v210_v9  ;;  %250 = vst.msk [vmem:[#allocation2 + $0x10] sm:$0xf] %vm242_vm1, %v211_v10 }
  0x12   : > { %251 = vst.msk [vmem:[#allocation2 + $0x14] sm:$0xf] %vm242_vm1, %v212_v11  ;;  %v225_v14 = vld [vmem:[%s5229_s30 + $0x3c] sm:$0xf]  ;;  %v226_v15 = vld [vmem:[%s5229_s30 + $0x40] sm:$0xf]  ;;  %3357 = vperm.xlu1 %5026, %v5222_v6  }
  0x13   : > { %252 = vst.msk [vmem:[#allocation2 + $0x18] sm:$0xf] %vm242_vm1, %v213_v13  ;;  %v227_v16 = vld [vmem:[%s5229_s30 + $0x44] sm:$0xf]  ;;  %v228_v17 = vld [vmem:[%s5229_s30 + $0x48] sm:$0xf] }
  0x14   : > { %264 = vst.msk [vmem:[#allocation2 + $0x48] sm:$0xf] %vm242_vm1, %v225_v14  ;;  %265 = vst.msk [vmem:[#allocation2 + $0x4c] sm:$0xf] %vm242_vm1, %v226_v15  ;;  %v214_v18 = vld [vmem:[%s5229_s30 + $0x10] sm:$0xf] }
  0x15   : > { %266 = vst.msk [vmem:[#allocation2 + $0x50] sm:$0xf] %vm242_vm1, %v227_v16  ;;  %267 = vst.msk [vmem:[#allocation2 + $0x54] sm:$0xf] %vm242_vm1, %v228_v17  ;;  %v229_v19 = vld [vmem:[%s5229_s30 + $0x4c] sm:$0xf] }
  0x16   : > { %253 = vst.msk [vmem:[#allocation2 + $0x1c] sm:$0xf] %vm242_vm1, %v214_v18  ;;  %v230_v20 = vld [vmem:[%s5229_s30 + $0x50] sm:$0xf]  ;;  %v5268_v21 = vsel %vm605_vm0, %v4271_v5, 0  ;;  %v5278_v26 = vld [vmem:[%s7265_s2 + $0x38] sm:$0xff]  ;;  %3367 = vperm.xlu1 %5026, %v5246_v12  }
  0x17   : > { %v315_v22 = vld [vmem:[#allocation2 + $0x8] sm:$0x8]  ;;  %268 = vst.msk [vmem:[#allocation2 + $0x58] sm:$0xf] %vm242_vm1, %v229_v19  ;;  %269 = vst.msk [vmem:[#allocation2 + $0x5c] sm:$0xf] %vm242_vm1, %v230_v20 }
  0x18   : > { %v215_v23 = vld [vmem:[%s5229_s30 + $0x14] sm:$0xf]  ;;  %v216_v24 = vld [vmem:[%s5229_s30 + $0x18] sm:$0xf]  ;;  %v217_v28 = vld [vmem:[%s5229_s30 + $0x1c] sm:$0xf] }
  0x19   : > { %v231_v25 = vld [vmem:[%s5229_s30 + $0x54] sm:$0xf]  ;;  %254 = vst.msk [vmem:[#allocation2 + $0x20] sm:$0xf] %vm242_vm1, %v215_v23  ;;  %255 = vst.msk [vmem:[#allocation2 + $0x24] sm:$0xf] %vm242_vm1, %v216_v24 }
  0x1a   : > { %v232_v27 = vld [vmem:[%s5229_s30 + $0x58] sm:$0xf]  ;;  %270 = vst.msk [vmem:[#allocation2 + $0x60] sm:$0xf] %vm242_vm1, %v231_v25  ;;  %v218_v29 = vld [vmem:[%s5229_s30 + $0x20] sm:$0xf]  ;;  %3377 = vperm.xlu1 %5026, %v5278_v26  }
  0x1b   : > { %vm403_vm2 = vsmask.f32 4352  ;;  %271 = vst.msk [vmem:[#allocation2 + $0x64] sm:$0xf] %vm242_vm1, %v232_v27  ;;  %256 = vst.msk [vmem:[#allocation2 + $0x28] sm:$0xf] %vm242_vm1, %v217_v28 }
  0x1c   : > { %257 = vst.msk [vmem:[#allocation2 + $0x2c] sm:$0xf] %vm242_vm1, %v218_v29  ;;  %v233_v30 = vld [vmem:[%s5229_s30 + $0x5c] sm:$0xf]  ;;  %v234_v31 = vld [vmem:[%s5229_s30 + $0x60] sm:$0xf] }
  0x1d   : > { %v219_v32 = vld [vmem:[%s5229_s30 + $0x24] sm:$0xf]  ;;  %vm556_vm3 = vcmask 64512   ;;  %272 = vst.msk [vmem:[#allocation2 + $0x68] sm:$0xf] %vm242_vm1, %v233_v30  ;;  %v7268_v2 = vmov 1  }
  0x1e   : > { %273 = vst.msk [vmem:[#allocation2 + $0x6c] sm:$0xf] %vm242_vm1, %v234_v31  ;;  %v220_v33 = vld [vmem:[%s5229_s30 + $0x28] sm:$0xf]  ;;  %258 = vst.msk [vmem:[#allocation2 + $0x30] sm:$0xf] %vm242_vm1, %v219_v32  ;;  %5027 = vset.pattern.permute.xlu1 %v7268_v2 }
  0x1f   : > { %v235_v34 = vld [vmem:[%s5229_s30 + $0x64] sm:$0xf]  ;;  %v236_v35 = vld [vmem:[%s5229_s30 + $0x68] sm:$0xf]  ;;  %v5299_v36 = vld [vmem:[#allocation2 + $0xc] sm:$0xf]  ;;  %3565 = vperm.xlu1 %5027, %v5237_v8  }
  0x20   : > { %v285_v37 = vld [vmem:[#allocation2 + $0x10] sm:$0xf]  ;;  %v286_v38 = vld [vmem:[#allocation2 + $0x14] sm:$0xf]  ;;  %259 = vst.msk [vmem:[#allocation2 + $0x34] sm:$0xf] %vm242_vm1, %v220_v33  ;;  %v4219_v40 = vcombine.low %v315_v22, %v5299_v36 }
  0x21   : > { %274 = vst.msk [vmem:[#allocation2 + $0x70] sm:$0xf] %vm242_vm1, %v235_v34  ;;  %275 = vst.msk [vmem:[#allocation2 + $0x74] sm:$0xf] %vm242_vm1, %v236_v35  ;;  %v287_v39 = vld [vmem:[#allocation2 + $0x18] sm:$0xf]  ;;  %v4220_v41 = vcombine.low %v285_v37, %v286_v38  ;;  %v5307_v44 = vcombine.low %v5299_v36, %v285_v37 }
  0x22   : > { %v299_v42 = vld [vmem:[#allocation2 + $0x48] sm:$0xf]  ;;  %v300_v43 = vld [vmem:[#allocation2 + $0x4c] sm:$0xf]  ;;  %v5309_v45 = vcombine.low %v286_v38, %v287_v39  ;;  %v301_v46 = vld [vmem:[#allocation2 + $0x50] sm:$0xf] }
  0x23   : > { %7315 = vst [vmem:[#allocation3_spill] sm:$0xff] %v5307_v44  ;;  %v302_v47 = vld [vmem:[#allocation2 + $0x54] sm:$0xf]  ;;  %v4227_v48 = vcombine.low %v299_v42, %v300_v43  ;;  %v5311_v49 = vld [vmem:[#allocation2 + $0x1c] sm:$0xf]  ;;  %v405_v50 = vshrl.u32 %v4219_v40, 16  ;;  %3573 = vperm.xlu1 %5027, %v5189_v1  }
  0x24   : > { %7316 = vst [vmem:[#allocation4_spill] sm:$0xff] %v5309_v45  ;;  %v408_v51 = vshll.u32 %v4219_v40, 16  ;;  %v413_v52 = vshrl.u32 %v4220_v41, 16  ;;  %v416_v53 = vshll.u32 %v4220_v41, 16  ;;  %v4228_v54 = vcombine.low %v301_v46, %v302_v47  ;;  %v303_v58 = vld [vmem:[#allocation2 + $0x58] sm:$0xf] }
  0x25   : > { %v476_v55 = vshrl.u32 %v4227_v48, 16  ;;  %v479_v56 = vshll.u32 %v4227_v48, 16  ;;  %v4221_v57 = vcombine.low %v287_v39, %v5311_v49  ;;  %v5314_v59 = vld [vmem:[#allocation2 + $0x5c] sm:$0xf]  ;;  %v407_v60 = vrot.slane %v405_v50, 3  ;;  %s4217_s25 = sshll.u32 %s7580_s16, 1 }
  0x26   : > { %v410_v61 = vrot.slane %v408_v51, 4  ;;  %v415_v62 = vrot.slane %v413_v52, 3  ;;  %v418_v63 = vrot.slane %v416_v53, 4  ;;  %v5316_v0 = vld [vmem:[#allocation2 + $0x20] sm:$0xf]  ;;  %v485_v9 = vshrl.u32 %v4228_v54, 16  ;;  %s7118_s13 = scalar_lea.vmem %s7267_s4, %s4217_s25 }
  0x27   : > { %v478_v4 = vrot.slane %v476_v55, 3  ;;  %v481_v5 = vrot.slane %v479_v56, 4  ;;  %v488_v10 = vshll.u32 %v4228_v54, 16  ;;  %v5319_v11 = vld [vmem:[#allocation2 + $0x24] sm:$0xf]  ;;  %v422_v15 = vshrl.u32 %v4221_v57, 16  ;;  %3577 = vperm.xlu1 %5027, %v5222_v6  }
  0x28   : > { %v411_v13 = vor.u32 %v410_v61, %v407_v60  ;;  %v5322_v14 = vor.u32 %v418_v63, %v415_v62  ;;  %v425_v16 = vshll.u32 %v4221_v57, 16  ;;  %v5324_v17 = vld [vmem:[#allocation2 + $0x60] sm:$0xf]  ;;  %v5326_v18 = vld [vmem:[#allocation2 + $0x64] sm:$0xf]  ;;  %v487_v20 = vrot.slane %v485_v9, 3 }
  0x29   : > { %v5328_v19 = vor.u32 %v481_v5, %v478_v4  ;;  %v490_v22 = vrot.slane %v488_v10, 4  ;;  %v4229_v23 = vcombine.low %v303_v58, %v5314_v59  ;;  %v5331_v24 = vld [vmem:[#allocation2 + $0x28] sm:$0xf]  ;;  %v5333_v25 = vld [vmem:[#allocation2 + $0x2c] sm:$0xf]  ;;  %v424_v27 = vrot.slane %v422_v15, 3 }
  0x2a   : > { %v420_v8 = vsel %vm403_vm2, %v411_v13, %v5322_v14  ;;  %v427_v28 = vrot.slane %v425_v16, 4  ;;  %v4222_v29 = vcombine.low %v5316_v0, %v5319_v11  ;;  %v4230_v33 = vcombine.low %v5324_v17, %v5326_v18  ;;  %v5342_v34 = vld [vmem:[#allocation2 + $0x68] sm:$0xf]  ;;  %v5344_v35 = vld [vmem:[#allocation2 + $0x6c] sm:$0xf] }
  0x2b   : > { %4699 = vmatprep.mubr.msk.bf16.mxu0 %vm556_vm3, %v420_v8  ;;  %v491_v30 = vor.u32 %v490_v22, %v487_v20  ;;  %v494_v31 = vshrl.u32 %v4229_v23, 16  ;;  %v497_v32 = vshll.u32 %v4229_v23, 16  ;;  %v5346_v37 = vld [vmem:[#allocation2 + $0x30] sm:$0xf]  ;;  %v5348_v38 = vld [vmem:[#allocation2 + $0x34] sm:$0xf]  ;;  %v4223_v42 = vcombine.low %v5331_v24, %v5333_v25  ;;  %3585 = vperm.xlu1 %5027, %v5246_v12  }
  0x2c   : > { %v428_v39 = vor.u32 %v427_v28, %v424_v27  ;;  %v431_v40 = vshrl.u32 %v4222_v29, 16  ;;  %v434_v41 = vshll.u32 %v4222_v29, 16  ;;  %v5353_v43 = vld [vmem:[#allocation2 + $0x70] sm:$0xf]  ;;  %v5355_v46 = vld [vmem:[#allocation2 + $0x74] sm:$0xf]  ;;  %v4231_v15 = vcombine.low %v5342_v34, %v5344_v35 }
  0x2d   : > { %v221_v47 = vld [vmem:[%s5229_s30 + $0x2c] sm:$0xf]  ;;  %v5361_v48 = vld [vmem:[%s7264_s1 + $0x4] sm:$0xf]  ;;  %v5365_v1 = vsel %vm403_vm2, %v5328_v19, %v491_v30  ;;  %v496_v50 = vrot.slane %v494_v31, 3  ;;  %v499_v51 = vrot.slane %v497_v32, 4  ;;  %v4224_v16 = vcombine.low %v5346_v37, %v5348_v38 }
  0x2e   : > { %7317 = vst [vmem:[#allocation5_spill] sm:$0xff] %v5365_v1  ;;  %v503_v52 = vshrl.u32 %v4230_v33, 16  ;;  %v222_v53 = vld [vmem:[%s5229_s30 + $0x30] sm:$0xf]  ;;  %260 = vst.msk [vmem:[#allocation2 + $0x38] sm:$0xf] %vm242_vm1, %v221_v47  ;;  %4715 = vmatprep.mubr.msk.bf16.mxu1 %vm556_vm3, %v5365_v1  ;;  %v5373_v54 = vsel %vm403_vm2, %v5322_v14, %v428_v39  ;;  %v4232_v27 = vcombine.low %v5353_v43, %v5355_v46 }
  0x2f   : > { %v433_v55 = vrot.slane %v431_v40, 3  ;;  %v436_v56 = vrot.slane %v434_v41, 4  ;;  %v506_v57 = vshll.u32 %v4230_v33, 16  ;;  %261 = vst.msk [vmem:[#allocation2 + $0x3c] sm:$0xf] %vm242_vm1, %v222_v53  ;;  %v5380_v60 = vld [vmem:[%s7265_s2 + $0x8] sm:$0xff]  ;;  %4700 = vmatmul.mubr.msk.bf16.vlgmr.msra.gmra.mxu0 %vm556_vm3, %v5373_v54  ;;  %v500_v61 = vor.u32 %v499_v51, %v496_v50  ;;  %3593 = vperm.xlu1 %5027, %v5278_v26  }
  0x30   : > { %v237_v58 = vld [vmem:[%s5229_s30 + $0x6c] sm:$0xf]  ;;  %v505_v62 = vrot.slane %v503_v52, 3  ;;  %v440_v63 = vshrl.u32 %v4223_v42, 16  ;;  %v443_v4 = vshll.u32 %v4223_v42, 16  ;;  %4766 = vmatpush3.bf16.msra.mxu0 %v5268_v21  ;;  %3347 = vperm.xlu0 %5025, %v5380_v60   ;;  %v5404_v21 = vld [vmem:[%s7265_s2 + $0x20] sm:$0xff] }
  0x31   : > { %v238_v5 = vld [vmem:[%s5229_s30 + $0x70] sm:$0xf]  ;;  %276 = vst.msk [vmem:[#allocation2 + $0x78] sm:$0xf] %vm242_vm1, %v237_v58  ;;  %v437_v10 = vor.u32 %v436_v56, %v433_v55  ;;  %v508_v13 = vrot.slane %v506_v57, 4  ;;  %v5407_v22 = vsel %vm403_vm2, %v491_v30, %v500_v61  ;;  %5010 = vmatprep.subr.msk.bf16.mxu0 %vm605_vm0, %v5361_v48  ;;  %v512_v32 = vshrl.u32 %v4231_v15, 16 }
  0x32   : > { %v5390_v9 = vld [vmem:[%s7264_s1 + $0x10] sm:$0xf]  ;;  %277 = vst.msk [vmem:[#allocation2 + $0x7c] sm:$0xf] %vm242_vm1, %v238_v5  ;;  %v223_v6 = vld [vmem:[%s5229_s30 + $0x34] sm:$0xf]  ;;  %4716 = vmatmul.mubr.msk.bf16.vlgmr.msra.gmra.mxu1 %vm556_vm3, %v5407_v22 }
  0x33   : > { %v224_v20 = vld [vmem:[%s5229_s30 + $0x38] sm:$0xf]  ;;  %7318 = vst [vmem:[#allocation6_spill] sm:$0xff] %v5407_v22  ;;  %v442_v23 = vrot.slane %v440_v63, 3  ;;  %v445_v8 = vrot.slane %v443_v4, 4  ;;  %v5420_v30 = vsel %vm403_vm2, %v428_v39, %v437_v10  ;;  %v509_v31 = vor.u32 %v508_v13, %v505_v62  ;;  %4732 = vmatpush3.bf16.msra.mxu1 %v5232_v7 }
  0x34   : > { %262 = vst.msk [vmem:[#allocation2 + $0x40] sm:$0xf] %vm242_vm1, %v223_v6  ;;  %263 = vst.msk [vmem:[#allocation2 + $0x44] sm:$0xf] %vm242_vm1, %v224_v20  ;;  %v239_v28 = vld [vmem:[%s5229_s30 + $0x74] sm:$0xf]  ;;  %4703 = vmatprep.mubr.msk.bf16.mxu0 %vm556_vm3, %v5420_v30  ;;  %5009 = vmatprep.subr.msk.bf16.mxu1 %vm605_vm0, %v5390_v9 }
  0x35   : > { %v240_v29 = vld [vmem:[%s5229_s30 + $0x78] sm:$0xf]  ;;  %v515_v33 = vshll.u32 %v4231_v15, 16  ;;  %278 = vst.msk [vmem:[#allocation2 + $0x80] sm:$0xf] %vm242_vm1, %v239_v28  ;;  %v446_v42 = vor.u32 %v445_v8, %v442_v23  ;;  %v449_v47 = vshrl.u32 %v4224_v16, 16  ;;  %v5432_v52 = vsel %vm403_vm2, %v500_v61, %v509_v31  ;;  %3362 = vperm.xlu0 %5025, %v5404_v21  }
  0x36   : > { %279 = vst.msk [vmem:[#allocation2 + $0x84] sm:$0xf] %vm242_vm1, %v240_v29  ;;  %v241_v40 = vld [vmem:[%s5229_s30 + $0x7c] sm:$0xf]  ;;  %v281_v41 = vld [vmem:[#allocation2] sm:$0x8]  ;;  %4719 = vmatprep.mubr.msk.bf16.mxu1 %vm556_vm3, %v5432_v52 }
  0x37   : > { %v452_v50 = vshll.u32 %v4224_v16, 16  ;;  %v521_v51 = vshrl.u32 %v4232_v27, 16  ;;  %280 = vst.msk [vmem:[#allocation2 + $0x88] sm:$0xf] %vm242_vm1, %v241_v40  ;;  %v5429_v39 = vld [vmem:[#allocation2 + $0x4] sm:$0xf]  ;;  %v5442_v7 = vsel %vm403_vm2, %v437_v10, %v446_v42 }
  0x38   : > { %7319 = vst [vmem:[#allocation7_spill] sm:$0xff] %v5429_v39  ;;  %7320 = vst [vmem:[#allocation8_spill] sm:$0xff] %v5432_v52  ;;  %v514_v53 = vrot.slane %v512_v32, 3  ;;  %v517_v55 = vrot.slane %v515_v33, 4  ;;  %v524_v56 = vshll.u32 %v4232_v27, 16  ;;  %v451_v58 = vrot.slane %v449_v47, 3  ;;  %4704 = vmatmul.mubr.msk.bf16.gmra.mxu0 %vm556_vm3, %v5442_v7 }
  0x39   : > { %v5434_v57 = vld [vmem:[#allocation2 + $0x38] sm:$0xf]  ;;  %v454_v62 = vrot.slane %v452_v50, 4  ;;  %v523_v61 = vrot.slane %v521_v51, 3  ;;  %v5444_v63 = vld [vmem:[#allocation2 + $0x3c] sm:$0xf]  ;;  %v5454_v16 = vcombine.low %v281_v41, %v5429_v39  ;;  %v5473_v27 = vcombine.low %v5311_v49, %v5316_v0 }
  0x3a   : > { %v518_v4 = vor.u32 %v517_v55, %v514_v53  ;;  %v526_v5 = vrot.slane %v524_v56, 4  ;;  %v4225_v12 = vcombine.low %v5434_v57, %v5444_v63  ;;  %v5449_v13 = vld [vmem:[#allocation2 + $0x78] sm:$0xf]  ;;  %v5451_v15 = vld [vmem:[#allocation2 + $0x8] sm:$0xf]  ;;  %v5459_v10 = vld [vmem:[%s7265_s2 + $0x30] sm:$0xff] }
  0x3b   : > { %7321 = vst [vmem:[#allocation9_spill] sm:$0xff] %v5451_v15  ;;  %v455_v6 = vor.u32 %v454_v62, %v451_v58  ;;  %v5463_v20 = vld [vmem:[#allocation2 + $0x7c] sm:$0xf]  ;;  %v5467_v23 = vcombine.low %v5451_v15, %v5299_v36  ;;  %7323 = vst [vmem:[#allocation11_spill] sm:$0xff] %v5473_v27  ;;  %v5478_v40 = vld [vmem:[#allocation2 + $0x40] sm:$0xf]  ;;  %3372 = vperm.xlu0 %5025, %v5459_v10  }
  0x3c   : > { %7322 = vst [vmem:[#allocation10_spill] sm:$0xff] %v5463_v20  ;;  %v5476_v28 = vsel %vm403_vm2, %v509_v31, %v518_v4  ;;  %v527_v29 = vor.u32 %v526_v5, %v523_v61  ;;  %v458_v32 = vshrl.u32 %v4225_v12, 16  ;;  %v461_v33 = vshll.u32 %v4225_v12, 16  ;;  %v5480_v41 = vld [vmem:[#allocation2 + $0x44] sm:$0xf]  ;;  %v5517_v27 = vld [vmem:[%s7265_s2 + $0x50] sm:$0xff] }
  0x3d   : > { %7324 = vst [vmem:[#allocation12_spill] sm:$0xff] %v5476_v28  ;;  %7325 = vst [vmem:[#allocation13_spill] sm:$0xff] %v5480_v41  ;;  %v5484_v36 = vsel %vm403_vm2, %v446_v42, %v455_v6  ;;  %v4233_v47 = vcombine.low %v5449_v13, %v5463_v20  ;;  %v4226_v49 = vcombine.low %v5478_v40, %v5480_v41  ;;  %v5490_v0 = vld [vmem:[#allocation2 + $0x80] sm:$0xf]  ;;  %v5492_v31 = vld [vmem:[#allocation2 + $0x84] sm:$0xf]  ;;  %4720 = vmatmul.mubr.msk.bf16.gmra.mxu1 %vm556_vm3, %v5476_v28 }
  0x3e   : > { %7326 = vst [vmem:[#allocation14_spill] sm:$0xff] %v5492_v31  ;;  %v780_v50 = vshrl.u32 %v5454_v16, 16  ;;  %v3316_v51 = vld [vmem:[%s7265_s2 + $0x40] sm:$0xff]  ;;  %4707 = vmatprep.mubr.msk.bf16.mxu0 %vm556_vm3, %v5484_v36  ;;  %v5504_v26 = vsel %vm403_vm2, %v518_v4, %v527_v29  ;;  %v460_v42 = vrot.slane %v458_v32, 3  ;;  %v463_v53 = vrot.slane %v461_v33, 4 }
  0x3f   : > { %7327 = vst [vmem:[#allocation15_spill] sm:$0xff] %v5504_v26  ;;  %v4234_v55 = vcombine.low %v5490_v0, %v5492_v31  ;;  %v5508_v56 = vld [vmem:[#allocation2 + $0x88] sm:$0xf]  ;;  %4723 = vmatprep.mubr.msk.bf16.mxu1 %vm556_vm3, %v5504_v26  ;;  %v530_v58 = vshrl.u32 %v4233_v47, 16  ;;  %v533_v62 = vshll.u32 %v4233_v47, 16  ;;  %v467_v61 = vshrl.u32 %v4226_v49, 16  ;;  %3597 = vperm.xlu1 %5027, %v3316_v51  }
  0x40   : > { %7328 = vst [vmem:[#allocation16_spill] sm:$0xff] %v5508_v56  ;;  %v470_v5 = vshll.u32 %v4226_v49, 16  ;;  %v464_v12 = vor.u32 %v463_v53, %v460_v42  ;;  %v4235_v4 = vcombine.low %v5508_v56, %v5508_v56  ;;  %3382 = vperm.xlu0 %5025, %v3316_v51   ;;  %v5522_v45 = vld [vmem:[#allocation2 + $0x14] sm:$0xf]  ;;  %v5524_v44 = vld [vmem:[#allocation2 + $0x18] sm:$0xf] }
  0x41   : > { %v539_v8 = vshrl.u32 %v4234_v55, 16  ;;  %v542_v2 = vshll.u32 %v4234_v55, 16  ;;  %v532_v32 = vrot.slane %v530_v58, 3  ;;  %v535_v33 = vrot.slane %v533_v62, 4  ;;  %v979_v55 = vld [vmem:[#allocation2 + $0x10] sm:$0x8] }
  0x42   : > { %v469_v3 = vrot.slane %v467_v61, 3  ;;  %v472_v41 = vrot.slane %v470_v5, 4  ;;  %v5520_v47 = vsel %vm403_vm2, %v455_v6, %v464_v12  ;;  %v548_v53 = vshrl.u32 %v4235_v4, 16  ;;  %7329 = vst [vmem:[#allocation17_spill] sm:$0xff] %v5522_v45  ;;  %7330 = vst [vmem:[#allocation18_spill] sm:$0xff] %v5524_v44  ;;  %v5529_v58 = vld [vmem:[%s7265_s2 + $0x48] sm:$0xff] }
  0x43   : > { %v541_v49 = vrot.slane %v539_v8, 3  ;;  %v544_v42 = vrot.slane %v542_v2, 4  ;;  %4708 = vmatmul.mubr.msk.bf16.gmra.mxu0 %vm556_vm3, %v5520_v47  ;;  %v5533_v51 = vor.u32 %v535_v33, %v532_v32  ;;  %v551_v62 = vshll.u32 %v4235_v4, 16  ;;  %v5535_v2 = vld [vmem:[#allocation2 + $0x1c] sm:$0xf] }
  0x44   : > { %v473_v6 = vor.u32 %v472_v41, %v469_v3  ;;  %v782_v8 = vrot.slane %v780_v50, 3  ;;  %7331 = vst [vmem:[#allocation19_spill] sm:$0xff] %v5535_v2  ;;  %v5537_v61 = vld [vmem:[#allocation2 + $0x20] sm:$0xf]  ;;  %v550_v15 = vrot.slane %v548_v53, 3  ;;  %v783_v39 = vshll.u32 %v5454_v16, 16  ;;  %3387 = vperm.xlu0 %5025, %v5529_v58  }
  0x45   : > { %7332 = vst [vmem:[#allocation20_spill] sm:$0xff] %v5537_v61  ;;  %v545_v5 = vor.u32 %v544_v42, %v541_v49  ;;  %v788_v26 = vshrl.u32 %v5467_v23, 16  ;;  %v5541_v28 = vld [vmem:[#allocation2 + $0x24] sm:$0xf]  ;;  %v7334_v52 = vmov 0   ;;  %v5546_v32 = vsel %vm403_vm2, %v527_v29, %v5533_v51  ;;  %v5571_v49 = vld [vmem:[%s7265_s2 + $0x58] sm:$0xff] }
  0x46   : > { %7333 = vst [vmem:[#allocation21_spill] sm:$0xff] %v5541_v28  ;;  %5028 = vset.pattern.permute.xlu1 %v7334_v52  ;;  %7335 = vst [vmem:[#allocation22_spill] sm:$0xff] %v5546_v32  ;;  %v5549_v3 = vsel %vm403_vm2, %v464_v12, %v473_v6  ;;  %v5553_v41 = vsel %vm403_vm2, %v473_v6, %v5328_v19  ;;  %v553_v50 = vrot.slane %v551_v62, 4  ;;  %v5556_v16 = vld [vmem:[#allocation2 + $0x28] sm:$0xf]  ;;  %4724 = vmatmul.mubr.msk.bf16.gmra.mxu1 %vm556_vm3, %v5546_v32  ;;  %v5576_v42 = vld [vmem:[%s7265_s2 + $0x60] sm:$0xff] }
  0x47   : > { %7336 = vst [vmem:[#allocation23_spill] sm:$0xff] %v5549_v3  ;;  %3392 = vperm.xlu1 %5028, %v5517_v27   ;;  %7337 = vst [vmem:[#allocation24_spill] sm:$0xff] %v5556_v16  ;;  %v5558_v4 = vld [vmem:[#allocation2 + $0x2c] sm:$0xf]  ;;  %4711 = vmatprep.mubr.msk.bf16.mxu0 %vm556_vm3, %v5549_v3  ;;  %v546_v29 = vsel %vm403_vm2, %v5533_v51, %v545_v5  ;;  %v785_v19 = vrot.slane %v783_v39, 4  ;;  %v790_v12 = vrot.slane %v788_v26, 3 }
  0x48   : > { %7338 = vst [vmem:[#allocation25_spill] sm:$0xff] %v5558_v4  ;;  %v791_v33 = vshll.u32 %v5467_v23, 16  ;;  %4727 = vmatprep.mubr.msk.bf16.mxu1 %vm556_vm3, %v546_v29  ;;  %v554_v53 = vor.u32 %v553_v50, %v550_v15  ;;  %v4272_v6 = vcombine.low %v979_v55, %v5522_v45  ;;  %v4273_v39 = vcombine.low %v5524_v44, %v5535_v2  ;;  %v5589_v55 = vld [vmem:[#allocation2 + $0x30] sm:$0xf]  ;;  %v5591_v3 = vld [vmem:[#allocation2 + $0x34] sm:$0xf] }
  0x49   : > { %v4274_v23 = vcombine.low %v5537_v61, %v5541_v28  ;;  %v786_v26 = vor.u32 %v785_v19, %v782_v8  ;;  %v4275_v22 = vcombine.low %v5556_v16, %v5558_v4  ;;  %7339 = vst [vmem:[#allocation26_spill] sm:$0xff] %v5591_v3  ;;  %3402 = vperm.xlu0 %5025, %v5576_v42   ;;  %v5595_v61 = vld [vmem:[#allocation2 + $0x38] sm:$0xf]  ;;  %v5604_v28 = vld [vmem:[#allocation2 + $0x3c] sm:$0xf]  ;;  %v7341_v20 = vmov 1  }
  0x4a   : > { %v793_v62 = vrot.slane %v791_v33, 4  ;;  %v555_v1 = vsel %vm403_vm2, %v545_v5, %v554_v53  ;;  %v1098_v29 = vshrl.u32 %v4272_v6, 16  ;;  %v1101_v15 = vshll.u32 %v4272_v6, 16  ;;  %v5600_v5 = vld [vmem:[%s7265_s2 + $0x78] sm:$0xff]  ;;  %7340 = vst [vmem:[#allocation27_spill] sm:$0xff] %v5604_v28 }
  0x4b   : > { %v1106_v50 = vshrl.u32 %v4273_v39, 16  ;;  %3397 = vperm.xlu1 %5028, %v5571_v49   ;;  %v1109_v19 = vshll.u32 %v4273_v39, 16  ;;  %v1115_v33 = vshrl.u32 %v4274_v23, 16  ;;  %v1118_v32 = vshll.u32 %v4274_v23, 16  ;;  %4712 = vmatmul.mubr.msk.bf16.gmra.mxu0 %vm556_vm3, %v5553_v41  ;;  %v5609_v16 = vld [vmem:[#allocation2 + $0x44] sm:$0xf] }
  0x4c   : > { %v794_v8 = vor.u32 %v793_v62, %v790_v12  ;;  %v1100_v53 = vrot.slane %v1098_v29, 3  ;;  %v1103_v6 = vrot.slane %v1101_v15, 4  ;;  %v1124_v4 = vshrl.u32 %v4275_v22, 16  ;;  %v5607_v62 = vld [vmem:[#allocation2 + $0x40] sm:$0xf] }
  0x4d   : > { %v1108_v2 = vrot.slane %v1106_v50, 3  ;;  %v1111_v39 = vrot.slane %v1109_v19, 4  ;;  %v1117_v23 = vrot.slane %v1115_v33, 3  ;;  %v1120_v44 = vrot.slane %v1118_v32, 4  ;;  %3417 = vperm.xlu0 %5025, %v5600_v5   ;;  %v5621_v32 = vld [vmem:[#allocation2 + $0x48] sm:$0xf] }
  0x4e   : > { %v795_v12 = vsel %vm403_vm2, %v786_v26, %v794_v8  ;;  %v1104_v45 = vor.u32 %v1103_v6, %v1100_v53  ;;  %v1126_v31 = vrot.slane %v1124_v4, 3  ;;  %v1127_v56 = vshll.u32 %v4275_v22, 16  ;;  %4728 = vmatmul.mubr.msk.bf16.gmra.mxu1 %vm556_vm3, %v555_v1  ;;  %v5623_v22 = vld [vmem:[#allocation2 + $0x4c] sm:$0xf]  ;;  %v5628_v1 = vld [vmem:[%s7265_s2 + $0x90] sm:$0xff] }
  0x4f   : > { %5029 = vset.pattern.permute.xlu1 %v7341_v20  ;;  %v1112_v29 = vor.u32 %v1111_v39, %v1108_v2  ;;  %v1562_v26 = vsel %vm605_vm0, %v5390_v9, 0  ;;  %v4276_v15 = vcombine.low %v5589_v55, %v5591_v3  ;;  %v4277_v50 = vcombine.low %v5595_v61, %v5604_v28  ;;  %4733 = vmatprep.mubr.msk.bf16.mxu1 %vm556_vm3, %v795_v12 }
  0x50   : > { %3605 = vperm.xlu1 %5029, %v5517_v27   ;;  %v1121_v9 = vor.u32 %v1120_v44, %v1117_v23  ;;  %v1730_v2 = vsel %vm605_vm0, %v5361_v48, 0  ;;  %v1129_v4 = vrot.slane %v1127_v56, 4  ;;  %v4278_v19 = vcombine.low %v5607_v62, %v5609_v16  ;;  %v5644_v23 = vld [vmem:[#allocation2 + $0x50] sm:$0xf] }
  0x51   : > { %v1113_v27 = vsel %vm403_vm2, %v1104_v45, %v1112_v29  ;;  %v1133_v33 = vshrl.u32 %v4276_v15, 16  ;;  %v1136_v53 = vshll.u32 %v4276_v15, 16  ;;  %v1142_v6 = vshrl.u32 %v4277_v50, 16  ;;  %3432 = vperm.xlu0 %5025, %v5628_v1   ;;  %v5646_v15 = vld [vmem:[#allocation2 + $0x54] sm:$0xf] }
  0x52   : > { %4767 = vmatprep.mubr.msk.bf16.mxu0 %vm556_vm3, %v1113_v27  ;;  %v1122_v39 = vsel %vm403_vm2, %v1112_v29, %v1121_v9  ;;  %v1130_v28 = vor.u32 %v1129_v4, %v1126_v31  ;;  %v1145_v3 = vshll.u32 %v4277_v50, 16  ;;  %v4279_v44 = vcombine.low %v5621_v32, %v5623_v22 }
  0x53   : > { %v796_v48 = vsel %vm403_vm2, %v794_v8, %v5322_v14  ;;  %v1135_v56 = vrot.slane %v1133_v33, 3  ;;  %v1138_v12 = vrot.slane %v1136_v53, 4  ;;  %v1144_v45 = vrot.slane %v1142_v6, 3  ;;  %4768 = vmatmul.mubr.msk.bf16.vlgmr.msra.gmra.mxu0 %vm556_vm3, %v1122_v39  ;;  %v3321_v14 = vld [vmem:[%s7265_s2 + $0x68] sm:$0xff]  ;;  %v5656_v8 = vld [vmem:[%s7264_s1 + $0x14] sm:$0xf] }
  0x54   : > { %3609 = vperm.xlu1 %5029, %v5571_v49   ;;  %v1131_v31 = vsel %vm403_vm2, %v1121_v9, %v1130_v28  ;;  %v1147_v29 = vrot.slane %v1145_v3, 4  ;;  %v1151_v50 = vshrl.u32 %v4278_v19, 16  ;;  %v1154_v4 = vshll.u32 %v4278_v19, 16  ;;  %7342 = vst [vmem:[#allocation28_spill] sm:$0xff] %v5656_v8  ;;  %4834 = vmatpush3.bf16.msra.mxu0 %v1730_v2  ;;  %v5662_v9 = vld [vmem:[%s7264_s1 + $0x1c] sm:$0xf] }
  0x55   : > { %4771 = vmatprep.mubr.msk.bf16.mxu0 %vm556_vm3, %v1131_v31  ;;  %v1139_v49 = vor.u32 %v1138_v12, %v1135_v56  ;;  %7343 = vst [vmem:[#allocation29_spill] sm:$0xff] %v5662_v9  ;;  %v1160_v19 = vshrl.u32 %v4279_v44, 16  ;;  %v1163_v27 = vshll.u32 %v4279_v44, 16  ;;  %5012 = vmatprep.subr.msk.bf16.mxu0 %vm605_vm0, %v5656_v8  ;;  %v5669_v2 = vld [vmem:[#allocation2 + $0x58] sm:$0xf]  ;;  %v4280_v53 = vcombine.low %v5644_v23, %v5646_v15 }
  0x56   : > { %v1148_v3 = vor.u32 %v1147_v29, %v1144_v45  ;;  %5034 = vset.pattern.permute.xlu0 %v7341_v20  ;;  %4734 = vmatmul.mubr.msk.bf16.vlgmr.msra.gmra.mxu1 %vm556_vm3, %v796_v48  ;;  %v5671_v33 = vld [vmem:[#allocation2 + $0x5c] sm:$0xf]  ;;  %v1153_v39 = vrot.slane %v1151_v50, 3  ;;  %v1156_v44 = vrot.slane %v1154_v4, 4  ;;  %v5686_v45 = vld [vmem:[#allocation2 + $0x60] sm:$0xf] }
  0x57   : > { %4800 = vmatpush3.bf16.msra.mxu1 %v1562_v26  ;;  %4737 = vmatprep.mubr.msk.bf16.mxu1 %vm556_vm3, %v5373_v54  ;;  %v1140_v6 = vsel %vm403_vm2, %v1130_v28, %v1139_v49  ;;  %v1162_v56 = vrot.slane %v1160_v19, 3  ;;  %v1165_v12 = vrot.slane %v1163_v27, 4  ;;  %v3322_v26 = vld [vmem:[%s7265_s2 + $0x70] sm:$0xff]  ;;  %v4281_v54 = vcombine.low %v5669_v2, %v5671_v33  ;;  %v5689_v28 = vld [vmem:[#allocation2 + $0x64] sm:$0xf] }
  0x58   : > { %5030 = vset.pattern.permute.xlu1 %v7334_v52  ;;  %5011 = vmatprep.subr.msk.bf16.mxu1 %vm605_vm0, %v5662_v9  ;;  %v1149_v48 = vsel %vm403_vm2, %v1139_v49, %v1148_v3  ;;  %7344 = vst [vmem:[#allocation30_spill] sm:$0xff] %v5689_v28  ;;  %v1169_v31 = vshrl.u32 %v4280_v53, 16  ;;  %v1172_v29 = vshll.u32 %v4280_v53, 16  ;;  %v1157_v50 = vor.u32 %v1156_v44, %v1153_v39  ;;  %v5693_v4 = vld [vmem:[#allocation2 + $0x68] sm:$0xf] }
  0x59   : > { %3407 = vperm.xlu1 %5030, %v3321_v14   ;;  %3569 = vperm.xlu0 %5034, %v5380_v60   ;;  %v1166_v49 = vor.u32 %v1165_v12, %v1162_v56  ;;  %v1178_v19 = vshrl.u32 %v4281_v54, 16  ;;  %v1181_v27 = vshll.u32 %v4281_v54, 16  ;;  %v4282_v60 = vcombine.low %v5686_v45, %v5689_v28  ;;  %v5702_v53 = vld [vmem:[#allocation2 + $0x70] sm:$0xf] }
  0x5a   : > { %v1171_v39 = vrot.slane %v1169_v31, 3  ;;  %v1174_v44 = vrot.slane %v1172_v29, 4  ;;  %v1158_v56 = vsel %vm403_vm2, %v1148_v3, %v1157_v50  ;;  %v5719_v29 = vld [vmem:[#allocation2 + $0x78] sm:$0xf]  ;;  %vm2278_vm4 = vsmask.f32 7424 }
  0x5b   : > { %4772 = vmatmul.mubr.msk.bf16.gmra.mxu0 %vm556_vm3, %v1140_v6  ;;  %v5700_v6 = vld [vmem:[#allocation2 + $0x6c] sm:$0xf]  ;;  %v1180_v12 = vrot.slane %v1178_v19, 3  ;;  %v1183_v54 = vrot.slane %v1181_v27, 4  ;;  %v1190_v31 = vshll.u32 %v4282_v60, 16  ;;  %vm3858_vm5 = vcmask 57344  }
  0x5c   : > { %4775 = vmatprep.mubr.msk.bf16.mxu0 %vm556_vm3, %v1149_v48  ;;  %7345 = vst [vmem:[#allocation31_spill] sm:$0xff] %v5700_v6  ;;  %v5706_v48 = vld [vmem:[#allocation2 + $0x74] sm:$0xf]  ;;  %v4283_v9 = vcombine.low %v5693_v4, %v5700_v6  ;;  %v5722_v19 = vld [vmem:[#allocation2 + $0x7c] sm:$0xf] }
  0x5d   : > { %3412 = vperm.xlu1 %5030, %v3322_v26   ;;  %3581 = vperm.xlu0 %5034, %v5404_v21   ;;  %7346 = vst [vmem:[#allocation32_spill] sm:$0xff] %v5706_v48  ;;  %v4254_v21 = vcombine.low %v5490_v0, %v5490_v0  ;;  %v4284_v3 = vcombine.low %v5702_v53, %v5706_v48 }
  0x5e   : > { %4738 = vmatmul.mubr.msk.bf16.gmra.mxu1 %vm556_vm3, %v5420_v30  ;;  %v1167_v30 = vsel %vm403_vm2, %v1157_v50, %v1166_v49  ;;  %v1175_v50 = vor.u32 %v1174_v44, %v1171_v39  ;;  %v1184_v27 = vor.u32 %v1183_v54, %v1180_v12  ;;  %v1196_v6 = vshrl.u32 %v4283_v9, 16 }
  0x5f   : > { %4741 = vmatprep.mubr.msk.bf16.mxu1 %vm556_vm3, %v5442_v7  ;;  %v1187_v7 = vshrl.u32 %v4282_v60, 16  ;;  %v798_v8 = vshrl.u32 %v4254_v21, 16  ;;  %v1205_v39 = vshrl.u32 %v4284_v3, 16  ;;  %v1208_v44 = vshll.u32 %v4284_v3, 16  ;;  %v7354_v3 = vld [vmem:[#allocation21_spill] sm:$0xff] }
  0x60   : > { %v1198_v12 = vrot.slane %v1196_v6, 3  ;;  %v7351_v6 = vld [vmem:[#allocation17_spill] sm:$0xff] }
  0x61   : > { %5031 = vset.pattern.permute.xlu1 %v7341_v20  ;;  %3589 = vperm.xlu0 %5034, %v5459_v10   ;;  %v1199_v10 = vshll.u32 %v4283_v9, 16  ;;  %v800_v28 = vrot.slane %v798_v8, 3  ;;  %v1189_v60 = vrot.slane %v1187_v7, 3  ;;  %v4285_v8 = vcombine.low %v5719_v29, %v5722_v19 }
  0x62   : > { %3617 = vperm.xlu1 %5031, %v3321_v14   ;;  %v801_v14 = vshll.u32 %v4254_v21, 16  ;;  %v5741_v21 = vcombine.low %v5333_v25, %v5346_v37  ;;  %v5757_v25 = vld [vmem:[#allocation2 + $0x80] sm:$0xf] }
  0x63   : > { %4776 = vmatmul.mubr.msk.bf16.gmra.mxu0 %vm556_vm3, %v1158_v56  ;;  %v1192_v56 = vrot.slane %v1190_v31, 4  ;;  %v1201_v54 = vrot.slane %v1199_v10, 4  ;;  %v1217_v7 = vshll.u32 %v4285_v8, 16  ;;  %v7352_v31 = vld [vmem:[#allocation23_spill] sm:$0xff]  ;;  %v1210_v10 = vrot.slane %v1208_v44, 4 }
  0x64   : > { %4779 = vmatprep.mubr.msk.bf16.mxu0 %vm556_vm3, %v1167_v30  ;;  %v803_v48 = vrot.slane %v801_v14, 4  ;;  %v1185_v30 = vsel %vm403_vm2, %v1175_v50, %v1184_v27  ;;  %v1207_v14 = vrot.slane %v1205_v39, 3  ;;  %v7357_v39 = vld [vmem:[#allocation27_spill] sm:$0xff] }
  0x65   : > { %3601 = vperm.xlu0 %5034, %v5529_v58   ;;  %v5736_v58 = vcombine.low %v5319_v11, %v5331_v24  ;;  %v3325_v11 = vld [vmem:[%s7265_s2 + $0x88] sm:$0xff]  ;;  %v5754_v24 = vcombine.low %v5444_v63, %v5478_v40  ;;  %v5774_v63 = vcombine.low %v5344_v35, %v5353_v43  ;;  %v5778_v40 = vcombine.low %v5355_v46, %v5449_v13  ;;  %v7363_v35 = vld [vmem:[#allocation12_spill] sm:$0xff] }
  0x66   : > { %3621 = vperm.xlu1 %5031, %v3322_v26   ;;  %4742 = vmatmul.mubr.msk.bf16.gmra.mxu1 %vm556_vm3, %v5484_v36  ;;  %v3324_v26 = vld [vmem:[%s7265_s2 + $0x80] sm:$0xff]  ;;  %v1176_v36 = vsel %vm403_vm2, %v1166_v49, %v1175_v50  ;;  %v804_v9 = vor.u32 %v803_v48, %v800_v28  ;;  %v7350_v49 = vld [vmem:[#allocation18_spill] sm:$0xff]  ;;  %v1202_v43 = vor.u32 %v1201_v54, %v1198_v12  ;;  %v1214_v48 = vshrl.u32 %v4285_v8, 16  ;;  %v5791_v46 = vld [vmem:[#allocation2 + $0x88] sm:$0xf] }
  0x67   : > { %4745 = vmatprep.mubr.msk.bf16.mxu1 %vm556_vm3, %v5520_v47  ;;  %v5745_v47 = vcombine.low %v5348_v38, %v5434_v57  ;;  %v5765_v38 = vcombine.low %v5314_v59, %v5324_v17  ;;  %v5770_v57 = vcombine.low %v5326_v18, %v5342_v34  ;;  %v7347_v59 = vld [vmem:[#allocation10_spill] sm:$0xff]  ;;  %v7348_v28 = vld [vmem:[#allocation16_spill] sm:$0xff]  ;;  %v5793_v13 = vld [vmem:[#allocation2 + $0x8c] sm:$0xf] }
  0x68   : > { %v5761_v37 = vsel %vm403_vm2, %v5533_v51, %v804_v9  ;;  %v1193_v51 = vor.u32 %v1192_v56, %v1189_v60  ;;  %v5785_v17 = vcombine.low %v7347_v59, %v5490_v0  ;;  %v7349_v18 = vld [vmem:[#allocation14_spill] sm:$0xff]  ;;  %v7353_v0 = vld [vmem:[#allocation24_spill] sm:$0xff]  ;;  %v7355_v8 = vld [vmem:[#allocation25_spill] sm:$0xff]  ;;  %v1216_v54 = vrot.slane %v1214_v48, 3 }
  0x69   : > { %3613 = vperm.xlu0 %5034, %v5576_v42   ;;  %v5781_v42 = vld [vmem:[#allocation2 + $0x84] sm:$0xf]  ;;  %v4322_v34 = vcombine.low %v7349_v18, %v7348_v28  ;;  %v7356_v9 = vld [vmem:[#allocation26_spill] sm:$0xff]  ;;  %v7358_v50 = vld [vmem:[#allocation5_spill] sm:$0xff] }
  0x6a   : > { %5032 = vset.pattern.permute.xlu1 %v7334_v52  ;;  %v4286_v60 = vcombine.low %v5757_v25, %v5781_v42  ;;  %v1194_v56 = vsel %vm403_vm2, %v1184_v27, %v1193_v51  ;;  %v1203_v12 = vsel %vm403_vm2, %v1193_v51, %v1202_v43  ;;  %v3329_v27 = vld [vmem:[%s7265_s2 + $0xa8] sm:$0xff]  ;;  %v1211_v51 = vor.u32 %v1210_v10, %v1207_v14  ;;  %v7359_v14 = vld [vmem:[#allocation6_spill] sm:$0xff]  ;;  %v3327_v10 = vld [vmem:[%s7265_s2 + $0x98] sm:$0xff] }
  0x6b   : > { %3422 = vperm.xlu1 %5032, %v3324_v26   ;;  %4780 = vmatmul.mubr.msk.bf16.gmra.mxu0 %vm556_vm3, %v1176_v36  ;;  %v3328_v36 = vld [vmem:[%s7265_s2 + $0xa0] sm:$0xff] }
  0x6c   : > { %4783 = vmatprep.mubr.msk.bf16.mxu0 %vm556_vm3, %v1185_v30  ;;  %v1223_v59 = vshrl.u32 %v4286_v60, 16  ;;  %v1226_v48 = vshll.u32 %v4286_v60, 16  ;;  %v5821_v30 = vld [vmem:[#allocation2 + $0x90] sm:$0xf] }
  0x6d   : > { %3625 = vperm.xlu0 %5034, %v5600_v5   ;;  %v4287_v5 = vcombine.low %v5791_v46, %v5793_v13 }
  0x6e   : > { %4746 = vmatmul.mubr.msk.bf16.gmra.mxu1 %vm556_vm3, %v7352_v31 }
  0x6f   : > { %3427 = vperm.xlu1 %5032, %v3325_v11   ;;  %4749 = vmatprep.mubr.msk.bf16.mxu1 %vm556_vm3, %v5553_v41  ;;  %v1219_v41 = vrot.slane %v1217_v7, 4  ;;  %v1232_v7 = vshrl.u32 %v4287_v5, 16 }
  0x71   : > { %3637 = vperm.xlu0 %5034, %v5628_v1   ;;  %v1220_v31 = vor.u32 %v1219_v41, %v1216_v54  ;;  %v1235_v1 = vshll.u32 %v4287_v5, 16  ;;  %v1225_v5 = vrot.slane %v1223_v59, 3  ;;  %v1234_v41 = vrot.slane %v1232_v7, 3 }
  0x73   : > { %5033 = vset.pattern.permute.xlu1 %v7341_v20  ;;  %4784 = vmatmul.mubr.msk.bf16.gmra.mxu0 %vm556_vm3, %v1194_v56  ;;  %v1212_v56 = vsel %vm403_vm2, %v1202_v43, %v1211_v51  ;;  %v1221_v54 = vsel %vm403_vm2, %v1211_v51, %v1220_v31  ;;  %v1237_v44 = vrot.slane %v1235_v1, 4  ;;  %v7360_v43 = vld [vmem:[#allocation30_spill] sm:$0xff]  ;;  %v7361_v1 = vld [vmem:[#allocation31_spill] sm:$0xff] }
  0x74   : > { %3629 = vperm.xlu1 %5033, %v3324_v26   ;;  %4787 = vmatprep.mubr.msk.bf16.mxu0 %vm556_vm3, %v1203_v12  ;;  %v3332_v26 = vld [vmem:[%s7265_s2 + $0xc0] sm:$0xff]  ;;  %v1228_v12 = vrot.slane %v1226_v48, 4  ;;  %v4367_v59 = vcombine.low %v7360_v43, %v5693_v4 }
  0x75   : > { %3649 = vperm.xlu0 %5034, %v3329_v27   ;;  %v1238_v60 = vor.u32 %v1237_v44, %v1234_v41  ;;  %v7364_v44 = vld [vmem:[#allocation32_spill] sm:$0xff] }
  0x76   : > { %4750 = vmatmul.mubr.msk.bf16.gmra.mxu1 %vm556_vm3, %v7358_v50  ;;  %v4288_v50 = vcombine.low %v5821_v30, %v5821_v30  ;;  %v1229_v51 = vor.u32 %v1228_v12, %v1225_v5  ;;  %v4369_v41 = vcombine.low %v7364_v44, %v5719_v29  ;;  %v5119_v44 = vld [vmem:[#allocation2 + $0x24] sm:$0xff]  }
  0x77   : > { %4753 = vmatprep.mubr.msk.bf16.mxu1 %vm556_vm3, %v7359_v14  ;;  %v3335_v14 = vld [vmem:[%s7265_s2 + $0xd8] sm:$0xff] }
  0x78   : > { %3633 = vperm.xlu1 %5033, %v3325_v11   ;;  %v1241_v48 = vshrl.u32 %v4288_v50, 16  ;;  %v1244_v7 = vshll.u32 %v4288_v50, 16  ;;  %v4368_v11 = vcombine.low %v7361_v1, %v5702_v53  ;;  %v1230_v5 = vsel %vm403_vm2, %v1220_v31, %v1229_v51  ;;  %v7365_v31 = vld [vmem:[#allocation15_spill] sm:$0xff] }
  0x79   : > { %3661 = vperm.xlu0 %5034, %v3332_v26  }
  0x7a   : > { %v1243_v12 = vrot.slane %v1241_v48, 3  ;;  %v1246_v50 = vrot.slane %v1244_v7, 4  ;;  %v3330_v48 = vld [vmem:[%s7265_s2 + $0xb0] sm:$0xff]  ;;  %v7367_v7 = vld [vmem:[#allocation7_spill] sm:$0xff] }
  0x7b   : > { %4788 = vmatmul.mubr.msk.bf16.gmra.mxu0 %vm556_vm3, %v1212_v56  ;;  %v7362_v56 = vld [vmem:[#allocation8_spill] sm:$0xff] }
  0x7c   : > { %5035 = vset.pattern.permute.xlu1 %v7334_v52  ;;  %4791 = vmatprep.mubr.msk.bf16.mxu0 %vm556_vm3, %v1221_v54  ;;  %v1239_v54 = vsel %vm403_vm2, %v1229_v51, %v1238_v60  ;;  %v7366_v51 = vld [vmem:[#allocation22_spill] sm:$0xff] }
  0x7d   : > { %3437 = vperm.xlu1 %5035, %v3327_v10   ;;  %3673 = vperm.xlu0 %5034, %v3335_v14  }
  0x7e   : > { %4754 = vmatmul.mubr.msk.bf16.gmra.mxu1 %vm556_vm3, %v7362_v56  ;;  %v1247_v56 = vor.u32 %v1246_v50, %v1243_v12  ;;  %v7371_v50 = vld [vmem:[#allocation28_spill] sm:$0xff] }
  0x7f   : > { %4757 = vmatprep.mubr.msk.bf16.mxu1 %vm556_vm3, %v7363_v35 }
  0x81   : > { %3442 = vperm.xlu1 %5035, %v3328_v36   ;;  %5042 = vset.pattern.permute.xlu0 %v7334_v52 }
  0x82   : > { %3447 = vperm.xlu0 %5042, %v3329_v27   ;;  %v1248_v27 = vsel %vm403_vm2, %v1238_v60, %v1247_v56  ;;  %v7370_v60 = vld [vmem:[#allocation3_spill] sm:$0xff]  ;;  %v5905_v56 = vld [vmem:[%s7264_s1 + $0x20] sm:$0xf] }
  0x83   : > { %4792 = vmatmul.mubr.msk.bf16.gmra.mxu0 %vm556_vm3, %v1230_v5  ;;  %v7368_v5 = vld [vmem:[#allocation9_spill] sm:$0xff] }
  0x84   : > { %4795 = vmatprep.mubr.msk.bf16.mxu0 %vm556_vm3, %v1239_v54  ;;  %v7369_v12 = vcombine.low %v7367_v7, %v7368_v5  ;;  %v2460_v54 = vsel %vm605_vm0, %v7371_v50, 0  ;;  %v7374_v7 = vld [vmem:[#allocation11_spill] sm:$0xff]  ;;  %v3333_v5 = vld [vmem:[%s7265_s2 + $0xc8] sm:$0xff]  ;;  %v5138_v50 = vld [vmem:[#allocation2 + $0x54] sm:$0xf] }
  0x85   : > { %5036 = vset.pattern.permute.xlu1 %v7341_v20 }
  0x86   : > { %3641 = vperm.xlu1 %5036, %v3327_v10   ;;  %4758 = vmatmul.mubr.msk.bf16.gmra.mxu1 %vm556_vm3, %v7365_v31  ;;  %v5120_v10 = vld [vmem:[#allocation2 + $0x2c] sm:$0xff]  }
  0x87   : > { %3462 = vperm.xlu0 %5042, %v3332_v26   ;;  %4761 = vmatprep.mubr.msk.bf16.mxu1 %vm556_vm3, %v7366_v51  ;;  %v3338_v26 = vld [vmem:[%s7265_s2 + $0xf0] sm:$0xff]  ;;  %v7373_v51 = vld [vmem:[#allocation4_spill] sm:$0xff] }
  0x8a   : > { %3645 = vperm.xlu1 %5036, %v3328_v36  }
  0x8b   : > { %3477 = vperm.xlu0 %5042, %v3335_v14   ;;  %4796 = vmatmul.mubr.msk.bf16.gmra.mxu0 %vm556_vm3, %v1248_v27  ;;  %v3331_v14 = vld [vmem:[%s7265_s2 + $0xb8] sm:$0xff]  ;;  %v5917_v27 = vld [vmem:[%s7264_s1 + $0x8] sm:$0xf] }
  0x8c   : > { %4835 = vmatprep.mubr.msk.bf16.mxu0 %vm556_vm3, %v7369_v12  ;;  %v7375_v12 = vld [vmem:[#allocation13_spill] sm:$0xff] }
  0x8e   : > { %5037 = vset.pattern.permute.xlu1 %v7334_v52  ;;  %4762 = vmatmul.mubr.msk.bf16.gmra.mxu1 %vm556_vm3, %v5761_v37  ;;  %v7372_v37 = vld [vmem:[#allocation29_spill] sm:$0xff] }
  0x8f   : > { %3452 = vperm.xlu1 %5037, %v3330_v48   ;;  %4801 = vmatprep.mubr.msk.bf16.mxu1 %vm556_vm3, %v7370_v60  ;;  %v1960_v31 = vsel %vm605_vm0, %v7372_v37, 0 }
  0x90   : > { %3492 = vperm.xlu0 %5042, %v3338_v26  }
  0x93   : > { %3457 = vperm.xlu1 %5037, %v3331_v14   ;;  %4836 = vmatmul.mubr.msk.bf16.vlgmr.msra.gmra.mxu0 %vm556_vm3, %v7370_v60  ;;  %v5137_v60 = vld [vmem:[#allocation2 + $0x50] sm:$0xf] }
  0x94   : > { %5045 = vset.pattern.permute.xlu0 %v7341_v20  ;;  %4902 = vmatpush3.bf16.msra.mxu0 %v2460_v54  ;;  %v5139_v54 = vld [vmem:[#allocation2 + $0x58] sm:$0xf] }
  0x95   : > { %4839 = vmatprep.mubr.msk.bf16.mxu0 %vm556_vm3, %v7373_v51  ;;  %5014 = vmatprep.subr.msk.bf16.mxu0 %vm605_vm0, %v5905_v56  ;;  %v4316_v37 = vcombine.low %v5138_v50, %v5139_v54  ;;  %v5091_v54 = vld [vmem:[#allocation2 + $0x2c] sm:$0xff]  }
  0x96   : > { %3685 = vperm.xlu0 %5045, %v3338_v26   ;;  %4802 = vmatmul.mubr.msk.bf16.vlgmr.msra.gmra.mxu1 %vm556_vm3, %v7373_v51  ;;  %v5086_v51 = vld [vmem:[#allocation2 + $0x14] sm:$0xff]  }
  0x97   : > { %5038 = vset.pattern.permute.xlu1 %v7341_v20  ;;  %4868 = vmatpush3.bf16.msra.mxu1 %v1960_v31  ;;  %v5085_v31 = vld [vmem:[#allocation2 + $0xc] sm:$0xff]  }
  0x98   : > { %4805 = vmatprep.mubr.msk.bf16.mxu1 %vm556_vm3, %v7374_v7  ;;  %3653 = vperm.xlu1 %5038, %v3330_v48   ;;  %v3334_v48 = vld [vmem:[%s7265_s2 + $0xd0] sm:$0xff] }
  0x99   : > { %5013 = vmatprep.subr.msk.bf16.mxu1 %vm605_vm0, %v5917_v27 }
  0x9b   : > { %4840 = vmatmul.mubr.msk.bf16.gmra.mxu0 %vm556_vm3, %v7374_v7  ;;  %v2282_v7 = vshll.u32 %v5085_v31, 16 }
  0x9c   : > { %4843 = vmatprep.mubr.msk.bf16.mxu0 %vm556_vm3, %v5736_v58  ;;  %3657 = vperm.xlu1 %5038, %v3331_v14  }
  0x9e   : > { %4806 = vmatmul.mubr.msk.bf16.gmra.mxu1 %vm556_vm3, %v5736_v58  ;;  %v5135_v58 = vld [vmem:[#allocation2 + $0x48] sm:$0xf] }
  0x9f   : > { %4809 = vmatprep.mubr.msk.bf16.mxu1 %vm556_vm3, %v5741_v21  ;;  %v4314_v26 = vcombine.low %v7375_v12, %v5135_v58  ;;  %v2287_v58 = vshll.u32 %v5086_v51, 16  ;;  %v5087_v12 = vld [vmem:[#allocation2 + $0x1c] sm:$0xff]  }
  0xa0   : > { %5039 = vset.pattern.permute.xlu1 %v7334_v52 }
  0xa1   : > { %3467 = vperm.xlu1 %5039, %v3333_v5  }
  0xa3   : > { %4844 = vmatmul.mubr.msk.bf16.gmra.mxu0 %vm556_vm3, %v5741_v21  ;;  %v5136_v21 = vld [vmem:[#allocation2 + $0x4c] sm:$0xf] }
  0xa4   : > { %4847 = vmatprep.mubr.msk.bf16.mxu0 %vm556_vm3, %v5745_v47  ;;  %v4315_v14 = vcombine.low %v5136_v21, %v5137_v60  ;;  %v5089_v21 = vld [vmem:[#allocation2 + $0x24] sm:$0xff]   ;;  %v2295_v60 = vshll.u32 %v5087_v12, 16 }
  0xa5   : > { %3472 = vperm.xlu1 %5039, %v3334_v48   ;;  %v2303_v50 = vshll.u32 %v5089_v21, 16 }
  0xa6   : > { %4810 = vmatmul.mubr.msk.bf16.gmra.mxu1 %vm556_vm3, %v5745_v47  ;;  %v3336_v47 = vld [vmem:[%s7265_s2 + $0xe0] sm:$0xff] }
  0xa7   : > { %4813 = vmatprep.mubr.msk.bf16.mxu1 %vm556_vm3, %v5754_v24 }
  0xa9   : > { %5040 = vset.pattern.permute.xlu1 %v7341_v20 }
  0xaa   : > { %3665 = vperm.xlu1 %5040, %v3333_v5   ;;  %v2280_v5 = vshrl.u32 %v5085_v31, 16  ;;  %v5093_v31 = vld [vmem:[#allocation2 + $0x34] sm:$0xff]  }
  0xab   : > { %4848 = vmatmul.mubr.msk.bf16.gmra.mxu0 %vm556_vm3, %v5754_v24  ;;  %v3337_v24 = vld [vmem:[%s7265_s2 + $0xe8] sm:$0xff]  ;;  %v2319_v28 = vshll.u32 %v5093_v31, 16 }
  0xac   : > { %4851 = vmatprep.mubr.msk.bf16.mxu0 %vm556_vm3, %v4314_v26 }
  0xae   : > { %4814 = vmatmul.mubr.msk.bf16.gmra.mxu1 %vm556_vm3, %v4314_v26  ;;  %3669 = vperm.xlu1 %5040, %v3334_v48   ;;  %v5979_v48 = vrot.slane %v2282_v7, 1  ;;  %v2289_v26 = vrot.slane %v2287_v58, 1  ;;  %v2307_v7 = vshrl.u32 %v5089_v21, 16  ;;  %v7378_v21 = vld [vmem:[#allocation20_spill] sm:$0xff] }
  0xaf   : > { %4817 = vmatprep.mubr.msk.bf16.mxu1 %vm556_vm3, %v4315_v14 }
  0xb2   : > { %5041 = vset.pattern.permute.xlu1 %v7334_v52 }
  0xb3   : > { %4852 = vmatmul.mubr.msk.bf16.gmra.mxu0 %vm556_vm3, %v4315_v14  ;;  %3482 = vperm.xlu1 %5041, %v3336_v47  }
  0xb4   : > { %4855 = vmatprep.mubr.msk.bf16.mxu0 %vm556_vm3, %v4316_v37 }
  0xb6   : > { %4818 = vmatmul.mubr.msk.bf16.gmra.mxu1 %vm556_vm3, %v4316_v37 }
  0xb7   : > { %4821 = vmatprep.mubr.msk.bf16.mxu1 %vm556_vm3, %v5765_v38  ;;  %3487 = vperm.xlu1 %5041, %v3337_v24  }
  0xbb   : > { %4856 = vmatmul.mubr.msk.bf16.gmra.mxu0 %vm556_vm3, %v5765_v38  ;;  %5043 = vset.pattern.permute.xlu1 %v7341_v20  ;;  %v3339_v38 = vld [vmem:[%s7265_s2 + $0xf8] sm:$0xff] }
  0xbc   : > { %4859 = vmatprep.mubr.msk.bf16.mxu0 %vm556_vm3, %v5770_v57  ;;  %3677 = vperm.xlu1 %5043, %v3336_v47   ;;  %v2299_v47 = vshrl.u32 %v5087_v12, 16 }
  0xbe   : > { %4822 = vmatmul.mubr.msk.bf16.gmra.mxu1 %vm556_vm3, %v5770_v57  ;;  %v2285_v57 = vor.u32 %v5979_v48, %v2280_v5  ;;  %v3113_v5 = vsel %vm605_vm0, %v5905_v56, 0  ;;  %v2321_v56 = vrot.slane %v2319_v28, 1 }
  0xbf   : > { %4825 = vmatprep.mubr.msk.bf16.mxu1 %vm556_vm3, %v5774_v63 }
  0xc0   : > { %3681 = vperm.xlu1 %5043, %v3337_v24   ;;  %v5995_v14 = vsel %vm2278_vm4, %v2285_v57, %v2289_v26  ;;  %v2305_v24 = vrot.slane %v2303_v50, 1  ;;  %v5097_v57 = vld [vmem:[#allocation2 + $0x44] sm:$0xff]   ;;  %v2323_v50 = vshrl.u32 %v5093_v31, 16  ;;  %v7381_v31 = vcombine.low %v7355_v8, %v5589_v55  ;;  %v5103_v8 = vld [vmem:[#allocation2 + $0x5c] sm:$0xff]  }
  0xc1   : > { %v2339_v28 = vshrl.u32 %v5097_v57, 16 }
  0xc3   : > { %4860 = vmatmul.mubr.msk.bf16.gmra.mxu0 %vm556_vm3, %v5774_v63  ;;  %v2291_v63 = vshrl.u32 %v5086_v51, 16 }
  0xc4   : > { %4863 = vmatprep.mubr.msk.bf16.mxu0 %vm556_vm3, %v5778_v40  ;;  %5044 = vset.pattern.permute.xlu1 %v7334_v52  ;;  %v2297_v52 = vrot.slane %v2295_v60, 1 }
  0xc5   : > { %3497 = vperm.xlu1 %5044, %v3339_v38  }
  0xc6   : > { %4826 = vmatmul.mubr.msk.bf16.gmra.mxu1 %vm556_vm3, %v5778_v40  ;;  %v2293_v40 = vor.u32 %v2291_v63, %v2289_v26  ;;  %v2301_v37 = vor.u32 %v2299_v47, %v2297_v52  ;;  %v7377_v26 = vld [vmem:[#allocation19_spill] sm:$0xff]  ;;  %v7380_v63 = vcombine.low %v7354_v3, %v7353_v0  ;;  %v2325_v0 = vor.u32 %v2323_v50, %v2321_v56 }
  0xc7   : > { %4829 = vmatprep.mubr.msk.bf16.mxu1 %vm556_vm3, %v5785_v17  ;;  %v7379_v60 = vcombine.low %v7377_v26, %v7378_v21  ;;  %v2359_v26 = vshll.u32 %v5103_v8, 16 }
  0xc8   : > { %v6011_v51 = vsel %vm2278_vm4, %v2293_v40, %v2297_v52  ;;  %v6016_v58 = vsel %vm2278_vm4, %v2301_v37, %v2305_v24  ;;  %v2335_v40 = vshll.u32 %v5097_v57, 16  ;;  %v7384_v57 = vcombine.low %v5609_v16, %v5621_v32 }
  0xc9   : > { %5046 = vset.pattern.permute.xlu1 %v7341_v20  ;;  %v7376_v20 = vcombine.low %v7351_v6, %v7350_v49  ;;  %v2651_v49 = vsel %vm605_vm0, %v5917_v27, 0  ;;  %v2309_v6 = vor.u32 %v2307_v7, %v2305_v24  ;;  %v5099_v24 = vld [vmem:[#allocation2 + $0x4c] sm:$0xff]   ;;  %v7382_v7 = vcombine.low %v7356_v9, %v5595_v61 }
  0xca   : > { %3689 = vperm.xlu1 %5046, %v3339_v38   ;;  %v2315_v38 = vshrl.u32 %v5091_v54, 16 }
  0xcb   : > { %4864 = vmatmul.mubr.msk.bf16.gmra.mxu0 %vm556_vm3, %v5785_v17  ;;  %v2311_v17 = vshll.u32 %v5091_v54, 16 }
  0xcc   : > { %4903 = vmatprep.mubr.msk.bf16.mxu0 %vm556_vm3, %v5995_v14 }
  0xcd   : > { %v2313_v18 = vrot.slane %v2311_v17, 1  ;;  %v5101_v17 = vld [vmem:[#allocation2 + $0x54] sm:$0xff]  }
  0xce   : > { %4830 = vmatmul.mubr.msk.bf16.gmra.mxu1 %vm556_vm3, %v4322_v34  ;;  %v5095_v34 = vld [vmem:[#allocation2 + $0x3c] sm:$0xff]  }
  0xcf   : > { %4869 = vmatprep.mubr.msk.bf16.mxu1 %vm556_vm3, %v7376_v20  ;;  %v2317_v12 = vor.u32 %v2315_v38, %v2313_v18  ;;  %v2327_v27 = vshll.u32 %v5095_v34, 16  ;;  %v6033_v47 = vsel %vm2278_vm4, %v2309_v6, %v2313_v18  ;;  %v2331_v54 = vshrl.u32 %v5095_v34, 16 }
  0xd0   : > { %v2337_v20 = vrot.slane %v2335_v40, 1  ;;  %v2347_v34 = vshrl.u32 %v5099_v24, 16 }
  0xd1   : > { %v6036_v52 = vsel %vm2278_vm4, %v2317_v12, %v2321_v56  ;;  %v2329_v37 = vrot.slane %v2327_v27, 1  ;;  %v5105_v12 = vld [vmem:[#allocation2 + $0x64] sm:$0xff]   ;;  %v7383_v56 = vcombine.low %v7357_v39, %v5607_v62  ;;  %v2363_v27 = vshrl.u32 %v5103_v8, 16  ;;  %v5107_v39 = vld [vmem:[#allocation2 + $0x6c] sm:$0xff]  }
  0xd2   : > { %v2341_v61 = vor.u32 %v2339_v28, %v2337_v20  ;;  %v2367_v50 = vshll.u32 %v5105_v12, 16  ;;  %v2361_v62 = vrot.slane %v2359_v26, 1  ;;  %v5113_v8 = vld [vmem:[#allocation2 + $0x84] sm:$0xff]  }
  0xd3   : > { %4904 = vmatmul.mubr.msk.bf16.vlgmr.msra.gmra.mxu0 %vm556_vm3, %v6011_v51  ;;  %v2333_v3 = vor.u32 %v2331_v54, %v2329_v37  ;;  %v6051_v38 = vsel %vm2278_vm4, %v2325_v0, %v2329_v37  ;;  %v6076_v54 = vpop.permute.xlu1 %3352  ;;  %v5109_v37 = vld [vmem:[#allocation2 + $0x74] sm:$0xff]   ;;  %v7387_v0 = vcombine.low %v5646_v15, %v5669_v2  ;;  %v5111_v15 = vld [vmem:[#allocation2 + $0x7c] sm:$0xff]  }
  0xd4   : > { %4970 = vmatpush3.bf16.msra.mxu0 %v3113_v5  ;;  %4907 = vmatprep.mubr.msk.bf16.mxu0 %vm556_vm3, %v6016_v58  ;;  %v2343_v5 = vshll.u32 %v5099_v24, 16  ;;  %7385 = vst [vmem:[#allocation10_spill] sm:$0xff] %v6076_v54  ;;  %v2365_v32 = vor.u32 %v2363_v27, %v2361_v62  ;;  %v2369_v40 = vrot.slane %v2367_v50, 1  ;;  %v7386_v24 = vcombine.low %v5623_v22, %v5644_v23 }
  0xd5   : > { %v6054_v18 = vsel %vm2278_vm4, %v2333_v3, %v2337_v20  ;;  %v2375_v3 = vshll.u32 %v5107_v39, 16  ;;  %v2399_v50 = vshll.u32 %v5113_v8, 16 }
  0xd6   : > { %4870 = vmatmul.mubr.msk.bf16.vlgmr.msra.gmra.mxu1 %vm556_vm3, %v7379_v60  ;;  %v2345_v55 = vrot.slane %v2343_v5, 1  ;;  %v2355_v60 = vshrl.u32 %v5101_v17, 16  ;;  %v2383_v5 = vshll.u32 %v5109_v37, 16 }
  0xd7   : > { %4936 = vmatpush3.bf16.msra.mxu1 %v2651_v49  ;;  %4873 = vmatprep.mubr.msk.bf16.mxu1 %vm556_vm3, %v7380_v63  ;;  %v2351_v49 = vshll.u32 %v5101_v17, 16  ;;  %v2371_v17 = vshrl.u32 %v5105_v12, 16  ;;  %v6094_v28 = vpop.permute.xlu1 %3357  ;;  %v2377_v23 = vrot.slane %v2375_v3, 1  ;;  %v2391_v12 = vshll.u32 %v5111_v15, 16  ;;  %v5118_v3 = vld [vmem:[#allocation2 + $0x1c] sm:$0xff]  }
  0xd8   : > { %v2349_v9 = vor.u32 %v2347_v34, %v2345_v55  ;;  %v6069_v21 = vsel %vm2278_vm4, %v2341_v61, %v2345_v55  ;;  %7388 = vst [vmem:[#allocation16_spill] sm:$0xff] %v6094_v28  ;;  %v2385_v55 = vrot.slane %v2383_v5, 1 }
  0xd9   : > { %v2353_v6 = vrot.slane %v2351_v49, 1  ;;  %v2373_v2 = vor.u32 %v2371_v17, %v2369_v40 }
  0xdb   : > { %4908 = vmatmul.mubr.msk.bf16.gmra.mxu0 %vm556_vm3, %v6033_v47  ;;  %v6072_v63 = vsel %vm2278_vm4, %v2349_v9, %v2353_v6  ;;  %v2357_v16 = vor.u32 %v2355_v60, %v2353_v6  ;;  %v7389_v9 = vcombine.low %v5671_v33, %v5686_v45  ;;  %v6121_v26 = vsel %vm2278_vm4, %v2373_v2, %v2377_v23 }
  0xdc   : > { %4911 = vmatprep.mubr.msk.bf16.mxu0 %vm556_vm3, %v6036_v52  ;;  %v2387_v60 = vshrl.u32 %v5109_v37, 16  ;;  %v2395_v45 = vshrl.u32 %v5111_v15, 16 }
  0xdd   : > { %v6089_v20 = vsel %vm2278_vm4, %v2357_v16, %v2361_v62  ;;  %v5117_v62 = vld [vmem:[#allocation2 + $0x14] sm:$0xff]  }
  0xde   : > { %4874 = vmatmul.mubr.msk.bf16.gmra.mxu1 %vm556_vm3, %v7381_v31  ;;  %v6092_v31 = vsel %vm2278_vm4, %v2365_v32, %v2369_v40  ;;  %v2389_v16 = vor.u32 %v2387_v60, %v2385_v55  ;;  %v5115_v32 = vld [vmem:[#allocation2 + $0x8c] ss:$0 sps:$4 sm:$0x11]   ;;  %v5116_v40 = vld [vmem:[#allocation2 + $0x4] sm:$0xff]   ;;  %v2935_v17 = vshll.u32 %v5117_v62, 16  ;;  %v2940_v60 = vshll.u32 %v5118_v3, 16 }
  0xdf   : > { %4877 = vmatprep.mubr.msk.bf16.mxu1 %vm556_vm3, %v7382_v7  ;;  %v2379_v7 = vshrl.u32 %v5107_v39, 16 }
  0xe0   : > { %v2937_v1 = vrot.slane %v2935_v17, 1  ;;  %v2942_v36 = vrot.slane %v2940_v60, 1 }
  0xe1   : > { %v2381_v49 = vor.u32 %v2379_v7, %v2377_v23 }
  0xe3   : > { %4912 = vmatmul.mubr.msk.bf16.gmra.mxu0 %vm556_vm3, %v6051_v38  ;;  %v6126_v33 = vsel %vm2278_vm4, %v2381_v49, %v2385_v55  ;;  %v2403_v49 = vshrl.u32 %v5113_v8, 16  ;;  %v2407_v55 = vshll.u32 %v5115_v32, 16 }
  0xe4   : > { %4915 = vmatprep.mubr.msk.bf16.mxu0 %vm556_vm3, %v6054_v18 }
  0xe6   : > { %4878 = vmatmul.mubr.msk.bf16.gmra.mxu1 %vm556_vm3, %v7383_v56  ;;  %v6116_v56 = vpop.permute.xlu1 %3367 }
  0xe7   : > { %4881 = vmatprep.mubr.msk.bf16.mxu1 %vm556_vm3, %v7384_v57  ;;  %7390 = vst [vmem:[#allocation14_spill] sm:$0xff] %v6116_v56  ;;  %v7394_v56 = vcombine.low %v5722_v19, %v5757_v25  ;;  %v2952_v25 = vshrl.u32 %v5119_v44, 16 }
  0xea   : > { %v6142_v7 = vpop.permute.xlu1 %3377 }
  0xeb   : > { %4916 = vmatmul.mubr.msk.bf16.gmra.mxu0 %vm556_vm3, %v6069_v21  ;;  %7392 = vst [vmem:[#allocation17_spill] sm:$0xff] %v6142_v7 }
  0xec   : > { %4919 = vmatprep.mubr.msk.bf16.mxu0 %vm556_vm3, %v6072_v63 }
  0xee   : > { %4882 = vmatmul.mubr.msk.bf16.gmra.mxu1 %vm556_vm3, %v7386_v24 }
  0xef   : > { %4885 = vmatprep.mubr.msk.bf16.mxu1 %vm556_vm3, %v7387_v0  ;;  %v6096_v22 = vpop.f32.mrf.mxu0  ;;  %v2401_v0 = vrot.slane %v2399_v50, 1 }
  0xf1   : > { %v6102_v34 = vpop.f32.mrf.mxu0  ;;  %v2405_v50 = vor.u32 %v2403_v49, %v2401_v0 }
  0xf2   : > { %v6104_v61 = vpop.f32.mrf.mxu1 }
  0xf3   : > { %4920 = vmatmul.mubr.msk.bf16.gmra.mxu0 %vm556_vm3, %v6089_v20  ;;  %v6110_v6 = vpop.f32.mrf.mxu0 }
  0xf4   : > { %4923 = vmatprep.mubr.msk.bf16.mxu0 %vm556_vm3, %v6092_v31  ;;  %v6118_v57 = vpop.f32.mrf.mxu1 }
  0xf5   : > { %v6123_v27 = vpop.f32.mrf.mxu0 }
  0xf6   : > { %4886 = vmatmul.mubr.msk.bf16.gmra.mxu1 %vm556_vm3, %v7389_v9  ;;  %v6128_v4 = vpop.f32.mrf.mxu1  ;;  %v2634_v9 = vshll.u32 %v5116_v40, 16 }
  0xf7   : > { %4889 = vmatprep.mubr.msk.bf16.mxu1 %vm556_vm3, %v4367_v59  ;;  %v2393_v59 = vrot.slane %v2391_v12, 1 }
  0xf8   : > { %v6130_v43 = vpop.f32.mrf.mxu0  ;;  %v6134_v39 = vpop.f32.mrf.mxu1 }
  0xf9   : > { %v6140_v24 = vor.u32 %v2395_v45, %v2393_v59  ;;  %v6159_v2 = vsel %vm2278_vm4, %v2389_v16, %v2393_v59  ;;  %v2409_v59 = vrot.slane %v2407_v55, 1  ;;  %v2632_v16 = vshrl.u32 %v5116_v40, 16 }
  0xfa   : > { %v6138_v37 = vpop.f32.mrf.mxu0  ;;  %v2948_v40 = vshll.u32 %v5119_v44, 16  ;;  %v5122_v44 = vld [vmem:[#allocation2 + $0x3c] sm:$0xff]  }
  0xfb   : > { %4924 = vmatmul.mubr.msk.bf16.gmra.mxu0 %vm556_vm3, %v6121_v26  ;;  %7391 = vst [vmem:[#allocation18_spill] sm:$0xff] %v6140_v24  ;;  %v2402_v53 = vsel %vm2278_vm4, %v6140_v24, %v2401_v0  ;;  %v7395_v0 = vcombine.low %v5781_v42, %v5791_v46  ;;  %v2410_v55 = vsel %vm2278_vm4, %v2405_v50, %v2409_v59  ;;  %v5121_v42 = vld [vmem:[#allocation2 + $0x34] sm:$0xff]  }
  0xfc   : > { %4927 = vmatprep.mubr.msk.bf16.mxu0 %vm556_vm3, %v6126_v33  ;;  %v6150_v23 = vpop.f32.mrf.mxu0 }
  0xfd   : > { %v6144_v5 = vpop.f32.mrf.mxu1 }
  0xfe   : > { %4890 = vmatmul.mubr.msk.bf16.gmra.mxu1 %vm556_vm3, %v4368_v11  ;;  %v6161_v12 = vpop.f32.mrf.mxu0  ;;  %v2933_v11 = vshrl.u32 %v5117_v62, 16  ;;  %v2636_v62 = vrot.slane %v2634_v9, 1 }
  0xff   : > { %4893 = vmatprep.mubr.msk.bf16.mxu1 %vm556_vm3, %v4369_v41  ;;  %v6156_v15 = vpop.f32.mrf.mxu1  ;;  %v6171_v41 = vpop.permute.xlu1 %3565 }
 0x100   : > { %7393 = vst [vmem:[#allocation23_spill] sm:$0xff] %v6171_v41  ;;  %v2938_v17 = vor.u32 %v2937_v1, %v2933_v11  ;;  %v2637_v9 = vor.u32 %v2636_v62, %v2632_v16 }
 0x101   : > { %v6165_v45 = vpop.f32.mrf.mxu1 }
 0x102   : > { %v2943_v19 = vsel %vm2278_vm4, %v2938_v17, %v2942_v36 }
 0x103   : > { %v6167_v29 = vpop.f32.mrf.mxu0  ;;  %4928 = vmatmul.mubr.msk.bf16.gmra.mxu0 %vm556_vm3, %v6159_v2  ;;  %v6173_v8 = vpop.f32.mrf.mxu1 }
 0x104   : > { %4931 = vmatprep.mubr.msk.bf16.mxu0 %vm556_vm3, %v2402_v53  ;;  %v2944_v53 = vshrl.u32 %v5118_v3, 16  ;;  %v6196_v1 = vpop.permute.xlu1 %3573  ;;  %v2638_v3 = vsel %vm2278_vm4, %v2637_v9, %v5979_v48 }
 0x105   : > { %v6176_v32 = vpop.f32.mrf.mxu0  ;;  %7396 = vst [vmem:[#allocation24_spill] sm:$0xff] %v6196_v1  ;;  %v7399_v1 = vcombine.low %v5793_v13, %v5821_v30 }
 0x106   : > { %v6178_v35 = vpop.f32.mrf.mxu1  ;;  %4894 = vmatmul.mubr.msk.bf16.gmra.mxu1 %vm556_vm3, %v7394_v56  ;;  %v2956_v56 = vshll.u32 %v5120_v10, 16  ;;  %v2946_v50 = vor.u32 %v2944_v53, %v2942_v36  ;;  %v2960_v53 = vshrl.u32 %v5120_v10, 16 }
 0x107   : > { %v6184_v41 = vpop.f32.mrf.mxu0  ;;  %4897 = vmatprep.mubr.msk.bf16.mxu1 %vm556_vm3, %v7395_v0  ;;  %v2950_v0 = vrot.slane %v2948_v40, 1  ;;  %v2964_v40 = vshll.u32 %v5121_v42, 16 }
 0x108   : > { %v6190_v49 = vpop.f32.mrf.mxu1  ;;  %v2958_v62 = vrot.slane %v2956_v56, 1  ;;  %v6219_v36 = vpop.permute.xlu1 %3577 }
 0x109   : > { %v6193_v11 = vpop.f32.mrf.mxu0  ;;  %v2954_v16 = vor.u32 %v2952_v25, %v2950_v0  ;;  %7400 = vst [vmem:[#allocation26_spill] sm:$0xff] %v6219_v36  ;;  %v2951_v9 = vsel %vm2278_vm4, %v2946_v50, %v2950_v0  ;;  %v2972_v25 = vshll.u32 %v5122_v44, 16  ;;  %v5124_v50 = vld [vmem:[#allocation2 + $0x4c] sm:$0xff]  }
 0x10a   : > { %v6198_v60 = vpop.f32.mrf.mxu1  ;;  %v2962_v36 = vor.u32 %v2960_v53, %v2958_v62 }
 0x10b   : > { %v6200_v46 = vpop.f32.mrf.mxu0  ;;  %4932 = vmatmul.mubr.msk.bf16.gmra.mxu0 %vm556_vm3, %v2410_v55  ;;  %v2959_v13 = vsel %vm2278_vm4, %v2954_v16, %v2958_v62  ;;  %v2974_v10 = vrot.slane %v2972_v25, 1  ;;  %v2976_v25 = vshrl.u32 %v5122_v44, 16 }
 0x10c   : > { %v6203_v7 = vpop.f32.mrf.mxu1  ;;  %4971 = vmatprep.mubr.msk.bf16.mxu0 %vm556_vm3, %v2943_v19  ;;  %v2968_v19 = vshrl.u32 %v5121_v42, 16 }
 0x10d   : > { %7397 = vst [vmem:[#allocation21_spill] sm:$0xff] %v6203_v7  ;;  %v6208_v59 = vpop.f32.mrf.mxu0 }
 0x10e   : > { %v6210_v17 = vpop.f32.mrf.mxu1  ;;  %4898 = vmatmul.mubr.msk.bf16.gmra.mxu1 %vm556_vm3, %v7399_v1  ;;  %v2966_v1 = vrot.slane %v2964_v40, 1 }
 0x10f   : > { %7398 = vst [vmem:[#allocation25_spill] sm:$0xff] %v6210_v17  ;;  %v6216_v55 = vpop.f32.mrf.mxu0  ;;  %4937 = vmatprep.mubr.msk.bf16.mxu1 %vm556_vm3, %v2638_v3  ;;  %v5123_v3 = vld [vmem:[#allocation2 + $0x44] sm:$0xff]  }
 0x110   : > { %v6221_v48 = vpop.f32.mrf.mxu1  ;;  %v2970_v0 = vor.u32 %v2968_v19, %v2966_v1  ;;  %v2967_v53 = vsel %vm2278_vm4, %v2962_v36, %v2966_v1 }
 0x111   : > { %7401 = vst [vmem:[#allocation27_spill] sm:$0xff] %v6221_v48  ;;  %v6224_v56 = vpop.f32.mrf.mxu0  ;;  %v6233_v48 = vpop.permute.xlu1 %3585 }
 0x112   : > { %v6227_v30 = vpop.f32.mrf.mxu1  ;;  %7404 = vst [vmem:[#allocation30_spill] sm:$0xff] %v6233_v48  ;;  %v2975_v19 = vsel %vm2278_vm4, %v2970_v0, %v2974_v10 }
 0x113   : > { %7402 = vst [vmem:[#allocation5_spill] sm:$0xff] %v6227_v30  ;;  %v4769_v28 = vpop.f32.mrf.mxu0  ;;  %4972 = vmatmul.mubr.msk.bf16.vlgmr.msra.gmra.mxu0 %vm556_vm3, %v2951_v9  ;;  %v2980_v9 = vshll.u32 %v5123_v3, 16  ;;  %v2984_v30 = vshrl.u32 %v5123_v3, 16 }
 0x114   : > { %v6230_v54 = vpop.f32.mrf.mxu1  ;;  %4975 = vmatprep.mubr.msk.bf16.mxu0 %vm556_vm3, %v2959_v13 }
 0x115   : > { %7403 = vst [vmem:[#allocation6_spill] sm:$0xff] %v6230_v54  ;;  %v1334_v42 = vpop.f32.mrf.mxu0  ;;  %v2982_v36 = vrot.slane %v2980_v9, 1  ;;  %v6249_v1 = vpop.permute.xlu1 %3593 }
 0x116   : > { %v4735_v17 = vpop.f32.mrf.mxu1  ;;  %4938 = vmatmul.mubr.msk.bf16.vlgmr.msra.gmra.mxu1 %vm556_vm3, %v5995_v14  ;;  %v2988_v14 = vshll.u32 %v5124_v50, 16  ;;  %7405 = vst [vmem:[#allocation31_spill] sm:$0xff] %v6249_v1 }
 0x117   : > { %v861_v16 = vadd.f32 %v4735_v17, %v6096_v22  ;;  %v4770_v40 = vpop.f32.mrf.mxu0  ;;  %4941 = vmatprep.mubr.msk.bf16.mxu1 %vm556_vm3, %v6011_v51  ;;  %v5125_v22 = vld [vmem:[#allocation2 + $0x54] sm:$0xff]  }
 0x118   : > { %v852_v62 = vpop.f32.mrf.mxu1 }
 0x119   : > { %v6242_v13 = vadd.f32 %v4769_v28, %v861_v16  ;;  %v853_v48 = vadd.f32 %v852_v62, %v6102_v34  ;;  %v1337_v54 = vpop.f32.mrf.mxu0  ;;  %v2978_v28 = vor.u32 %v2976_v25, %v2974_v10  ;;  %v6252_v34 = vld [vmem:[#allocation2 + $0x5c] sm:$0xff]   ;;  %v2990_v16 = vrot.slane %v2988_v14, 1 }
 0x11a   : > { %v4736_v7 = vpop.f32.mrf.mxu1 }
 0x11b   : > { %v6245_v17 = vadd.f32 %v1334_v42, %v853_v48  ;;  %v864_v51 = vadd.f32 %v4736_v7, %v6110_v6  ;;  %v4773_v24 = vpop.f32.mrf.mxu0  ;;  %4976 = vmatmul.mubr.msk.bf16.gmra.mxu0 %vm556_vm3, %v2967_v53  ;;  %v2986_v42 = vor.u32 %v2984_v30, %v2982_v36  ;;  %v2996_v7 = vshll.u32 %v5125_v22, 16 }
 0x11c   : > { %v855_v44 = vpop.f32.mrf.mxu1  ;;  %4979 = vmatprep.mubr.msk.bf16.mxu0 %vm556_vm3, %v2975_v19  ;;  %v2983_v53 = vsel %vm2278_vm4, %v2978_v28, %v2982_v36  ;;  %v3000_v19 = vshrl.u32 %v5125_v22, 16  ;;  %v3004_v30 = vshll.u32 %v6252_v34, 16 }
 0x11d   : > { %v6254_v3 = vadd.f32 %v4770_v40, %v864_v51  ;;  %v856_v0 = vadd.f32 %v855_v44, %v6123_v27  ;;  %v1350_v48 = vpop.f32.mrf.mxu0  ;;  %v2992_v27 = vshrl.u32 %v5124_v50, 16  ;;  %v6270_v51 = vpop.permute.xlu1 %3597  ;;  %v2998_v44 = vrot.slane %v2996_v7, 1  ;;  %v5127_v50 = vld [vmem:[#allocation2 + $0x64] sm:$0xff]   ;;  %v5128_v7 = vld [vmem:[#allocation2 + $0x6c] sm:$0xff]  }
 0x11e   : > { %v4739_v6 = vpop.f32.mrf.mxu1  ;;  %4942 = vmatmul.mubr.msk.bf16.gmra.mxu1 %vm556_vm3, %v6016_v58  ;;  %7406 = vst [vmem:[#allocation8_spill] sm:$0xff] %v6270_v51  ;;  %v3006_v28 = vrot.slane %v3004_v30, 1  ;;  %v3008_v30 = vshrl.u32 %v6252_v34, 16  ;;  %v6300_v34 = vld [vmem:[#allocation2 + $0x7c] sm:$0xff]  }
 0x11f   : > { %v6259_v9 = vadd.f32 %v1337_v54, %v856_v0  ;;  %v877_v10 = vadd.f32 %v4739_v6, %v6130_v43  ;;  %v4774_v62 = vpop.f32.mrf.mxu0  ;;  %4945 = vmatprep.mubr.msk.bf16.mxu1 %vm556_vm3, %v6033_v47  ;;  %v2991_v54 = vsel %vm2278_vm4, %v2986_v42, %v2990_v16 }
 0x120   : > { %v868_v40 = vpop.f32.mrf.mxu1 }
 0x121   : > { %v6266_v25 = vadd.f32 %v4773_v24, %v877_v10  ;;  %v869_v58 = vadd.f32 %v868_v40, %v6138_v37  ;;  %v1353_v14 = vpop.f32.mrf.mxu0  ;;  %v2994_v24 = vor.u32 %v2992_v27, %v2990_v16  ;;  %v3002_v37 = vor.u32 %v3000_v19, %v2998_v44  ;;  %v6287_v27 = vpop.permute.xlu1 %3392 }
 0x122   : > { %v4740_v43 = vpop.f32.mrf.mxu1  ;;  %v3012_v16 = vshll.u32 %v5127_v50, 16 }
 0x123   : > { %v6272_v0 = vadd.f32 %v1350_v48, %v869_v58  ;;  %v880_v47 = vadd.f32 %v4740_v43, %v6150_v23  ;;  %v4777_v36 = vpop.f32.mrf.mxu0  ;;  %4980 = vmatmul.mubr.msk.bf16.gmra.mxu0 %vm556_vm3, %v2983_v53  ;;  %v3007_v19 = vsel %vm2278_vm4, %v3002_v37, %v3006_v28  ;;  %v3010_v37 = vor.u32 %v3008_v30, %v3006_v28 }
 0x124   : > { %v871_v22 = vpop.f32.mrf.mxu1  ;;  %4983 = vmatprep.mubr.msk.bf16.mxu0 %vm556_vm3, %v2991_v54  ;;  %v3020_v54 = vshll.u32 %v5128_v7, 16 }
 0x125   : > { %v6277_v6 = vadd.f32 %v4774_v62, %v880_v47  ;;  %v872_v42 = vadd.f32 %v871_v22, %v6161_v12  ;;  %v1366_v10 = vpop.f32.mrf.mxu0  ;;  %v2999_v12 = vsel %vm2278_vm4, %v2994_v24, %v2998_v44  ;;  %v5129_v47 = vld [vmem:[#allocation2 + $0x74] sm:$0xff]   ;;  %v3014_v44 = vrot.slane %v3012_v16, 1 }
 0x126   : > { %v4743_v48 = vpop.f32.mrf.mxu1  ;;  %4946 = vmatmul.mubr.msk.bf16.gmra.mxu1 %vm556_vm3, %v6036_v52  ;;  %v3028_v16 = vshll.u32 %v5129_v47, 16  ;;  %v3032_v30 = vshrl.u32 %v5129_v47, 16 }
 0x127   : > { %v6282_v23 = vadd.f32 %v1353_v14, %v872_v42  ;;  %v893_v40 = vadd.f32 %v4743_v48, %v6167_v29  ;;  %v4778_v53 = vpop.f32.mrf.mxu0  ;;  %4949 = vmatprep.mubr.msk.bf16.mxu1 %vm556_vm3, %v6051_v38  ;;  %v3016_v29 = vshrl.u32 %v5127_v50, 16 }
 0x128   : > { %v884_v62 = vpop.f32.mrf.mxu1 }
 0x129   : > { %v6292_v58 = vadd.f32 %v4777_v36, %v893_v40  ;;  %v885_v52 = vadd.f32 %v884_v62, %v6176_v32  ;;  %v1369_v14 = vpop.f32.mrf.mxu0  ;;  %v3018_v48 = vor.u32 %v3016_v29, %v3014_v44  ;;  %v6305_v40 = vpop.permute.xlu1 %3397 }
 0x12a   : > { %v4744_v43 = vpop.f32.mrf.mxu1 }
 0x12b   : > { %v6295_v38 = vadd.f32 %v1366_v10, %v885_v52  ;;  %v896_v22 = vadd.f32 %v4744_v43, %v6184_v41  ;;  %v4781_v42 = vpop.f32.mrf.mxu0  ;;  %4984 = vmatmul.mubr.msk.bf16.gmra.mxu0 %vm556_vm3, %v2999_v12  ;;  %v3022_v10 = vrot.slane %v3020_v54, 1  ;;  %v3036_v52 = vshll.u32 %v6300_v34, 16 }
 0x12c   : > { %v887_v24 = vpop.f32.mrf.mxu1  ;;  %4987 = vmatprep.mubr.msk.bf16.mxu0 %vm556_vm3, %v3007_v19  ;;  %v3024_v19 = vshrl.u32 %v5128_v7, 16  ;;  %v5131_v7 = vld [vmem:[#allocation2 + $0x84] sm:$0xff]  }
 0x12d   : > { %v6302_v32 = vadd.f32 %v4778_v53, %v896_v22  ;;  %v888_v36 = vadd.f32 %v887_v24, %v6193_v11  ;;  %v1382_v50 = vpop.f32.mrf.mxu0  ;;  %v3015_v11 = vsel %vm2278_vm4, %v3010_v37, %v3014_v44  ;;  %v6324_v47 = vpop.permute.xlu1 %3605  ;;  %v3038_v37 = vrot.slane %v3036_v52, 1 }
 0x12e   : > { %v4747_v41 = vpop.f32.mrf.mxu1  ;;  %4950 = vmatmul.mubr.msk.bf16.gmra.mxu1 %vm556_vm3, %v6054_v18  ;;  %7407 = vst [vmem:[#allocation12_spill] sm:$0xff] %v6324_v47 }
 0x12f   : > { %v6309_v62 = vadd.f32 %v1369_v14, %v888_v36  ;;  %v909_v28 = vadd.f32 %v4747_v41, %v6200_v46  ;;  %v4782_v12 = vpop.f32.mrf.mxu0  ;;  %4953 = vmatprep.mubr.msk.bf16.mxu1 %vm556_vm3, %v6069_v21  ;;  %v3023_v14 = vsel %vm2278_vm4, %v3018_v48, %v3022_v10  ;;  %v3030_v46 = vrot.slane %v3028_v16, 1  ;;  %v5132_v41 = vld [vmem:[#allocation2 + $0x8c] sm:$0xff]  }
 0x130   : > { %v900_v53 = vpop.f32.mrf.mxu1 }
 0x131   : > { %v6316_v29 = vadd.f32 %v4781_v42, %v909_v28  ;;  %v901_v18 = vadd.f32 %v900_v53, %v6208_v59  ;;  %v1385_v54 = vpop.f32.mrf.mxu0  ;;  %v3026_v42 = vor.u32 %v3024_v19, %v3022_v10  ;;  %v3034_v59 = vor.u32 %v3032_v30, %v3030_v46 }
 0x132   : > { %v4748_v43 = vpop.f32.mrf.mxu1  ;;  %v3044_v10 = vshll.u32 %v5131_v7, 16  ;;  %v3040_v19 = vshrl.u32 %v6300_v34, 16 }
 0x133   : > { %v6320_v22 = vadd.f32 %v1382_v50, %v901_v18  ;;  %v912_v21 = vadd.f32 %v4748_v43, %v6216_v55  ;;  %v4785_v24 = vpop.f32.mrf.mxu0  ;;  %4988 = vmatmul.mubr.msk.bf16.gmra.mxu0 %vm556_vm3, %v3015_v11  ;;  %v3048_v18 = vshrl.u32 %v5131_v7, 16 }
 0x134   : > { %v903_v44 = vpop.f32.mrf.mxu1  ;;  %4991 = vmatprep.mubr.msk.bf16.mxu0 %vm556_vm3, %v3023_v14  ;;  %v3042_v34 = vor.u32 %v3040_v19, %v3038_v37 }
 0x135   : > { %v6327_v36 = vadd.f32 %v4782_v12, %v912_v21  ;;  %v904_v48 = vadd.f32 %v903_v44, %v6224_v56  ;;  %v1398_v50 = vpop.f32.mrf.mxu0  ;;  %v3031_v12 = vsel %vm2278_vm4, %v3026_v42, %v3030_v46  ;;  %v3039_v56 = vsel %vm2278_vm4, %v3034_v59, %v3038_v37  ;;  %v5133_v37 = vld [vmem:[#allocation2 + $0x84] ss:$0 sps:$4 sm:$0x11]  }
 0x136   : > { %v4751_v16 = vpop.f32.mrf.mxu1  ;;  %4954 = vmatmul.mubr.msk.bf16.gmra.mxu1 %vm556_vm3, %v6072_v63  ;;  %v3046_v46 = vrot.slane %v3044_v10, 1 }
 0x137   : > { %v6332_v55 = vadd.f32 %v1385_v54, %v904_v48  ;;  %v925_v28 = vadd.f32 %v4751_v16, %v6104_v61  ;;  %v4786_v53 = vpop.f32.mrf.mxu0  ;;  %4957 = vmatprep.mubr.msk.bf16.mxu1 %vm556_vm3, %v6089_v20  ;;  %v3052_v54 = vshll.u32 %v5132_v41, 16  ;;  %v6343_v61 = vpop.permute.xlu1 %3609 }
 0x138   : > { %v916_v11 = vpop.f32.mrf.mxu1  ;;  %7408 = vst [vmem:[#allocation32_spill] sm:$0xff] %v6343_v61  ;;  %v3050_v59 = vor.u32 %v3048_v18, %v3046_v46 }
 0x139   : > { %v6340_v30 = vadd.f32 %v4785_v24, %v925_v28  ;;  %v917_v63 = vadd.f32 %v916_v11, %v6118_v57  ;;  %v1401_v52 = vpop.f32.mrf.mxu0  ;;  %v5134_v24 = vld [vmem:[#allocation2 + $0x94] ss:$0 sps:$4 sm:$0x11]   ;;  %v3054_v48 = vrot.slane %v3052_v54, 1  ;;  %v3056_v11 = vshrl.u32 %v5132_v41, 16 }
 0x13a   : > { %v4752_v14 = vpop.f32.mrf.mxu1  ;;  %v2640_v54 = vshll.u32 %v5133_v37, 16 }
 0x13b   : > { %v6345_v43 = vadd.f32 %v1398_v50, %v917_v63  ;;  %v928_v20 = vadd.f32 %v4752_v14, %v6128_v4  ;;  %v4789_v21 = vpop.f32.mrf.mxu0  ;;  %4992 = vmatmul.mubr.msk.bf16.gmra.mxu0 %vm556_vm3, %v3031_v12  ;;  %v3060_v12 = vshll.u32 %v5134_v24, 16  ;;  %v3055_v63 = vsel %vm2278_vm4, %v3050_v59, %v3054_v48  ;;  %v6384_v59 = vpop.permute.xlu0 %3342 }
 0x13c   : > { %v919_v44 = vpop.f32.mrf.mxu1  ;;  %4995 = vmatprep.mubr.msk.bf16.mxu0 %vm556_vm3, %v3039_v56 }
 0x13d   : > { %7409 = vst [vmem:[#allocation15_spill] sm:$0xff] %v6345_v43  ;;  %v6350_v57 = vadd.f32 %v4786_v53, %v928_v20  ;;  %v920_v7 = vadd.f32 %v919_v44, %v6134_v39  ;;  %v1414_v42 = vpop.f32.mrf.mxu0  ;;  %v6360_v53 = vpop.permute.xlu1 %3407  ;;  %v3047_v39 = vsel %vm2278_vm4, %v3042_v34, %v3046_v46  ;;  %v3058_v20 = vor.u32 %v3056_v11, %v3054_v48 }
 0x13e   : > { %v4755_v50 = vpop.f32.mrf.mxu1  ;;  %4958 = vmatmul.mubr.msk.bf16.gmra.mxu1 %vm556_vm3, %v6092_v31  ;;  %v3062_v41 = vrot.slane %v3060_v12, 1 }
 0x13f   : > { %7410 = vst [vmem:[#allocation22_spill] sm:$0xff] %v6350_v57  ;;  %v6355_v4 = vadd.f32 %v1401_v52, %v920_v7  ;;  %v941_v16 = vadd.f32 %v4755_v50, %v6144_v5  ;;  %v4790_v28 = vpop.f32.mrf.mxu0  ;;  %4961 = vmatprep.mubr.msk.bf16.mxu1 %vm556_vm3, %v6121_v26 }
 0x140   : > { %v932_v10 = vpop.f32.mrf.mxu1 }
 0x141   : > { %7411 = vst [vmem:[#allocation7_spill] sm:$0xff] %v6355_v4  ;;  %v6363_v56 = vadd.f32 %v4789_v21, %v941_v16  ;;  %v933_v31 = vadd.f32 %v932_v10, %v6156_v15  ;;  %v1417_v19 = vpop.f32.mrf.mxu0  ;;  %v6375_v44 = vpop.permute.xlu1 %3412 }
 0x142   : > { %v4756_v5 = vpop.f32.mrf.mxu1 }
 0x143   : > { %7412 = vst [vmem:[#allocation9_spill] sm:$0xff] %v6363_v56  ;;  %v6367_v52 = vadd.f32 %v1414_v42, %v933_v31  ;;  %v944_v26 = vadd.f32 %v4756_v5, %v6165_v45  ;;  %v4793_v18 = vpop.f32.mrf.mxu0  ;;  %4996 = vmatmul.mubr.msk.bf16.gmra.mxu0 %vm556_vm3, %v3047_v39  ;;  %v2642_v42 = vrot.slane %v2640_v54, 1  ;;  %v7418_v39 = vld [vmem:[#allocation18_spill] sm:$0xff]  ;;  %v6401_v5 = vpop.permute.xlu0 %3347 }
 0x144   : > { %v935_v14 = vpop.f32.mrf.mxu1  ;;  %4999 = vmatprep.mubr.msk.bf16.mxu0 %vm556_vm3, %v3055_v63 }
 0x145   : > { %7413 = vst [vmem:[#allocation3_spill] sm:$0xff] %v6367_v52  ;;  %v6372_v21 = vadd.f32 %v4790_v28, %v944_v26  ;;  %v936_v15 = vadd.f32 %v935_v14, %v6173_v8  ;;  %v1430_v46 = vpop.f32.mrf.mxu0  ;;  %v3063_v8 = vsel %vm2278_vm4, %v3058_v20, %v3062_v41  ;;  %v6396_v11 = vpop.permute.xlu1 %3617 }
 0x146   : > { %v4759_v34 = vpop.f32.mrf.mxu1  ;;  %4962 = vmatmul.mubr.msk.bf16.gmra.mxu1 %vm556_vm3, %v6126_v33  ;;  %7419 = vst [vmem:[#allocation13_spill] sm:$0xff] %v6396_v11 }
 0x147   : > { %7414 = vst [vmem:[#allocation28_spill] sm:$0xff] %v6372_v21  ;;  %v6379_v45 = vadd.f32 %v1417_v19, %v936_v15  ;;  %v957_v24 = vadd.f32 %v4759_v34, %v6178_v35  ;;  %v4794_v7 = vpop.f32.mrf.mxu0  ;;  %4965 = vmatprep.mubr.msk.bf16.mxu1 %vm556_vm3, %v6159_v2  ;;  %v2643_v2 = vsel %vm2278_vm4, %v7418_v39, %v2642_v42  ;;  %v7421_v19 = vld [vmem:[#allocation21_spill] sm:$0xff]  ;;  %v7425_v15 = vld [vmem:[#allocation27_spill] sm:$0xff]  ;;  %v7430_v39 = vld [vmem:[#allocation6_spill] sm:$0xff] }
 0x148   : > { %v948_v48 = vpop.f32.mrf.mxu1 }
 0x149   : > { %7415 = vst [vmem:[#allocation29_spill] sm:$0xff] %v6379_v45  ;;  %v6387_v50 = vadd.f32 %v4793_v18, %v957_v24  ;;  %v949_v16 = vadd.f32 %v948_v48, %v6190_v49  ;;  %v1433_v28 = vpop.f32.mrf.mxu0  ;;  %v7423_v18 = vld [vmem:[#allocation25_spill] sm:$0xff]  ;;  %v6410_v24 = vpop.permute.xlu1 %3621 }
 0x14a   : > { %v4760_v33 = vpop.f32.mrf.mxu1  ;;  %7426 = vst [vmem:[#allocation21_spill] sm:$0xff] %v6410_v24  ;;  %v7428_v48 = vld [vmem:[#allocation5_spill] sm:$0xff] }
 0x14b   : > { %7416 = vst [vmem:[#allocation4_spill] sm:$0xff] %v6387_v50  ;;  %v6390_v37 = vadd.f32 %v1430_v46, %v949_v16  ;;  %v960_v35 = vadd.f32 %v4760_v33, %v6198_v60  ;;  %v4797_v10 = vpop.f32.mrf.mxu0  ;;  %5000 = vmatmul.mubr.msk.bf16.gmra.mxu0 %vm556_vm3, %v3063_v8  ;;  %v6415_v33 = vpop.permute.xlu0 %3362 }
 0x14c   : > { %v951_v12 = vpop.f32.mrf.mxu1 }
 0x14d   : > { %7417 = vst [vmem:[#allocation11_spill] sm:$0xff] %v6390_v37  ;;  %v6398_v31 = vadd.f32 %v4794_v7, %v960_v35  ;;  %v952_v63 = vadd.f32 %v951_v12, %v7421_v19  ;;  %v1446_v49 = vpop.f32.mrf.mxu0 }
 0x14e   : > { %v4763_v26 = vpop.f32.mrf.mxu1  ;;  %4966 = vmatmul.mubr.msk.bf16.gmra.mxu1 %vm556_vm3, %v2643_v2 }
 0x14f   : > { %7420 = vst [vmem:[#allocation19_spill] sm:$0xff] %v6398_v31  ;;  %v6404_v60 = vadd.f32 %v1433_v28, %v952_v63  ;;  %v973_v54 = vadd.f32 %v4763_v26, %v7423_v18  ;;  %v4798_v14 = vpop.f32.mrf.mxu0  ;;  %v6424_v18 = vpop.permute.xlu1 %3422 }
 0x150   : > { %v964_v20 = vpop.f32.mrf.mxu1  ;;  %7432 = vst [vmem:[#allocation6_spill] sm:$0xff] %v6424_v18 }
 0x151   : > { %7422 = vst [vmem:[#allocation20_spill] sm:$0xff] %v6404_v60  ;;  %v6407_v41 = vadd.f32 %v4797_v10, %v973_v54  ;;  %v965_v46 = vadd.f32 %v964_v20, %v7425_v15  ;;  %v1449_v34 = vpop.f32.mrf.mxu0  ;;  %v6428_v15 = vpop.permute.xlu0 %3372 }
 0x152   : > { %v4764_v7 = vpop.f32.mrf.mxu1 }
 0x153   : > { %7424 = vst [vmem:[#allocation18_spill] sm:$0xff] %v6407_v41  ;;  %v6412_v42 = vadd.f32 %v1446_v49, %v965_v46  ;;  %v976_v8 = vadd.f32 %v4764_v7, %v7428_v48  ;;  %v4837_v16 = vpop.f32.mrf.mxu0 }
 0x154   : > { %v967_v28 = vpop.f32.mrf.mxu1 }
 0x155   : > { %7427 = vst [vmem:[#allocation25_spill] sm:$0xff] %v6412_v42  ;;  %v6417_v35 = vadd.f32 %v4798_v14, %v976_v8  ;;  %v968_v2 = vadd.f32 %v967_v28, %v7430_v39  ;;  %v1766_v10 = vpop.f32.mrf.mxu0  ;;  %v6434_v28 = vpop.permute.xlu1 %3427 }
 0x156   : > { %v4803_v12 = vpop.f32.mrf.mxu1  ;;  %7433 = vst [vmem:[#allocation33_spill] sm:$0xff] %v6434_v28 }
 0x157   : > { %7429 = vst [vmem:[#allocation27_spill] sm:$0xff] %v6417_v35  ;;  %v6420_v19 = vadd.f32 %v1449_v34, %v968_v2  ;;  %v6422_v63 = vadd.f32 %v4837_v16, %v4803_v12  ;;  %v4838_v26 = vpop.f32.mrf.mxu0  ;;  %v6438_v12 = vpop.permute.xlu0 %3382 }
 0x158   : > { %v1598_v49 = vpop.f32.mrf.mxu1 }
 0x159   : > { %7431 = vst [vmem:[#allocation5_spill] sm:$0xff] %v6420_v19  ;;  %v6426_v54 = vadd.f32 %v1766_v10, %v1598_v49  ;;  %v1769_v20 = vpop.f32.mrf.mxu0  ;;  %v6444_v61 = vpop.permute.xlu1 %3629 }
 0x15a   : > { %v4804_v46 = vpop.f32.mrf.mxu1  ;;  %7434 = vst [vmem:[#allocation34_spill] sm:$0xff] %v6444_v61 }
 0x15b   : > { %v6430_v14 = vadd.f32 %v4838_v26, %v4804_v46  ;;  %v4841_v7 = vpop.f32.mrf.mxu0  ;;  %v6448_v47 = vpop.permute.xlu0 %3387 }
 0x15c   : > { %v1601_v48 = vpop.f32.mrf.mxu1 }
 0x15d   : > { %v6432_v8 = vadd.f32 %v1769_v20, %v1601_v48  ;;  %v1782_v34 = vpop.f32.mrf.mxu0  ;;  %v6454_v35 = vpop.permute.xlu1 %3633 }
 0x15e   : > { %v4807_v16 = vpop.f32.mrf.mxu1  ;;  %7435 = vst [vmem:[#allocation35_spill] sm:$0xff] %v6454_v35 }
 0x15f   : > { %v6436_v39 = vadd.f32 %v4841_v7, %v4807_v16  ;;  %v4842_v2 = vpop.f32.mrf.mxu0  ;;  %v6458_v42 = vpop.permute.xlu0 %3402 }
 0x160   : > { %v1614_v10 = vpop.f32.mrf.mxu1 }
 0x161   : > { %v6440_v49 = vadd.f32 %v1782_v34, %v1614_v10  ;;  %v1785_v11 = vpop.f32.mrf.mxu0  ;;  %v6464_v31 = vpop.permute.xlu1 %3437 }
 0x162   : > { %v4808_v24 = vpop.f32.mrf.mxu1  ;;  %7436 = vst [vmem:[#allocation36_spill] sm:$0xff] %v6464_v31 }
 0x163   : > { %v6442_v26 = vadd.f32 %v4842_v2, %v4808_v24  ;;  %v4845_v46 = vpop.f32.mrf.mxu0  ;;  %v6468_v37 = vpop.permute.xlu0 %3417 }
 0x164   : > { %v1617_v20 = vpop.f32.mrf.mxu1 }
 0x165   : > { %v6446_v48 = vadd.f32 %v1785_v11, %v1617_v20  ;;  %v1798_v51 = vpop.f32.mrf.mxu0  ;;  %v6474_v21 = vpop.permute.xlu1 %3442 }
 0x166   : > { %v4811_v7 = vpop.f32.mrf.mxu1  ;;  %7437 = vst [vmem:[#allocation37_spill] sm:$0xff] %v6474_v21 }
 0x167   : > { %v6450_v16 = vadd.f32 %v4845_v46, %v4811_v7  ;;  %v4846_v1 = vpop.f32.mrf.mxu0  ;;  %v6478_v56 = vpop.permute.xlu0 %3432 }
 0x168   : > { %v1630_v19 = vpop.f32.mrf.mxu1 }
 0x169   : > { %v6452_v34 = vadd.f32 %v1798_v51, %v1630_v19  ;;  %v1801_v10 = vpop.f32.mrf.mxu0  ;;  %v6484_v31 = vpop.permute.xlu1 %3641 }
 0x16a   : > { %v4812_v24 = vpop.f32.mrf.mxu1  ;;  %7440 = vst [vmem:[#allocation40_spill] sm:$0xff] %v6484_v31 }
 0x16b   : > { %v6456_v2 = vadd.f32 %v4846_v1, %v4812_v24  ;;  %v4849_v61 = vpop.f32.mrf.mxu0  ;;  %v6488_v57 = vpop.permute.xlu0 %3569 }
 0x16c   : > { %v1633_v11 = vpop.f32.mrf.mxu1  ;;  %7442 = vst [vmem:[#allocation42_spill] sm:$0xff] %v6488_v57 }
 0x16d   : > { %v6460_v20 = vadd.f32 %v1801_v10, %v1633_v11  ;;  %v1814_v41 = vpop.f32.mrf.mxu0 }
 0x16e   : > { %v4815_v60 = vpop.f32.mrf.mxu1 }
 0x16f   : > { %v6462_v46 = vadd.f32 %v4849_v61, %v4815_v60  ;;  %v4850_v7 = vpop.f32.mrf.mxu0 }
 0x170   : > { %v1646_v51 = vpop.f32.mrf.mxu1 }
 0x171   : > { %v6466_v19 = vadd.f32 %v1814_v41, %v1646_v51  ;;  %v1817_v35 = vpop.f32.mrf.mxu0 }
 0x172   : > { %v4816_v1 = vpop.f32.mrf.mxu1 }
 0x173   : > { %v6470_v24 = vadd.f32 %v4850_v7, %v4816_v1  ;;  %v4853_v50 = vpop.f32.mrf.mxu0 }
 0x174   : > { %v1649_v45 = vpop.f32.mrf.mxu1 }
 0x175   : > { %v6472_v10 = vadd.f32 %v1817_v35, %v1649_v45  ;;  %v1830_v11 = vpop.f32.mrf.mxu0 }
 0x176   : > { %v4819_v61 = vpop.f32.mrf.mxu1 }
 0x177   : > { %v6476_v60 = vadd.f32 %v4853_v50, %v4819_v61  ;;  %v4854_v52 = vpop.f32.mrf.mxu0 }
 0x178   : > { %v1662_v41 = vpop.f32.mrf.mxu1 }
 0x179   : > { %v6480_v51 = vadd.f32 %v1830_v11, %v1662_v41  ;;  %v1833_v28 = vpop.f32.mrf.mxu0 }
 0x17a   : > { %v4820_v4 = vpop.f32.mrf.mxu1 }
 0x17b   : > { %7438 = vst [vmem:[#allocation38_spill] sm:$0xff] %v6480_v51  ;;  %v6482_v7 = vadd.f32 %v4854_v52, %v4820_v4  ;;  %v4857_v1 = vpop.f32.mrf.mxu0  ;;  %v6494_v51 = vpop.permute.xlu1 %3645 }
 0x17c   : > { %v1665_v45 = vpop.f32.mrf.mxu1  ;;  %7445 = vst [vmem:[#allocation45_spill] sm:$0xff] %v6494_v51 }
 0x17d   : > { %7439 = vst [vmem:[#allocation39_spill] sm:$0xff] %v6482_v7  ;;  %v6486_v35 = vadd.f32 %v1833_v28, %v1665_v45  ;;  %v1846_v21 = vpop.f32.mrf.mxu0  ;;  %v6498_v7 = vpop.permute.xlu0 %3581 }
 0x17e   : > { %v4823_v50 = vpop.f32.mrf.mxu1  ;;  %7447 = vst [vmem:[#allocation47_spill] sm:$0xff] %v6498_v7 }
 0x17f   : > { %7441 = vst [vmem:[#allocation41_spill] sm:$0xff] %v6486_v35  ;;  %v6490_v61 = vadd.f32 %v4857_v1, %v4823_v50  ;;  %v4858_v18 = vpop.f32.mrf.mxu0 }
 0x180   : > { %v1678_v43 = vpop.f32.mrf.mxu1 }
 0x181   : > { %7443 = vst [vmem:[#allocation43_spill] sm:$0xff] %v6490_v61  ;;  %v6492_v11 = vadd.f32 %v1846_v21, %v1678_v43  ;;  %v1849_v41 = vpop.f32.mrf.mxu0  ;;  %v6504_v61 = vpop.permute.xlu1 %3452 }
 0x182   : > { %v4824_v4 = vpop.f32.mrf.mxu1  ;;  %7450 = vst [vmem:[#allocation50_spill] sm:$0xff] %v6504_v61 }
 0x183   : > { %7444 = vst [vmem:[#allocation44_spill] sm:$0xff] %v6492_v11  ;;  %v6496_v52 = vadd.f32 %v4858_v18, %v4824_v4  ;;  %v4861_v31 = vpop.f32.mrf.mxu0  ;;  %v6508_v11 = vpop.permute.xlu0 %3589 }
 0x184   : > { %v1681_v28 = vpop.f32.mrf.mxu1  ;;  %7452 = vst [vmem:[#allocation52_spill] sm:$0xff] %v6508_v11 }
 0x185   : > { %7446 = vst [vmem:[#allocation46_spill] sm:$0xff] %v6496_v52  ;;  %v6500_v45 = vadd.f32 %v1849_v41, %v1681_v28  ;;  %v1862_v57 = vpop.f32.mrf.mxu0 }
 0x186   : > { %v4827_v35 = vpop.f32.mrf.mxu1 }
 0x187   : > { %7448 = vst [vmem:[#allocation48_spill] sm:$0xff] %v6500_v45  ;;  %v6502_v1 = vadd.f32 %v4861_v31, %v4827_v35  ;;  %v4862_v50 = vpop.f32.mrf.mxu0  ;;  %v6514_v45 = vpop.permute.xlu1 %3457 }
 0x188   : > { %v1694_v43 = vpop.f32.mrf.mxu1  ;;  %v6518_v61 = vpop.permute.xlu0 %3601 }
 0x189   : > { %7449 = vst [vmem:[#allocation49_spill] sm:$0xff] %v6502_v1  ;;  %v6506_v21 = vadd.f32 %v1862_v57, %v1694_v43  ;;  %v1865_v51 = vpop.f32.mrf.mxu0  ;;  %7455 = vst [vmem:[#allocation55_spill] sm:$0xff] %v6518_v61  ;;  %v7461_v61 = vld [vmem:[#allocation10_spill] sm:$0xff] }
 0x18a   : > { %v4828_v18 = vpop.f32.mrf.mxu1 }
 0x18b   : > { %7451 = vst [vmem:[#allocation51_spill] sm:$0xff] %v6506_v21  ;;  %v6510_v4 = vadd.f32 %v4862_v50, %v4828_v18  ;;  %v4865_v7 = vpop.f32.mrf.mxu0 }
 0x18c   : > { %v1697_v52 = vpop.f32.mrf.mxu1 }
 0x18d   : > { %7453 = vst [vmem:[#allocation53_spill] sm:$0xff] %v6510_v4  ;;  %v6512_v41 = vadd.f32 %v1865_v51, %v1697_v52  ;;  %v1878_v28 = vpop.f32.mrf.mxu0  ;;  %v6526_v51 = vpop.permute.xlu1 %3653 }
 0x18e   : > { %v4831_v31 = vpop.f32.mrf.mxu1  ;;  %7458 = vst [vmem:[#allocation58_spill] sm:$0xff] %v6526_v51 }
 0x18f   : > { %7454 = vst [vmem:[#allocation54_spill] sm:$0xff] %v6512_v41  ;;  %v6516_v35 = vadd.f32 %v4865_v7, %v4831_v31  ;;  %v4866_v1 = vpop.f32.mrf.mxu0  ;;  %v6532_v7 = vpop.permute.xlu0 %3613 }
 0x190   : > { %v1710_v57 = vpop.f32.mrf.mxu1  ;;  %7460 = vst [vmem:[#allocation60_spill] sm:$0xff] %v6532_v7 }
 0x191   : > { %v6520_v43 = vadd.f32 %v1878_v28, %v1710_v57  ;;  %v1881_v11 = vpop.f32.mrf.mxu0  ;;  %v3502_v28 = vmul.f32 %v7461_v61, %v6242_v13 }
 0x192   : > { %v4832_v21 = vpop.f32.mrf.mxu1 }
 0x193   : > { %7456 = vst [vmem:[#allocation56_spill] sm:$0xff] %v6520_v43  ;;  %v6522_v50 = vadd.f32 %v4866_v1, %v4832_v21  ;;  %v6524_v18 = vpop.f32.mrf.mxu0  ;;  %v3500_v21 = vmul.f32 %v6384_v59, %v6245_v17  ;;  %v3501_v59 = vmul.f32 %v6401_v5, %v6259_v9  ;;  %v3504_v9 = vmul.f32 %v6415_v33, %v6272_v0  ;;  %v7466_v0 = vld [vmem:[#allocation14_spill] sm:$0xff] }
 0x194   : > { %7457 = vst [vmem:[#allocation57_spill] sm:$0xff] %v6524_v18  ;;  %v1713_v52 = vpop.f32.mrf.mxu1  ;;  %v7464_v18 = vld [vmem:[#allocation16_spill] sm:$0xff]  ;;  %v3505_v33 = vmul.f32 %v7466_v0, %v6282_v23 }
 0x195   : > { %v6528_v41 = vadd.f32 %v1881_v11, %v1713_v52  ;;  %v6530_v4 = vpop.f32.mrf.mxu0  ;;  %v3503_v13 = vmul.f32 %v7464_v18, %v6254_v3  ;;  %v3506_v3 = vmul.f32 %v6428_v15, %v6266_v25  ;;  %v7465_v15 = vld [vmem:[#allocation17_spill] sm:$0xff] }
 0x196   : > { %7459 = vst [vmem:[#allocation59_spill] sm:$0xff] %v6530_v4  ;;  %v4871_v31 = vpop.f32.mrf.mxu1  ;;  %v6546_v4 = vpop.permute.xlu1 %3657 }
 0x197   : > { %v2125_v57 = vadd.f32 %v4871_v31, %v6422_v63  ;;  %v6537_v43 = vpop.f32.mrf.mxu0  ;;  %7463 = vst [vmem:[#allocation61_spill] sm:$0xff] %v6546_v4 }
 0x198   : > { %7462 = vst [vmem:[#allocation10_spill] sm:$0xff] %v6537_v43  ;;  %v1996_v1 = vpop.f32.mrf.mxu1  ;;  %v6555_v43 = vpop.permute.xlu0 %3625 }
 0x199   : > { %v6541_v51 = vadd.f32 %v3502_v28, %v2125_v57  ;;  %v2123_v11 = vadd.f32 %v1996_v1, %v6426_v54  ;;  %v6544_v52 = vpop.f32.mrf.mxu0 }
 0x19a   : > { %v4872_v7 = vpop.f32.mrf.mxu1 }
 0x19b   : > { %v6550_v61 = vadd.f32 %v3500_v21, %v2123_v11  ;;  %v2126_v63 = vadd.f32 %v4872_v7, %v6430_v14  ;;  %v6553_v31 = vpop.f32.mrf.mxu0  ;;  %v6571_v21 = vpop.permute.xlu1 %3467 }
 0x19c   : > { %v1999_v17 = vpop.f32.mrf.mxu1 }
 0x19d   : > { %v6559_v54 = vadd.f32 %v3503_v13, %v2126_v63  ;;  %v2124_v28 = vadd.f32 %v1999_v17, %v6432_v8  ;;  %v6562_v57 = vpop.f32.mrf.mxu0  ;;  %v6580_v63 = vpop.permute.xlu0 %3637 }
 0x19e   : > { %v4875_v1 = vpop.f32.mrf.mxu1 }
 0x19f   : > { %v6566_v18 = vadd.f32 %v3501_v59, %v2124_v28  ;;  %v2129_v14 = vadd.f32 %v4875_v1, %v6436_v39  ;;  %v6569_v7 = vpop.f32.mrf.mxu0  ;;  %v3507_v39 = vmul.f32 %v7465_v15, %v6277_v6  ;;  %v3510_v6 = vmul.f32 %v6287_v27, %v6292_v58 }
 0x1a0   : > { %v2012_v11 = vpop.f32.mrf.mxu1  ;;  %v3511_v27 = vmul.f32 %v6305_v40, %v6302_v32  ;;  %v3514_v40 = vmul.f32 %v6375_v44, %v6316_v29  ;;  %v3515_v29 = vmul.f32 %v6468_v37, %v6327_v36  ;;  %v3518_v36 = vmul.f32 %v6478_v56, %v6340_v30  ;;  %v7477_v56 = vld [vmem:[#allocation22_spill] sm:$0xff] }
 0x1a1   : > { %v6575_v5 = vadd.f32 %v3506_v3, %v2129_v14  ;;  %v2127_v8 = vadd.f32 %v2012_v11, %v6440_v49  ;;  %v6578_v13 = vpop.f32.mrf.mxu0  ;;  %v6596_v11 = vpop.permute.xlu1 %3472 }
 0x1a2   : > { %v4876_v25 = vpop.f32.mrf.mxu1 }
 0x1a3   : > { %v6584_v17 = vadd.f32 %v3504_v9, %v2127_v8  ;;  %v2130_v59 = vadd.f32 %v4876_v25, %v6442_v26  ;;  %v6587_v28 = vpop.f32.mrf.mxu0  ;;  %v6605_v25 = vpop.permute.xlu0 %3649 }
 0x1a4   : > { %v2015_v1 = vpop.f32.mrf.mxu1  ;;  %7467 = vst [vmem:[#allocation16_spill] sm:$0xff] %v6605_v25 }
 0x1a5   : > { %v6591_v3 = vadd.f32 %v3507_v39, %v2130_v59  ;;  %v2128_v49 = vadd.f32 %v2015_v1, %v6446_v48  ;;  %v6594_v14 = vpop.f32.mrf.mxu0  ;;  %v3508_v48 = vmul.f32 %v6438_v12, %v6295_v38  ;;  %v6621_v0 = vpop.permute.xlu1 %3665  ;;  %v3509_v38 = vmul.f32 %v6448_v47, %v6309_v62 }
 0x1a6   : > { %v4879_v4 = vpop.f32.mrf.mxu1  ;;  %7468 = vst [vmem:[#allocation17_spill] sm:$0xff] %v6621_v0  ;;  %v3512_v62 = vmul.f32 %v6458_v42, %v6320_v22  ;;  %v3513_v42 = vmul.f32 %v6360_v53, %v6332_v55  ;;  %v7472_v55 = vld [vmem:[#allocation15_spill] sm:$0xff]  ;;  %v7473_v53 = vld [vmem:[#allocation6_spill] sm:$0xff] }
 0x1a7   : > { %v6600_v9 = vadd.f32 %v3505_v33, %v2128_v49  ;;  %v2133_v26 = vadd.f32 %v4879_v4, %v6450_v16  ;;  %v6603_v8 = vpop.f32.mrf.mxu0 }
 0x1a8   : > { %v2028_v23 = vpop.f32.mrf.mxu1 }
 0x1a9   : > { %v6609_v15 = vadd.f32 %v3510_v6, %v2133_v26  ;;  %v2131_v39 = vadd.f32 %v2028_v23, %v6452_v34  ;;  %v6612_v59 = vpop.f32.mrf.mxu0  ;;  %v6630_v6 = vpop.permute.xlu0 %3661 }
 0x1aa   : > { %v4880_v1 = vpop.f32.mrf.mxu1  ;;  %7469 = vst [vmem:[#allocation14_spill] sm:$0xff] %v6630_v6  ;;  %v7482_v6 = vld [vmem:[#allocation7_spill] sm:$0xff] }
 0x1ab   : > { %v6616_v58 = vadd.f32 %v3508_v48, %v2131_v39  ;;  %v2134_v16 = vadd.f32 %v4880_v1, %v6456_v2  ;;  %v6619_v4 = vpop.f32.mrf.mxu0  ;;  %v6646_v1 = vpop.permute.xlu1 %3669 }
 0x1ac   : > { %v2031_v33 = vpop.f32.mrf.mxu1  ;;  %7470 = vst [vmem:[#allocation62_spill] sm:$0xff] %v6646_v1 }
 0x1ad   : > { %v6625_v12 = vadd.f32 %v3511_v27, %v2134_v16  ;;  %v2132_v34 = vadd.f32 %v2031_v33, %v6460_v20  ;;  %v6628_v49 = vpop.f32.mrf.mxu0  ;;  %v6655_v33 = vpop.permute.xlu0 %3673 }
 0x1ae   : > { %v4883_v32 = vpop.f32.mrf.mxu1  ;;  %7471 = vst [vmem:[#allocation63_spill] sm:$0xff] %v6655_v33 }
 0x1af   : > { %v6634_v2 = vadd.f32 %v3509_v38, %v2132_v34  ;;  %v2137_v26 = vadd.f32 %v4883_v32, %v6462_v46  ;;  %v6637_v23 = vpop.f32.mrf.mxu0 }
 0x1b0   : > { %v2044_v48 = vpop.f32.mrf.mxu1 }
 0x1b1   : > { %v6641_v47 = vadd.f32 %v3514_v40, %v2137_v26  ;;  %v2135_v20 = vadd.f32 %v2044_v48, %v6466_v19  ;;  %v6644_v39 = vpop.f32.mrf.mxu0  ;;  %v6671_v26 = vpop.permute.xlu1 %3482 }
 0x1b2   : > { %v4884_v27 = vpop.f32.mrf.mxu1 }
 0x1b3   : > { %v6650_v44 = vadd.f32 %v3512_v62, %v2135_v20  ;;  %v2138_v46 = vadd.f32 %v4884_v27, %v6470_v24  ;;  %v6653_v16 = vpop.f32.mrf.mxu0  ;;  %v3516_v62 = vmul.f32 %v7473_v53, %v7472_v55  ;;  %v7483_v55 = vld [vmem:[#allocation33_spill] sm:$0xff] }
 0x1b4   : > { %v2047_v22 = vpop.f32.mrf.mxu1 }
 0x1b5   : > { %v6659_v19 = vadd.f32 %v3515_v29, %v2138_v46  ;;  %v2136_v38 = vadd.f32 %v2047_v22, %v6472_v10  ;;  %v6662_v34 = vpop.f32.mrf.mxu0  ;;  %v7475_v10 = vld [vmem:[#allocation38_spill] sm:$0xff]  ;;  %v3448_v46 = vpop.permute.xlu0 %3447  ;;  %v7478_v22 = vld [vmem:[#allocation36_spill] sm:$0xff] }
 0x1b6   : > { %v4887_v32 = vpop.f32.mrf.mxu1  ;;  %v6694_v1 = vpop.permute.xlu1 %3487 }
 0x1b7   : > { %v6666_v37 = vadd.f32 %v3513_v42, %v2136_v38  ;;  %v2141_v24 = vadd.f32 %v4887_v32, %v6476_v60  ;;  %v6669_v40 = vpop.f32.mrf.mxu0  ;;  %v3519_v42 = vmul.f32 %v7478_v22, %v7477_v56  ;;  %v7480_v38 = vld [vmem:[#allocation39_spill] sm:$0xff]  ;;  %v7487_v56 = vld [vmem:[#allocation9_spill] sm:$0xff] }
 0x1b8   : > { %v2060_v48 = vpop.f32.mrf.mxu1 }
 0x1b9   : > { %v6675_v20 = vadd.f32 %v3518_v36, %v2141_v24  ;;  %v2139_v27 = vadd.f32 %v2060_v48, %v7475_v10  ;;  %v6678_v29 = vpop.f32.mrf.mxu0  ;;  %v3517_v36 = vmul.f32 %v7483_v55, %v7482_v6  ;;  %v7485_v48 = vld [vmem:[#allocation41_spill] sm:$0xff] }
 0x1ba   : > { %7476 = vst [vmem:[#allocation6_spill] sm:$0xff] %v6678_v29  ;;  %v4888_v30 = vpop.f32.mrf.mxu1 }
 0x1bb   : > { %7474 = vst [vmem:[#allocation15_spill] sm:$0xff] %v6675_v20  ;;  %v6682_v60 = vadd.f32 %v3516_v62, %v2139_v27  ;;  %v2142_v32 = vadd.f32 %v4888_v30, %v7480_v38  ;;  %v6685_v0 = vpop.f32.mrf.mxu0  ;;  %v7488_v62 = vld [vmem:[#allocation50_spill] sm:$0xff]  ;;  %v7490_v30 = vld [vmem:[#allocation43_spill] sm:$0xff]  ;;  %v7496_v20 = vld [vmem:[#allocation28_spill] sm:$0xff] }
 0x1bc   : > { %7481 = vst [vmem:[#allocation22_spill] sm:$0xff] %v6685_v0  ;;  %v2063_v33 = vpop.f32.mrf.mxu1  ;;  %v3522_v27 = vmul.f32 %v7488_v62, %v7487_v56  ;;  %v3463_v0 = vpop.permute.xlu0 %3462 }
 0x1bd   : > { %7479 = vst [vmem:[#allocation38_spill] sm:$0xff] %v6682_v60  ;;  %v6689_v24 = vadd.f32 %v3519_v42, %v2142_v32  ;;  %v2140_v53 = vadd.f32 %v2063_v33, %v7485_v48  ;;  %v6692_v10 = vpop.f32.mrf.mxu0  ;;  %v7491_v42 = vld [vmem:[#allocation3_spill] sm:$0xff]  ;;  %v7492_v32 = vld [vmem:[#allocation37_spill] sm:$0xff]  ;;  %v7494_v48 = vld [vmem:[#allocation44_spill] sm:$0xff] }
 0x1be   : > { %7486 = vst [vmem:[#allocation39_spill] sm:$0xff] %v6692_v10  ;;  %v4891_v25 = vpop.f32.mrf.mxu1  ;;  %v3520_v55 = vmul.f32 %v7492_v32, %v7491_v42  ;;  %v7500_v42 = vld [vmem:[#allocation29_spill] sm:$0xff] }
 0x1bf   : > { %7484 = vst [vmem:[#allocation36_spill] sm:$0xff] %v6689_v24  ;;  %v6698_v22 = vadd.f32 %v3517_v36, %v2140_v53  ;;  %v2145_v38 = vadd.f32 %v4891_v25, %v7490_v30  ;;  %v6701_v60 = vpop.f32.mrf.mxu0  ;;  %v3523_v36 = vmul.f32 %v6514_v45, %v7496_v20  ;;  %v7497_v25 = vld [vmem:[#allocation46_spill] sm:$0xff]  ;;  %v6717_v30 = vpop.permute.xlu1 %3677  ;;  %v7504_v45 = vld [vmem:[#allocation4_spill] sm:$0xff] }
 0x1c0   : > { %v2076_v6 = vpop.f32.mrf.mxu1  ;;  %7499 = vst [vmem:[#allocation50_spill] sm:$0xff] %v6717_v30  ;;  %v3526_v20 = vmul.f32 %v6596_v11, %v7504_v45 }
 0x1c1   : > { %7489 = vst [vmem:[#allocation7_spill] sm:$0xff] %v6698_v22  ;;  %v6705_v33 = vadd.f32 %v3522_v27, %v2145_v38  ;;  %v2143_v24 = vadd.f32 %v2076_v6, %v7494_v48  ;;  %v6708_v10 = vpop.f32.mrf.mxu0  ;;  %v3521_v27 = vmul.f32 %v3448_v46, %v7500_v42  ;;  %v7502_v6 = vld [vmem:[#allocation48_spill] sm:$0xff] }
 0x1c2   : > { %7495 = vst [vmem:[#allocation41_spill] sm:$0xff] %v6708_v10  ;;  %v4892_v29 = vpop.f32.mrf.mxu1  ;;  %v3478_v10 = vpop.permute.xlu0 %3477 }
 0x1c3   : > { %7493 = vst [vmem:[#allocation33_spill] sm:$0xff] %v6705_v33  ;;  %v6712_v53 = vadd.f32 %v3520_v55, %v2143_v24  ;;  %v2146_v56 = vadd.f32 %v4892_v29, %v7497_v25  ;;  %v6715_v62 = vpop.f32.mrf.mxu0  ;;  %v7506_v29 = vld [vmem:[#allocation49_spill] sm:$0xff] }
 0x1c4   : > { %7498 = vst [vmem:[#allocation9_spill] sm:$0xff] %v6715_v62  ;;  %v2079_v22 = vpop.f32.mrf.mxu1  ;;  %v7507_v62 = vld [vmem:[#allocation11_spill] sm:$0xff] }
 0x1c5   : > { %v6720_v38 = vadd.f32 %v3523_v36, %v2146_v56  ;;  %v2144_v32 = vadd.f32 %v2079_v22, %v7502_v6  ;;  %v6723_v48 = vpop.f32.mrf.mxu0  ;;  %v3524_v46 = vmul.f32 %v3463_v0, %v7507_v62  ;;  %v7509_v56 = vld [vmem:[#allocation51_spill] sm:$0xff]  ;;  %v6738_v6 = vpop.permute.xlu1 %3681  ;;  %v7514_v0 = vld [vmem:[#allocation20_spill] sm:$0xff] }
 0x1c6   : > { %7503 = vst [vmem:[#allocation3_spill] sm:$0xff] %v6723_v48  ;;  %v4895_v33 = vpop.f32.mrf.mxu1  ;;  %7510 = vst [vmem:[#allocation28_spill] sm:$0xff] %v6738_v6  ;;  %v7511_v48 = vld [vmem:[#allocation19_spill] sm:$0xff]  ;;  %v3525_v62 = vmul.f32 %v6571_v21, %v7514_v0 }
 0x1c7   : > { %7501 = vst [vmem:[#allocation43_spill] sm:$0xff] %v6720_v38  ;;  %v6727_v24 = vadd.f32 %v3521_v27, %v2144_v32  ;;  %v2149_v55 = vadd.f32 %v4895_v33, %v7506_v29  ;;  %v6730_v25 = vpop.f32.mrf.mxu0  ;;  %v3527_v11 = vmul.f32 %v3478_v10, %v7511_v48  ;;  %v7512_v32 = vld [vmem:[#allocation53_spill] sm:$0xff]  ;;  %v3493_v29 = vpop.permute.xlu0 %3492 }
 0x1c8   : > { %v2092_v30 = vpop.f32.mrf.mxu1 }
 0x1c9   : > { %7505 = vst [vmem:[#allocation37_spill] sm:$0xff] %v6727_v24  ;;  %v6733_v36 = vadd.f32 %v3526_v20, %v2149_v55  ;;  %v2147_v22 = vadd.f32 %v2092_v30, %v7509_v56  ;;  %v6736_v42 = vpop.f32.mrf.mxu0  ;;  %v7515_v30 = vld [vmem:[#allocation54_spill] sm:$0xff] }
 0x1ca   : > { %v4896_v38 = vpop.f32.mrf.mxu1 }
 0x1cb   : > { %7508 = vst [vmem:[#allocation44_spill] sm:$0xff] %v6733_v36  ;;  %v6741_v27 = vadd.f32 %v3524_v46, %v2147_v22  ;;  %v2150_v33 = vadd.f32 %v4896_v38, %v7512_v32  ;;  %v6744_v45 = vpop.f32.mrf.mxu0  ;;  %v7517_v36 = vld [vmem:[#allocation18_spill] sm:$0xff]  ;;  %v3498_v22 = vpop.permute.xlu1 %3497 }
 0x1cc   : > { %7513 = vst [vmem:[#allocation46_spill] sm:$0xff] %v6744_v45  ;;  %v2095_v24 = vpop.f32.mrf.mxu1  ;;  %v3530_v10 = vmul.f32 %v3493_v29, %v7517_v36  ;;  %v7520_v45 = vld [vmem:[#allocation25_spill] sm:$0xff] }
 0x1cd   : > { %v6748_v20 = vadd.f32 %v3527_v11, %v2150_v33  ;;  %v2148_v55 = vadd.f32 %v2095_v24, %v7515_v30  ;;  %v6751_v56 = vpop.f32.mrf.mxu0  ;;  %v3528_v21 = vmul.f32 %v6671_v26, %v7520_v45  ;;  %v7522_v33 = vld [vmem:[#allocation56_spill] sm:$0xff] }
 0x1ce   : > { %7516 = vst [vmem:[#allocation29_spill] sm:$0xff] %v6751_v56  ;;  %v4899_v6 = vpop.f32.mrf.mxu1  ;;  %v7523_v56 = vld [vmem:[#allocation27_spill] sm:$0xff] }
 0x1cf   : > { %v6754_v48 = vadd.f32 %v3525_v62, %v2148_v55  ;;  %v2153_v38 = vadd.f32 %v4899_v6, %v6516_v35  ;;  %v6757_v46 = vpop.f32.mrf.mxu0  ;;  %v3531_v36 = vmul.f32 %v3498_v22, %v7523_v56  ;;  %v7525_v55 = vld [vmem:[#allocation5_spill] sm:$0xff] }
 0x1d0   : > { %7519 = vst [vmem:[#allocation4_spill] sm:$0xff] %v6757_v46  ;;  %v2108_v32 = vpop.f32.mrf.mxu1 }
 0x1d1   : > { %7518 = vst [vmem:[#allocation48_spill] sm:$0xff] %v6754_v48  ;;  %v6761_v11 = vadd.f32 %v3530_v10, %v2153_v38  ;;  %v2151_v24 = vadd.f32 %v2108_v32, %v7522_v33  ;;  %v6764_v0 = vpop.f32.mrf.mxu0  ;;  %v3529_v48 = vmul.f32 %v6694_v1, %v7525_v55  ;;  %v7527_v32 = vld [vmem:[#allocation57_spill] sm:$0xff] }
 0x1d2   : > { %v4900_v30 = vpop.f32.mrf.mxu1 }
 0x1d3   : > { %7521 = vst [vmem:[#allocation49_spill] sm:$0xff] %v6761_v11  ;;  %v6767_v29 = vadd.f32 %v3528_v21, %v2151_v24  ;;  %v2154_v35 = vadd.f32 %v4900_v30, %v6522_v50  ;;  %v4973_v6 = vpop.f32.mrf.mxu0  ;;  %v7528_v50 = vld [vmem:[#allocation59_spill] sm:$0xff]  ;;  %v7529_v11 = vld [vmem:[#allocation24_spill] sm:$0xff] }
 0x1d4   : > { %v2111_v62 = vpop.f32.mrf.mxu1 }
 0x1d5   : > { %7524 = vst [vmem:[#allocation11_spill] sm:$0xff] %v6767_v29  ;;  %v6772_v46 = vadd.f32 %v3531_v36, %v2154_v35  ;;  %v2152_v26 = vadd.f32 %v2111_v62, %v6528_v41  ;;  %v3149_v45 = vpop.f32.mrf.mxu0  ;;  %v7530_v35 = vld [vmem:[#allocation10_spill] sm:$0xff] }
 0x1d6   : > { %v4939_v10 = vpop.f32.mrf.mxu1 }
 0x1d7   : > { %v6775_v38 = vadd.f32 %v3529_v48, %v2152_v26  ;;  %v2696_v33 = vadd.f32 %v4939_v10, %v7527_v32  ;;  %v4974_v56 = vpop.f32.mrf.mxu0  ;;  %v7531_v26 = vld [vmem:[#allocation23_spill] sm:$0xff] }
 0x1d8   : > { %v2687_v22 = vpop.f32.mrf.mxu1 }
 0x1d9   : > { %7526 = vst [vmem:[#allocation51_spill] sm:$0xff] %v6775_v38  ;;  %v3278_v21 = vadd.f32 %v4973_v6, %v2696_v33  ;;  %v2688_v24 = vadd.f32 %v2687_v22, %v7528_v50  ;;  %v3152_v30 = vpop.f32.mrf.mxu0 }
 0x1da   : > { %v4940_v29 = vpop.f32.mrf.mxu1 }
 0x1db   : > { %v3694_v1 = vmul.f32 %v7529_v11, %v3278_v21  ;;  %v3276_v36 = vadd.f32 %v3149_v45, %v2688_v24  ;;  %v2699_v55 = vadd.f32 %v4940_v29, %v7530_v35  ;;  %v4977_v41 = vpop.f32.mrf.mxu0  ;;  %v7532_v45 = vld [vmem:[#allocation26_spill] sm:$0xff] }
 0x1dc   : > { %v2690_v62 = vpop.f32.mrf.mxu1 }
 0x1dd   : > { %v6782_v48 = vadd.f32 %v3694_v1, %v6541_v51  ;;  %v3692_v10 = vmul.f32 %v7531_v26, %v3276_v36  ;;  %v3279_v32 = vadd.f32 %v4974_v56, %v2699_v55  ;;  %v2691_v38 = vadd.f32 %v2690_v62, %v6544_v52  ;;  %v3165_v6 = vpop.f32.mrf.mxu0  ;;  %v7533_v36 = vld [vmem:[#allocation42_spill] sm:$0xff] }
 0x1de   : > { %v4943_v11 = vpop.f32.mrf.mxu1 }
 0x1df   : > { %v4514_v29 = vpack.c.bf16 %v6782_v48, %v6782_v48  ;;  %v6796_v51 = vadd.f32 %v3692_v10, %v6550_v61  ;;  %v3695_v33 = vmul.f32 %v7532_v45, %v3279_v32  ;;  %v4978_v56 = vpop.f32.mrf.mxu0  ;;  %v3277_v52 = vadd.f32 %v3152_v30, %v2691_v38 }
 0x1e0   : > { %v2712_v22 = vadd.f32 %v4943_v11, %v6553_v31  ;;  %v2703_v21 = vpop.f32.mrf.mxu1  ;;  %v7535_v11 = vld [vmem:[#allocation47_spill] sm:$0xff] }
 0x1e1   : > { %4092 = vst.msk [vmem:[%s6791_s10 + $0x8] sm:$0xf] %vm242_vm1, %v4514_v29  ;;  %v4512_v50 = vpack.c.bf16 %v6796_v51, %v6796_v51  ;;  %v6805_v24 = vadd.f32 %v3695_v33, %v6559_v54  ;;  %v2704_v1 = vadd.f32 %v2703_v21, %v6562_v57  ;;  %v3168_v61 = vpop.f32.mrf.mxu0  ;;  %v3693_v35 = vmul.f32 %v7533_v36, %v3277_v52  ;;  %v7534_v54 = vld [vmem:[#allocation52_spill] sm:$0xff] }
 0x1e2   : > { %v3282_v55 = vadd.f32 %v4977_v41, %v2712_v22  ;;  %v4944_v62 = vpop.f32.mrf.mxu1 }
 0x1e3   : > { %4090 = vst.msk [vmem:[%s6791_s10] sm:$0xf] %vm242_vm1, %v4512_v50  ;;  %v4515_v31 = vpack.c.bf16 %v6805_v24, %v6805_v24  ;;  %v3280_v38 = vadd.f32 %v3165_v6, %v2704_v1  ;;  %v2715_v30 = vadd.f32 %v4944_v62, %v6569_v7  ;;  %v4981_v26 = vpop.f32.mrf.mxu0  ;;  %v6815_v10 = vadd.f32 %v3693_v35, %v6566_v18 }
 0x1e4   : > { %v3698_v32 = vmul.f32 %v7534_v54, %v3282_v55  ;;  %v2706_v57 = vpop.f32.mrf.mxu1  ;;  %v3756_v6 = vsel %vm556_vm3, %v6796_v51, 0.0  ;;  %v3759_v35 = vsel %vm556_vm3, %v6782_v48, 0.0  ;;  %v7537_v54 = vld [vmem:[#allocation30_spill] sm:$0xff] }
 0x1e5   : > { %4093 = vst.msk [vmem:[%s6791_s10 + $0xc] sm:$0xf] %vm242_vm1, %v4515_v31  ;;  %v3696_v41 = vmul.f32 %v7535_v11, %v3280_v38  ;;  %v3283_v29 = vadd.f32 %v4978_v56, %v2715_v30  ;;  %v2707_v45 = vadd.f32 %v2706_v57, %v6578_v13  ;;  %v3181_v33 = vpop.f32.mrf.mxu0  ;;  %v3757_v7 = vsel %vm556_vm3, %v6815_v10, 0.0  ;;  %v7536_v13 = vld [vmem:[#allocation31_spill] sm:$0xff] }
 0x1e6   : > { %v4513_v18 = vpack.c.bf16 %v6815_v10, %v6815_v10  ;;  %v6829_v52 = vadd.f32 %v3698_v32, %v6575_v5  ;;  %v4947_v22 = vpop.f32.mrf.mxu1  ;;  %v3758_v21 = vadd.f32 %v3757_v7, %v3756_v6  ;;  %v3761_v30 = vsel %vm556_vm3, %v6805_v24, 0.0 }
 0x1e7   : > { %v6832_v56 = vadd.f32 %v3696_v41, %v6584_v17  ;;  %v3699_v50 = vmul.f32 %v7536_v13, %v3283_v29  ;;  %v3281_v1 = vadd.f32 %v3168_v61, %v2707_v45  ;;  %v4982_v36 = vpop.f32.mrf.mxu0  ;;  %v2728_v55 = vadd.f32 %v4947_v22, %v6587_v28 }
 0x1e8   : > { %4091 = vst.msk [vmem:[%s6791_s10 + $0x4] sm:$0xf] %vm242_vm1, %v4513_v18  ;;  %v4518_v5 = vpack.c.bf16 %v6829_v52, %v6829_v52  ;;  %v2719_v62 = vpop.f32.mrf.mxu1  ;;  %v3760_v31 = vadd.f32 %v3759_v35, %v3758_v21  ;;  %v7538_v18 = vld [vmem:[#allocation12_spill] sm:$0xff] }
 0x1e9   : > { %v4516_v17 = vpack.c.bf16 %v6832_v56, %v6832_v56  ;;  %v6845_v38 = vadd.f32 %v3699_v50, %v6591_v3  ;;  %v3184_v61 = vpop.f32.mrf.mxu0  ;;  %v3697_v32 = vmul.f32 %v7537_v54, %v3281_v1  ;;  %v3286_v57 = vadd.f32 %v4981_v26, %v2728_v55 }
 0x1ea   : > { %4096 = vst.msk [vmem:[%s6791_s10 + $0x18] sm:$0xf] %vm242_vm1, %v4518_v5  ;;  %v2720_v28 = vadd.f32 %v2719_v62, %v6594_v14  ;;  %v4948_v11 = vpop.f32.mrf.mxu1  ;;  %v3762_v41 = vadd.f32 %v3761_v30, %v3760_v31  ;;  %v3763_v6 = vsel %vm556_vm3, %v6832_v56, 0.0  ;;  %v7539_v5 = vld [vmem:[#allocation8_spill] sm:$0xff]  ;;  %v3767_v54 = vsel %vm556_vm3, %v6829_v52, 0.0 }
 0x1eb   : > { %4094 = vst.msk [vmem:[%s6791_s10 + $0x10] sm:$0xf] %vm242_vm1, %v4516_v17  ;;  %v4519_v3 = vpack.c.bf16 %v6845_v38, %v6845_v38  ;;  %v2731_v29 = vadd.f32 %v4948_v11, %v6603_v8  ;;  %v4985_v45 = vpop.f32.mrf.mxu0  ;;  %v6861_v7 = vadd.f32 %v3697_v32, %v6600_v9  ;;  %v3702_v26 = vmul.f32 %v7538_v18, %v3286_v57  ;;  %v7540_v31 = vld [vmem:[#allocation32_spill] sm:$0xff] }
 0x1ec   : > { %v3284_v22 = vadd.f32 %v3181_v33, %v2720_v28  ;;  %v2722_v14 = vpop.f32.mrf.mxu1  ;;  %v3764_v21 = vadd.f32 %v3763_v6, %v3762_v41 }
 0x1ed   : > { %4097 = vst.msk [vmem:[%s6791_s10 + $0x1c] sm:$0xf] %vm242_vm1, %v4519_v3  ;;  %v3287_v13 = vadd.f32 %v4982_v36, %v2731_v29  ;;  %v2723_v50 = vadd.f32 %v2722_v14, %v6612_v59  ;;  %v3197_v1 = vpop.f32.mrf.mxu0  ;;  %v3765_v8 = vsel %vm556_vm3, %v6861_v7, 0.0  ;;  %v4517_v35 = vpack.c.bf16 %v6861_v7, %v6861_v7 }
 0x1ee   : > { %v6872_v9 = vadd.f32 %v3702_v26, %v6609_v15  ;;  %v3700_v33 = vmul.f32 %v7539_v5, %v3284_v22  ;;  %v4951_v55 = vpop.f32.mrf.mxu1  ;;  %v3766_v62 = vadd.f32 %v3765_v8, %v3764_v21  ;;  %v3769_v29 = vsel %vm556_vm3, %v6845_v38, 0.0  ;;  %v7542_v21 = vld [vmem:[#allocation21_spill] sm:$0xff] }
 0x1ef   : > { %v3703_v17 = vmul.f32 %v7540_v31, %v3287_v13  ;;  %v3285_v36 = vadd.f32 %v3184_v61, %v2723_v50  ;;  %v2744_v59 = vadd.f32 %v4951_v55, %v6619_v4  ;;  %v4986_v30 = vpop.f32.mrf.mxu0  ;;  %4095 = vst.msk [vmem:[%s6791_s10 + $0x14] sm:$0xf] %vm242_vm1, %v4517_v35  ;;  %v7541_v61 = vld [vmem:[#allocation55_spill] sm:$0xff]  ;;  %v7543_v31 = vld [vmem:[#allocation60_spill] sm:$0xff] }
 0x1f0   : > { %v4522_v15 = vpack.c.bf16 %v6872_v9, %v6872_v9  ;;  %v6884_v32 = vadd.f32 %v3700_v33, %v6616_v58  ;;  %v2735_v57 = vpop.f32.mrf.mxu1  ;;  %v3768_v28 = vadd.f32 %v3767_v54, %v3766_v62 }
 0x1f1   : > { %v6887_v11 = vadd.f32 %v3703_v17, %v6625_v12  ;;  %v3701_v4 = vmul.f32 %v7541_v61, %v3285_v36  ;;  %v3290_v41 = vadd.f32 %v4985_v45, %v2744_v59  ;;  %v3200_v3 = vpop.f32.mrf.mxu0  ;;  %v2736_v6 = vadd.f32 %v2735_v57, %v6628_v49 }
 0x1f2   : > { %4100 = vst.msk [vmem:[%s6791_s10 + $0x28] sm:$0xf] %vm242_vm1, %v4522_v15  ;;  %v4520_v58 = vpack.c.bf16 %v6884_v32, %v6884_v32  ;;  %v4952_v18 = vpop.f32.mrf.mxu1  ;;  %v3770_v26 = vadd.f32 %v3769_v29, %v3768_v28  ;;  %v3771_v14 = vsel %vm556_vm3, %v6884_v32, 0.0  ;;  %v3775_v57 = vsel %vm556_vm3, %v6872_v9, 0.0 }
 0x1f3   : > { %v4523_v12 = vpack.c.bf16 %v6887_v11, %v6887_v11  ;;  %v6900_v22 = vadd.f32 %v3701_v4, %v6634_v2  ;;  %v4989_v45 = vpop.f32.mrf.mxu0  ;;  %v3706_v13 = vmul.f32 %v7542_v21, %v3290_v41  ;;  %v3288_v50 = vadd.f32 %v3197_v1, %v2736_v6  ;;  %v7544_v4 = vld [vmem:[#allocation13_spill] sm:$0xff] }
 0x1f4   : > { %4098 = vst.msk [vmem:[%s6791_s10 + $0x20] sm:$0xf] %vm242_vm1, %v4520_v58  ;;  %v2747_v49 = vadd.f32 %v4952_v18, %v6637_v23  ;;  %v2738_v8 = vpop.f32.mrf.mxu1  ;;  %v3772_v35 = vadd.f32 %v3771_v14, %v3770_v26  ;;  %v3777_v58 = vsel %vm556_vm3, %v6887_v11, 0.0 }
 0x1f5   : > { %4101 = vst.msk [vmem:[%s6791_s10 + $0x2c] sm:$0xf] %vm242_vm1, %v4523_v12  ;;  %v3773_v2 = vsel %vm556_vm3, %v6900_v22, 0.0  ;;  %v4521_v5 = vpack.c.bf16 %v6900_v22, %v6900_v22  ;;  %v2739_v33 = vadd.f32 %v2738_v8, %v6644_v39  ;;  %v3213_v55 = vpop.f32.mrf.mxu0  ;;  %v6916_v62 = vadd.f32 %v3706_v13, %v6641_v47 }
 0x1f6   : > { %v3704_v1 = vmul.f32 %v7543_v31, %v3288_v50  ;;  %v3291_v17 = vadd.f32 %v4986_v30, %v2747_v49  ;;  %v4955_v23 = vpop.f32.mrf.mxu1  ;;  %v3774_v36 = vadd.f32 %v3773_v2, %v3772_v35  ;;  %v7545_v49 = vld [vmem:[#allocation15_spill] sm:$0xff]  ;;  %v7546_v2 = vld [vmem:[#allocation34_spill] sm:$0xff] }
 0x1f7   : > { %4099 = vst.msk [vmem:[%s6791_s10 + $0x24] sm:$0xf] %vm242_vm1, %v4521_v5  ;;  %v3289_v59 = vadd.f32 %v3200_v3, %v2739_v33  ;;  %v2760_v54 = vadd.f32 %v4955_v23, %v6653_v16  ;;  %v4990_v15 = vpop.f32.mrf.mxu0  ;;  %v4526_v39 = vpack.c.bf16 %v6916_v62, %v6916_v62  ;;  %v7548_v23 = vld [vmem:[#allocation22_spill] sm:$0xff] }
 0x1f8   : > { %v6927_v47 = vadd.f32 %v3704_v1, %v6650_v44  ;;  %v3707_v30 = vmul.f32 %v6555_v43, %v3291_v17  ;;  %v2751_v28 = vpop.f32.mrf.mxu1  ;;  %v3776_v61 = vadd.f32 %v3775_v57, %v3774_v36  ;;  %v7549_v57 = vld [vmem:[#allocation38_spill] sm:$0xff] }
 0x1f9   : > { %v3705_v41 = vmul.f32 %v7544_v4, %v3289_v59  ;;  %v3294_v3 = vadd.f32 %v4989_v45, %v2760_v54  ;;  %v2752_v16 = vadd.f32 %v2751_v28, %v6662_v34  ;;  %v3216_v29 = vpop.f32.mrf.mxu0  ;;  %4104 = vst.msk [vmem:[%s6791_s10 + $0x38] sm:$0xf] %vm242_vm1, %v4526_v39  ;;  %v3783_v54 = vsel %vm556_vm3, %v6916_v62, 0.0 }
 0x1fa   : > { %v4524_v44 = vpack.c.bf16 %v6927_v47, %v6927_v47  ;;  %v6939_v6 = vadd.f32 %v3707_v30, %v6659_v19  ;;  %v4956_v43 = vpop.f32.mrf.mxu1  ;;  %v3778_v18 = vadd.f32 %v3777_v58, %v3776_v61  ;;  %v3779_v14 = vsel %vm556_vm3, %v6927_v47, 0.0  ;;  %v7550_v30 = vld [vmem:[#allocation40_spill] sm:$0xff] }
 0x1fb   : > { %v6942_v26 = vadd.f32 %v3705_v41, %v6666_v37  ;;  %v3710_v34 = vmul.f32 %v6580_v63, %v3294_v3  ;;  %v3292_v12 = vadd.f32 %v3213_v55, %v2752_v16  ;;  %v4993_v45 = vpop.f32.mrf.mxu0  ;;  %v2763_v21 = vadd.f32 %v4956_v43, %v6669_v40  ;;  %v7547_v55 = vld [vmem:[#allocation6_spill] sm:$0xff]  ;;  %v7551_v3 = vld [vmem:[#allocation39_spill] sm:$0xff] }
 0x1fc   : > { %4102 = vst.msk [vmem:[%s6791_s10 + $0x30] sm:$0xf] %vm242_vm1, %v4524_v44  ;;  %v4527_v19 = vpack.c.bf16 %v6939_v6, %v6939_v6  ;;  %v2754_v13 = vpop.f32.mrf.mxu1  ;;  %v3780_v50 = vadd.f32 %v3779_v14, %v3778_v18  ;;  %v3785_v44 = vsel %vm556_vm3, %v6939_v6, 0.0  ;;  %v7552_v18 = vld [vmem:[#allocation36_spill] sm:$0xff] }
 0x1fd   : > { %v3781_v37 = vsel %vm556_vm3, %v6942_v26, 0.0  ;;  %v4525_v63 = vpack.c.bf16 %v6942_v26, %v6942_v26  ;;  %v6957_v8 = vadd.f32 %v3710_v34, %v7545_v49  ;;  %v3229_v35 = vpop.f32.mrf.mxu0  ;;  %v3708_v5 = vmul.f32 %v7546_v2, %v3292_v12  ;;  %v7553_v12 = vld [vmem:[#allocation35_spill] sm:$0xff] }
 0x1fe   : > { %4105 = vst.msk [vmem:[%s6791_s10 + $0x3c] sm:$0xf] %vm242_vm1, %v4527_v19  ;;  %v3295_v33 = vadd.f32 %v4990_v15, %v2763_v21  ;;  %v2755_v40 = vadd.f32 %v2754_v13, %v7547_v55  ;;  %v4959_v31 = vpop.f32.mrf.mxu1  ;;  %v3782_v1 = vadd.f32 %v3781_v37, %v3780_v50  ;;  %v7554_v21 = vld [vmem:[#allocation58_spill] sm:$0xff]  ;;  %v7555_v2 = vld [vmem:[#allocation7_spill] sm:$0xff] }
 0x1ff   : > { %4103 = vst.msk [vmem:[%s6791_s10 + $0x34] sm:$0xf] %vm242_vm1, %v4525_v63  ;;  %v4530_v17 = vpack.c.bf16 %v6957_v8, %v6957_v8  ;;  %v2776_v36 = vadd.f32 %v4959_v31, %v7548_v23  ;;  %v4994_v59 = vpop.f32.mrf.mxu0  ;;  %v6971_v39 = vadd.f32 %v3708_v5, %v7549_v57 }
 0x200   : > { %v3711_v15 = vmul.f32 %v7550_v30, %v3295_v33  ;;  %v3293_v28 = vadd.f32 %v3216_v29, %v2755_v40  ;;  %v2767_v61 = vpop.f32.mrf.mxu1  ;;  %v3784_v4 = vadd.f32 %v3783_v54, %v3782_v1  ;;  %v7556_v40 = vld [vmem:[#allocation33_spill] sm:$0xff] }
 0x201   : > { %4108 = vst.msk [vmem:[%s6791_s10 + $0x48] sm:$0xf] %vm242_vm1, %v4530_v17  ;;  %v3298_v41 = vadd.f32 %v4993_v45, %v2776_v36  ;;  %v2768_v16 = vadd.f32 %v2767_v61, %v7551_v3  ;;  %v3232_v58 = vpop.f32.mrf.mxu0  ;;  %v4528_v43 = vpack.c.bf16 %v6971_v39, %v6971_v39  ;;  %v3787_v63 = vsel %vm556_vm3, %v6971_v39, 0.0  ;;  %v7558_v54 = vld [vmem:[#allocation41_spill] sm:$0xff] }
 0x202   : > { %v6982_v34 = vadd.f32 %v3711_v15, %v7552_v18  ;;  %v3709_v29 = vmul.f32 %v7553_v12, %v3293_v28  ;;  %v4960_v14 = vpop.f32.mrf.mxu1  ;;  %v3786_v19 = vadd.f32 %v3785_v44, %v3784_v4  ;;  %v3791_v4 = vsel %vm556_vm3, %v6957_v8, 0.0  ;;  %v7560_v44 = vld [vmem:[#allocation9_spill] sm:$0xff] }
 0x203   : > { %v3714_v13 = vmul.f32 %v7554_v21, %v3298_v41  ;;  %v3296_v45 = vadd.f32 %v3229_v35, %v2768_v16  ;;  %v2779_v50 = vadd.f32 %v4960_v14, %v6701_v60  ;;  %v4997_v37 = vpop.f32.mrf.mxu0  ;;  %4106 = vst.msk [vmem:[%s6791_s10 + $0x40] sm:$0xf] %vm242_vm1, %v4528_v43  ;;  %v7557_v35 = vld [vmem:[#allocation45_spill] sm:$0xff] }
 0x204   : > { %v4531_v49 = vpack.c.bf16 %v6982_v34, %v6982_v34  ;;  %v6994_v5 = vadd.f32 %v3709_v29, %v7555_v2  ;;  %v2770_v33 = vpop.f32.mrf.mxu1  ;;  %v3788_v55 = vadd.f32 %v3787_v63, %v3786_v19  ;;  %v7559_v41 = vld [vmem:[#allocation61_spill] sm:$0xff]  ;;  %v7561_v29 = vld [vmem:[#allocation3_spill] sm:$0xff]  ;;  %v3793_v21 = vsel %vm556_vm3, %v6982_v34, 0.0 }
 0x205   : > { %v6997_v31 = vadd.f32 %v3714_v13, %v7556_v40  ;;  %v3712_v60 = vmul.f32 %v7557_v35, %v3296_v45  ;;  %v3299_v1 = vadd.f32 %v4994_v59, %v2779_v50  ;;  %v3245_v17 = vpop.f32.mrf.mxu0  ;;  %v2771_v57 = vadd.f32 %v2770_v33, %v7558_v54  ;;  %v7562_v13 = vld [vmem:[#allocation43_spill] sm:$0xff]  ;;  %v7563_v50 = vld [vmem:[#allocation16_spill] sm:$0xff] }
 0x206   : > { %4109 = vst.msk [vmem:[%s6791_s10 + $0x4c] sm:$0xf] %vm242_vm1, %v4531_v49  ;;  %v3789_v23 = vsel %vm556_vm3, %v6994_v5, 0.0  ;;  %v4529_v36 = vpack.c.bf16 %v6994_v5, %v6994_v5  ;;  %v4963_v30 = vpop.f32.mrf.mxu1 }
 0x207   : > { %v3790_v15 = vadd.f32 %v3789_v23, %v3788_v55  ;;  %v4534_v28 = vpack.c.bf16 %v6997_v31, %v6997_v31  ;;  %v7010_v61 = vadd.f32 %v3712_v60, %v6712_v53  ;;  %v4998_v59 = vpop.f32.mrf.mxu0  ;;  %v3715_v3 = vmul.f32 %v7559_v41, %v3299_v1  ;;  %v7564_v1 = vld [vmem:[#allocation37_spill] sm:$0xff]  ;;  %v7567_v41 = vld [vmem:[#allocation44_spill] sm:$0xff] }
 0x208   : > { %4107 = vst.msk [vmem:[%s6791_s10 + $0x44] sm:$0xf] %vm242_vm1, %v4529_v36  ;;  %v3297_v16 = vadd.f32 %v3232_v58, %v2771_v57  ;;  %v2792_v43 = vadd.f32 %v4963_v30, %v7560_v44  ;;  %v2783_v18 = vpop.f32.mrf.mxu1  ;;  %v7565_v36 = vld [vmem:[#allocation62_spill] sm:$0xff] }
 0x209   : > { %v3792_v12 = vadd.f32 %v3791_v4, %v3790_v15  ;;  %4112 = vst.msk [vmem:[%s6791_s10 + $0x58] sm:$0xf] %vm242_vm1, %v4534_v28  ;;  %v4532_v53 = vpack.c.bf16 %v7010_v61, %v7010_v61  ;;  %v2784_v14 = vadd.f32 %v2783_v18, %v7561_v29  ;;  %v3248_v19 = vpop.f32.mrf.mxu0  ;;  %v7026_v45 = vadd.f32 %v3715_v3, %v7562_v13  ;;  %v7566_v30 = vld [vmem:[#allocation14_spill] sm:$0xff] }
 0x20a   : > { %v3713_v58 = vmul.f32 %v7563_v50, %v3297_v16  ;;  %v3302_v63 = vadd.f32 %v4997_v37, %v2792_v43  ;;  %v4964_v49 = vpop.f32.mrf.mxu1  ;;  %v3795_v35 = vsel %vm556_vm3, %v7010_v61, 0.0 }
 0x20b   : > { %v3794_v2 = vadd.f32 %v3793_v21, %v3792_v12  ;;  %4110 = vst.msk [vmem:[%s6791_s10 + $0x50] sm:$0xf] %vm242_vm1, %v4532_v53  ;;  %v3300_v33 = vadd.f32 %v3245_v17, %v2784_v14  ;;  %v2795_v55 = vadd.f32 %v4964_v49, %v6730_v25  ;;  %v5001_v40 = vpop.f32.mrf.mxu0  ;;  %v4535_v60 = vpack.c.bf16 %v7026_v45, %v7026_v45  ;;  %v7569_v14 = vld [vmem:[#allocation46_spill] sm:$0xff]  ;;  %v7570_v49 = vld [vmem:[#allocation17_spill] sm:$0xff] }
 0x20c   : > { %v7037_v23 = vadd.f32 %v3713_v58, %v7564_v1  ;;  %v3718_v37 = vmul.f32 %v7565_v36, %v3302_v63  ;;  %v2786_v54 = vpop.f32.mrf.mxu1  ;;  %v3799_v53 = vsel %vm556_vm3, %v6997_v31, 0.0  ;;  %v3801_v63 = vsel %vm556_vm3, %v7026_v45, 0.0 }
 0x20d   : > { %v3796_v57 = vadd.f32 %v3795_v35, %v3794_v2  ;;  %v3716_v15 = vmul.f32 %v7566_v30, %v3300_v33  ;;  %v3303_v17 = vadd.f32 %v4998_v59, %v2795_v55  ;;  %v2787_v25 = vadd.f32 %v2786_v54, %v6736_v42  ;;  %4113 = vst.msk [vmem:[%s6791_s10 + $0x5c] sm:$0xf] %vm242_vm1, %v4535_v60  ;;  %v3261_v44 = vpop.f32.mrf.mxu0  ;;  %v7568_v59 = vld [vmem:[#allocation63_spill] sm:$0xff]  ;;  %v7571_v55 = vld [vmem:[#allocation29_spill] sm:$0xff]  ;;  %v7573_v30 = vld [vmem:[#allocation48_spill] sm:$0xff] }
 0x20e   : > { %v3797_v28 = vsel %vm556_vm3, %v7037_v23, 0.0  ;;  %v4533_v4 = vpack.c.bf16 %v7037_v23, %v7037_v23  ;;  %v7049_v3 = vadd.f32 %v3718_v37, %v7567_v41  ;;  %v4967_v16 = vpop.f32.mrf.mxu1  ;;  %v7572_v37 = vld [vmem:[#allocation4_spill] sm:$0xff] }
 0x20f   : > { %v3798_v43 = vadd.f32 %v3797_v28, %v3796_v57  ;;  %v7052_v18 = vadd.f32 %v3716_v15, %v6741_v27  ;;  %v3719_v42 = vmul.f32 %v7568_v59, %v3303_v17  ;;  %v3301_v12 = vadd.f32 %v3248_v19, %v2787_v25  ;;  %v3686_v19 = vpop.permute.xlu0 %3685  ;;  %v5002_v1 = vpop.f32.mrf.mxu0 }
 0x210   : > { %4111 = vst.msk [vmem:[%s6791_s10 + $0x54] sm:$0xf] %vm242_vm1, %v4533_v4  ;;  %v4538_v29 = vpack.c.bf16 %v7049_v3, %v7049_v3  ;;  %v2808_v21 = vadd.f32 %v4967_v16, %v7569_v14  ;;  %v2799_v13 = vpop.f32.mrf.mxu1  ;;  %v3690_v28 = vpop.permute.xlu1 %3689 }
 0x211   : > { %v3800_v50 = vadd.f32 %v3799_v53, %v3798_v43  ;;  %v4536_v27 = vpack.c.bf16 %v7052_v18, %v7052_v18  ;;  %v7065_v58 = vadd.f32 %v3719_v42, %v6748_v20  ;;  %v3717_v2 = vmul.f32 %v7570_v49, %v3301_v12  ;;  %v7574_v42 = vld [vmem:[#allocation50_spill] sm:$0xff]  ;;  %v7577_v49 = vld [vmem:[#allocation28_spill] sm:$0xff] }
 0x212   : > { %4116 = vst.msk [vmem:[%s6791_s10 + $0x68] sm:$0xf] %vm242_vm1, %v4538_v29  ;;  %v3306_v33 = vadd.f32 %v5001_v40, %v2808_v21  ;;  %v2800_v35 = vadd.f32 %v2799_v13, %v7571_v55  ;;  %v4968_v60 = vpop.f32.mrf.mxu1  ;;  %v3803_v57 = vsel %vm556_vm3, %v7052_v18, 0.0  ;;  %v3264_v29 = vpop.f32.mrf.mxu0 }
 0x213   : > { %v3802_v36 = vadd.f32 %v3801_v63, %v3800_v50  ;;  %4114 = vst.msk [vmem:[%s6791_s10 + $0x60] sm:$0xf] %vm242_vm1, %v4536_v27  ;;  %v4539_v20 = vpack.c.bf16 %v7065_v58, %v7065_v58  ;;  %v2811_v54 = vadd.f32 %v4968_v60, %v7572_v37  ;;  %v7081_v15 = vadd.f32 %v3717_v2, %v7573_v30 }
 0x214   : > { %v3304_v17 = vadd.f32 %v3261_v44, %v2800_v35  ;;  %v3722_v40 = vmul.f32 %v3686_v19, %v3306_v33  ;;  %v2802_v25 = vpop.f32.mrf.mxu1  ;;  %v7575_v44 = vld [vmem:[#allocation49_spill] sm:$0xff]  ;;  %v3807_v50 = vsel %vm556_vm3, %v7049_v3, 0.0  ;;  %v3809_v55 = vsel %vm556_vm3, %v7065_v58, 0.0 }
 0x215   : > { %v3804_v4 = vadd.f32 %v3803_v57, %v3802_v36  ;;  %4117 = vst.msk [vmem:[%s6791_s10 + $0x6c] sm:$0xf] %vm242_vm1, %v4539_v20  ;;  %v3307_v41 = vadd.f32 %v5002_v1, %v2811_v54  ;;  %v2803_v16 = vadd.f32 %v2802_v25, %v6764_v0  ;;  %v3805_v43 = vsel %vm556_vm3, %v7081_v15, 0.0  ;;  %v7576_v0 = vld [vmem:[#allocation11_spill] sm:$0xff] }
 0x216   : > { %v4537_v59 = vpack.c.bf16 %v7081_v15, %v7081_v15  ;;  %v3720_v12 = vmul.f32 %v7574_v42, %v3304_v17  ;;  %v3754_v53 = vadd.f32 %v3722_v40, %v7575_v44  ;;  %v7578_v1 = vld [vmem:[#allocation51_spill] sm:$0xff] }
 0x217   : > { %v3806_v14 = vadd.f32 %v3805_v43, %v3804_v4  ;;  %v3305_v21 = vadd.f32 %v3264_v29, %v2803_v16  ;;  %v3723_v13 = vmul.f32 %v3690_v28, %v3307_v41 }
 0x218   : > { %4115 = vst.msk [vmem:[%s6791_s10 + $0x64] sm:$0xf] %vm242_vm1, %v4537_v59  ;;  %v3752_v27 = vadd.f32 %v3720_v12, %v7576_v0  ;;  %v4542_v19 = vpack.c.bf16 %v3754_v53, %v3754_v53  ;;  %v3815_v17 = vsel %vm556_vm3, %v3754_v53, 0.0 }
 0x219   : > { %v3808_v63 = vadd.f32 %v3807_v50, %v3806_v14  ;;  %v3721_v2 = vmul.f32 %v7577_v49, %v3305_v21  ;;  %v3755_v33 = vadd.f32 %v3723_v13, %v6772_v46 }
 0x21a   : > { %v4540_v35 = vpack.c.bf16 %v3752_v27, %v3752_v27  ;;  %4120 = vst.msk [vmem:[%s6791_s10 + $0x78] sm:$0xf] %vm242_vm1, %v4542_v19  ;;  %v3811_v37 = vsel %vm556_vm3, %v3752_v27, 0.0 }
 0x21b   : > { %v3810_v60 = vadd.f32 %v3809_v55, %v3808_v63  ;;  %v3753_v36 = vadd.f32 %v3721_v2, %v7578_v1  ;;  %v4543_v20 = vpack.c.bf16 %v3755_v33, %v3755_v33  ;;  %v3817_v25 = vsel %vm556_vm3, %v3755_v33, 0.0 }
 0x21c   : > { %4118 = vst.msk [vmem:[%s6791_s10 + $0x70] sm:$0xf] %vm242_vm1, %v4540_v35 }
 0x21d   : > { %v3812_v54 = vadd.f32 %v3811_v37, %v3810_v60  ;;  %v3813_v57 = vsel %vm556_vm3, %v3753_v36, 0.0  ;;  %v4541_v30 = vpack.c.bf16 %v3753_v36, %v3753_v36  ;;  %4121 = vst.msk [vmem:[%s6791_s10 + $0x7c] sm:$0xf] %vm242_vm1, %v4543_v20 }
 0x21f   : > { %v3814_v46 = vadd.f32 %v3813_v57, %v3812_v54  ;;  %4119 = vst.msk [vmem:[%s6791_s10 + $0x74] sm:$0xf] %vm242_vm1, %v4541_v30 }
 0x221   : > { %v3816_v40 = vadd.f32 %v3815_v17, %v3814_v46 }
 0x223   : > { %v3818_v28 = vadd.f32 %v3817_v25, %v3816_v40 }
 0x225   : > { %v3819_v4 = vrot.slane %v3818_v28, 4 }
 0x227   : > { %v3820_v41 = vadd.f32 %v3819_v4, %v3818_v28 }
 0x229   : > { %v3821_v16 = vrot.slane %v3820_v41, 2 }
 0x22b   : > { %v3822_v43 = vadd.f32 %v3821_v16, %v3820_v41 }
 0x22d   : > { %v3823_v59 = vrot.slane %v3822_v43, 1 }
 0x22f   : > { %v3824_v42 = vadd.f32 %v3823_v59, %v3822_v43 }
 0x231   : > { %v3825_v12 = vmul.f32 0.00390625, %v3824_v42 }
 0x233   : > { %3859 = vst.msk [vmem:[%s7118_s13] sm:$0x1] %vm3858_vm5, %v3825_v12  ;;  %v3835_v44 = vsub.f32 %v6900_v22, %v3825_v12  ;;  %v3838_v29 = vsub.f32 %v6927_v47, %v3825_v12  ;;  %v7125_v14 = vsub.f32 %v6942_v26, %v3825_v12  ;;  %v7128_v21 = vsub.f32 %v6916_v62, %v3825_v12 }
 0x234   : > { %v7131_v13 = vsub.f32 %v6939_v6, %v3825_v12  ;;  %v7134_v50 = vsub.f32 %v6971_v39, %v3825_v12  ;;  %v7137_v0 = vsub.f32 %v6994_v5, %v3825_v12  ;;  %v7140_v19 = vsub.f32 %v6957_v8, %v3825_v12 }
 0x235   : > { %v7143_v22 = vsub.f32 %v6982_v34, %v3825_v12  ;;  %v7146_v47 = vsub.f32 %v7010_v61, %v3825_v12  ;;  %v7149_v62 = vsub.f32 %v7037_v23, %v3825_v12  ;;  %v7152_v6 = vsub.f32 %v6997_v31, %v3825_v12 }
 0x236   : > { %v7155_v26 = vsub.f32 %v7026_v45, %v3825_v12  ;;  %v7158_v39 = vsub.f32 %v7052_v18, %v3825_v12  ;;  %v7161_v8 = vsub.f32 %v7081_v15, %v3825_v12  ;;  %v7164_v34 = vsub.f32 %v7049_v3, %v3825_v12 }
 0x237   : > { %v7167_v5 = vsub.f32 %v7065_v58, %v3825_v12  ;;  %v7169_v61 = vsub.f32 %v3752_v27, %v3825_v12  ;;  %v7171_v23 = vsub.f32 %v3753_v36, %v3825_v12  ;;  %v7173_v31 = vsub.f32 %v3754_v53, %v3825_v12 }
 0x238   : > { %v7175_v45 = vsub.f32 %v3755_v33, %v3825_v12  ;;  %v3826_v18 = vsub.f32 %v6796_v51, %v3825_v12  ;;  %v3827_v63 = vsub.f32 %v6815_v10, %v3825_v12  ;;  %v3828_v15 = vsub.f32 %v6782_v48, %v3825_v12 }
 0x239   : > { %v3829_v3 = vsub.f32 %v6805_v24, %v3825_v12  ;;  %v3830_v58 = vsub.f32 %v6832_v56, %v3825_v12  ;;  %v3831_v55 = vsub.f32 %v6861_v7, %v3825_v12  ;;  %v3832_v51 = vsub.f32 %v6829_v52, %v3825_v12 }
 0x23a   : > { %v3860_v49 = vmul.f32 %v3826_v18, %v3826_v18  ;;  %v3861_v2 = vmul.f32 %v3827_v63, %v3827_v63  ;;  %v3862_v27 = vmul.f32 %v3828_v15, %v3828_v15  ;;  %v3833_v24 = vsub.f32 %v6845_v38, %v3825_v12 }
 0x23b   : > { %v3863_v35 = vmul.f32 %v3829_v3, %v3829_v3  ;;  %v3864_v10 = vmul.f32 %v3830_v58, %v3830_v58  ;;  %v3865_v36 = vmul.f32 %v3831_v55, %v3831_v55  ;;  %v3834_v7 = vsub.f32 %v6884_v32, %v3825_v12 }
 0x23c   : > { %v3892_v53 = vsel %vm556_vm3, %v3860_v49, 0.0  ;;  %v3893_v33 = vsel %vm556_vm3, %v3861_v2, 0.0  ;;  %v3895_v48 = vsel %vm556_vm3, %v3862_v27, 0.0  ;;  %v3866_v37 = vmul.f32 %v3832_v51, %v3832_v51 }
 0x23d   : > { %v3894_v60 = vadd.f32 %v3893_v33, %v3892_v53  ;;  %v3897_v56 = vsel %vm556_vm3, %v3863_v35, 0.0  ;;  %v3899_v54 = vsel %vm556_vm3, %v3864_v10, 0.0  ;;  %v3867_v30 = vmul.f32 %v3833_v24, %v3833_v24 }
 0x23e   : > { %v3901_v46 = vsel %vm556_vm3, %v3865_v36, 0.0  ;;  %v3836_v17 = vsub.f32 %v6872_v9, %v3825_v12  ;;  %v3868_v40 = vmul.f32 %v3834_v7, %v3834_v7  ;;  %v3903_v25 = vsel %vm556_vm3, %v3866_v37, 0.0 }
 0x23f   : > { %v3896_v1 = vadd.f32 %v3895_v48, %v3894_v60  ;;  %v3837_v28 = vsub.f32 %v6887_v11, %v3825_v12  ;;  %v3869_v4 = vmul.f32 %v3835_v44, %v3835_v44  ;;  %v3905_v41 = vsel %vm556_vm3, %v3867_v30, 0.0 }
 0x240   : > { %v3870_v16 = vmul.f32 %v3836_v17, %v3836_v17  ;;  %v3907_v43 = vsel %vm556_vm3, %v3868_v40, 0.0  ;;  %v3872_v15 = vmul.f32 %v3838_v29, %v3838_v29  ;;  %v3873_v49 = vmul.f32 %v7125_v14, %v7125_v14 }
 0x241   : > { %v3898_v20 = vadd.f32 %v3897_v56, %v3896_v1  ;;  %v3871_v42 = vmul.f32 %v3837_v28, %v3837_v28  ;;  %v3909_v18 = vsel %vm556_vm3, %v3869_v4, 0.0  ;;  %v3874_v44 = vmul.f32 %v7128_v21, %v7128_v21 }
 0x242   : > { %v3911_v9 = vsel %vm556_vm3, %v3870_v16, 0.0  ;;  %v3915_v2 = vsel %vm556_vm3, %v3872_v15, 0.0  ;;  %v3875_v27 = vmul.f32 %v7131_v13, %v7131_v13  ;;  %v3917_v29 = vsel %vm556_vm3, %v3873_v49, 0.0 }
 0x243   : > { %v3900_v57 = vadd.f32 %v3899_v54, %v3898_v20  ;;  %v3913_v11 = vsel %vm556_vm3, %v3871_v42, 0.0  ;;  %v3876_v35 = vmul.f32 %v7134_v50, %v7134_v50  ;;  %v3919_v14 = vsel %vm556_vm3, %v3874_v44, 0.0 }
 0x244   : > { %v3877_v33 = vmul.f32 %v7137_v0, %v7137_v0  ;;  %v3921_v21 = vsel %vm556_vm3, %v3875_v27, 0.0  ;;  %v3878_v51 = vmul.f32 %v7140_v19, %v7140_v19  ;;  %v3879_v48 = vmul.f32 %v7143_v22, %v7143_v22 }
 0x245   : > { %v3902_v52 = vadd.f32 %v3901_v46, %v3900_v57  ;;  %v3923_v13 = vsel %vm556_vm3, %v3876_v35, 0.0  ;;  %v3880_v24 = vmul.f32 %v7146_v47, %v7146_v47  ;;  %v3881_v56 = vmul.f32 %v7149_v62, %v7149_v62 }
 0x246   : > { %v3925_v50 = vsel %vm556_vm3, %v3877_v33, 0.0  ;;  %v3927_v0 = vsel %vm556_vm3, %v3878_v51, 0.0  ;;  %v3929_v19 = vsel %vm556_vm3, %v3879_v48, 0.0  ;;  %v3882_v7 = vmul.f32 %v7152_v6, %v7152_v6 }
 0x247   : > { %v3904_v38 = vadd.f32 %v3903_v25, %v3902_v52  ;;  %v3931_v22 = vsel %vm556_vm3, %v3880_v24, 0.0  ;;  %v3883_v54 = vmul.f32 %v7155_v26, %v7155_v26  ;;  %v3933_v47 = vsel %vm556_vm3, %v3881_v56, 0.0 }
 0x248   : > { %v3884_v30 = vmul.f32 %v7158_v39, %v7158_v39  ;;  %v3935_v62 = vsel %vm556_vm3, %v3882_v7, 0.0  ;;  %v3885_v52 = vmul.f32 %v7161_v8, %v7161_v8  ;;  %v3886_v40 = vmul.f32 %v7164_v34, %v7164_v34 }
 0x249   : > { %v3906_v32 = vadd.f32 %v3905_v41, %v3904_v38  ;;  %v3937_v6 = vsel %vm556_vm3, %v3883_v54, 0.0  ;;  %v3887_v38 = vmul.f32 %v7167_v5, %v7167_v5  ;;  %v3888_v4 = vmul.f32 %v7169_v61, %v7169_v61 }
 0x24a   : > { %v3939_v26 = vsel %vm556_vm3, %v3884_v30, 0.0  ;;  %v3941_v39 = vsel %vm556_vm3, %v3885_v52, 0.0  ;;  %v3943_v8 = vsel %vm556_vm3, %v3886_v40, 0.0  ;;  %v3891_v42 = vmul.f32 %v7175_v45, %v7175_v45 }
 0x24b   : > { %v3908_v59 = vadd.f32 %v3907_v43, %v3906_v32  ;;  %v3889_v32 = vmul.f32 %v7171_v23, %v7171_v23  ;;  %v3945_v34 = vsel %vm556_vm3, %v3887_v38, 0.0  ;;  %v3890_v43 = vmul.f32 %v7173_v31, %v7173_v31 }
 0x24c   : > { %v3947_v5 = vsel %vm556_vm3, %v3888_v4, 0.0  ;;  %v3953_v23 = vsel %vm556_vm3, %v3891_v42, 0.0 }
 0x24d   : > { %v3910_v63 = vadd.f32 %v3909_v18, %v3908_v59  ;;  %v3949_v61 = vsel %vm556_vm3, %v3889_v32, 0.0 }
 0x24f   : > { %v3912_v3 = vadd.f32 %v3911_v9, %v3910_v63  ;;  %v3951_v63 = vsel %vm556_vm3, %v3890_v43, 0.0 }
 0x251   : > { %v3914_v12 = vadd.f32 %v3913_v11, %v3912_v3 }
 0x253   : > { %v3916_v58 = vadd.f32 %v3915_v2, %v3914_v12 }
 0x255   : > { %v3918_v55 = vadd.f32 %v3917_v29, %v3916_v58 }
 0x257   : > { %v3920_v53 = vadd.f32 %v3919_v14, %v3918_v55 }
 0x259   : > { %v3922_v60 = vadd.f32 %v3921_v21, %v3920_v53 }
 0x25b   : > { %v3924_v10 = vadd.f32 %v3923_v13, %v3922_v60 }
 0x25d   : > { %v3926_v1 = vadd.f32 %v3925_v50, %v3924_v10 }
 0x25f   : > { %v3928_v36 = vadd.f32 %v3927_v0, %v3926_v1 }
 0x261   : > { %v3930_v20 = vadd.f32 %v3929_v19, %v3928_v36 }
 0x263   : > { %v3932_v37 = vadd.f32 %v3931_v22, %v3930_v20 }
 0x265   : > { %v3934_v57 = vadd.f32 %v3933_v47, %v3932_v37 }
 0x267   : > { %v3936_v46 = vadd.f32 %v3935_v62, %v3934_v57 }
 0x269   : > { %v3938_v17 = vadd.f32 %v3937_v6, %v3936_v46 }
 0x26b   : > { %v3940_v25 = vadd.f32 %v3939_v26, %v3938_v17 }
 0x26d   : > { %v3942_v28 = vadd.f32 %v3941_v39, %v3940_v25 }
 0x26f   : > { %v3944_v41 = vadd.f32 %v3943_v8, %v3942_v28 }
 0x271   : > { %v3946_v16 = vadd.f32 %v3945_v34, %v3944_v41 }
 0x273   : > { %v3948_v59 = vadd.f32 %v3947_v5, %v3946_v16 }
 0x275   : > { %v3950_v18 = vadd.f32 %v3949_v61, %v3948_v59 }
 0x277   : > { %v3952_v15 = vadd.f32 %v3951_v63, %v3950_v18 }
 0x279   : > { %v3954_v9 = vadd.f32 %v3953_v23, %v3952_v15 }
 0x27b   : > { %v3955_v3 = vrot.slane %v3954_v9, 4 }
 0x27d   : > { %v3956_v49 = vadd.f32 %v3955_v3, %v3954_v9 }
 0x27f   : > { %v3957_v11 = vrot.slane %v3956_v49, 2 }
 0x281   : > { %v3958_v31 = vadd.f32 %v3957_v11, %v3956_v49 }
 0x283   : > { %v3959_v12 = vrot.slane %v3958_v31, 1 }
 0x285   : > { %v3960_v44 = vadd.f32 %v3959_v12, %v3958_v31 }
 0x287   : > { %3961 = vst.msk [vmem:[%s7118_s13 + $0x1] sm:$0x1] %vm3858_vm5, %v3960_v44 }
 0x288 PF: > { %s15_s15 = sadd.s32 1, %s5146_s15  }
 0x289   : > { %p12_p4 = scmp.ge.s32.totalorder %s15_s15, 4  }
 0x28b   :  { %14 = sbr.rel (!%p12_p4) target bundleno = 1 (0x1), region = 82 }

// kernel: basic_block_forward.4
= control target key start
LH: loop header
LB: loop body
LE: loop exit
PB: predicated region body
PF: predicated region fallthrough
CT: control target
= control target key end

     0   :  { %s5664_s21 = smov 0   ;;  %s7842_s0 = inlined_call_operand.vmem [shape: bf16[2,256,8], index: 0, kind: input, shape index: {}]   ;;  %s7843_s1 = inlined_call_operand.vmem [shape: f32[1,8], index: 1, kind: input, shape index: {}]   ;;  %s7844_s2 = inlined_call_operand.vmem [shape: f32[1,8], index: 2, kind: input, shape index: {}]   ;;  %s7845_s3 = inlined_call_operand.vmem [shape: bf16[9,8,8], index: 3, kind: input, shape index: {}]   ;;  %s7846_s4 = inlined_call_operand.vmem [shape: f32[256,2], index: 4, kind: input, shape index: {}]   ;;  %s7847_s5 = inlined_call_operand.vmem [shape: bf16[2,256,8], index: 5, kind: output, shape index: {0}]   ;;  %s7848_s6 = inlined_call_operand.vmem [shape: f32[2,2,8], index: 6, kind: output, shape index: {1}]  }
   0x1 LB: > { %s4532_s22 = sadd.s32 4294967295, %s5625_s21   ;;  %p4536_p0 = scmp.ge.s32.totalorder %s5625_s21, 1  ;;  %s5625_s21 = sphi %s5664_s21, %s17_s21  }
   0x2   : > { %p215_p1 = scmp.lt.s32.totalorder %s5625_s21, 3 }
   0x4   : > { %p216_p2 = pnand %p4536_p0, %p215_p1 }
   0x6   : > { %219 = sbr.rel (%p216_p2) target bundleno = 671 (0x29f), region = 40 }
   0xb   : > { %v4576_v0 = vld [vmem:[%s7845_s3 + $0xc] sm:$0xf]  ;;  %vm929_vm0 = vcmask 1043456   ;;  %v5678_v1 = vld [vmem:[%s7846_s4 + $0x10] sm:$0xff]  ;;  %p249_p3 = scmp.lt.s32.totalorder %s4532_s22, 1  ;;  %vm454_vm1 = vcmask 60416  }
   0xc   : > { %5475 = vmatprep.subr.msk.bf16.mxu1 %vm929_vm0, %v4576_v0  ;;  %5474 = vmatprep.subr.msk.bf16.mxu0 %vm929_vm0, %v4576_v0  ;;  %v931_v2 = vsel %vm929_vm0, %v4576_v0, 0  ;;  %v7851_v3 = vmov 0   ;;  %v638_v4 = vld [vmem:[%s7845_s3] sm:$0xf]  ;;  %v4629_v5 = vld [vmem:[%s7845_s3 + $0x18] sm:$0xf] }
   0xd   : > { %5473 = vmatpush3.bf16.msra.mxu1 %v931_v2  ;;  %5495 = vset.pattern.permute.xlu1 %v7851_v3  ;;  %s8135_s22 = smov (!%p249_p3, %s4532_s22), 1  ;;  %457 = vst.msk [vmem:[#allocation2 + $0x8] sm:$0xf] %vm454_vm1, %v7851_v3  ;;  %455 = vst.msk [vmem:[#allocation2] sm:$0xf] %vm454_vm1, %v7851_v3  ;;  %v5711_v6 = vld [vmem:[%s7846_s4 + $0x18] sm:$0xff] }
   0xe   : > { %456 = vst.msk [vmem:[#allocation2 + $0x4] sm:$0xf] %vm454_vm1, %v7851_v3  ;;  %458 = vst.msk [vmem:[#allocation2 + $0x8c] sm:$0xf] %vm454_vm1, %v7851_v3  ;;  %5167 = vmatpush3.bf16.msra.mxu0 %v931_v2  ;;  %3676 = vperm.xlu1 %5495, %v5678_v1   ;;  %s4868_s7 = sshll.u32 %s8135_s22, 7  ;;  %v5728_v8 = vld [vmem:[%s7846_s4] sm:$0xff] }
   0xf   : > { %459 = vst.msk [vmem:[#allocation2 + $0x90] sm:$0xf] %vm454_vm1, %v7851_v3  ;;  %460 = vst.msk [vmem:[#allocation2 + $0x94] sm:$0xf] %vm454_vm1, %v7851_v3  ;;  %5476 = vmatprep.subr.msk.bf16.mxu1 %vm929_vm0, %v638_v4  ;;  %5477 = vmatprep.subr.msk.bf16.mxu0 %vm929_vm0, %v4629_v5  ;;  %s5718_s12 = scalar_lea.vmem %s7842_s0, %s4868_s7  ;;  %v5723_v7 = vld [vmem:[%s7843_s1] ss:$0 sm:$0xff]  ;;  %s7370_s30 = scalar_lea.vmem %s7847_s5, %s4868_s7 }
  0x10   : > { %5494 = vset.pattern.permute.xlu0 %v7851_v3  ;;  %v4935_v9 = vld [vmem:[%s5718_s12] sm:$0xff]   ;;  %v4998_v10 = vld [vmem:[%s5718_s12 + $0x8] sm:$0xff]   ;;  %v5734_v11 = vld [vmem:[%s5718_s12 + $0x38] sm:$0xff]   ;;  %v5737_v12 = vsel %vm929_vm0, %v638_v4, 0  ;;  %v5740_v13 = vsel %vm929_vm0, %v4629_v5, 0  ;;  %vm880_vm3 = vcmask 64512  }
  0x11   : > { %3666 = vperm.xlu0 %5494, %v5728_v8   ;;  %v4936_v14 = vunpack.c.l.bf16 %v4935_v9  ;;  %v4937_v15 = vunpack.c.h.bf16 %v4935_v9  ;;  %v4940_v16 = vunpack.c.l.bf16 %v4998_v10  ;;  %v4941_v17 = vunpack.c.h.bf16 %v4998_v10  ;;  %v5005_v18 = vld [vmem:[%s5718_s12 + $0x40] sm:$0xff]   ;;  %v5006_v19 = vld [vmem:[%s5718_s12 + $0x48] sm:$0xff]   ;;  %v5776_v42 = vld [vmem:[%s7846_s4 + $0x38] sm:$0xff]  ;;  %s4541_s7 = sshll.u32 %s8135_s22, 1 }
  0x12   : > { %3681 = vperm.xlu1 %5495, %v5711_v6   ;;  %v5749_v20 = vld [vmem:[%s7844_s2] ss:$0 sm:$0xff]  ;;  %v4964_v21 = vunpack.c.l.bf16 %v5734_v11  ;;  %v4965_v22 = vunpack.c.h.bf16 %v5734_v11  ;;  %v4968_v23 = vunpack.c.l.bf16 %v5005_v18  ;;  %v4969_v24 = vunpack.c.h.bf16 %v5005_v18  ;;  %v5756_v25 = vld [vmem:[%s7846_s4 + $0x28] sm:$0xff]  ;;  %v4999_v51 = vld [vmem:[%s5718_s12 + $0x10] sm:$0xff]   ;;  %s7697_s10 = scalar_lea.vmem %s7848_s6, %s4541_s7 }
  0x13   : > { %v335_v26 = vmul.f32 %v4936_v14, %v5723_v7  ;;  %v336_v27 = vmul.f32 %v4937_v15, %v5723_v7  ;;  %v337_v28 = vmul.f32 %v4940_v16, %v5723_v7  ;;  %v338_v29 = vmul.f32 %v4941_v17, %v5723_v7  ;;  %v5007_v52 = vld [vmem:[%s5718_s12 + $0x50] sm:$0xff]   ;;  %v5785_v53 = vld [vmem:[%s7846_s4 + $0x8] sm:$0xff]  ;;  %v5000_v58 = vld [vmem:[%s5718_s12 + $0x18] sm:$0xff]  }
  0x14   : > { %v4972_v30 = vunpack.c.l.bf16 %v5006_v19  ;;  %v4973_v31 = vunpack.c.h.bf16 %v5006_v19  ;;  %v350_v32 = vmul.f32 %v4965_v22, %v5723_v7  ;;  %v351_v33 = vmul.f32 %v4968_v23, %v5723_v7  ;;  %v5789_v59 = vld [vmem:[%s5718_s12 + $0x58] sm:$0xff]   ;;  %v5801_v9 = vld [vmem:[%s7846_s4 + $0x20] sm:$0xff] }
  0x15   : > { %v374_v34 = vadd.f32 %v5749_v20, %v335_v26  ;;  %v375_v35 = vadd.f32 %v5749_v20, %v336_v27  ;;  %v376_v36 = vadd.f32 %v5749_v20, %v337_v28  ;;  %v377_v37 = vadd.f32 %v5749_v20, %v338_v29  ;;  %3671 = vperm.xlu0 %5494, %v5785_v53   ;;  %v5810_v23 = vld [vmem:[%s5718_s12 + $0x20] sm:$0xff]  }
  0x16   : > { %3691 = vperm.xlu1 %5495, %v5756_v25   ;;  %v352_v38 = vmul.f32 %v4969_v24, %v5723_v7  ;;  %v353_v39 = vmul.f32 %v4972_v30, %v5723_v7  ;;  %v389_v40 = vadd.f32 %v5749_v20, %v350_v32  ;;  %v390_v41 = vadd.f32 %v5749_v20, %v351_v33 }
  0x17   : > { %v406_v43 = vmax.f32 %v374_v34, 0.0  ;;  %v407_v44 = vmax.f32 %v375_v35, 0.0  ;;  %v408_v45 = vmax.f32 %v376_v36, 0.0  ;;  %v409_v46 = vmax.f32 %v377_v37, 0.0  ;;  %v5826_v34 = vld [vmem:[%s7846_s4 + $0x30] sm:$0xff] }
  0x18   : > { %v391_v47 = vadd.f32 %v5749_v20, %v352_v38  ;;  %v392_v48 = vadd.f32 %v5749_v20, %v353_v39  ;;  %v421_v49 = vmax.f32 %v389_v40, 0.0  ;;  %v422_v50 = vmax.f32 %v390_v41, 0.0  ;;  %v639_v35 = vld [vmem:[#allocation2 + $0x8] sm:$0x8] }
  0x19   : > { %v4870_v54 = vpack.c.bf16 %v406_v43, %v406_v43  ;;  %v4871_v55 = vpack.c.bf16 %v407_v44, %v407_v44  ;;  %v4872_v56 = vpack.c.bf16 %v408_v45, %v408_v45  ;;  %v4873_v57 = vpack.c.bf16 %v409_v46, %v409_v46  ;;  %3686 = vperm.xlu0 %5494, %v5801_v9  }
  0x1a   : > { %3701 = vperm.xlu1 %5495, %v5776_v42   ;;  %v423_v60 = vmax.f32 %v391_v47, 0.0  ;;  %v424_v61 = vmax.f32 %v392_v48, 0.0  ;;  %v4885_v62 = vpack.c.bf16 %v421_v49, %v421_v49  ;;  %v4886_v63 = vpack.c.bf16 %v422_v50, %v422_v50 }
  0x1b   : > { %573 = vst.msk [vmem:[#allocation2 + $0xc] sm:$0xf] %vm454_vm1, %v4870_v54  ;;  %574 = vst.msk [vmem:[#allocation2 + $0x10] sm:$0xf] %vm454_vm1, %v4871_v55  ;;  %v4944_v0 = vunpack.c.l.bf16 %v4999_v51  ;;  %v4976_v2 = vunpack.c.l.bf16 %v5007_v52  ;;  %v354_v4 = vmul.f32 %v4973_v31, %v5723_v7  ;;  %v4945_v5 = vunpack.c.h.bf16 %v4999_v51 }
  0x1c   : > { %575 = vst.msk [vmem:[#allocation2 + $0x14] sm:$0xf] %vm454_vm1, %v4872_v56  ;;  %576 = vst.msk [vmem:[#allocation2 + $0x18] sm:$0xf] %vm454_vm1, %v4873_v57  ;;  %v4887_v10 = vpack.c.bf16 %v423_v60, %v423_v60  ;;  %v4888_v14 = vpack.c.bf16 %v424_v61, %v424_v61  ;;  %v4948_v15 = vunpack.c.l.bf16 %v5000_v58  ;;  %v4977_v16 = vunpack.c.h.bf16 %v5007_v52 }
  0x1d   : > { %588 = vst.msk [vmem:[#allocation2 + $0x48] sm:$0xf] %vm454_vm1, %v4885_v62  ;;  %589 = vst.msk [vmem:[#allocation2 + $0x4c] sm:$0xf] %vm454_vm1, %v4886_v63  ;;  %v339_v17 = vmul.f32 %v4944_v0, %v5723_v7  ;;  %v355_v18 = vmul.f32 %v4976_v2, %v5723_v7  ;;  %v393_v19 = vadd.f32 %v5749_v20, %v354_v4  ;;  %v7849_v24 = vmov 1   ;;  %3696 = vperm.xlu0 %5494, %v5826_v34  }
  0x1e   : > { %v340_v22 = vmul.f32 %v4945_v5, %v5723_v7  ;;  %5496 = vset.pattern.permute.xlu1 %v7849_v24  ;;  %590 = vst.msk [vmem:[#allocation2 + $0x50] sm:$0xf] %vm454_vm1, %v4887_v10  ;;  %591 = vst.msk [vmem:[#allocation2 + $0x54] sm:$0xf] %vm454_vm1, %v4888_v14  ;;  %v341_v26 = vmul.f32 %v4948_v15, %v5723_v7  ;;  %v4980_v27 = vunpack.c.l.bf16 %v5789_v59  ;;  %v4949_v29 = vunpack.c.h.bf16 %v5000_v58 }
  0x1f   : > { %v356_v28 = vmul.f32 %v4977_v16, %v5723_v7  ;;  %3889 = vperm.xlu1 %5496, %v5728_v8   ;;  %v378_v30 = vadd.f32 %v5749_v20, %v339_v17  ;;  %v394_v31 = vadd.f32 %v5749_v20, %v355_v18  ;;  %v425_v32 = vmax.f32 %v393_v19, 0.0 }
  0x20   : > { %v379_v33 = vadd.f32 %v5749_v20, %v340_v22  ;;  %vm727_vm2 = vsmask.f32 4352  ;;  %v380_v36 = vadd.f32 %v5749_v20, %v341_v26  ;;  %v357_v8 = vmul.f32 %v4980_v27, %v5723_v7 }
  0x21   : > { %v395_v37 = vadd.f32 %v5749_v20, %v356_v28  ;;  %v4952_v38 = vunpack.c.l.bf16 %v5810_v23  ;;  %v410_v39 = vmax.f32 %v378_v30, 0.0  ;;  %v426_v40 = vmax.f32 %v394_v31, 0.0  ;;  %v5860_v28 = vld [vmem:[%s7846_s4 + $0x48] sm:$0xff] }
  0x22   : > { %v4889_v41 = vpack.c.bf16 %v425_v32, %v425_v32  ;;  %v411_v43 = vmax.f32 %v379_v33, 0.0  ;;  %v5832_v44 = vld [vmem:[#allocation2 + $0xc] sm:$0xf]  ;;  %v609_v45 = vld [vmem:[#allocation2 + $0x10] sm:$0xf]  ;;  %v396_v47 = vadd.f32 %v5749_v20, %v357_v8  ;;  %v342_v48 = vmul.f32 %v4949_v29, %v5723_v7  ;;  %v5864_v33 = vld [vmem:[%s5718_s12 + $0x60] sm:$0xff]  }
  0x23   : > { %v610_v46 = vld [vmem:[#allocation2 + $0x14] sm:$0xf]  ;;  %v343_v49 = vmul.f32 %v4952_v38, %v5723_v7  ;;  %v4981_v50 = vunpack.c.h.bf16 %v5789_v59  ;;  %3897 = vperm.xlu1 %5496, %v5678_v1   ;;  %v5840_v51 = vld [vmem:[#allocation2 + $0x18] sm:$0xf]  ;;  %v4577_v52 = vcombine.low %v639_v35, %v5832_v44  ;;  %v4874_v57 = vpack.c.bf16 %v410_v39, %v410_v39  ;;  %v5850_v1 = vld [vmem:[%s7846_s4 + $0x40] sm:$0xff] }
  0x24   : > { %v4578_v54 = vcombine.low %v609_v45, %v610_v46  ;;  %v623_v55 = vld [vmem:[#allocation2 + $0x48] sm:$0xf]  ;;  %v624_v56 = vld [vmem:[#allocation2 + $0x4c] sm:$0xf]  ;;  %v4890_v58 = vpack.c.bf16 %v426_v40, %v426_v40  ;;  %592 = vst.msk [vmem:[#allocation2 + $0x58] sm:$0xf] %vm454_vm1, %v4889_v41  ;;  %v5845_v60 = vcombine.low %v610_v46, %v5840_v51  ;;  %v4875_v63 = vpack.c.bf16 %v411_v43, %v411_v43 }
  0x25   : > { %v4585_v61 = vcombine.low %v623_v55, %v624_v56  ;;  %v412_v62 = vmax.f32 %v380_v36, 0.0  ;;  %v729_v0 = vshrl.u32 %v4577_v52, 16  ;;  %v732_v2 = vshll.u32 %v4577_v52, 16  ;;  %v625_v10 = vld [vmem:[#allocation2 + $0x50] sm:$0xf]  ;;  %3706 = vperm.xlu0 %5494, %v5850_v1   ;;  %v5884_v52 = vld [vmem:[%s7846_s4 + $0x60] sm:$0xff] }
  0x26   : > { %7880 = vst [vmem:[#allocation3_spill] sm:$0xff] %v5845_v60  ;;  %v737_v4 = vshrl.u32 %v4578_v54, 16  ;;  %v740_v5 = vshll.u32 %v4578_v54, 16  ;;  %577 = vst.msk [vmem:[#allocation2 + $0x1c] sm:$0xf] %vm454_vm1, %v4874_v57  ;;  %v427_v18 = vmax.f32 %v395_v37, 0.0  ;;  %v381_v8 = vadd.f32 %v5749_v20, %v342_v48 }
  0x27   : > { %593 = vst.msk [vmem:[#allocation2 + $0x5c] sm:$0xf] %vm454_vm1, %v4890_v58  ;;  %v626_v14 = vld [vmem:[#allocation2 + $0x54] sm:$0xf]  ;;  %v800_v15 = vshrl.u32 %v4585_v61, 16  ;;  %v803_v16 = vshll.u32 %v4585_v61, 16  ;;  %v4876_v17 = vpack.c.bf16 %v412_v62, %v412_v62  ;;  %3901 = vperm.xlu1 %5496, %v5711_v6   ;;  %v382_v45 = vadd.f32 %v5749_v20, %v343_v49 }
  0x28   : > { %578 = vst.msk [vmem:[#allocation2 + $0x20] sm:$0xf] %vm454_vm1, %v4875_v63  ;;  %v731_v19 = vrot.slane %v729_v0, 3  ;;  %v734_v22 = vrot.slane %v732_v2, 4  ;;  %v739_v26 = vrot.slane %v737_v4, 3  ;;  %v742_v27 = vrot.slane %v740_v5, 4 }
  0x29   : > { %v4586_v29 = vcombine.low %v625_v10, %v626_v14  ;;  %v802_v30 = vrot.slane %v800_v15, 3  ;;  %v805_v31 = vrot.slane %v803_v16, 4  ;;  %579 = vst.msk [vmem:[#allocation2 + $0x24] sm:$0xf] %vm454_vm1, %v4876_v17  ;;  %v428_v32 = vmax.f32 %v396_v47, 0.0  ;;  %3711 = vperm.xlu0 %5494, %v5860_v28   ;;  %v5879_v48 = vld [vmem:[%s5718_s12 + $0x28] sm:$0xff]  }
  0x2a   : > { %v735_v6 = vor.u32 %v734_v22, %v731_v19  ;;  %v5866_v35 = vor.u32 %v742_v27, %v739_v26  ;;  %v4891_v36 = vpack.c.bf16 %v427_v18, %v427_v18  ;;  %v413_v46 = vmax.f32 %v381_v8, 0.0  ;;  %v5901_v59 = vld [vmem:[%s7846_s4 + $0x78] sm:$0xff] }
  0x2b   : > { %v5869_v37 = vor.u32 %v805_v31, %v802_v30  ;;  %v809_v38 = vshrl.u32 %v4586_v29, 16  ;;  %v812_v39 = vshll.u32 %v4586_v29, 16  ;;  %v627_v40 = vld [vmem:[#allocation2 + $0x58] sm:$0xf]  ;;  %v4892_v41 = vpack.c.bf16 %v428_v32, %v428_v32  ;;  %3909 = vperm.xlu1 %5496, %v5756_v25  }
  0x2c   : > { %v744_v43 = vsel %vm727_vm2, %v735_v6, %v5866_v35  ;;  %594 = vst.msk [vmem:[#allocation2 + $0x60] sm:$0xf] %vm454_vm1, %v4891_v36  ;;  %v4984_v47 = vunpack.c.l.bf16 %v5864_v33  ;;  %v358_v49 = vmul.f32 %v4981_v50, %v5723_v7  ;;  %v4953_v57 = vunpack.c.h.bf16 %v5810_v23 }
  0x2d   : > { %5168 = vmatprep.mubr.msk.bf16.mxu0 %vm880_vm3, %v744_v43  ;;  %v811_v25 = vrot.slane %v809_v38, 3  ;;  %v814_v54 = vrot.slane %v812_v39, 4  ;;  %v612_v55 = vld [vmem:[#allocation2 + $0x1c] sm:$0xf]  ;;  %595 = vst.msk [vmem:[#allocation2 + $0x64] sm:$0xf] %vm454_vm1, %v4892_v41  ;;  %v4877_v0 = vpack.c.bf16 %v413_v46, %v413_v46  ;;  %v4956_v10 = vunpack.c.l.bf16 %v5879_v48  ;;  %3726 = vperm.xlu0 %5494, %v5884_v52  }
  0x2e   : > { %v628_v56 = vld [vmem:[#allocation2 + $0x5c] sm:$0xf]  ;;  %v4579_v58 = vcombine.low %v5840_v51, %v612_v55  ;;  %v414_v63 = vmax.f32 %v382_v45, 0.0  ;;  %v359_v4 = vmul.f32 %v4984_v47, %v5723_v7  ;;  %v397_v5 = vadd.f32 %v5749_v20, %v358_v49  ;;  %v5919_v41 = vld [vmem:[%s7845_s3 + $0x10] sm:$0xf] }
  0x2f   : > { %v4587_v61 = vcombine.low %v627_v40, %v628_v56  ;;  %v613_v62 = vld [vmem:[#allocation2 + $0x20] sm:$0xf]  ;;  %v815_v2 = vor.u32 %v814_v54, %v811_v25  ;;  %3917 = vperm.xlu1 %5496, %v5776_v42   ;;  %580 = vst.msk [vmem:[#allocation2 + $0x28] sm:$0xf] %vm454_vm1, %v4877_v0  ;;  %v344_v39 = vmul.f32 %v4953_v57, %v5723_v7  ;;  %v5924_v43 = vld [vmem:[%s7845_s3 + $0x4] sm:$0xf] }
  0x30   : > { %v746_v23 = vshrl.u32 %v4579_v58, 16  ;;  %v749_v50 = vshll.u32 %v4579_v58, 16  ;;  %v614_v15 = vld [vmem:[#allocation2 + $0x24] sm:$0xf]  ;;  %v4878_v42 = vpack.c.bf16 %v414_v63, %v414_v63  ;;  %v398_v18 = vadd.f32 %v5749_v20, %v359_v4  ;;  %v5927_v25 = vld [vmem:[%s5718_s12 + $0x68] sm:$0xff]   ;;  %v5946_v0 = vld [vmem:[%s5718_s12 + $0x30] sm:$0xff]  }
  0x31   : > { %v818_v51 = vshrl.u32 %v4587_v61, 16  ;;  %v821_v14 = vshll.u32 %v4587_v61, 16  ;;  %v5906_v16 = vsel %vm727_vm2, %v5869_v37, %v815_v2  ;;  %v4580_v17 = vcombine.low %v613_v62, %v614_v15  ;;  %3741 = vperm.xlu0 %5494, %v5901_v59  }
  0x32   : > { %7881 = vst [vmem:[#allocation4_spill] sm:$0xff] %v5906_v16  ;;  %5184 = vmatprep.mubr.msk.bf16.mxu1 %vm880_vm3, %v5906_v16  ;;  %v748_v19 = vrot.slane %v746_v23, 3  ;;  %v751_v22 = vrot.slane %v749_v50, 4  ;;  %581 = vst.msk [vmem:[#allocation2 + $0x2c] sm:$0xf] %vm454_vm1, %v4878_v42  ;;  %v429_v32 = vmax.f32 %v397_v5, 0.0  ;;  %v345_v40 = vmul.f32 %v4956_v10, %v5723_v7 }
  0x33   : > { %v820_v26 = vrot.slane %v818_v51, 3  ;;  %v823_v27 = vrot.slane %v821_v14, 4  ;;  %v755_v29 = vshrl.u32 %v4580_v17, 16  ;;  %v758_v30 = vshll.u32 %v4580_v17, 16  ;;  %v629_v31 = vld [vmem:[#allocation2 + $0x60] sm:$0xf]  ;;  %3921 = vperm.xlu1 %5496, %v5850_v1  }
  0x34   : > { %v430_v6 = vmax.f32 %v398_v18, 0.0  ;;  %v752_v36 = vor.u32 %v751_v22, %v748_v19  ;;  %v630_v38 = vld [vmem:[#allocation2 + $0x64] sm:$0xf]  ;;  %v4893_v47 = vpack.c.bf16 %v429_v32, %v429_v32  ;;  %v383_v49 = vadd.f32 %v5749_v20, %v344_v39  ;;  %v5957_v23 = vld [vmem:[%s7846_s4 + $0x50] sm:$0xff] }
  0x35   : > { %v824_v8 = vor.u32 %v823_v27, %v820_v26  ;;  %v757_v1 = vrot.slane %v755_v29, 3  ;;  %v760_v45 = vrot.slane %v758_v30, 4  ;;  %v4588_v46 = vcombine.low %v629_v31, %v630_v38  ;;  %v5980_v18 = vld [vmem:[%s5718_s12 + $0x70] sm:$0xff]  }
  0x36   : > { %v5931_v54 = vsel %vm727_vm2, %v5866_v35, %v752_v36  ;;  %v4894_v56 = vpack.c.bf16 %v430_v6, %v430_v6  ;;  %v615_v62 = vld [vmem:[#allocation2 + $0x28] sm:$0xf]  ;;  %596 = vst.msk [vmem:[#allocation2 + $0x68] sm:$0xf] %vm454_vm1, %v4893_v47  ;;  %v384_v63 = vadd.f32 %v5749_v20, %v345_v40  ;;  %v4985_v4 = vunpack.c.h.bf16 %v5864_v33  ;;  %v5970_v33 = vld [vmem:[%s7846_s4 + $0x90] sm:$0xff]  ;;  %v5996_v6 = vld [vmem:[%s7846_s4 + $0x58] sm:$0xff] }
  0x37   : > { %v5934_v55 = vsel %vm727_vm2, %v815_v2, %v824_v8  ;;  %5169 = vmatmul.mubr.msk.bf16.vlgmr.msra.gmra.mxu0 %vm880_vm3, %v5931_v54  ;;  %v5941_v57 = vor.u32 %v760_v45, %v757_v1  ;;  %v827_v58 = vshrl.u32 %v4588_v46, 16  ;;  %v830_v61 = vshll.u32 %v4588_v46, 16  ;;  %5497 = vset.pattern.permute.xlu1 %v7851_v3 }
  0x38   : > { %7882 = vst [vmem:[#allocation5_spill] sm:$0xff] %v5934_v55  ;;  %5185 = vmatmul.mubr.msk.bf16.vlgmr.msra.gmra.mxu1 %vm880_vm3, %v5934_v55  ;;  %5235 = vmatpush3.bf16.msra.mxu0 %v5740_v13  ;;  %597 = vst.msk [vmem:[#allocation2 + $0x6c] sm:$0xf] %vm454_vm1, %v4894_v56  ;;  %v415_v2 = vmax.f32 %v383_v49, 0.0  ;;  %v4988_v5 = vunpack.c.l.bf16 %v5927_v25  ;;  %v4957_v10 = vunpack.c.h.bf16 %v5879_v48  ;;  %v416_v51 = vmax.f32 %v384_v63, 0.0 }
  0x39   : > { %5201 = vmatpush3.bf16.msra.mxu1 %v5737_v12  ;;  %v5961_v12 = vsel %vm727_vm2, %v752_v36, %v5941_v57  ;;  %v829_v13 = vrot.slane %v827_v58, 3  ;;  %v832_v50 = vrot.slane %v830_v61, 4  ;;  %5479 = vmatprep.subr.msk.bf16.mxu0 %vm929_vm0, %v5924_v43  ;;  %v5974_v48 = vld [vmem:[#allocation2 + $0x2c] sm:$0xf]  ;;  %v360_v15 = vmul.f32 %v4985_v4, %v5723_v7 }
  0x3a   : > { %5478 = vmatprep.subr.msk.bf16.mxu1 %vm929_vm0, %v5919_v41  ;;  %5172 = vmatprep.mubr.msk.bf16.mxu0 %vm880_vm3, %v5961_v12  ;;  %v4879_v14 = vpack.c.bf16 %v415_v2, %v415_v2  ;;  %v361_v17 = vmul.f32 %v4988_v5, %v5723_v7  ;;  %v4960_v42 = vunpack.c.l.bf16 %v5946_v0  ;;  %v4581_v22 = vcombine.low %v615_v62, %v5974_v48 }
  0x3b   : > { %v5983_v19 = vor.u32 %v832_v50, %v829_v13  ;;  %v4880_v26 = vpack.c.bf16 %v416_v51, %v416_v51  ;;  %v346_v27 = vmul.f32 %v4957_v10, %v5723_v7  ;;  %3716 = vperm.xlu1 %5497, %v5957_v23   ;;  %v399_v29 = vadd.f32 %v5749_v20, %v360_v15 }
  0x3c   : > { %582 = vst.msk [vmem:[#allocation2 + $0x30] sm:$0xf] %vm454_vm1, %v4879_v14  ;;  %v400_v30 = vadd.f32 %v5749_v20, %v361_v17  ;;  %v347_v31 = vmul.f32 %v4960_v42, %v5723_v7  ;;  %v4989_v32 = vunpack.c.h.bf16 %v5927_v25  ;;  %3756 = vperm.xlu0 %5494, %v5970_v33   ;;  %v764_v38 = vshrl.u32 %v4581_v22, 16 }
  0x3d   : > { %v6001_v36 = vsel %vm727_vm2, %v824_v8, %v5983_v19  ;;  %v767_v39 = vshll.u32 %v4581_v22, 16  ;;  %583 = vst.msk [vmem:[#allocation2 + $0x34] sm:$0xf] %vm454_vm1, %v4880_v26  ;;  %v385_v40 = vadd.f32 %v5749_v20, %v346_v27  ;;  %v631_v1 = vld [vmem:[#allocation2 + $0x68] sm:$0xf]  ;;  %v431_v45 = vmax.f32 %v399_v29, 0.0 }
  0x3e   : > { %7883 = vst [vmem:[#allocation6_spill] sm:$0xff] %v6001_v36  ;;  %5188 = vmatprep.mubr.msk.bf16.mxu1 %vm880_vm3, %v6001_v36  ;;  %v432_v46 = vmax.f32 %v400_v30, 0.0  ;;  %v386_v47 = vadd.f32 %v5749_v20, %v347_v31  ;;  %v4992_v25 = vunpack.c.l.bf16 %v5980_v18  ;;  %v766_v56 = vrot.slane %v764_v38, 3  ;;  %v5012_v29 = vld [vmem:[%s5718_s12 + $0x78] sm:$0xff]  }
  0x3f   : > { %v769_v49 = vrot.slane %v767_v39, 4  ;;  %v6009_v8 = vld [vmem:[#allocation2 + $0x6c] sm:$0xf]  ;;  %v417_v58 = vmax.f32 %v385_v40, 0.0  ;;  %v362_v61 = vmul.f32 %v4989_v32, %v5723_v7  ;;  %3721 = vperm.xlu1 %5497, %v5996_v6   ;;  %v4895_v63 = vpack.c.bf16 %v431_v45, %v431_v45 }
  0x40   : > { %v4589_v62 = vcombine.low %v631_v1, %v6009_v8  ;;  %v4896_v2 = vpack.c.bf16 %v432_v46, %v432_v46  ;;  %v418_v4 = vmax.f32 %v386_v47, 0.0  ;;  %5503 = vset.pattern.permute.xlu0 %v7849_v24  ;;  %v363_v13 = vmul.f32 %v4992_v25, %v5723_v7  ;;  %v605_v47 = vld [vmem:[#allocation2] sm:$0x8] }
  0x41   : > { %v6015_v5 = vor.u32 %v769_v49, %v766_v56  ;;  %v4881_v10 = vpack.c.bf16 %v417_v58, %v417_v58  ;;  %v401_v50 = vadd.f32 %v5749_v20, %v362_v61  ;;  %3893 = vperm.xlu0 %5503, %v5785_v53   ;;  %598 = vst.msk [vmem:[#allocation2 + $0x70] sm:$0xf] %vm454_vm1, %v4895_v63  ;;  %v4961_v17 = vunpack.c.h.bf16 %v5946_v0 }
  0x42   : > { %v836_v51 = vshrl.u32 %v4589_v62, 16  ;;  %v839_v14 = vshll.u32 %v4589_v62, 16  ;;  %599 = vst.msk [vmem:[#allocation2 + $0x74] sm:$0xf] %vm454_vm1, %v4896_v2  ;;  %v4882_v15 = vpack.c.bf16 %v418_v4, %v418_v4  ;;  %v402_v53 = vadd.f32 %v5749_v20, %v363_v13 }
  0x43   : > { %v6026_v42 = vsel %vm727_vm2, %v5941_v57, %v6015_v5  ;;  %v6028_v22 = vld [vmem:[#allocation2 + $0x30] sm:$0xf]  ;;  %584 = vst.msk [vmem:[#allocation2 + $0x38] sm:$0xf] %vm454_vm1, %v4881_v10  ;;  %v433_v26 = vmax.f32 %v401_v50, 0.0  ;;  %v349_v27 = vmul.f32 %v4964_v21, %v5723_v7  ;;  %5498 = vset.pattern.permute.xlu1 %v7849_v24  ;;  %v348_v31 = vmul.f32 %v4961_v17, %v5723_v7 }
  0x44   : > { %5173 = vmatmul.mubr.msk.bf16.gmra.mxu0 %vm880_vm3, %v6026_v42  ;;  %v838_v0 = vrot.slane %v836_v51, 3  ;;  %v841_v57 = vrot.slane %v839_v14, 4  ;;  %v6039_v30 = vld [vmem:[#allocation2 + $0x34] sm:$0xf]  ;;  %585 = vst.msk [vmem:[#allocation2 + $0x3c] sm:$0xf] %vm454_vm1, %v4882_v15  ;;  %v4993_v32 = vunpack.c.h.bf16 %v5980_v18  ;;  %3929 = vperm.xlu1 %5498, %v5957_v23   ;;  %v4996_v45 = vunpack.c.l.bf16 %v5012_v29 }
  0x45   : > { %v4582_v11 = vcombine.low %v6028_v22, %v6039_v30  ;;  %v434_v21 = vmax.f32 %v402_v53, 0.0  ;;  %v4897_v38 = vpack.c.bf16 %v433_v26, %v433_v26  ;;  %v388_v39 = vadd.f32 %v5749_v20, %v349_v27  ;;  %3905 = vperm.xlu0 %5503, %v5801_v9   ;;  %v6053_v18 = vld [vmem:[#allocation2 + $0x4] sm:$0xf]  ;;  %v6055_v23 = vld [vmem:[#allocation2 + $0x8] sm:$0xf] }
  0x46   : > { %v6049_v40 = vor.u32 %v841_v57, %v838_v0  ;;  %v387_v1 = vadd.f32 %v5749_v20, %v348_v31  ;;  %v364_v46 = vmul.f32 %v4993_v32, %v5723_v7  ;;  %v365_v62 = vmul.f32 %v4996_v45, %v5723_v7  ;;  %v6082_v53 = vld [vmem:[%s7846_s4 + $0x68] sm:$0xff]  ;;  %v6106_v45 = vld [vmem:[%s7846_s4 + $0x70] sm:$0xff] }
  0x47   : > { %v773_v25 = vshrl.u32 %v4582_v11, 16  ;;  %v776_v56 = vshll.u32 %v4582_v11, 16  ;;  %v4898_v49 = vpack.c.bf16 %v434_v21, %v434_v21  ;;  %600 = vst.msk [vmem:[#allocation2 + $0x78] sm:$0xf] %vm454_vm1, %v4897_v38  ;;  %v420_v58 = vmax.f32 %v388_v39, 0.0 }
  0x48   : > { %v6061_v9 = vsel %vm727_vm2, %v5983_v19, %v6049_v40  ;;  %v419_v61 = vmax.f32 %v387_v1, 0.0  ;;  %v403_v63 = vadd.f32 %v5749_v20, %v364_v46  ;;  %3933 = vperm.xlu1 %5498, %v5996_v6   ;;  %v6068_v10 = vld [vmem:[#allocation2 + $0x70] sm:$0xf]  ;;  %v4997_v50 = vunpack.c.h.bf16 %v5012_v29 }
  0x49   : > { %7884 = vst [vmem:[#allocation7_spill] sm:$0xff] %v6061_v9  ;;  %5189 = vmatmul.mubr.msk.bf16.gmra.mxu1 %vm880_vm3, %v6061_v9  ;;  %v775_v2 = vrot.slane %v773_v25, 3  ;;  %v778_v4 = vrot.slane %v776_v56, 4  ;;  %v6070_v13 = vld [vmem:[#allocation2 + $0x74] sm:$0xf]  ;;  %v4884_v19 = vpack.c.bf16 %v420_v58, %v420_v58  ;;  %3913 = vperm.xlu0 %5503, %v5826_v34   ;;  %v404_v15 = vadd.f32 %v5749_v20, %v365_v62 }
  0x4a   : > { %601 = vst.msk [vmem:[#allocation2 + $0x7c] sm:$0xf] %vm454_vm1, %v4898_v49  ;;  %v4590_v51 = vcombine.low %v6068_v10, %v6070_v13  ;;  %v6076_v14 = vld [vmem:[#allocation2 + $0x38] sm:$0xf]  ;;  %v4883_v6 = vpack.c.bf16 %v419_v61, %v419_v61  ;;  %v435_v17 = vmax.f32 %v403_v63, 0.0  ;;  %v366_v34 = vmul.f32 %v4997_v50, %v5723_v7 }
  0x4b   : > { %v779_v26 = vor.u32 %v778_v4, %v775_v2  ;;  %v6084_v27 = vld [vmem:[#allocation2 + $0x3c] sm:$0xf]  ;;  %587 = vst.msk [vmem:[#allocation2 + $0x44] sm:$0xf] %vm454_vm1, %v4884_v19  ;;  %v4610_v29 = vcombine.low %v605_v47, %v6053_v18  ;;  %v4611_v0 = vcombine.low %v6055_v23, %v5832_v44  ;;  %v436_v11 = vmax.f32 %v404_v15, 0.0 }
  0x4c   : > { %v845_v57 = vshrl.u32 %v4590_v51, 16  ;;  %v848_v31 = vshll.u32 %v4590_v51, 16  ;;  %v4583_v32 = vcombine.low %v6076_v14, %v6084_v27  ;;  %586 = vst.msk [vmem:[#allocation2 + $0x40] sm:$0xf] %vm454_vm1, %v4883_v6  ;;  %5499 = vset.pattern.permute.xlu1 %v7851_v3  ;;  %v4899_v7 = vpack.c.bf16 %v435_v17, %v435_v17  ;;  %v1303_v1 = vld [vmem:[#allocation2 + $0x10] sm:$0x8] }
  0x4d   : > { %v6097_v21 = vsel %vm727_vm2, %v6015_v5, %v779_v26  ;;  %v405_v38 = vadd.f32 %v5749_v20, %v366_v34  ;;  %v1104_v39 = vshrl.u32 %v4610_v29, 16  ;;  %v6100_v44 = vld [vmem:[#allocation2 + $0x14] sm:$0xf]  ;;  %3731 = vperm.xlu1 %5499, %v6082_v53   ;;  %3925 = vperm.xlu0 %5503, %v5860_v28   ;;  %v4900_v56 = vpack.c.bf16 %v436_v11, %v436_v11  ;;  %v6116_v62 = vld [vmem:[#allocation2 + $0x18] sm:$0xf] }
  0x4e   : > { %5176 = vmatprep.mubr.msk.bf16.mxu0 %vm880_vm3, %v6097_v21  ;;  %v847_v5 = vrot.slane %v845_v57, 3  ;;  %v850_v46 = vrot.slane %v848_v31, 4  ;;  %v782_v47 = vshrl.u32 %v4583_v32, 16  ;;  %v785_v20 = vshll.u32 %v4583_v32, 16  ;;  %v6111_v25 = vld [vmem:[#allocation2 + $0x78] sm:$0xf] }
  0x4f   : > { %602 = vst.msk [vmem:[#allocation2 + $0x80] sm:$0xf] %vm454_vm1, %v4899_v7  ;;  %v437_v49 = vmax.f32 %v405_v38, 0.0  ;;  %v6114_v58 = vrot.slane %v1104_v39, 3  ;;  %v1107_v61 = vshll.u32 %v4610_v29, 16  ;;  %v1112_v51 = vshrl.u32 %v4611_v0, 16 }
  0x50   : > { %v6118_v63 = vld [vmem:[#allocation2 + $0x1c] sm:$0xf]  ;;  %v6120_v28 = vld [vmem:[#allocation2 + $0x20] sm:$0xf]  ;;  %v851_v2 = vor.u32 %v850_v46, %v847_v5  ;;  %v784_v4 = vrot.slane %v782_v47, 3  ;;  %v787_v19 = vrot.slane %v785_v20, 4  ;;  %v4630_v7 = vcombine.low %v1303_v1, %v6100_v44 }
  0x51   : > { %7885 = vst [vmem:[#allocation8_spill] sm:$0xff] %v6118_v63  ;;  %7886 = vst [vmem:[#allocation9_spill] sm:$0xff] %v6120_v28  ;;  %v6122_v50 = vld [vmem:[#allocation2 + $0x7c] sm:$0xf]  ;;  %v4901_v15 = vpack.c.bf16 %v437_v49, %v437_v49  ;;  %v1109_v17 = vrot.slane %v1107_v61, 4  ;;  %v1115_v34 = vshll.u32 %v4611_v0, 16  ;;  %3736 = vperm.xlu1 %5499, %v6106_v45   ;;  %3937 = vperm.xlu0 %5503, %v5884_v52  }
  0x52   : > { %v4591_v6 = vcombine.low %v6111_v25, %v6122_v50  ;;  %603 = vst.msk [vmem:[#allocation2 + $0x84] sm:$0xf] %vm454_vm1, %v4900_v56  ;;  %v6127_v29 = vld [vmem:[#allocation2 + $0x24] sm:$0xf]  ;;  %v6133_v57 = vsel %vm727_vm2, %v6049_v40, %v851_v2  ;;  %v788_v31 = vor.u32 %v787_v19, %v784_v4  ;;  %v1114_v11 = vrot.slane %v1112_v51, 3 }
  0x53   : > { %7887 = vst [vmem:[#allocation10_spill] sm:$0xff] %v6133_v57  ;;  %v6135_v32 = vld [vmem:[#allocation2 + $0x44] sm:$0xf]  ;;  %5192 = vmatprep.mubr.msk.bf16.mxu1 %vm880_vm3, %v6133_v57  ;;  %v6140_v39 = vld [vmem:[#allocation2 + $0x40] sm:$0xf]  ;;  %v1110_v52 = vor.u32 %v1109_v17, %v6114_v58  ;;  %v1117_v5 = vrot.slane %v1115_v34, 4  ;;  %v4631_v1 = vcombine.low %v6116_v62, %v6118_v63  ;;  %v4632_v47 = vcombine.low %v6120_v28, %v6127_v29 }
  0x54   : > { %7888 = vst [vmem:[#allocation11_spill] sm:$0xff] %v6135_v32  ;;  %v854_v0 = vshrl.u32 %v4591_v6, 16  ;;  %v857_v38 = vshll.u32 %v4591_v6, 16  ;;  %604 = vst.msk [vmem:[#allocation2 + $0x88] sm:$0xf] %vm454_vm1, %v4901_v15  ;;  %v6145_v40 = vsel %vm727_vm2, %v779_v26, %v788_v31  ;;  %v4584_v46 = vcombine.low %v6140_v39, %v6135_v32 }
  0x55   : > { %5177 = vmatmul.mubr.msk.bf16.gmra.mxu0 %vm880_vm3, %v6145_v40  ;;  %v6155_v49 = vor.u32 %v1117_v5, %v1114_v11  ;;  %v1422_v58 = vshrl.u32 %v4630_v7, 16  ;;  %5500 = vset.pattern.permute.xlu1 %v7849_v24  ;;  %v1425_v19 = vshll.u32 %v4630_v7, 16  ;;  %v1430_v51 = vshrl.u32 %v4631_v1, 16 }
  0x56   : > { %v856_v20 = vrot.slane %v854_v0, 3  ;;  %v859_v56 = vrot.slane %v857_v38, 4  ;;  %v791_v26 = vshrl.u32 %v4584_v46, 16  ;;  %v794_v61 = vshll.u32 %v4584_v46, 16  ;;  %v6158_v4 = vld [vmem:[#allocation2 + $0x80] sm:$0xf]  ;;  %3941 = vperm.xlu1 %5500, %v6082_v53   ;;  %3949 = vperm.xlu0 %5503, %v5901_v59  }
  0x57   : > { %v1424_v15 = vrot.slane %v1422_v58, 3  ;;  %v1433_v17 = vshll.u32 %v4631_v1, 16  ;;  %v6166_v34 = vsel %vm929_vm0, %v5924_v43, 0  ;;  %v1427_v5 = vrot.slane %v1425_v19, 4  ;;  %v6180_v43 = vld [vmem:[#allocation2 + $0x2c] sm:$0xf] }
  0x58   : > { %v6162_v6 = vor.u32 %v859_v56, %v856_v20  ;;  %v793_v11 = vrot.slane %v791_v26, 3  ;;  %v796_v0 = vrot.slane %v794_v61, 4  ;;  %v1432_v46 = vrot.slane %v1430_v51, 3  ;;  %v6178_v20 = vld [vmem:[#allocation2 + $0x28] sm:$0xf] }
  0x59   : > { %v6168_v38 = vld [vmem:[#allocation2 + $0x84] sm:$0xf]  ;;  %v1435_v53 = vrot.slane %v1433_v17, 4  ;;  %v6182_v56 = vld [vmem:[#allocation2 + $0x30] sm:$0xf]  ;;  %v6192_v61 = vsel %vm727_vm2, %v1110_v52, %v6155_v49  ;;  %v1428_v19 = vor.u32 %v1427_v5, %v1424_v15  ;;  %v1439_v51 = vshrl.u32 %v4632_v47, 16 }
  0x5a   : > { %v6172_v7 = vsel %vm727_vm2, %v851_v2, %v6162_v6  ;;  %v4592_v59 = vcombine.low %v6158_v4, %v6168_v38  ;;  %v6184_v58 = vld [vmem:[#allocation2 + $0x34] sm:$0xf]  ;;  %v797_v2 = vor.u32 %v796_v0, %v793_v11  ;;  %v6194_v17 = vld [vmem:[#allocation2 + $0x38] sm:$0xf]  ;;  %v6196_v1 = vld [vmem:[#allocation2 + $0x3c] sm:$0xf]  ;;  %3945 = vperm.xlu1 %5500, %v6106_v45   ;;  %3961 = vperm.xlu0 %5503, %v5970_v33  }
  0x5b   : > { %7889 = vst [vmem:[#allocation12_spill] sm:$0xff] %v6172_v7  ;;  %7890 = vst [vmem:[#allocation13_spill] sm:$0xff] %v6184_v58  ;;  %5193 = vmatmul.mubr.msk.bf16.gmra.mxu1 %vm880_vm3, %v6172_v7  ;;  %v6188_v26 = vld [vmem:[#allocation2 + $0x88] sm:$0xf]  ;;  %v1436_v11 = vor.u32 %v1435_v53, %v1432_v46  ;;  %v1441_v15 = vrot.slane %v1439_v51, 3  ;;  %v1442_v5 = vshll.u32 %v4632_v47, 16  ;;  %v4634_v51 = vcombine.low %v6182_v56, %v6184_v58 }
  0x5c   : > { %7891 = vst [vmem:[#allocation14_spill] sm:$0xff] %v6194_v17  ;;  %7892 = vst [vmem:[#allocation15_spill] sm:$0xff] %v6196_v1  ;;  %v863_v24 = vshrl.u32 %v4592_v59, 16  ;;  %v866_v3 = vshll.u32 %v4592_v59, 16  ;;  %v4593_v28 = vcombine.low %v6188_v26, %v6188_v26  ;;  %v6203_v0 = vsel %vm727_vm2, %v788_v31, %v797_v2  ;;  %v6212_v45 = vld [vmem:[%s7846_s4 + $0x80] sm:$0xff]  ;;  %v6217_v46 = vld [vmem:[%s7846_s4 + $0xa8] sm:$0xff] }
  0x5d   : > { %7893 = vst [vmem:[#allocation16_spill] sm:$0xff] %v6203_v0  ;;  %v6207_v52 = vsel %vm727_vm2, %v797_v2, %v5869_v37  ;;  %5180 = vmatprep.mubr.msk.bf16.mxu0 %vm880_vm3, %v6203_v0  ;;  %v1437_v47 = vsel %vm727_vm2, %v1428_v19, %v1436_v11  ;;  %v1444_v53 = vrot.slane %v1442_v5, 4  ;;  %v4633_v2 = vcombine.low %v6178_v20, %v6180_v43  ;;  %v6234_v19 = vld [vmem:[#allocation2 + $0x44] sm:$0xf]  ;;  %v6236_v5 = vld [vmem:[#allocation2 + $0x48] sm:$0xf] }
  0x5e   : > { %7894 = vst [vmem:[#allocation17_spill] sm:$0xff] %v6207_v52  ;;  %v865_v33 = vrot.slane %v863_v24, 3  ;;  %v868_v31 = vrot.slane %v866_v3, 4  ;;  %v872_v59 = vshrl.u32 %v4593_v28, 16  ;;  %v875_v37 = vshll.u32 %v4593_v28, 16  ;;  %5181 = vmatmul.mubr.msk.bf16.gmra.mxu0 %vm880_vm3, %v6207_v52  ;;  %3973 = vperm.xlu0 %5503, %v6217_v46  }
  0x5f   : > { %v7895_v63 = vmov 0   ;;  %5236 = vmatprep.mubr.msk.bf16.mxu0 %vm880_vm3, %v1437_v47  ;;  %v4635_v3 = vcombine.low %v6194_v17, %v6196_v1  ;;  %v6232_v28 = vld [vmem:[#allocation2 + $0x40] sm:$0xf]  ;;  %v6238_v7 = vld [vmem:[#allocation2 + $0x4c] sm:$0xf]  ;;  %v1445_v57 = vor.u32 %v1444_v53, %v1441_v15  ;;  %v1448_v9 = vshrl.u32 %v4633_v2, 16 }
  0x60   : > { %5501 = vset.pattern.permute.xlu1 %v7895_v63  ;;  %v869_v32 = vor.u32 %v868_v31, %v865_v33  ;;  %v874_v60 = vrot.slane %v872_v59, 3  ;;  %v877_v24 = vrot.slane %v875_v37, 4  ;;  %v1451_v33 = vshll.u32 %v4633_v2, 16  ;;  %v6244_v59 = vld [vmem:[%s7846_s4 + $0x88] sm:$0xff]  ;;  %v6254_v1 = vld [vmem:[%s7846_s4 + $0xc0] sm:$0xff] }
  0x61   : > { %3746 = vperm.xlu1 %5501, %v6212_v45   ;;  %v1457_v31 = vshrl.u32 %v4634_v51, 16  ;;  %v1460_v36 = vshll.u32 %v4634_v51, 16  ;;  %v1466_v55 = vshrl.u32 %v4635_v3, 16  ;;  %v1446_v15 = vsel %vm727_vm2, %v1436_v11, %v1445_v57 }
  0x62   : > { %v870_v37 = vsel %vm727_vm2, %v6162_v6, %v869_v32  ;;  %v878_v47 = vor.u32 %v877_v24, %v874_v60  ;;  %v1450_v53 = vrot.slane %v1448_v9, 3  ;;  %v1453_v2 = vrot.slane %v1451_v33, 4  ;;  %3985 = vperm.xlu0 %5503, %v6254_v1  }
  0x63   : > { %5196 = vmatprep.mubr.msk.bf16.mxu1 %vm880_vm3, %v870_v37  ;;  %v1459_v16 = vrot.slane %v1457_v31, 3  ;;  %v1462_v0 = vrot.slane %v1460_v36, 4  ;;  %v1468_v58 = vrot.slane %v1466_v55, 3  ;;  %v1469_v17 = vshll.u32 %v4635_v3, 16  ;;  %v6268_v55 = vld [vmem:[%s7845_s3 + $0x14] sm:$0xf] }
  0x64   : > { %v879_v52 = vsel %vm727_vm2, %v869_v32, %v878_v47  ;;  %v1454_v60 = vor.u32 %v1453_v2, %v1450_v53  ;;  %v4636_v9 = vcombine.low %v6232_v28, %v6234_v19  ;;  %v4637_v11 = vcombine.low %v6236_v5, %v6238_v7  ;;  %7896 = vst [vmem:[#allocation18_spill] sm:$0xff] %v6268_v55  ;;  %v6273_v32 = vld [vmem:[#allocation2 + $0x50] sm:$0xf]  ;;  %v6282_v37 = vld [vmem:[#allocation2 + $0x54] sm:$0xf] }
  0x65   : > { %3751 = vperm.xlu1 %5501, %v6244_v59   ;;  %5197 = vmatmul.mubr.msk.bf16.gmra.mxu1 %vm880_vm3, %v879_v52  ;;  %v1471_v51 = vrot.slane %v1469_v17, 4  ;;  %v6278_v52 = vld [vmem:[%s7846_s4 + $0xd8] sm:$0xff]  ;;  %v1120_v47 = vsel %vm727_vm2, %v6155_v49, %v5866_v35  ;;  %v4638_v2 = vcombine.low %v6273_v32, %v6282_v37  ;;  %vm2602_vm4 = vsmask.f32 7424 }
  0x66   : > { %5202 = vmatprep.mubr.msk.bf16.mxu1 %vm880_vm3, %v6192_v61  ;;  %5237 = vmatmul.mubr.msk.bf16.vlgmr.msra.gmra.mxu0 %vm880_vm3, %v1446_v15  ;;  %v1455_v36 = vsel %vm727_vm2, %v1445_v57, %v1454_v60  ;;  %v1463_v61 = vor.u32 %v1462_v0, %v1459_v16  ;;  %v1475_v17 = vshrl.u32 %v4636_v9, 16  ;;  %v1478_v24 = vshll.u32 %v4636_v9, 16  ;;  %v6292_v15 = vld [vmem:[#allocation2 + $0x5c] sm:$0xf] }
  0x67   : > { %5303 = vmatpush3.bf16.msra.mxu0 %v6166_v34  ;;  %5240 = vmatprep.mubr.msk.bf16.mxu0 %vm880_vm3, %v1455_v36  ;;  %v1472_v3 = vor.u32 %v1471_v51, %v1468_v58  ;;  %v1484_v33 = vshrl.u32 %v4637_v11, 16  ;;  %v1487_v31 = vshll.u32 %v4637_v11, 16  ;;  %v7897_v57 = vmov 1   ;;  %v6290_v34 = vld [vmem:[#allocation2 + $0x58] sm:$0xf] }
  0x68   : > { %5481 = vmatprep.subr.msk.bf16.mxu0 %vm929_vm0, %v6268_v55  ;;  %3997 = vperm.xlu0 %5503, %v6278_v52   ;;  %v1886_v16 = vsel %vm929_vm0, %v5919_v41, 0  ;;  %v1464_v58 = vsel %vm727_vm2, %v1454_v60, %v1463_v61  ;;  %v1477_v0 = vrot.slane %v1475_v17, 3  ;;  %v1480_v53 = vrot.slane %v1478_v24, 4  ;;  %v6310_v41 = vld [vmem:[%s7845_s3 + $0x1c] sm:$0xf] }
  0x69   : > { %5502 = vset.pattern.permute.xlu1 %v7897_v57  ;;  %v1473_v35 = vsel %vm727_vm2, %v1463_v61, %v1472_v3  ;;  %v1486_v49 = vrot.slane %v1484_v33, 3  ;;  %v1489_v9 = vrot.slane %v1487_v31, 4  ;;  %7898 = vst [vmem:[#allocation19_spill] sm:$0xff] %v6310_v41  ;;  %v6313_v60 = vld [vmem:[#allocation2 + $0x60] sm:$0xf]  ;;  %v1493_v36 = vshrl.u32 %v4638_v2, 16 }
  0x6a   : > { %3953 = vperm.xlu1 %5502, %v6212_v45   ;;  %v4639_v45 = vcombine.low %v6290_v34, %v6292_v15  ;;  %v6315_v11 = vld [vmem:[#allocation2 + $0x64] sm:$0xf]  ;;  %v1481_v51 = vor.u32 %v1480_v53, %v1477_v0  ;;  %v1496_v61 = vshll.u32 %v4638_v2, 16  ;;  %v6319_v33 = vld [vmem:[#allocation2 + $0x68] sm:$0xf]  ;;  %vm4182_vm5 = vcmask 57344  }
  0x6b   : > { %7899 = vst [vmem:[#allocation20_spill] sm:$0xff] %v6315_v11  ;;  %v1490_v17 = vor.u32 %v1489_v9, %v1486_v49  ;;  %7900 = vst [vmem:[#allocation21_spill] sm:$0xff] %v6319_v33  ;;  %v6321_v31 = vld [vmem:[#allocation2 + $0x6c] sm:$0xf]  ;;  %v4612_v9 = vcombine.low %v6158_v4, %v6158_v4 }
  0x6c   : > { %v1505_v24 = vshll.u32 %v4639_v45, 16  ;;  %7901 = vst [vmem:[#allocation22_spill] sm:$0xff] %v6321_v31  ;;  %5511 = vset.pattern.permute.xlu0 %v7895_v63  ;;  %v1498_v0 = vrot.slane %v1496_v61, 4  ;;  %v4641_v53 = vcombine.low %v6319_v33, %v6321_v31 }
  0x6d   : > { %5203 = vmatmul.mubr.msk.bf16.vlgmr.msra.gmra.mxu1 %vm880_vm3, %v1120_v47  ;;  %v4640_v47 = vcombine.low %v6313_v60, %v6315_v11  ;;  %3771 = vperm.xlu0 %5511, %v6217_v46   ;;  %v1491_v2 = vsel %vm727_vm2, %v1481_v51, %v1490_v17  ;;  %v1125_v61 = vshll.u32 %v4612_v9, 16 }
  0x6e   : > { %5269 = vmatpush3.bf16.msra.mxu1 %v1886_v16  ;;  %5206 = vmatprep.mubr.msk.bf16.mxu1 %vm880_vm3, %v5931_v54  ;;  %v1502_v54 = vshrl.u32 %v4639_v45, 16  ;;  %v3651_v16 = vld [vmem:[%s7846_s4 + $0x98] sm:$0xff]  ;;  %v1507_v49 = vrot.slane %v1505_v24, 4  ;;  %v3652_v45 = vld [vmem:[%s7846_s4 + $0xa0] sm:$0xff]  ;;  %v1523_v55 = vshll.u32 %v4641_v53, 16 }
  0x6f   : > { %5241 = vmatmul.mubr.msk.bf16.gmra.mxu0 %vm880_vm3, %v1464_v58  ;;  %3957 = vperm.xlu1 %5502, %v6244_v59   ;;  %v1482_v59 = vsel %vm727_vm2, %v1472_v3, %v1481_v51  ;;  %v1495_v58 = vrot.slane %v1493_v36, 3  ;;  %v1511_v46 = vshrl.u32 %v4640_v47, 16  ;;  %v1514_v3 = vshll.u32 %v4640_v47, 16  ;;  %v6350_v51 = vld [vmem:[#allocation2 + $0x74] sm:$0xf] }
  0x70   : > { %5244 = vmatprep.mubr.msk.bf16.mxu0 %vm880_vm3, %v1473_v35  ;;  %5480 = vmatprep.subr.msk.bf16.mxu1 %vm929_vm0, %v6310_v41  ;;  %v1504_v35 = vrot.slane %v1502_v54, 3  ;;  %v1122_v36 = vshrl.u32 %v4612_v9, 16  ;;  %v6353_v24 = vld [vmem:[#allocation2 + $0x78] sm:$0xf]  ;;  %v6355_v47 = vld [vmem:[#allocation2 + $0x7c] sm:$0xf]  ;;  %v4697_v9 = vcombine.low %v6053_v18, %v6055_v23 }
  0x71   : > { %3786 = vperm.xlu0 %5511, %v6254_v1   ;;  %v1499_v54 = vor.u32 %v1498_v0, %v1495_v58  ;;  %v1127_v1 = vrot.slane %v1125_v61, 4  ;;  %v1516_v11 = vrot.slane %v1514_v3, 4  ;;  %v4643_v58 = vcombine.low %v6353_v24, %v6355_v47  ;;  %v6414_v3 = vld [vmem:[#allocation2 + $0x8c] sm:$0xf]  ;;  %v6511_v23 = vld [vmem:[%s7845_s3 + $0x20] sm:$0xf] }
  0x72   : > { %v1508_v41 = vor.u32 %v1507_v49, %v1504_v35  ;;  %v1124_v31 = vrot.slane %v1122_v36, 3  ;;  %v6367_v35 = vcombine.low %v5974_v48, %v6028_v22  ;;  %v6371_v49 = vcombine.low %v6039_v30, %v6076_v14  ;;  %v3662_v14 = vld [vmem:[%s7846_s4 + $0xf0] sm:$0xff] }
  0x73   : > { %5504 = vset.pattern.permute.xlu1 %v7895_v63  ;;  %v6383_v48 = vcombine.low %v6084_v27, %v6140_v39  ;;  %v6396_v27 = vld [vmem:[#allocation2 + $0x80] sm:$0xf]  ;;  %v6398_v39 = vld [vmem:[#allocation2 + $0x84] sm:$0xf] }
  0x74   : > { %3761 = vperm.xlu1 %5504, %v3651_v16   ;;  %v1128_v0 = vor.u32 %v1127_v1, %v1124_v31  ;;  %v4644_v36 = vcombine.low %v6396_v27, %v6398_v39  ;;  %v7908_v1 = vld [vmem:[#allocation5_spill] sm:$0xff] }
  0x75   : > { %5207 = vmatmul.mubr.msk.bf16.gmra.mxu1 %vm880_vm3, %v5961_v12  ;;  %v6348_v12 = vld [vmem:[#allocation2 + $0x70] sm:$0xf]  ;;  %3801 = vperm.xlu0 %5511, %v6278_v52   ;;  %v1509_v52 = vsel %vm727_vm2, %v1499_v54, %v1508_v41 }
  0x76   : > { %5210 = vmatprep.mubr.msk.bf16.mxu1 %vm880_vm3, %v6026_v42  ;;  %v1520_v42 = vshrl.u32 %v4641_v53, 16  ;;  %v4642_v33 = vcombine.low %v6348_v12, %v6350_v51  ;;  %v6378_v31 = vsel %vm727_vm2, %v6162_v6, %v1128_v0  ;;  %v1538_v6 = vshrl.u32 %v4643_v58, 16  ;;  %v7904_v0 = vld [vmem:[#allocation16_spill] sm:$0xff] }
  0x77   : > { %5245 = vmatmul.mubr.msk.bf16.gmra.mxu0 %vm880_vm3, %v1482_v59  ;;  %v1513_v59 = vrot.slane %v1511_v46, 3  ;;  %v1525_v46 = vrot.slane %v1523_v55, 4  ;;  %v1541_v55 = vshll.u32 %v4643_v58, 16  ;;  %v6444_v58 = vld [vmem:[#allocation2 + $0x90] sm:$0xf] }
  0x78   : > { %5248 = vmatprep.mubr.msk.bf16.mxu0 %vm880_vm3, %v1491_v2  ;;  %3766 = vperm.xlu1 %5504, %v3652_v45   ;;  %v1500_v2 = vsel %vm727_vm2, %v1490_v17, %v1499_v54  ;;  %v1522_v53 = vrot.slane %v1520_v42, 3  ;;  %v1529_v30 = vshrl.u32 %v4642_v33, 16  ;;  %v6393_v17 = vcombine.low %v6009_v8, %v6068_v10  ;;  %v3654_v42 = vld [vmem:[%s7846_s4 + $0xb0] sm:$0xff] }
  0x79   : > { %v1517_v22 = vor.u32 %v1516_v11, %v1513_v59  ;;  %v6406_v11 = vcombine.low %v6122_v50, %v6158_v4  ;;  %3816 = vperm.xlu0 %5511, %v3662_v14   ;;  %v1540_v61 = vrot.slane %v1538_v6, 3  ;;  %v1543_v54 = vrot.slane %v1541_v55, 4  ;;  %v7903_v59 = vld [vmem:[#allocation13_spill] sm:$0xff]  ;;  %v3655_v55 = vld [vmem:[%s7846_s4 + $0xb8] sm:$0xff] }
  0x7a   : > { %v1526_v10 = vor.u32 %v1525_v46, %v1522_v53  ;;  %v1531_v50 = vrot.slane %v1529_v30, 3  ;;  %v7905_v53 = vld [vmem:[#allocation17_spill] sm:$0xff]  ;;  %v1550_v6 = vshll.u32 %v4644_v36, 16 }
  0x7c   : > { %5505 = vset.pattern.permute.xlu1 %v7897_v57 }
  0x7d   : > { %5211 = vmatmul.mubr.msk.bf16.gmra.mxu1 %vm880_vm3, %v6097_v21  ;;  %3965 = vperm.xlu1 %5505, %v3651_v16   ;;  %v1532_v21 = vshll.u32 %v4642_v33, 16  ;;  %v4680_v33 = vcombine.low %v6168_v38, %v6188_v26  ;;  %v6412_v16 = vld [vmem:[#allocation2 + $0x88] sm:$0xf]  ;;  %v5564_v38 = vld [vmem:[#allocation2 + $0x3c] sm:$0xff]  }
  0x7e   : > { %5214 = vmatprep.mubr.msk.bf16.mxu1 %vm880_vm3, %v6145_v40  ;;  %v6402_v40 = vcombine.low %v6070_v13, %v6111_v25  ;;  %v1518_v25 = vsel %vm727_vm2, %v1508_v41, %v1517_v22  ;;  %v1527_v41 = vsel %vm727_vm2, %v1517_v22, %v1526_v10  ;;  %5514 = vset.pattern.permute.xlu0 %v7897_v57 }
  0x7f   : > { %5249 = vmatmul.mubr.msk.bf16.gmra.mxu0 %vm880_vm3, %v1500_v2  ;;  %v1534_v4 = vrot.slane %v1532_v21, 4  ;;  %v4645_v2 = vcombine.low %v6412_v16, %v6414_v3  ;;  %v1544_v22 = vor.u32 %v1543_v54, %v1540_v61  ;;  %v1547_v21 = vshrl.u32 %v4644_v36, 16  ;;  %4009 = vperm.xlu0 %5514, %v3662_v14   ;;  %v7907_v54 = vld [vmem:[#allocation4_spill] sm:$0xff] }
  0x80   : > { %5252 = vmatprep.mubr.msk.bf16.mxu0 %vm880_vm3, %v1509_v52  ;;  %v7906_v52 = vld [vmem:[#allocation15_spill] sm:$0xff]  ;;  %v1552_v61 = vrot.slane %v1550_v6, 4  ;;  %v4646_v14 = vcombine.low %v6444_v58, %v6444_v58 }
  0x81   : > { %3969 = vperm.xlu1 %5505, %v3652_v45   ;;  %v7902_v45 = vld [vmem:[#allocation14_spill] sm:$0xff]  ;;  %v1535_v30 = vor.u32 %v1534_v4, %v1531_v50  ;;  %v1549_v36 = vrot.slane %v1547_v21, 3  ;;  %v7909_v50 = vld [vmem:[#allocation21_spill] sm:$0xff] }
  0x82   : > { %v7912_v21 = vld [vmem:[#allocation6_spill] sm:$0xff] }
  0x83   : > { %v1536_v4 = vsel %vm727_vm2, %v1526_v10, %v1535_v30  ;;  %v7910_v10 = vld [vmem:[#allocation20_spill] sm:$0xff]  ;;  %v1553_v6 = vor.u32 %v1552_v61, %v1549_v36  ;;  %v4727_v36 = vcombine.low %v6350_v51, %v6353_v24  ;;  %v7913_v61 = vld [vmem:[#allocation7_spill] sm:$0xff]  ;;  %v5589_v51 = vld [vmem:[#allocation2 + $0x2c] sm:$0xff]  }
  0x85   : > { %5215 = vmatmul.mubr.msk.bf16.gmra.mxu1 %vm880_vm3, %v7904_v0  ;;  %5506 = vset.pattern.permute.xlu1 %v7895_v63  ;;  %v1556_v0 = vshrl.u32 %v4645_v2, 16  ;;  %v1554_v13 = vsel %vm727_vm2, %v1544_v22, %v1553_v6 }
  0x86   : > { %5218 = vmatprep.mubr.msk.bf16.mxu1 %vm880_vm3, %v7905_v53  ;;  %3776 = vperm.xlu1 %5506, %v3654_v42   ;;  %v1559_v53 = vshll.u32 %v4645_v2, 16 }
  0x87   : > { %5253 = vmatmul.mubr.msk.bf16.gmra.mxu0 %vm880_vm3, %v1518_v25  ;;  %v1558_v2 = vrot.slane %v1556_v0, 3  ;;  %v7911_v0 = vld [vmem:[#allocation22_spill] sm:$0xff] }
  0x88   : > { %5256 = vmatprep.mubr.msk.bf16.mxu0 %vm880_vm3, %v1527_v41  ;;  %v1545_v41 = vsel %vm727_vm2, %v1535_v30, %v1544_v22  ;;  %v1561_v46 = vrot.slane %v1559_v53, 4  ;;  %v1568_v30 = vshll.u32 %v4646_v14, 16  ;;  %v4726_v53 = vcombine.low %v7911_v0, %v6348_v12  ;;  %v3658_v22 = vld [vmem:[%s7846_s4 + $0xd0] sm:$0xff]  ;;  %v5588_v0 = vld [vmem:[#allocation2 + $0x24] sm:$0xff]  }
  0x8a   : > { %3781 = vperm.xlu1 %5506, %v3655_v55   ;;  %v1562_v25 = vor.u32 %v1561_v46, %v1558_v2  ;;  %v1570_v8 = vrot.slane %v1568_v30, 4  ;;  %v5605_v2 = vld [vmem:[#allocation2 + $0x10] sm:$0xf]  ;;  %v5606_v30 = vld [vmem:[#allocation2 + $0x1c] sm:$0xf] }
  0x8d   : > { %5219 = vmatmul.mubr.msk.bf16.gmra.mxu1 %vm880_vm3, %v7907_v54  ;;  %v1565_v54 = vshrl.u32 %v4646_v14, 16 }
  0x8e   : > { %5222 = vmatprep.mubr.msk.bf16.mxu1 %vm880_vm3, %v7908_v1  ;;  %5507 = vset.pattern.permute.xlu1 %v7897_v57 }
  0x8f   : > { %5257 = vmatmul.mubr.msk.bf16.gmra.mxu0 %vm880_vm3, %v1536_v4  ;;  %3977 = vperm.xlu1 %5507, %v3654_v42   ;;  %v1567_v1 = vrot.slane %v1565_v54, 3  ;;  %v1563_v4 = vsel %vm727_vm2, %v1553_v6, %v1562_v25  ;;  %v3657_v42 = vld [vmem:[%s7846_s4 + $0xc8] sm:$0xff]  ;;  %v7916_v54 = vld [vmem:[#allocation18_spill] sm:$0xff] }
  0x90   : > { %5260 = vmatprep.mubr.msk.bf16.mxu0 %vm880_vm3, %v1545_v41  ;;  %v7914_v41 = vld [vmem:[#allocation10_spill] sm:$0xff]  ;;  %v2784_v18 = vsel %vm929_vm0, %v7916_v54, 0  ;;  %v5611_v54 = vld [vmem:[#allocation2 + $0x4c] sm:$0xf] }
  0x91   : > { %v1571_v46 = vor.u32 %v1570_v8, %v1567_v1  ;;  %v5607_v1 = vld [vmem:[#allocation2 + $0x20] sm:$0xf] }
  0x93   : > { %3981 = vperm.xlu1 %5507, %v3655_v55   ;;  %v1572_v14 = vsel %vm727_vm2, %v1562_v25, %v1571_v46  ;;  %v5604_v25 = vld [vmem:[#allocation2 + $0xc] sm:$0xf] }
  0x94   : > { %v3661_v46 = vld [vmem:[%s7846_s4 + $0xe8] sm:$0xff] }
  0x95   : > { %5223 = vmatmul.mubr.msk.bf16.gmra.mxu1 %vm880_vm3, %v7912_v21  ;;  %v4665_v21 = vcombine.low %v5604_v25, %v5605_v2  ;;  %v3663_v25 = vld [vmem:[%s7846_s4 + $0xf8] sm:$0xff]  ;;  %v5610_v2 = vld [vmem:[#allocation2 + $0x48] sm:$0xf] }
  0x96   : > { %5226 = vmatprep.mubr.msk.bf16.mxu1 %vm880_vm3, %v7913_v61  ;;  %v7918_v61 = vld [vmem:[#allocation19_spill] sm:$0xff] }
  0x97   : > { %5261 = vmatmul.mubr.msk.bf16.gmra.mxu0 %vm880_vm3, %v1554_v13  ;;  %5508 = vset.pattern.permute.xlu1 %v7895_v63  ;;  %v7915_v13 = vld [vmem:[#allocation12_spill] sm:$0xff] }
  0x98   : > { %5264 = vmatprep.mubr.msk.bf16.mxu0 %vm880_vm3, %v1563_v4  ;;  %3791 = vperm.xlu1 %5508, %v3657_v42   ;;  %v4667_v4 = vcombine.low %v5606_v30, %v5607_v1  ;;  %v5616_v30 = vld [vmem:[#allocation2 + $0x60] sm:$0xf] }
  0x9c   : > { %3796 = vperm.xlu1 %5508, %v3658_v22  }
  0x9d   : > { %5227 = vmatmul.mubr.msk.bf16.gmra.mxu1 %vm880_vm3, %v7914_v41  ;;  %v5609_v41 = vld [vmem:[#allocation2 + $0x28] sm:$0xf] }
  0x9e   : > { %5230 = vmatprep.mubr.msk.bf16.mxu1 %vm880_vm3, %v7915_v13 }
  0x9f   : > { %5265 = vmatmul.mubr.msk.bf16.gmra.mxu0 %vm880_vm3, %v1572_v14  ;;  %v5608_v14 = vld [vmem:[#allocation2 + $0x24] sm:$0xf] }
  0xa0   : > { %5304 = vmatprep.mubr.msk.bf16.mxu0 %vm880_vm3, %v4697_v9  ;;  %5509 = vset.pattern.permute.xlu1 %v7897_v57  ;;  %v7917_v9 = vld [vmem:[#allocation3_spill] sm:$0xff]  ;;  %v4668_v13 = vcombine.low %v5608_v14, %v5609_v41 }
  0xa1   : > { %3989 = vperm.xlu1 %5509, %v3657_v42   ;;  %v2284_v42 = vsel %vm929_vm0, %v7918_v61, 0  ;;  %v5618_v61 = vld [vmem:[#allocation2 + $0x68] sm:$0xf] }
  0xa5   : > { %5231 = vmatmul.mubr.msk.bf16.gmra.mxu1 %vm880_vm3, %v6378_v31  ;;  %3993 = vperm.xlu1 %5509, %v3658_v22   ;;  %v3660_v31 = vld [vmem:[%s7846_s4 + $0xe0] sm:$0xff]  ;;  %v6532_v22 = vld [vmem:[%s7845_s3 + $0x8] sm:$0xf] }
  0xa6   : > { %5270 = vmatprep.mubr.msk.bf16.mxu1 %vm880_vm3, %v4665_v21 }
  0xa7   : > { %5305 = vmatmul.mubr.msk.bf16.vlgmr.msra.gmra.mxu0 %vm880_vm3, %v4665_v21  ;;  %v7919_v21 = vld [vmem:[#allocation11_spill] sm:$0xff] }
  0xa8   : > { %5371 = vmatpush3.bf16.msra.mxu0 %v2784_v18  ;;  %5308 = vmatprep.mubr.msk.bf16.mxu0 %vm880_vm3, %v7917_v9  ;;  %v5612_v18 = vld [vmem:[#allocation2 + $0x50] sm:$0xf] }
  0xa9   : > { %5483 = vmatprep.subr.msk.bf16.mxu0 %vm929_vm0, %v6511_v23  ;;  %5510 = vset.pattern.permute.xlu1 %v7895_v63 }
  0xaa   : > { %3806 = vperm.xlu1 %5510, %v3660_v31  }
  0xad   : > { %5271 = vmatmul.mubr.msk.bf16.vlgmr.msra.gmra.mxu1 %vm880_vm3, %v7917_v9  ;;  %v5614_v9 = vld [vmem:[#allocation2 + $0x58] sm:$0xf] }
  0xae   : > { %5337 = vmatpush3.bf16.msra.mxu1 %v2284_v42  ;;  %5274 = vmatprep.mubr.msk.bf16.mxu1 %vm880_vm3, %v4667_v4 }
  0xaf   : > { %5309 = vmatmul.mubr.msk.bf16.gmra.mxu0 %vm880_vm3, %v4667_v4  ;;  %3811 = vperm.xlu1 %5510, %v3661_v46   ;;  %v5617_v4 = vld [vmem:[#allocation2 + $0x64] sm:$0xf] }
  0xb0   : > { %5312 = vmatprep.mubr.msk.bf16.mxu0 %vm880_vm3, %v4668_v13  ;;  %5482 = vmatprep.subr.msk.bf16.mxu1 %vm929_vm0, %v6532_v22  ;;  %v4676_v42 = vcombine.low %v5617_v4, %v5618_v61 }
  0xb3   : > { %5512 = vset.pattern.permute.xlu1 %v7897_v57 }
  0xb4   : > { %4001 = vperm.xlu1 %5512, %v3660_v31  }
  0xb5   : > { %5275 = vmatmul.mubr.msk.bf16.gmra.mxu1 %vm880_vm3, %v4668_v13 }
  0xb6   : > { %5278 = vmatprep.mubr.msk.bf16.mxu1 %vm880_vm3, %v6367_v35 }
  0xb7   : > { %5313 = vmatmul.mubr.msk.bf16.gmra.mxu0 %vm880_vm3, %v6367_v35  ;;  %v4672_v35 = vcombine.low %v7919_v21, %v5610_v2  ;;  %v5556_v2 = vld [vmem:[#allocation2 + $0x1c] sm:$0xff]  }
  0xb8   : > { %5316 = vmatprep.mubr.msk.bf16.mxu0 %vm880_vm3, %v6371_v49  ;;  %4005 = vperm.xlu1 %5512, %v3661_v46   ;;  %v5555_v46 = vld [vmem:[#allocation2 + $0x14] sm:$0xff]  }
  0xbc   : > { %5513 = vset.pattern.permute.xlu1 %v7895_v63  ;;  %v4673_v63 = vcombine.low %v5611_v54, %v5612_v18  ;;  %v5558_v54 = vld [vmem:[#allocation2 + $0x24] sm:$0xff]   ;;  %v2619_v18 = vshll.u32 %v5556_v2, 16 }
  0xbd   : > { %5279 = vmatmul.mubr.msk.bf16.gmra.mxu1 %vm880_vm3, %v6371_v49  ;;  %3821 = vperm.xlu1 %5513, %v3663_v25   ;;  %v5613_v49 = vld [vmem:[#allocation2 + $0x54] sm:$0xf] }
  0xbe   : > { %5282 = vmatprep.mubr.msk.bf16.mxu1 %vm880_vm3, %v6383_v48  ;;  %v4674_v31 = vcombine.low %v5613_v49, %v5614_v9  ;;  %v2623_v9 = vshrl.u32 %v5556_v2, 16 }
  0xbf   : > { %5317 = vmatmul.mubr.msk.bf16.gmra.mxu0 %vm880_vm3, %v6383_v48  ;;  %v5615_v48 = vld [vmem:[#allocation2 + $0x5c] sm:$0xf] }
  0xc0   : > { %5320 = vmatprep.mubr.msk.bf16.mxu0 %vm880_vm3, %v4672_v35  ;;  %v4675_v1 = vcombine.low %v5615_v48, %v5616_v30  ;;  %v5560_v48 = vld [vmem:[#allocation2 + $0x2c] sm:$0xff]  }
  0xc1   : > { %5515 = vset.pattern.permute.xlu1 %v7897_v57  ;;  %v5554_v57 = vld [vmem:[#allocation2 + $0xc] sm:$0xff]   ;;  %v2635_v4 = vshll.u32 %v5560_v48, 16 }
  0xc2   : > { %4013 = vperm.xlu1 %5515, %v3663_v25   ;;  %v2606_v14 = vshll.u32 %v5554_v57, 16  ;;  %v2604_v41 = vshrl.u32 %v5554_v57, 16  ;;  %v2611_v25 = vshll.u32 %v5555_v46, 16 }
  0xc3   : > { %v2637_v2 = vrot.slane %v2635_v4, 1 }
  0xc4   : > { %v6569_v13 = vrot.slane %v2606_v14, 1  ;;  %v2639_v14 = vshrl.u32 %v5560_v48, 16 }
  0xc5   : > { %5283 = vmatmul.mubr.msk.bf16.gmra.mxu1 %vm880_vm3, %v4672_v35  ;;  %v2613_v35 = vrot.slane %v2611_v25, 1  ;;  %v7920_v25 = vcombine.low %v6100_v44, %v6116_v62 }
  0xc6   : > { %5286 = vmatprep.mubr.msk.bf16.mxu1 %vm880_vm3, %v4673_v63  ;;  %v2609_v21 = vor.u32 %v6569_v13, %v2604_v41 }
  0xc7   : > { %5321 = vmatmul.mubr.msk.bf16.gmra.mxu0 %vm880_vm3, %v4673_v63  ;;  %v2615_v63 = vshrl.u32 %v5555_v46, 16 }
  0xc8   : > { %5324 = vmatprep.mubr.msk.bf16.mxu0 %vm880_vm3, %v4674_v31  ;;  %v6581_v49 = vsel %vm2602_vm4, %v2609_v21, %v2613_v35  ;;  %v5566_v21 = vld [vmem:[#allocation2 + $0x44] sm:$0xff]  }
  0xc9   : > { %v2617_v30 = vor.u32 %v2615_v63, %v2613_v35  ;;  %v2975_v35 = vsel %vm929_vm0, %v6532_v22, 0  ;;  %v7922_v63 = vld [vmem:[#allocation9_spill] sm:$0xff]  ;;  %v2659_v48 = vshll.u32 %v5566_v21, 16 }
  0xcb   : > { %v2661_v4 = vrot.slane %v2659_v48, 1 }
  0xcd   : > { %5287 = vmatmul.mubr.msk.bf16.gmra.mxu1 %vm880_vm3, %v4674_v31  ;;  %v2627_v31 = vshll.u32 %v5558_v54, 16 }
  0xce   : > { %5290 = vmatprep.mubr.msk.bf16.mxu1 %vm880_vm3, %v4675_v1 }
  0xcf   : > { %5325 = vmatmul.mubr.msk.bf16.gmra.mxu0 %vm880_vm3, %v4675_v1  ;;  %v2629_v57 = vrot.slane %v2627_v31, 1 }
  0xd0   : > { %5328 = vmatprep.mubr.msk.bf16.mxu0 %vm880_vm3, %v4676_v42 }
  0xd5   : > { %5291 = vmatmul.mubr.msk.bf16.gmra.mxu1 %vm880_vm3, %v4676_v42  ;;  %v2631_v42 = vshrl.u32 %v5558_v54, 16  ;;  %v2651_v54 = vshll.u32 %v5564_v38, 16 }
  0xd6   : > { %5294 = vmatprep.mubr.msk.bf16.mxu1 %vm880_vm3, %v6393_v17 }
  0xd7   : > { %5329 = vmatmul.mubr.msk.bf16.gmra.mxu0 %vm880_vm3, %v6393_v17  ;;  %v2621_v17 = vrot.slane %v2619_v18, 1  ;;  %v2633_v26 = vor.u32 %v2631_v42, %v2629_v57  ;;  %v7921_v18 = vld [vmem:[#allocation8_spill] sm:$0xff]  ;;  %v2653_v22 = vrot.slane %v2651_v54, 1  ;;  %v5570_v42 = vld [vmem:[#allocation2 + $0x54] sm:$0xff]  }
  0xd8   : > { %5332 = vmatprep.mubr.msk.bf16.mxu0 %vm880_vm3, %v6402_v40 }
  0xd9   : > { %v2625_v1 = vor.u32 %v2623_v9, %v2621_v17  ;;  %v6590_v61 = vsel %vm2602_vm4, %v2617_v30, %v2621_v17  ;;  %v6612_v44 = vsel %vm2602_vm4, %v2633_v26, %v2637_v2  ;;  %v7923_v9 = vcombine.low %v7921_v18, %v7922_v63 }
  0xda   : > { %v2655_v17 = vshrl.u32 %v5564_v38, 16  ;;  %v7924_v30 = vcombine.low %v6127_v29, %v6178_v20  ;;  %v7925_v29 = vcombine.low %v6180_v43, %v6182_v56  ;;  %v7926_v38 = vcombine.low %v7903_v59, %v7902_v45 }
  0xdb   : > { %v6599_v46 = vsel %vm2602_vm4, %v2625_v1, %v2629_v57  ;;  %v5568_v1 = vld [vmem:[#allocation2 + $0x4c] sm:$0xff]   ;;  %v2679_v18 = vshrl.u32 %v5570_v42, 16  ;;  %v7927_v63 = vcombine.low %v7906_v52, %v6232_v28 }
  0xdc   : > { %v5576_v28 = vld [vmem:[#allocation2 + $0x6c] sm:$0xff]  }
  0xdd   : > { %5295 = vmatmul.mubr.msk.bf16.gmra.mxu1 %vm880_vm3, %v6402_v40  ;;  %v5562_v40 = vld [vmem:[#allocation2 + $0x34] sm:$0xff]  }
  0xde   : > { %5298 = vmatprep.mubr.msk.bf16.mxu1 %vm880_vm3, %v6406_v11  ;;  %v2643_v41 = vshll.u32 %v5562_v40, 16  ;;  %v2647_v62 = vshrl.u32 %v5562_v40, 16  ;;  %v2657_v40 = vor.u32 %v2655_v17, %v2653_v22 }
  0xdf   : > { %5333 = vmatmul.mubr.msk.bf16.gmra.mxu0 %vm880_vm3, %v6406_v11  ;;  %v3437_v11 = vsel %vm929_vm0, %v6511_v23, 0 }
  0xe0   : > { %5372 = vmatprep.mubr.msk.bf16.mxu0 %vm880_vm3, %v6581_v49  ;;  %v2645_v23 = vrot.slane %v2643_v41, 1  ;;  %v2663_v41 = vshrl.u32 %v5566_v21, 16  ;;  %v6637_v20 = vsel %vm2602_vm4, %v2657_v40, %v2661_v4 }
  0xe2   : > { %v2649_v57 = vor.u32 %v2647_v62, %v2645_v23  ;;  %v2665_v43 = vor.u32 %v2663_v41, %v2661_v4  ;;  %v2699_v41 = vshll.u32 %v5576_v28, 16 }
  0xe5   : > { %5299 = vmatmul.mubr.msk.bf16.gmra.mxu1 %vm880_vm3, %v4680_v33  ;;  %v2641_v33 = vor.u32 %v2639_v14, %v2637_v2  ;;  %v6630_v14 = vsel %vm2602_vm4, %v2649_v57, %v2653_v22  ;;  %v2675_v2 = vshll.u32 %v5570_v42, 16  ;;  %v5578_v42 = vld [vmem:[#allocation2 + $0x74] sm:$0xff]  }
  0xe6   : > { %5338 = vmatprep.mubr.msk.bf16.mxu1 %vm880_vm3, %v7920_v25  ;;  %v2671_v25 = vshrl.u32 %v5568_v1, 16 }
  0xe7   : > { %5373 = vmatmul.mubr.msk.bf16.vlgmr.msra.gmra.mxu0 %vm880_vm3, %v6590_v61  ;;  %v6619_v31 = vsel %vm2602_vm4, %v2641_v33, %v2645_v23  ;;  %v5572_v33 = vld [vmem:[#allocation2 + $0x5c] sm:$0xff]   ;;  %v2677_v21 = vrot.slane %v2675_v2, 1  ;;  %v7930_v2 = vcombine.low %v6238_v7, %v6273_v32  ;;  %v2701_v7 = vrot.slane %v2699_v41, 1  ;;  %v5586_v41 = vld [vmem:[#allocation2 + $0x14] sm:$0xff]  }
  0xe8   : > { %5439 = vmatpush3.bf16.msra.mxu0 %v3437_v11  ;;  %5376 = vmatprep.mubr.msk.bf16.mxu0 %vm880_vm3, %v6599_v46  ;;  %v2667_v11 = vshll.u32 %v5568_v1, 16  ;;  %v2683_v45 = vshll.u32 %v5572_v33, 16  ;;  %v2687_v17 = vshrl.u32 %v5572_v33, 16  ;;  %v2707_v33 = vshll.u32 %v5578_v42, 16  ;;  %v5580_v32 = vld [vmem:[#allocation2 + $0x7c] sm:$0xff]  }
  0xe9   : > { %v2681_v52 = vor.u32 %v2679_v18, %v2677_v21 }
  0xea   : > { %v2669_v26 = vrot.slane %v2667_v11, 1  ;;  %v2685_v1 = vrot.slane %v2683_v45, 1  ;;  %v6675_v11 = vpop.permute.xlu1 %3676 }
  0xeb   : > { %7929 = vst [vmem:[#allocation14_spill] sm:$0xff] %v6675_v11 }
  0xec   : > { %v2673_v23 = vor.u32 %v2671_v25, %v2669_v26  ;;  %v6654_v59 = vsel %vm2602_vm4, %v2665_v43, %v2669_v26  ;;  %v2689_v40 = vor.u32 %v2687_v17, %v2685_v1  ;;  %v2703_v26 = vshrl.u32 %v5576_v28, 16 }
  0xed   : > { %5339 = vmatmul.mubr.msk.bf16.vlgmr.msra.gmra.mxu1 %vm880_vm3, %v7923_v9  ;;  %v7931_v43 = vcombine.low %v6282_v37, %v6290_v34  ;;  %v5582_v37 = vld [vmem:[#allocation2 + $0x84] sm:$0xff]   ;;  %v7933_v28 = vcombine.low %v6292_v15, %v6313_v60 }
  0xee   : > { %5405 = vmatpush3.bf16.msra.mxu1 %v2975_v35  ;;  %5342 = vmatprep.mubr.msk.bf16.mxu1 %vm880_vm3, %v7924_v30  ;;  %v5574_v35 = vld [vmem:[#allocation2 + $0x64] sm:$0xff]   ;;  %v6661_v9 = vsel %vm2602_vm4, %v2673_v23, %v2677_v21  ;;  %v7928_v30 = vcombine.low %v6234_v19, %v6236_v5  ;;  %v2705_v18 = vor.u32 %v2703_v26, %v2701_v7 }
  0xef   : > { %5377 = vmatmul.mubr.msk.bf16.gmra.mxu0 %vm880_vm3, %v6612_v44  ;;  %v2691_v48 = vshll.u32 %v5574_v35, 16  ;;  %v2695_v25 = vshrl.u32 %v5574_v35, 16  ;;  %v6701_v35 = vpop.permute.xlu1 %3681 }
  0xf0   : > { %5380 = vmatprep.mubr.msk.bf16.mxu0 %vm880_vm3, %v6619_v31  ;;  %7932 = vst [vmem:[#allocation13_spill] sm:$0xff] %v6701_v35 }
  0xf1   : > { %v2693_v4 = vrot.slane %v2691_v48, 1  ;;  %v2715_v48 = vshll.u32 %v5580_v32, 16 }
  0xf3   : > { %v2697_v45 = vor.u32 %v2695_v25, %v2693_v4  ;;  %v6719_v25 = vpop.permute.xlu1 %3691  ;;  %v2717_v60 = vrot.slane %v2715_v48, 1  ;;  %v2727_v48 = vshrl.u32 %v5582_v37, 16 }
  0xf4   : > { %7934 = vst [vmem:[#allocation16_spill] sm:$0xff] %v6719_v25 }
  0xf5   : > { %5343 = vmatmul.mubr.msk.bf16.gmra.mxu1 %vm880_vm3, %v7925_v29  ;;  %v6682_v29 = vsel %vm2602_vm4, %v2681_v52, %v2685_v1  ;;  %v2711_v1 = vshrl.u32 %v5578_v42, 16 }
  0xf6   : > { %5346 = vmatprep.mubr.msk.bf16.mxu1 %vm880_vm3, %v7926_v38  ;;  %v6689_v38 = vsel %vm2602_vm4, %v2689_v40, %v2693_v4  ;;  %v2719_v40 = vshrl.u32 %v5580_v32, 16  ;;  %v2723_v4 = vshll.u32 %v5582_v37, 16  ;;  %v5587_v32 = vld [vmem:[#allocation2 + $0x1c] sm:$0xff]  }
  0xf7   : > { %5381 = vmatmul.mubr.msk.bf16.gmra.mxu0 %vm880_vm3, %v6630_v14  ;;  %v6647_v56 = vpop.f32.mrf.mxu0 }
  0xf8   : > { %5384 = vmatprep.mubr.msk.bf16.mxu0 %vm880_vm3, %v6637_v20  ;;  %v6651_v62 = vpop.f32.mrf.mxu1 }
  0xf9   : > { %v6649_v54 = vpop.f32.mrf.mxu0 }
  0xfa   : > { %v6671_v57 = vpop.f32.mrf.mxu1 }
  0xfb   : > { %v6667_v22 = vpop.f32.mrf.mxu0 }
  0xfc   : > { %v6679_v5 = vpop.f32.mrf.mxu1 }
  0xfd   : > { %5347 = vmatmul.mubr.msk.bf16.gmra.mxu1 %vm880_vm3, %v7927_v63  ;;  %v6677_v19 = vpop.f32.mrf.mxu0  ;;  %v2709_v63 = vrot.slane %v2707_v33, 1  ;;  %v5584_v33 = vld [vmem:[#allocation2 + $0x8c] ss:$0 sps:$4 sm:$0x11]  }
  0xfe   : > { %5350 = vmatprep.mubr.msk.bf16.mxu1 %vm880_vm3, %v7928_v30  ;;  %v6699_v21 = vpop.f32.mrf.mxu1  ;;  %v6710_v30 = vsel %vm2602_vm4, %v2697_v45, %v2701_v7  ;;  %v2725_v7 = vrot.slane %v2723_v4, 1  ;;  %v2731_v6 = vshll.u32 %v5584_v33, 16  ;;  %v3264_v4 = vshll.u32 %v5587_v32, 16 }
  0xff   : > { %5385 = vmatmul.mubr.msk.bf16.gmra.mxu0 %vm880_vm3, %v6654_v59  ;;  %v6717_v52 = vsel %vm2602_vm4, %v2705_v18, %v2709_v63  ;;  %v2713_v42 = vor.u32 %v2711_v1, %v2709_v63  ;;  %v5585_v18 = vld [vmem:[#allocation2 + $0x4] sm:$0xff]   ;;  %v3257_v1 = vshrl.u32 %v5586_v41, 16 }
 0x100   : > { %5388 = vmatprep.mubr.msk.bf16.mxu0 %vm880_vm3, %v6661_v9  ;;  %v2958_v12 = vshll.u32 %v5585_v18, 16  ;;  %v2956_v55 = vshrl.u32 %v5585_v18, 16  ;;  %v7941_v18 = vcombine.low %v6398_v39, %v6412_v16 }
 0x102   : > { %v2960_v25 = vrot.slane %v2958_v12, 1 }
 0x104   : > { %v6695_v23 = vpop.f32.mrf.mxu0 }
 0x105   : > { %5351 = vmatmul.mubr.msk.bf16.gmra.mxu1 %vm880_vm3, %v7930_v2  ;;  %v7935_v2 = vcombine.low %v7910_v10, %v7909_v50  ;;  %v3259_v50 = vshll.u32 %v5586_v41, 16  ;;  %v2729_v41 = vor.u32 %v2727_v48, %v2725_v7 }
 0x106   : > { %5354 = vmatprep.mubr.msk.bf16.mxu1 %vm880_vm3, %v7931_v43  ;;  %v6705_v34 = vpop.f32.mrf.mxu0  ;;  %v6733_v43 = vor.u32 %v2719_v40, %v2717_v60 }
 0x107   : > { %5389 = vmatmul.mubr.msk.bf16.gmra.mxu0 %vm880_vm3, %v6682_v29  ;;  %v3261_v40 = vrot.slane %v3259_v50, 1  ;;  %v3266_v50 = vrot.slane %v3264_v4, 1 }
 0x108   : > { %5392 = vmatprep.mubr.msk.bf16.mxu0 %vm880_vm3, %v6689_v38  ;;  %v6725_v26 = vpop.f32.mrf.mxu0  ;;  %7936 = vst [vmem:[#allocation17_spill] sm:$0xff] %v6733_v43  ;;  %v2726_v63 = vsel %vm2602_vm4, %v6733_v43, %v2725_v7  ;;  %v3268_v43 = vshrl.u32 %v5587_v32, 16  ;;  %v5590_v32 = vld [vmem:[#allocation2 + $0x34] sm:$0xff]  }
 0x109   : > { %v6707_v17 = vpop.f32.mrf.mxu1  ;;  %v3262_v33 = vor.u32 %v3261_v40, %v3257_v1  ;;  %v3280_v1 = vshll.u32 %v5589_v51, 16 }
 0x10a   : > { %v6735_v10 = vpop.f32.mrf.mxu0 }
 0x10b   : > { %v6729_v15 = vpop.f32.mrf.mxu1  ;;  %v3267_v48 = vsel %vm2602_vm4, %v3262_v33, %v3266_v50  ;;  %v3282_v16 = vrot.slane %v3280_v1, 1  ;;  %v5591_v33 = vld [vmem:[#allocation2 + $0x3c] sm:$0xff]  }
 0x10c   : > { %v3296_v1 = vshll.u32 %v5591_v33, 16 }
 0x10d   : > { %5355 = vmatmul.mubr.msk.bf16.gmra.mxu1 %vm880_vm3, %v7933_v28  ;;  %v6737_v45 = vpop.f32.mrf.mxu1  ;;  %v6739_v28 = vpop.permute.xlu1 %3701 }
 0x10e   : > { %5358 = vmatprep.mubr.msk.bf16.mxu1 %vm880_vm3, %v7935_v2  ;;  %7937 = vst [vmem:[#allocation15_spill] sm:$0xff] %v6739_v28  ;;  %v6742_v2 = vsel %vm2602_vm4, %v2713_v42, %v2717_v60  ;;  %v2733_v42 = vrot.slane %v2731_v6, 1  ;;  %v3272_v28 = vshll.u32 %v5588_v0, 16  ;;  %v7939_v6 = vcombine.low %v6355_v47, %v6396_v27 }
 0x10f   : > { %5393 = vmatmul.mubr.msk.bf16.gmra.mxu0 %vm880_vm3, %v6710_v30  ;;  %v6756_v37 = vpop.f32.mrf.mxu1  ;;  %v2961_v47 = vor.u32 %v2960_v25, %v2956_v55  ;;  %v3288_v55 = vshll.u32 %v5590_v32, 16 }
 0x110   : > { %5396 = vmatprep.mubr.msk.bf16.mxu0 %vm880_vm3, %v6717_v52  ;;  %v2734_v11 = vsel %vm2602_vm4, %v2729_v41, %v2733_v42  ;;  %v3274_v27 = vrot.slane %v3272_v28, 1  ;;  %v3270_v41 = vor.u32 %v3268_v43, %v3266_v50  ;;  %v3284_v28 = vshrl.u32 %v5589_v51, 16 }
 0x111   : > { %v6763_v24 = vpop.permute.xlu1 %3889  ;;  %v7946_v43 = vcombine.low %v6414_v3, %v6444_v58 }
 0x112   : > { %7938 = vst [vmem:[#allocation4_spill] sm:$0xff] %v6763_v24  ;;  %v3275_v25 = vsel %vm2602_vm4, %v3270_v41, %v3274_v27  ;;  %v3286_v3 = vor.u32 %v3284_v28, %v3282_v16 }
 0x115   : > { %5359 = vmatmul.mubr.msk.bf16.gmra.mxu1 %vm880_vm3, %v4726_v53  ;;  %v6754_v60 = vpop.f32.mrf.mxu0  ;;  %v6788_v12 = vpop.permute.xlu1 %3897 }
 0x116   : > { %5362 = vmatprep.mubr.msk.bf16.mxu1 %vm880_vm3, %v4727_v36  ;;  %7943 = vst [vmem:[#allocation20_spill] sm:$0xff] %v6788_v12 }
 0x117   : > { %5397 = vmatmul.mubr.msk.bf16.gmra.mxu0 %vm880_vm3, %v6742_v2  ;;  %v6760_v53 = vpop.f32.mrf.mxu0 }
 0x118   : > { %5400 = vmatprep.mubr.msk.bf16.mxu0 %vm880_vm3, %v2726_v63  ;;  %v3276_v63 = vshrl.u32 %v5588_v0, 16 }
 0x119   : > { %v6765_v36 = vpop.f32.mrf.mxu0  ;;  %v6809_v24 = vpop.permute.xlu1 %3901 }
 0x11a   : > { %v3278_v39 = vor.u32 %v3276_v63, %v3274_v27  ;;  %v3292_v63 = vshrl.u32 %v5590_v32, 16  ;;  %7947 = vst [vmem:[#allocation7_spill] sm:$0xff] %v6809_v24  ;;  %v5592_v27 = vld [vmem:[#allocation2 + $0x44] sm:$0xff]   ;;  %v3298_v32 = vrot.slane %v3296_v1, 1 }
 0x11b   : > { %v6767_v8 = vpop.f32.mrf.mxu1  ;;  %v6769_v35 = vpop.f32.mrf.mxu0 }
 0x11d   : > { %5363 = vmatmul.mubr.msk.bf16.gmra.mxu1 %vm880_vm3, %v7939_v6  ;;  %v6776_v7 = vpop.f32.mrf.mxu1 }
 0x11e   : > { %7940 = vst [vmem:[#allocation5_spill] sm:$0xff] %v6776_v7  ;;  %5366 = vmatprep.mubr.msk.bf16.mxu1 %vm880_vm3, %v7941_v18  ;;  %v6785_v4 = vpop.f32.mrf.mxu0 }
 0x11f   : > { %v6783_v40 = vpop.f32.mrf.mxu1  ;;  %5401 = vmatmul.mubr.msk.bf16.gmra.mxu0 %vm880_vm3, %v2734_v11  ;;  %v2962_v11 = vsel %vm2602_vm4, %v2961_v47, %v6569_v13  ;;  %v3290_v47 = vrot.slane %v3288_v55, 1 }
 0x120   : > { %7942 = vst [vmem:[#allocation21_spill] sm:$0xff] %v6783_v40  ;;  %5440 = vmatprep.mubr.msk.bf16.mxu0 %vm880_vm3, %v3267_v48  ;;  %v6793_v42 = vpop.f32.mrf.mxu0  ;;  %v3283_v48 = vsel %vm2602_vm4, %v3278_v39, %v3282_v16 }
 0x121   : > { %v6791_v0 = vpop.f32.mrf.mxu1  ;;  %v3294_v39 = vor.u32 %v3292_v63, %v3290_v47 }
 0x122   : > { %7944 = vst [vmem:[#allocation22_spill] sm:$0xff] %v6791_v0  ;;  %v6795_v6 = vpop.f32.mrf.mxu0 }
 0x123   : > { %v3299_v28 = vsel %vm2602_vm4, %v3294_v39, %v3298_v32 }
 0x124   : > { %v6806_v50 = vpop.f32.mrf.mxu0 }
 0x125   : > { %v6800_v18 = vpop.f32.mrf.mxu1  ;;  %5367 = vmatmul.mubr.msk.bf16.gmra.mxu1 %vm880_vm3, %v7946_v43  ;;  %v5593_v43 = vld [vmem:[#allocation2 + $0x4c] sm:$0xff]  }
 0x126   : > { %7945 = vst [vmem:[#allocation6_spill] sm:$0xff] %v6800_v18  ;;  %5406 = vmatprep.mubr.msk.bf16.mxu1 %vm880_vm3, %v2962_v11  ;;  %v5238_v51 = vpop.f32.mrf.mxu0  ;;  %v3304_v11 = vshll.u32 %v5592_v27, 16  ;;  %v6820_v18 = vpop.permute.xlu1 %3909  ;;  %v3312_v63 = vshll.u32 %v5593_v43, 16 }
 0x127   : > { %v6812_v13 = vpop.f32.mrf.mxu1  ;;  %5441 = vmatmul.mubr.msk.bf16.vlgmr.msra.gmra.mxu0 %vm880_vm3, %v3275_v25  ;;  %7951 = vst [vmem:[#allocation3_spill] sm:$0xff] %v6820_v18  ;;  %v3300_v25 = vshrl.u32 %v5591_v33, 16  ;;  %v5594_v33 = vld [vmem:[#allocation2 + $0x54] sm:$0xff]  }
 0x128   : > { %7948 = vst [vmem:[#allocation10_spill] sm:$0xff] %v6812_v13  ;;  %5444 = vmatprep.mubr.msk.bf16.mxu0 %vm880_vm3, %v3283_v48  ;;  %v1658_v41 = vpop.f32.mrf.mxu0  ;;  %v3291_v13 = vsel %vm2602_vm4, %v3286_v3, %v3290_v47  ;;  %v3308_v48 = vshrl.u32 %v5592_v27, 16  ;;  %v3306_v47 = vrot.slane %v3304_v11, 1 }
 0x129   : > { %v6816_v58 = vpop.f32.mrf.mxu1  ;;  %v3302_v18 = vor.u32 %v3300_v25, %v3298_v32  ;;  %v3316_v32 = vshrl.u32 %v5593_v43, 16  ;;  %v5596_v43 = vld [vmem:[#allocation2 + $0x64] sm:$0xff]  }
 0x12a   : > { %7949 = vst [vmem:[#allocation12_spill] sm:$0xff] %v6816_v58  ;;  %v5239_v24 = vpop.f32.mrf.mxu0  ;;  %v3310_v0 = vor.u32 %v3308_v48, %v3306_v47  ;;  %v6834_v40 = vpop.permute.xlu1 %3917  ;;  %v3324_v48 = vshrl.u32 %v5594_v33, 16 }
 0x12b   : > { %v6818_v12 = vpop.f32.mrf.mxu1  ;;  %7952 = vst [vmem:[#allocation19_spill] sm:$0xff] %v6834_v40 }
 0x12c   : > { %7950 = vst [vmem:[#allocation18_spill] sm:$0xff] %v6818_v12  ;;  %v1661_v16 = vpop.f32.mrf.mxu0 }
 0x12d   : > { %v5204_v55 = vpop.f32.mrf.mxu1  ;;  %5407 = vmatmul.mubr.msk.bf16.vlgmr.msra.gmra.mxu1 %vm880_vm3, %v6581_v49 }
 0x12e   : > { %v1185_v1 = vadd.f32 %v5204_v55, %v6647_v56  ;;  %5410 = vmatprep.mubr.msk.bf16.mxu1 %vm880_vm3, %v6590_v61  ;;  %v3314_v56 = vrot.slane %v3312_v63, 1  ;;  %v5595_v55 = vld [vmem:[#allocation2 + $0x5c] sm:$0xff]  }
 0x12f   : > { %v1176_v12 = vpop.f32.mrf.mxu1  ;;  %v5242_v58 = vpop.f32.mrf.mxu0  ;;  %5445 = vmatmul.mubr.msk.bf16.gmra.mxu0 %vm880_vm3, %v3291_v13  ;;  %v3328_v63 = vshll.u32 %v5595_v55, 16 }
 0x130   : > { %v6830_v3 = vadd.f32 %v5238_v51, %v1185_v1  ;;  %v1177_v49 = vadd.f32 %v1176_v12, %v6649_v54  ;;  %5448 = vmatprep.mubr.msk.bf16.mxu0 %vm880_vm3, %v3299_v28  ;;  %v3320_v51 = vshll.u32 %v5594_v33, 16  ;;  %v3307_v12 = vsel %vm2602_vm4, %v3302_v18, %v3306_v47  ;;  %v6852_v47 = vpop.permute.xlu1 %3921 }
 0x131   : > { %v5205_v27 = vpop.f32.mrf.mxu1  ;;  %v1674_v39 = vpop.f32.mrf.mxu0  ;;  %7953 = vst [vmem:[#allocation11_spill] sm:$0xff] %v6852_v47  ;;  %v3318_v33 = vor.u32 %v3316_v32, %v3314_v56 }
 0x132   : > { %v6836_v61 = vadd.f32 %v1658_v41, %v1177_v49  ;;  %v1188_v13 = vadd.f32 %v5205_v27, %v6667_v22  ;;  %v3315_v41 = vsel %vm2602_vm4, %v3310_v0, %v3314_v56  ;;  %v3322_v18 = vrot.slane %v3320_v51, 1 }
 0x133   : > { %v1179_v11 = vpop.f32.mrf.mxu1  ;;  %v5243_v7 = vpop.f32.mrf.mxu0  ;;  %v3332_v56 = vshrl.u32 %v5595_v55, 16 }
 0x134   : > { %v6839_v1 = vadd.f32 %v5239_v24, %v1188_v13  ;;  %v1180_v54 = vadd.f32 %v1179_v11, %v6677_v19  ;;  %v3326_v27 = vor.u32 %v3324_v48, %v3322_v18  ;;  %v3330_v13 = vrot.slane %v3328_v63, 1 }
 0x135   : > { %v5208_v25 = vpop.f32.mrf.mxu1  ;;  %5411 = vmatmul.mubr.msk.bf16.gmra.mxu1 %vm880_vm3, %v6599_v46  ;;  %v1677_v28 = vpop.f32.mrf.mxu0  ;;  %v3340_v48 = vshrl.u32 %v5596_v43, 16 }
 0x136   : > { %v6846_v22 = vadd.f32 %v1661_v16, %v1180_v54  ;;  %v1201_v49 = vadd.f32 %v5208_v25, %v6695_v23  ;;  %5414 = vmatprep.mubr.msk.bf16.mxu1 %vm880_vm3, %v6612_v44  ;;  %v5597_v44 = vld [vmem:[#allocation2 + $0x6c] sm:$0xff]   ;;  %v3336_v25 = vshll.u32 %v5596_v43, 16 }
 0x137   : > { %v1192_v19 = vpop.f32.mrf.mxu1  ;;  %v5246_v24 = vpop.f32.mrf.mxu0  ;;  %5449 = vmatmul.mubr.msk.bf16.gmra.mxu0 %vm880_vm3, %v3307_v12  ;;  %v3344_v63 = vshll.u32 %v5597_v44, 16 }
 0x138   : > { %v6854_v46 = vadd.f32 %v5242_v58, %v1201_v49  ;;  %v1193_v0 = vadd.f32 %v1192_v19, %v6705_v34  ;;  %5452 = vmatprep.mubr.msk.bf16.mxu0 %vm880_vm3, %v3315_v41  ;;  %v3323_v34 = vsel %vm2602_vm4, %v3318_v33, %v3322_v18  ;;  %v3338_v19 = vrot.slane %v3336_v25, 1 }
 0x139   : > { %v5209_v16 = vpop.f32.mrf.mxu1  ;;  %v1690_v23 = vpop.f32.mrf.mxu0 }
 0x13a   : > { %v6858_v11 = vadd.f32 %v1674_v39, %v1193_v0  ;;  %v1204_v54 = vadd.f32 %v5209_v16, %v6725_v26  ;;  %v3331_v39 = vsel %vm2602_vm4, %v3326_v27, %v3330_v13  ;;  %v6868_v26 = vpop.permute.xlu1 %3716  ;;  %v3334_v0 = vor.u32 %v3332_v56, %v3330_v13  ;;  %v5599_v27 = vld [vmem:[#allocation2 + $0x7c] sm:$0xff]  }
 0x13b   : > { %v1195_v51 = vpop.f32.mrf.mxu1  ;;  %v5247_v12 = vpop.f32.mrf.mxu0  ;;  %v3342_v16 = vor.u32 %v3340_v48, %v3338_v19  ;;  %v3348_v56 = vshrl.u32 %v5597_v44, 16  ;;  %v3360_v48 = vshll.u32 %v5599_v27, 16 }
 0x13c   : > { %v6861_v47 = vadd.f32 %v5243_v7, %v1204_v54  ;;  %v1196_v58 = vadd.f32 %v1195_v51, %v6735_v10  ;;  %v3339_v13 = vsel %vm2602_vm4, %v3334_v0, %v3338_v19 }
 0x13d   : > { %v5212_v32 = vpop.f32.mrf.mxu1  ;;  %5415 = vmatmul.mubr.msk.bf16.gmra.mxu1 %vm880_vm3, %v6619_v31  ;;  %v1693_v41 = vpop.f32.mrf.mxu0  ;;  %v5598_v31 = vld [vmem:[#allocation2 + $0x74] sm:$0xff]  }
 0x13e   : > { %v6870_v49 = vadd.f32 %v1677_v28, %v1196_v58  ;;  %v1217_v7 = vadd.f32 %v5212_v32, %v6754_v60  ;;  %5418 = vmatprep.mubr.msk.bf16.mxu1 %vm880_vm3, %v6630_v14  ;;  %v3346_v60 = vrot.slane %v3344_v63, 1  ;;  %v3352_v25 = vshll.u32 %v5598_v31, 16 }
 0x13f   : > { %v1208_v10 = vpop.f32.mrf.mxu1  ;;  %v5250_v55 = vpop.f32.mrf.mxu0  ;;  %5453 = vmatmul.mubr.msk.bf16.gmra.mxu0 %vm880_vm3, %v3323_v34 }
 0x140   : > { %v6876_v18 = vadd.f32 %v5246_v24, %v1217_v7  ;;  %v1209_v43 = vadd.f32 %v1208_v10, %v6760_v53  ;;  %5456 = vmatprep.mubr.msk.bf16.mxu0 %vm880_vm3, %v3331_v39  ;;  %v6883_v34 = vpop.permute.xlu1 %3721  ;;  %v3347_v39 = vsel %vm2602_vm4, %v3342_v16, %v3346_v60  ;;  %v3354_v44 = vrot.slane %v3352_v25, 1  ;;  %v5600_v10 = vld [vmem:[#allocation2 + $0x84] sm:$0xff]  }
 0x141   : > { %v5213_v28 = vpop.f32.mrf.mxu1  ;;  %v1706_v33 = vpop.f32.mrf.mxu0 }
 0x142   : > { %v6880_v54 = vadd.f32 %v1690_v23, %v1209_v43  ;;  %v1220_v14 = vadd.f32 %v5213_v28, %v6765_v36  ;;  %v3356_v36 = vshrl.u32 %v5598_v31, 16  ;;  %v3350_v43 = vor.u32 %v3348_v56, %v3346_v60  ;;  %v5601_v28 = vld [vmem:[#allocation2 + $0x8c] sm:$0xff]  }
 0x143   : > { %v1211_v51 = vpop.f32.mrf.mxu1  ;;  %v5251_v58 = vpop.f32.mrf.mxu0 }
 0x144   : > { %v6885_v24 = vadd.f32 %v5247_v12, %v1220_v14  ;;  %v1212_v53 = vadd.f32 %v1211_v51, %v6769_v35  ;;  %v3358_v0 = vor.u32 %v3356_v36, %v3354_v44  ;;  %v6902_v16 = vpop.permute.xlu1 %3929  ;;  %v3355_v60 = vsel %vm2602_vm4, %v3350_v43, %v3354_v44 }
 0x145   : > { %v5216_v32 = vpop.f32.mrf.mxu1  ;;  %5419 = vmatmul.mubr.msk.bf16.gmra.mxu1 %vm880_vm3, %v6637_v20  ;;  %v1709_v23 = vpop.f32.mrf.mxu0  ;;  %7954 = vst [vmem:[#allocation8_spill] sm:$0xff] %v6902_v16  ;;  %v3376_v36 = vshll.u32 %v5601_v28, 16 }
 0x146   : > { %v6892_v63 = vadd.f32 %v1693_v41, %v1212_v53  ;;  %v1233_v7 = vadd.f32 %v5216_v32, %v6785_v4  ;;  %5422 = vmatprep.mubr.msk.bf16.mxu1 %vm880_vm3, %v6654_v59  ;;  %v3362_v4 = vrot.slane %v3360_v48, 1  ;;  %v3368_v53 = vshll.u32 %v5600_v10, 16 }
 0x147   : > { %v1224_v35 = vpop.f32.mrf.mxu1  ;;  %v5254_v12 = vpop.f32.mrf.mxu0  ;;  %5457 = vmatmul.mubr.msk.bf16.gmra.mxu0 %vm880_vm3, %v3339_v13  ;;  %v3378_v43 = vrot.slane %v3376_v36, 1 }
 0x148   : > { %v6898_v19 = vadd.f32 %v5250_v55, %v1233_v7  ;;  %v1225_v20 = vadd.f32 %v1224_v35, %v6793_v42  ;;  %5460 = vmatprep.mubr.msk.bf16.mxu0 %vm880_vm3, %v3347_v39  ;;  %v3364_v55 = vshrl.u32 %v5599_v27, 16  ;;  %v3372_v39 = vshrl.u32 %v5600_v10, 16  ;;  %v6920_v35 = vpop.permute.xlu1 %3933 }
 0x149   : > { %v5217_v41 = vpop.f32.mrf.mxu1  ;;  %v1722_v31 = vpop.f32.mrf.mxu0  ;;  %v3370_v7 = vrot.slane %v3368_v53, 1  ;;  %7955 = vst [vmem:[#allocation9_spill] sm:$0xff] %v6920_v35 }
 0x14a   : > { %v6904_v59 = vadd.f32 %v1706_v33, %v1225_v20  ;;  %v1236_v14 = vadd.f32 %v5217_v41, %v6795_v6  ;;  %v3363_v33 = vsel %vm2602_vm4, %v3358_v0, %v3362_v4  ;;  %v3366_v48 = vor.u32 %v3364_v55, %v3362_v4 }
 0x14b   : > { %v1227_v51 = vpop.f32.mrf.mxu1  ;;  %v5255_v25 = vpop.f32.mrf.mxu0  ;;  %v3374_v20 = vor.u32 %v3372_v39, %v3370_v7 }
 0x14c   : > { %v6907_v13 = vadd.f32 %v5251_v58, %v1236_v14  ;;  %v1228_v42 = vadd.f32 %v1227_v51, %v6806_v50  ;;  %v3371_v14 = vsel %vm2602_vm4, %v3366_v48, %v3370_v7 }
 0x14d   : > { %v5220_v56 = vpop.f32.mrf.mxu1  ;;  %5423 = vmatmul.mubr.msk.bf16.gmra.mxu1 %vm880_vm3, %v6661_v9  ;;  %v1725_v32 = vpop.f32.mrf.mxu0 }
 0x14e   : > { %v6914_v6 = vadd.f32 %v1709_v23, %v1228_v42  ;;  %v1249_v27 = vadd.f32 %v5220_v56, %v6651_v62  ;;  %5426 = vmatprep.mubr.msk.bf16.mxu1 %vm880_vm3, %v6682_v29  ;;  %v5603_v23 = vld [vmem:[#allocation2 + $0x94] ss:$0 sps:$4 sm:$0x11]  }
 0x14f   : > { %v1240_v58 = vpop.f32.mrf.mxu1  ;;  %v5258_v50 = vpop.f32.mrf.mxu0  ;;  %5461 = vmatmul.mubr.msk.bf16.gmra.mxu0 %vm880_vm3, %v3355_v60  ;;  %v3384_v55 = vshll.u32 %v5603_v23, 16 }
 0x150   : > { %v6922_v9 = vadd.f32 %v5254_v12, %v1249_v27  ;;  %v1241_v44 = vadd.f32 %v1240_v58, %v6671_v57  ;;  %5464 = vmatprep.mubr.msk.bf16.mxu0 %vm880_vm3, %v3363_v33  ;;  %v3380_v57 = vshrl.u32 %v5601_v28, 16  ;;  %v6936_v60 = vpop.permute.xlu1 %3731 }
 0x151   : > { %v5221_v10 = vpop.f32.mrf.mxu1  ;;  %v1738_v62 = vpop.f32.mrf.mxu0  ;;  %v3386_v36 = vrot.slane %v3384_v55, 1 }
 0x152   : > { %v6926_v29 = vadd.f32 %v1722_v31, %v1241_v44  ;;  %v1252_v41 = vadd.f32 %v5221_v10, %v6679_v5  ;;  %v3379_v31 = vsel %vm2602_vm4, %v3374_v20, %v3378_v43  ;;  %v3382_v39 = vor.u32 %v3380_v57, %v3378_v43 }
 0x153   : > { %v1243_v0 = vpop.f32.mrf.mxu1  ;;  %v5259_v4 = vpop.f32.mrf.mxu0 }
 0x154   : > { %7956 = vst [vmem:[#allocation23_spill] sm:$0xff] %v6926_v29  ;;  %v6930_v51 = vadd.f32 %v5255_v25, %v1252_v41  ;;  %v1244_v12 = vadd.f32 %v1243_v0, %v6699_v21  ;;  %v5602_v25 = vld [vmem:[#allocation2 + $0x84] ss:$0 sps:$4 sm:$0x11]   ;;  %v6951_v44 = vpop.permute.xlu1 %3736 }
 0x155   : > { %v5224_v53 = vpop.f32.mrf.mxu1  ;;  %5427 = vmatmul.mubr.msk.bf16.gmra.mxu1 %vm880_vm3, %v6689_v38  ;;  %v1741_v42 = vpop.f32.mrf.mxu0 }
 0x156   : > { %7957 = vst [vmem:[#allocation24_spill] sm:$0xff] %v6930_v51  ;;  %v6938_v5 = vadd.f32 %v1725_v32, %v1244_v12  ;;  %v1265_v56 = vadd.f32 %v5224_v53, %v6707_v17  ;;  %5430 = vmatprep.mubr.msk.bf16.mxu1 %vm880_vm3, %v6710_v30  ;;  %v2964_v30 = vshll.u32 %v5602_v25, 16 }
 0x157   : > { %v1256_v21 = vpop.f32.mrf.mxu1  ;;  %v5262_v28 = vpop.f32.mrf.mxu0  ;;  %5465 = vmatmul.mubr.msk.bf16.gmra.mxu0 %vm880_vm3, %v3371_v14  ;;  %v7964_v14 = vld [vmem:[#allocation5_spill] sm:$0xff] }
 0x158   : > { %7958 = vst [vmem:[#allocation25_spill] sm:$0xff] %v6938_v5  ;;  %v6944_v33 = vadd.f32 %v5258_v50, %v1265_v56  ;;  %v1257_v38 = vadd.f32 %v1256_v21, %v6729_v15  ;;  %5468 = vmatprep.mubr.msk.bf16.mxu0 %vm880_vm3, %v3379_v31  ;;  %v3387_v15 = vsel %vm2602_vm4, %v3382_v39, %v3386_v36  ;;  %v2966_v41 = vrot.slane %v2964_v30, 1  ;;  %v6970_v55 = vpop.permute.xlu1 %3941  ;;  %v7968_v31 = vld [vmem:[#allocation17_spill] sm:$0xff] }
 0x159   : > { %v5225_v32 = vpop.f32.mrf.mxu1  ;;  %v1754_v27 = vpop.f32.mrf.mxu0  ;;  %7965 = vst [vmem:[#allocation5_spill] sm:$0xff] %v6970_v55 }
 0x15a   : > { %7959 = vst [vmem:[#allocation26_spill] sm:$0xff] %v6944_v33  ;;  %v6948_v58 = vadd.f32 %v1738_v62, %v1257_v38  ;;  %v1268_v17 = vadd.f32 %v5225_v32, %v6737_v45  ;;  %v6959_v62 = vpop.permute.xlu0 %3666 }
 0x15b   : > { %v1259_v48 = vpop.f32.mrf.mxu1  ;;  %v5263_v7 = vpop.f32.mrf.mxu0 }
 0x15c   : > { %7960 = vst [vmem:[#allocation27_spill] sm:$0xff] %v6948_v58  ;;  %v6953_v23 = vadd.f32 %v5259_v4, %v1268_v17  ;;  %v1260_v50 = vadd.f32 %v1259_v48, %v6756_v37 }
 0x15d   : > { %v5228_v10 = vpop.f32.mrf.mxu1  ;;  %5431 = vmatmul.mubr.msk.bf16.gmra.mxu1 %vm880_vm3, %v6717_v52  ;;  %v1757_v20 = vpop.f32.mrf.mxu0 }
 0x15e   : > { %7961 = vst [vmem:[#allocation28_spill] sm:$0xff] %v6953_v23  ;;  %v6961_v43 = vadd.f32 %v1741_v42, %v1260_v50  ;;  %v1281_v45 = vadd.f32 %v5228_v10, %v6767_v8  ;;  %5434 = vmatprep.mubr.msk.bf16.mxu1 %vm880_vm3, %v6742_v2  ;;  %v7967_v42 = vld [vmem:[#allocation21_spill] sm:$0xff]  ;;  %v2967_v2 = vsel %vm2602_vm4, %v7968_v31, %v2966_v41  ;;  %v6977_v21 = vpop.permute.xlu0 %3671 }
 0x15f   : > { %v1272_v0 = vpop.f32.mrf.mxu1  ;;  %v5266_v4 = vpop.f32.mrf.mxu0  ;;  %5469 = vmatmul.mubr.msk.bf16.gmra.mxu0 %vm880_vm3, %v3387_v15 }
 0x160   : > { %7962 = vst [vmem:[#allocation29_spill] sm:$0xff] %v6961_v43  ;;  %v6967_v37 = vadd.f32 %v5262_v28, %v1281_v45  ;;  %v1273_v12 = vadd.f32 %v1272_v0, %v7964_v14  ;;  %v7970_v28 = vld [vmem:[#allocation22_spill] sm:$0xff]  ;;  %v6986_v15 = vpop.permute.xlu1 %3945 }
 0x161   : > { %v5229_v52 = vpop.f32.mrf.mxu1  ;;  %v1770_v57 = vpop.f32.mrf.mxu0  ;;  %7973 = vst [vmem:[#allocation22_spill] sm:$0xff] %v6986_v15  ;;  %v7975_v45 = vld [vmem:[#allocation10_spill] sm:$0xff] }
 0x162   : > { %7963 = vst [vmem:[#allocation30_spill] sm:$0xff] %v6967_v37  ;;  %v6972_v53 = vadd.f32 %v1754_v27, %v1273_v12  ;;  %v1284_v8 = vadd.f32 %v5229_v52, %v7967_v42  ;;  %v7972_v27 = vld [vmem:[#allocation6_spill] sm:$0xff]  ;;  %v6991_v14 = vpop.permute.xlu0 %3686  ;;  %v7977_v52 = vld [vmem:[#allocation12_spill] sm:$0xff] }
 0x163   : > { %v1275_v56 = vpop.f32.mrf.mxu1  ;;  %v5267_v25 = vpop.f32.mrf.mxu0 }
 0x164   : > { %7966 = vst [vmem:[#allocation31_spill] sm:$0xff] %v6972_v53  ;;  %v6979_v38 = vadd.f32 %v5263_v7, %v1284_v8  ;;  %v1276_v39 = vadd.f32 %v1275_v56, %v7970_v28 }
 0x165   : > { %v5232_v36 = vpop.f32.mrf.mxu1  ;;  %5435 = vmatmul.mubr.msk.bf16.gmra.mxu1 %vm880_vm3, %v2967_v2  ;;  %v1773_v32 = vpop.f32.mrf.mxu0  ;;  %v7979_v2 = vld [vmem:[#allocation18_spill] sm:$0xff] }
 0x166   : > { %7969 = vst [vmem:[#allocation21_spill] sm:$0xff] %v6979_v38  ;;  %v6983_v17 = vadd.f32 %v1757_v20, %v1276_v39  ;;  %v1297_v30 = vadd.f32 %v5232_v36, %v7972_v27 }
 0x167   : > { %v1288_v48 = vpop.f32.mrf.mxu1  ;;  %v5306_v50 = vpop.f32.mrf.mxu0 }
 0x168   : > { %7971 = vst [vmem:[#allocation17_spill] sm:$0xff] %v6983_v17  ;;  %v6988_v10 = vadd.f32 %v5266_v4, %v1297_v30  ;;  %v1289_v41 = vadd.f32 %v1288_v48, %v7975_v45  ;;  %v6999_v4 = vpop.permute.xlu1 %3746 }
 0x169   : > { %v5233_v7 = vpop.f32.mrf.mxu1  ;;  %v2090_v0 = vpop.f32.mrf.mxu0  ;;  %7980 = vst [vmem:[#allocation18_spill] sm:$0xff] %v6999_v4 }
 0x16a   : > { %7974 = vst [vmem:[#allocation6_spill] sm:$0xff] %v6988_v10  ;;  %v6993_v12 = vadd.f32 %v1770_v57, %v1289_v41  ;;  %v1300_v42 = vadd.f32 %v5233_v7, %v7977_v52  ;;  %v7005_v57 = vpop.permute.xlu0 %3696 }
 0x16b   : > { %v1291_v20 = vpop.f32.mrf.mxu1  ;;  %v5307_v8 = vpop.f32.mrf.mxu0 }
 0x16c   : > { %7976 = vst [vmem:[#allocation10_spill] sm:$0xff] %v6993_v12  ;;  %v6996_v31 = vadd.f32 %v5267_v25, %v1300_v42  ;;  %v1292_v56 = vadd.f32 %v1291_v20, %v7979_v2  ;;  %v7011_v20 = vpop.permute.xlu1 %3751 }
 0x16d   : > { %v5272_v28 = vpop.f32.mrf.mxu1  ;;  %v2093_v39 = vpop.f32.mrf.mxu0  ;;  %7982 = vst [vmem:[#allocation33_spill] sm:$0xff] %v7011_v20 }
 0x16e   : > { %7978 = vst [vmem:[#allocation12_spill] sm:$0xff] %v6996_v31  ;;  %v7001_v36 = vadd.f32 %v1773_v32, %v1292_v56  ;;  %v7003_v27 = vadd.f32 %v5306_v50, %v5272_v28  ;;  %v7015_v50 = vpop.permute.xlu0 %3706 }
 0x16f   : > { %v1922_v30 = vpop.f32.mrf.mxu1  ;;  %v5310_v48 = vpop.f32.mrf.mxu0 }
 0x170   : > { %7981 = vst [vmem:[#allocation32_spill] sm:$0xff] %v7001_v36  ;;  %v7007_v45 = vadd.f32 %v2090_v0, %v1922_v30 }
 0x171   : > { %v5273_v41 = vpop.f32.mrf.mxu1  ;;  %v2106_v7 = vpop.f32.mrf.mxu0 }
 0x172   : > { %v7009_v25 = vadd.f32 %v5307_v8, %v5273_v41  ;;  %v7021_v8 = vpop.permute.xlu1 %3953 }
 0x173   : > { %v1925_v52 = vpop.f32.mrf.mxu1  ;;  %v5311_v42 = vpop.f32.mrf.mxu0  ;;  %7983 = vst [vmem:[#allocation34_spill] sm:$0xff] %v7021_v8 }
 0x174   : > { %v7013_v2 = vadd.f32 %v2093_v39, %v1925_v52  ;;  %v7025_v39 = vpop.permute.xlu0 %3711 }
 0x175   : > { %v5276_v32 = vpop.f32.mrf.mxu1  ;;  %v2109_v56 = vpop.f32.mrf.mxu0 }
 0x176   : > { %v7017_v28 = vadd.f32 %v5310_v48, %v5276_v32 }
 0x177   : > { %v1938_v55 = vpop.f32.mrf.mxu1  ;;  %v5314_v15 = vpop.f32.mrf.mxu0 }
 0x178   : > { %v7019_v0 = vadd.f32 %v2106_v7, %v1938_v55  ;;  %v7031_v55 = vpop.permute.xlu1 %3957 }
 0x179   : > { %v5277_v30 = vpop.f32.mrf.mxu1  ;;  %v2122_v35 = vpop.f32.mrf.mxu0  ;;  %7984 = vst [vmem:[#allocation35_spill] sm:$0xff] %v7031_v55 }
 0x17a   : > { %v7023_v41 = vadd.f32 %v5311_v42, %v5277_v30  ;;  %v7035_v42 = vpop.permute.xlu0 %3726 }
 0x17b   : > { %v1941_v16 = vpop.f32.mrf.mxu1  ;;  %v5315_v40 = vpop.f32.mrf.mxu0 }
 0x17c   : > { %v7027_v52 = vadd.f32 %v2109_v56, %v1941_v16 }
 0x17d   : > { %v5280_v36 = vpop.f32.mrf.mxu1  ;;  %v2125_v31 = vpop.f32.mrf.mxu0 }
 0x17e   : > { %v7029_v48 = vadd.f32 %v5314_v15, %v5280_v36  ;;  %v7041_v15 = vpop.permute.xlu1 %3761 }
 0x17f   : > { %v1954_v32 = vpop.f32.mrf.mxu1  ;;  %v5318_v12 = vpop.f32.mrf.mxu0  ;;  %7985 = vst [vmem:[#allocation36_spill] sm:$0xff] %v7041_v15 }
 0x180   : > { %v7033_v7 = vadd.f32 %v2122_v35, %v1954_v32  ;;  %v7045_v35 = vpop.permute.xlu0 %3741 }
 0x181   : > { %v5281_v10 = vpop.f32.mrf.mxu1  ;;  %v2138_v8 = vpop.f32.mrf.mxu0 }
 0x182   : > { %v7037_v30 = vadd.f32 %v5315_v40, %v5281_v10 }
 0x183   : > { %v1957_v17 = vpop.f32.mrf.mxu1  ;;  %v5319_v38 = vpop.f32.mrf.mxu0 }
 0x184   : > { %v7039_v16 = vadd.f32 %v2125_v31, %v1957_v17  ;;  %v7051_v17 = vpop.permute.xlu1 %3766 }
 0x185   : > { %v5284_v56 = vpop.f32.mrf.mxu1  ;;  %v2141_v53 = vpop.f32.mrf.mxu0  ;;  %7986 = vst [vmem:[#allocation37_spill] sm:$0xff] %v7051_v17 }
 0x186   : > { %v7043_v36 = vadd.f32 %v5318_v12, %v5284_v56  ;;  %v7055_v12 = vpop.permute.xlu0 %3756 }
 0x187   : > { %v1970_v37 = vpop.f32.mrf.mxu1  ;;  %v5322_v55 = vpop.f32.mrf.mxu0  ;;  %7987 = vst [vmem:[#allocation38_spill] sm:$0xff] %v7055_v12 }
 0x188   : > { %v7047_v32 = vadd.f32 %v2138_v8, %v1970_v37 }
 0x189   : > { %v5285_v43 = vpop.f32.mrf.mxu1  ;;  %v2154_v23 = vpop.f32.mrf.mxu0 }
 0x18a   : > { %v7049_v40 = vadd.f32 %v5319_v38, %v5285_v43  ;;  %v7061_v43 = vpop.permute.xlu1 %3965 }
 0x18b   : > { %v1973_v10 = vpop.f32.mrf.mxu1  ;;  %v5323_v58 = vpop.f32.mrf.mxu0  ;;  %7990 = vst [vmem:[#allocation41_spill] sm:$0xff] %v7061_v43 }
 0x18c   : > { %v7053_v31 = vadd.f32 %v2141_v53, %v1973_v10  ;;  %v7065_v53 = vpop.permute.xlu0 %3893 }
 0x18d   : > { %v5288_v33 = vpop.f32.mrf.mxu1  ;;  %v2157_v20 = vpop.f32.mrf.mxu0  ;;  %7992 = vst [vmem:[#allocation43_spill] sm:$0xff] %v7065_v53 }
 0x18e   : > { %v7057_v56 = vadd.f32 %v5322_v55, %v5288_v33 }
 0x18f   : > { %v1986_v5 = vpop.f32.mrf.mxu1  ;;  %v5326_v15 = vpop.f32.mrf.mxu0 }
 0x190   : > { %7988 = vst [vmem:[#allocation39_spill] sm:$0xff] %v7057_v56  ;;  %v7059_v37 = vadd.f32 %v2154_v23, %v1986_v5  ;;  %v7071_v5 = vpop.permute.xlu1 %3969 }
 0x191   : > { %v5289_v8 = vpop.f32.mrf.mxu1  ;;  %v2170_v51 = vpop.f32.mrf.mxu0  ;;  %7995 = vst [vmem:[#allocation46_spill] sm:$0xff] %v7071_v5 }
 0x192   : > { %7989 = vst [vmem:[#allocation40_spill] sm:$0xff] %v7059_v37  ;;  %v7063_v38 = vadd.f32 %v5323_v58, %v5289_v8  ;;  %v7075_v58 = vpop.permute.xlu0 %3905 }
 0x193   : > { %v1989_v4 = vpop.f32.mrf.mxu1  ;;  %v5327_v17 = vpop.f32.mrf.mxu0  ;;  %7997 = vst [vmem:[#allocation48_spill] sm:$0xff] %v7075_v58 }
 0x194   : > { %7991 = vst [vmem:[#allocation42_spill] sm:$0xff] %v7063_v38  ;;  %v7067_v10 = vadd.f32 %v2157_v20, %v1989_v4 }
 0x195   : > { %v5292_v29 = vpop.f32.mrf.mxu1  ;;  %v2173_v12 = vpop.f32.mrf.mxu0 }
 0x196   : > { %7993 = vst [vmem:[#allocation44_spill] sm:$0xff] %v7067_v10  ;;  %v7069_v33 = vadd.f32 %v5326_v15, %v5292_v29  ;;  %v7081_v29 = vpop.permute.xlu1 %3776 }
 0x197   : > { %v2002_v55 = vpop.f32.mrf.mxu1  ;;  %v5330_v56 = vpop.f32.mrf.mxu0  ;;  %8000 = vst [vmem:[#allocation51_spill] sm:$0xff] %v7081_v29 }
 0x198   : > { %7994 = vst [vmem:[#allocation45_spill] sm:$0xff] %v7069_v33  ;;  %v7073_v23 = vadd.f32 %v2170_v51, %v2002_v55  ;;  %v7085_v51 = vpop.permute.xlu0 %3913 }
 0x199   : > { %v5293_v37 = vpop.f32.mrf.mxu1  ;;  %v2186_v43 = vpop.f32.mrf.mxu0  ;;  %8002 = vst [vmem:[#allocation53_spill] sm:$0xff] %v7085_v51 }
 0x19a   : > { %7996 = vst [vmem:[#allocation47_spill] sm:$0xff] %v7073_v23  ;;  %v7077_v8 = vadd.f32 %v5327_v17, %v5293_v37 }
 0x19b   : > { %v2005_v38 = vpop.f32.mrf.mxu1  ;;  %v5331_v53 = vpop.f32.mrf.mxu0 }
 0x19c   : > { %7998 = vst [vmem:[#allocation49_spill] sm:$0xff] %v7077_v8  ;;  %v7079_v4 = vadd.f32 %v2173_v12, %v2005_v38  ;;  %v7091_v12 = vpop.permute.xlu1 %3781 }
 0x19d   : > { %v5296_v20 = vpop.f32.mrf.mxu1  ;;  %v2189_v10 = vpop.f32.mrf.mxu0 }
 0x19e   : > { %7999 = vst [vmem:[#allocation50_spill] sm:$0xff] %v7079_v4  ;;  %v7083_v15 = vadd.f32 %v5330_v56, %v5296_v20  ;;  %v7095_v56 = vpop.permute.xlu0 %3925 }
 0x19f   : > { %v2018_v33 = vpop.f32.mrf.mxu1  ;;  %v5334_v5 = vpop.f32.mrf.mxu0  ;;  %8005 = vst [vmem:[#allocation56_spill] sm:$0xff] %v7095_v56 }
 0x1a0   : > { %8001 = vst [vmem:[#allocation52_spill] sm:$0xff] %v7083_v15  ;;  %v7087_v55 = vadd.f32 %v2186_v43, %v2018_v33 }
 0x1a1   : > { %v5297_v23 = vpop.f32.mrf.mxu1  ;;  %v2202_v58 = vpop.f32.mrf.mxu0 }
 0x1a2   : > { %v7089_v17 = vadd.f32 %v5331_v53, %v5297_v23  ;;  %v7105_v23 = vpop.permute.xlu1 %3977 }
 0x1a3   : > { %v2021_v37 = vpop.f32.mrf.mxu1  ;;  %v5335_v8 = vpop.f32.mrf.mxu0  ;;  %8009 = vst [vmem:[#allocation60_spill] sm:$0xff] %v7105_v23 }
 0x1a4   : > { %8003 = vst [vmem:[#allocation54_spill] sm:$0xff] %v7089_v17  ;;  %v7093_v38 = vadd.f32 %v2189_v10, %v2021_v37 }
 0x1a5   : > { %v5300_v4 = vpop.f32.mrf.mxu1  ;;  %v2205_v29 = vpop.f32.mrf.mxu0 }
 0x1a6   : > { %8004 = vst [vmem:[#allocation55_spill] sm:$0xff] %v7093_v38  ;;  %v7097_v20 = vadd.f32 %v5334_v5, %v5300_v4  ;;  %v7111_v38 = vpop.permute.xlu0 %3937 }
 0x1a7   : > { %v2034_v15 = vpop.f32.mrf.mxu1  ;;  %v7099_v51 = vpop.f32.mrf.mxu0  ;;  %8010 = vst [vmem:[#allocation61_spill] sm:$0xff] %v7111_v38 }
 0x1a8   : > { %8006 = vst [vmem:[#allocation57_spill] sm:$0xff] %v7099_v51  ;;  %v7101_v43 = vadd.f32 %v2202_v58, %v2034_v15  ;;  %v8012_v58 = vld [vmem:[#allocation14_spill] sm:$0xff] }
 0x1a9   : > { %v5301_v33 = vpop.f32.mrf.mxu1  ;;  %v7103_v53 = vpop.f32.mrf.mxu0  ;;  %v3826_v15 = vmul.f32 %v8012_v58, %v6830_v3 }
 0x1aa   : > { %8007 = vst [vmem:[#allocation58_spill] sm:$0xff] %v7101_v43  ;;  %8008 = vst [vmem:[#allocation59_spill] sm:$0xff] %v7103_v53  ;;  %v7107_v17 = vadd.f32 %v5335_v8, %v5301_v33  ;;  %v3824_v8 = vmul.f32 %v6959_v62, %v6836_v61  ;;  %v7124_v33 = vpop.permute.xlu1 %3981  ;;  %v7133_v58 = vpop.permute.xlu0 %3949  ;;  %v3825_v62 = vmul.f32 %v6977_v21, %v6846_v22 }
 0x1ab   : > { %v2037_v10 = vpop.f32.mrf.mxu1  ;;  %v7109_v37 = vpop.f32.mrf.mxu0  ;;  %8014 = vst [vmem:[#allocation63_spill] sm:$0xff] %v7124_v33  ;;  %v3828_v22 = vmul.f32 %v6991_v14, %v6858_v11  ;;  %v8017_v11 = vld [vmem:[#allocation16_spill] sm:$0xff] }
 0x1ac   : > { %v7113_v56 = vadd.f32 %v2205_v29, %v2037_v10  ;;  %v3829_v14 = vmul.f32 %v8017_v11, %v6870_v49 }
 0x1ad   : > { %v5340_v5 = vpop.f32.mrf.mxu1  ;;  %v7115_v4 = vpop.f32.mrf.mxu0 }
 0x1ae   : > { %8011 = vst [vmem:[#allocation62_spill] sm:$0xff] %v7115_v4  ;;  %v2449_v51 = vadd.f32 %v5340_v5, %v7003_v27  ;;  %v8015_v4 = vld [vmem:[#allocation13_spill] sm:$0xff]  ;;  %v7158_v21 = vpop.permute.xlu0 %3961 }
 0x1af   : > { %v2320_v53 = vpop.f32.mrf.mxu1  ;;  %v7120_v43 = vpop.f32.mrf.mxu0  ;;  %v3827_v3 = vmul.f32 %v8015_v4, %v6839_v1  ;;  %v3830_v1 = vmul.f32 %v7005_v57, %v6854_v46  ;;  %v8016_v57 = vld [vmem:[#allocation15_spill] sm:$0xff] }
 0x1b0   : > { %8013 = vst [vmem:[#allocation14_spill] sm:$0xff] %v7120_v43  ;;  %v7126_v23 = vadd.f32 %v3826_v15, %v2449_v51  ;;  %v2447_v29 = vadd.f32 %v2320_v53, %v7007_v45  ;;  %v7149_v4 = vpop.permute.xlu1 %3791 }
 0x1b1   : > { %v5341_v10 = vpop.f32.mrf.mxu1  ;;  %v7129_v38 = vpop.f32.mrf.mxu0 }
 0x1b2   : > { %v7135_v27 = vadd.f32 %v3824_v8, %v2447_v29  ;;  %v2450_v5 = vadd.f32 %v5341_v10, %v7009_v25 }
 0x1b3   : > { %v2323_v43 = vpop.f32.mrf.mxu1  ;;  %v7138_v61 = vpop.f32.mrf.mxu0 }
 0x1b4   : > { %v7142_v51 = vadd.f32 %v3827_v3, %v2450_v5  ;;  %v2448_v45 = vadd.f32 %v2323_v43, %v7013_v2  ;;  %v3831_v5 = vmul.f32 %v8016_v57, %v6861_v47  ;;  %v3834_v47 = vmul.f32 %v6868_v26, %v6876_v18 }
 0x1b5   : > { %v5344_v53 = vpop.f32.mrf.mxu1  ;;  %v7145_v15 = vpop.f32.mrf.mxu0  ;;  %v3832_v57 = vmul.f32 %v7015_v50, %v6880_v54  ;;  %v3835_v26 = vmul.f32 %v6883_v34, %v6885_v24  ;;  %v3833_v54 = vmul.f32 %v7025_v39, %v6892_v63  ;;  %v3838_v24 = vmul.f32 %v6951_v44, %v6898_v19 }
 0x1b6   : > { %v7151_v8 = vadd.f32 %v3825_v62, %v2448_v45  ;;  %v2453_v25 = vadd.f32 %v5344_v53, %v7017_v28  ;;  %v3836_v63 = vmul.f32 %v7035_v42, %v6904_v59  ;;  %v3839_v19 = vmul.f32 %v7045_v35, %v6907_v13  ;;  %v8024_v13 = vld [vmem:[#allocation38_spill] sm:$0xff] }
 0x1b7   : > { %v2336_v29 = vpop.f32.mrf.mxu1  ;;  %v7154_v10 = vpop.f32.mrf.mxu0  ;;  %v3837_v42 = vmul.f32 %v6936_v60, %v6914_v6  ;;  %v3842_v35 = vmul.f32 %v8024_v13, %v6922_v9  ;;  %v8027_v6 = vld [vmem:[#allocation23_spill] sm:$0xff]  ;;  %v8028_v60 = vld [vmem:[#allocation18_spill] sm:$0xff]  ;;  %v8032_v9 = vld [vmem:[#allocation24_spill] sm:$0xff] }
 0x1b8   : > { %v7160_v2 = vadd.f32 %v3830_v1, %v2453_v25  ;;  %v2451_v43 = vadd.f32 %v2336_v29, %v7019_v0  ;;  %v7174_v1 = vpop.permute.xlu1 %3796  ;;  %v8033_v13 = vld [vmem:[#allocation36_spill] sm:$0xff] }
 0x1b9   : > { %v5345_v3 = vpop.f32.mrf.mxu1  ;;  %v7163_v46 = vpop.f32.mrf.mxu0 }
 0x1ba   : > { %v7167_v62 = vadd.f32 %v3828_v22, %v2451_v43  ;;  %v2454_v28 = vadd.f32 %v5345_v3, %v7023_v41  ;;  %v7183_v22 = vpop.permute.xlu0 %3973 }
 0x1bb   : > { %v2339_v45 = vpop.f32.mrf.mxu1  ;;  %v7170_v53 = vpop.f32.mrf.mxu0  ;;  %8018 = vst [vmem:[#allocation13_spill] sm:$0xff] %v7183_v22  ;;  %v8037_v22 = vld [vmem:[#allocation25_spill] sm:$0xff] }
 0x1bc   : > { %v7176_v25 = vadd.f32 %v3831_v5, %v2454_v28  ;;  %v2452_v0 = vadd.f32 %v2339_v45, %v7027_v52  ;;  %v7199_v18 = vpop.permute.xlu1 %3989 }
 0x1bd   : > { %v5348_v29 = vpop.f32.mrf.mxu1  ;;  %v7179_v33 = vpop.f32.mrf.mxu0  ;;  %8019 = vst [vmem:[#allocation15_spill] sm:$0xff] %v7199_v18 }
 0x1be   : > { %v7185_v41 = vadd.f32 %v3829_v14, %v2452_v0  ;;  %v2457_v43 = vadd.f32 %v5348_v29, %v7029_v48  ;;  %v7208_v50 = vpop.permute.xlu0 %3985 }
 0x1bf   : > { %v2352_v3 = vpop.f32.mrf.mxu1  ;;  %v7188_v49 = vpop.f32.mrf.mxu0  ;;  %8020 = vst [vmem:[#allocation16_spill] sm:$0xff] %v7208_v50 }
 0x1c0   : > { %v7192_v5 = vadd.f32 %v3834_v47, %v2457_v43  ;;  %v2455_v52 = vadd.f32 %v2352_v3, %v7033_v7  ;;  %v7224_v39 = vpop.permute.xlu1 %3993 }
 0x1c1   : > { %v5349_v28 = vpop.f32.mrf.mxu1  ;;  %v7195_v45 = vpop.f32.mrf.mxu0  ;;  %8021 = vst [vmem:[#allocation64_spill] sm:$0xff] %v7224_v39 }
 0x1c2   : > { %v7201_v11 = vadd.f32 %v3832_v57, %v2455_v52  ;;  %v2458_v48 = vadd.f32 %v5349_v28, %v7037_v30  ;;  %v7233_v44 = vpop.permute.xlu0 %3997 }
 0x1c3   : > { %v2355_v14 = vpop.f32.mrf.mxu1  ;;  %v7204_v0 = vpop.f32.mrf.mxu0  ;;  %8022 = vst [vmem:[#allocation65_spill] sm:$0xff] %v7233_v44 }
 0x1c4   : > { %v7210_v7 = vadd.f32 %v3835_v26, %v2458_v48  ;;  %v2456_v29 = vadd.f32 %v2355_v14, %v7039_v16 }
 0x1c5   : > { %v5352_v47 = vpop.f32.mrf.mxu1  ;;  %v7213_v34 = vpop.f32.mrf.mxu0 }
 0x1c6   : > { %v7217_v43 = vadd.f32 %v3833_v54, %v2456_v29  ;;  %v2461_v30 = vadd.f32 %v5352_v47, %v7043_v36 }
 0x1c7   : > { %v2368_v3 = vpop.f32.mrf.mxu1  ;;  %v7220_v57 = vpop.f32.mrf.mxu0 }
 0x1c8   : > { %v7226_v52 = vadd.f32 %v3838_v24, %v2461_v30  ;;  %v2459_v16 = vadd.f32 %v2368_v3, %v7047_v32  ;;  %v7249_v24 = vpop.permute.xlu1 %3806 }
 0x1c9   : > { %v5353_v28 = vpop.f32.mrf.mxu1  ;;  %v7229_v26 = vpop.f32.mrf.mxu0 }
 0x1ca   : > { %v7235_v36 = vadd.f32 %v3836_v63, %v2459_v16  ;;  %v2462_v48 = vadd.f32 %v5353_v28, %v7049_v40  ;;  %v8025_v40 = vld [vmem:[#allocation39_spill] sm:$0xff]  ;;  %v3840_v28 = vmul.f32 %v8028_v60, %v8027_v6  ;;  %v8038_v6 = vld [vmem:[#allocation33_spill] sm:$0xff] }
 0x1cb   : > { %v2371_v14 = vpop.f32.mrf.mxu1  ;;  %v7238_v59 = vpop.f32.mrf.mxu0  ;;  %v3841_v60 = vmul.f32 %v8038_v6, %v8037_v22  ;;  %v8046_v22 = vld [vmem:[#allocation27_spill] sm:$0xff]  ;;  %v8047_v6 = vld [vmem:[#allocation37_spill] sm:$0xff] }
 0x1cc   : > { %v7242_v54 = vadd.f32 %v3839_v19, %v2462_v48  ;;  %v2460_v32 = vadd.f32 %v2371_v14, %v7053_v31  ;;  %v3772_v19 = vpop.permute.xlu0 %3771  ;;  %v8030_v48 = vld [vmem:[#allocation40_spill] sm:$0xff] }
 0x1cd   : > { %v5356_v29 = vpop.f32.mrf.mxu1  ;;  %v7245_v47 = vpop.f32.mrf.mxu0 }
 0x1ce   : > { %8023 = vst [vmem:[#allocation66_spill] sm:$0xff] %v7245_v47  ;;  %v7251_v30 = vadd.f32 %v3837_v42, %v2460_v32  ;;  %v2465_v3 = vadd.f32 %v5356_v29, %v8025_v40  ;;  %v3843_v42 = vmul.f32 %v8033_v13, %v8032_v9  ;;  %v8035_v29 = vld [vmem:[#allocation42_spill] sm:$0xff] }
 0x1cf   : > { %v2384_v63 = vpop.f32.mrf.mxu1  ;;  %v7254_v16 = vpop.f32.mrf.mxu0  ;;  %v8042_v9 = vld [vmem:[#allocation26_spill] sm:$0xff] }
 0x1d0   : > { %8026 = vst [vmem:[#allocation38_spill] sm:$0xff] %v7254_v16  ;;  %v7258_v31 = vadd.f32 %v3842_v35, %v2465_v3  ;;  %v2463_v14 = vadd.f32 %v2384_v63, %v8030_v48  ;;  %v7272_v35 = vpop.permute.xlu1 %3811  ;;  %v8040_v63 = vld [vmem:[#allocation44_spill] sm:$0xff]  ;;  %v3787_v13 = vpop.permute.xlu0 %3786 }
 0x1d1   : > { %v5357_v18 = vpop.f32.mrf.mxu1  ;;  %v7261_v44 = vpop.f32.mrf.mxu0 }
 0x1d2   : > { %8029 = vst [vmem:[#allocation39_spill] sm:$0xff] %v7258_v31  ;;  %8031 = vst [vmem:[#allocation23_spill] sm:$0xff] %v7261_v44  ;;  %v7265_v32 = vadd.f32 %v3840_v28, %v2463_v14  ;;  %v2466_v40 = vadd.f32 %v5357_v18, %v8035_v29  ;;  %v8043_v28 = vld [vmem:[#allocation51_spill] sm:$0xff]  ;;  %v8044_v29 = vld [vmem:[#allocation45_spill] sm:$0xff] }
 0x1d3   : > { %v2387_v50 = vpop.f32.mrf.mxu1  ;;  %v7268_v39 = vpop.f32.mrf.mxu0  ;;  %v3846_v14 = vmul.f32 %v8043_v28, %v8042_v9  ;;  %v8051_v31 = vld [vmem:[#allocation28_spill] sm:$0xff] }
 0x1d4   : > { %8034 = vst [vmem:[#allocation18_spill] sm:$0xff] %v7265_v32  ;;  %8036 = vst [vmem:[#allocation40_spill] sm:$0xff] %v7268_v39  ;;  %v7274_v3 = vadd.f32 %v3843_v42, %v2466_v40  ;;  %v2464_v48 = vadd.f32 %v2387_v50, %v8040_v63  ;;  %v3844_v42 = vmul.f32 %v8047_v6, %v8046_v22  ;;  %v8049_v50 = vld [vmem:[#allocation47_spill] sm:$0xff]  ;;  %v8055_v22 = vld [vmem:[#allocation29_spill] sm:$0xff] }
 0x1d5   : > { %v5360_v44 = vpop.f32.mrf.mxu1  ;;  %v7277_v16 = vpop.f32.mrf.mxu0  ;;  %v3847_v9 = vmul.f32 %v7091_v12, %v8051_v31  ;;  %v8058_v12 = vld [vmem:[#allocation30_spill] sm:$0xff] }
 0x1d6   : > { %8039 = vst [vmem:[#allocation24_spill] sm:$0xff] %v7274_v3  ;;  %8041 = vst [vmem:[#allocation36_spill] sm:$0xff] %v7277_v16  ;;  %v7281_v18 = vadd.f32 %v3841_v60, %v2464_v48  ;;  %v2469_v39 = vadd.f32 %v5360_v44, %v8044_v29  ;;  %v7295_v60 = vpop.permute.xlu1 %4001  ;;  %v8053_v44 = vld [vmem:[#allocation49_spill] sm:$0xff]  ;;  %v3850_v31 = vmul.f32 %v7174_v1, %v8058_v12 }
 0x1d7   : > { %v2400_v32 = vpop.f32.mrf.mxu1  ;;  %v7284_v47 = vpop.f32.mrf.mxu0  ;;  %8052 = vst [vmem:[#allocation44_spill] sm:$0xff] %v7295_v60 }
 0x1d8   : > { %8045 = vst [vmem:[#allocation42_spill] sm:$0xff] %v7284_v47  ;;  %v7288_v40 = vadd.f32 %v3846_v14, %v2469_v39  ;;  %v2467_v63 = vadd.f32 %v2400_v32, %v8049_v50  ;;  %v3845_v39 = vmul.f32 %v3772_v19, %v8055_v22  ;;  %v3802_v14 = vpop.permute.xlu0 %3801  ;;  %v8056_v32 = vld [vmem:[#allocation50_spill] sm:$0xff] }
 0x1d9   : > { %v5361_v3 = vpop.f32.mrf.mxu1  ;;  %v7291_v16 = vpop.f32.mrf.mxu0 }
 0x1da   : > { %8048 = vst [vmem:[#allocation25_spill] sm:$0xff] %v7288_v40  ;;  %8050 = vst [vmem:[#allocation33_spill] sm:$0xff] %v7291_v16  ;;  %v7297_v48 = vadd.f32 %v3844_v42, %v2467_v63  ;;  %v2470_v28 = vadd.f32 %v5361_v3, %v8053_v44  ;;  %v8059_v63 = vld [vmem:[#allocation52_spill] sm:$0xff]  ;;  %v7316_v22 = vpop.permute.xlu1 %4005 }
 0x1db   : > { %v2403_v29 = vpop.f32.mrf.mxu1  ;;  %v7300_v47 = vpop.f32.mrf.mxu0  ;;  %8062 = vst [vmem:[#allocation27_spill] sm:$0xff] %v7316_v22 }
 0x1dc   : > { %8054 = vst [vmem:[#allocation26_spill] sm:$0xff] %v7300_v47  ;;  %v7303_v6 = vadd.f32 %v3847_v9, %v2470_v28  ;;  %v2468_v50 = vadd.f32 %v2403_v29, %v8056_v32  ;;  %v8061_v47 = vld [vmem:[#allocation31_spill] sm:$0xff] }
 0x1dd   : > { %v5364_v16 = vpop.f32.mrf.mxu1  ;;  %v7306_v40 = vpop.f32.mrf.mxu0  ;;  %v3848_v19 = vmul.f32 %v3787_v13, %v8061_v47  ;;  %v8068_v47 = vld [vmem:[#allocation17_spill] sm:$0xff] }
 0x1de   : > { %8057 = vst [vmem:[#allocation51_spill] sm:$0xff] %v7306_v40  ;;  %v7310_v42 = vadd.f32 %v3845_v39, %v2468_v50  ;;  %v2473_v3 = vadd.f32 %v5364_v16, %v8059_v63  ;;  %v8064_v40 = vld [vmem:[#allocation21_spill] sm:$0xff]  ;;  %v3817_v39 = vpop.permute.xlu0 %3816  ;;  %v8066_v16 = vld [vmem:[#allocation54_spill] sm:$0xff]  ;;  %v3849_v13 = vmul.f32 %v7149_v4, %v8068_v47 }
 0x1df   : > { %v2416_v44 = vpop.f32.mrf.mxu1  ;;  %v7313_v60 = vpop.f32.mrf.mxu0  ;;  %v3851_v1 = vmul.f32 %v3802_v14, %v8064_v40 }
 0x1e0   : > { %8060 = vst [vmem:[#allocation45_spill] sm:$0xff] %v7313_v60  ;;  %v7318_v9 = vadd.f32 %v3850_v31, %v2473_v3  ;;  %v2471_v28 = vadd.f32 %v2416_v44, %v7087_v55  ;;  %v8070_v3 = vld [vmem:[#allocation55_spill] sm:$0xff]  ;;  %v3822_v14 = vpop.permute.xlu1 %3821 }
 0x1e1   : > { %v5365_v29 = vpop.f32.mrf.mxu1  ;;  %v7321_v32 = vpop.f32.mrf.mxu0 }
 0x1e2   : > { %8063 = vst [vmem:[#allocation37_spill] sm:$0xff] %v7321_v32  ;;  %v7324_v50 = vadd.f32 %v3848_v19, %v2471_v28  ;;  %v2474_v12 = vadd.f32 %v5365_v29, %v8066_v16  ;;  %v8072_v32 = vld [vmem:[#allocation6_spill] sm:$0xff] }
 0x1e3   : > { %v2419_v63 = vpop.f32.mrf.mxu1  ;;  %v7327_v60 = vpop.f32.mrf.mxu0  ;;  %v3854_v40 = vmul.f32 %v3817_v39, %v8072_v32 }
 0x1e4   : > { %8065 = vst [vmem:[#allocation47_spill] sm:$0xff] %v7324_v50  ;;  %8067 = vst [vmem:[#allocation28_spill] sm:$0xff] %v7327_v60  ;;  %v7331_v31 = vadd.f32 %v3851_v1, %v2474_v12  ;;  %v2472_v55 = vadd.f32 %v2419_v63, %v8070_v3  ;;  %v8073_v60 = vld [vmem:[#allocation10_spill] sm:$0xff]  ;;  %v8076_v3 = vld [vmem:[#allocation12_spill] sm:$0xff] }
 0x1e5   : > { %v5368_v44 = vpop.f32.mrf.mxu1  ;;  %v7334_v22 = vpop.f32.mrf.mxu0  ;;  %v3852_v50 = vmul.f32 %v7249_v24, %v8073_v60  ;;  %v8075_v1 = vld [vmem:[#allocation58_spill] sm:$0xff] }
 0x1e6   : > { %8069 = vst [vmem:[#allocation49_spill] sm:$0xff] %v7331_v31  ;;  %8071 = vst [vmem:[#allocation29_spill] sm:$0xff] %v7334_v22  ;;  %v7337_v19 = vadd.f32 %v3849_v13, %v2472_v55  ;;  %v2477_v28 = vadd.f32 %v5368_v44, %v7097_v20  ;;  %v3855_v22 = vmul.f32 %v3822_v14, %v8076_v3  ;;  %v8078_v20 = vld [vmem:[#allocation32_spill] sm:$0xff] }
 0x1e7   : > { %v2432_v29 = vpop.f32.mrf.mxu1  ;;  %v5442_v16 = vpop.f32.mrf.mxu0  ;;  %v3853_v55 = vmul.f32 %v7272_v35, %v8078_v20 }
 0x1e8   : > { %v7342_v4 = vadd.f32 %v3854_v40, %v2477_v28  ;;  %v2475_v12 = vadd.f32 %v2432_v29, %v8075_v1  ;;  %v8080_v29 = vld [vmem:[#allocation57_spill] sm:$0xff] }
 0x1e9   : > { %v5369_v63 = vpop.f32.mrf.mxu1  ;;  %v3473_v47 = vpop.f32.mrf.mxu0 }
 0x1ea   : > { %8074 = vst [vmem:[#allocation50_spill] sm:$0xff] %v7342_v4  ;;  %v7346_v31 = vadd.f32 %v3852_v50, %v2475_v12  ;;  %v2478_v32 = vadd.f32 %v5369_v63, %v7107_v17  ;;  %v8081_v17 = vld [vmem:[#allocation59_spill] sm:$0xff]  ;;  %v8082_v4 = vld [vmem:[#allocation20_spill] sm:$0xff] }
 0x1eb   : > { %v2435_v39 = vpop.f32.mrf.mxu1  ;;  %v5443_v13 = vpop.f32.mrf.mxu0 }
 0x1ec   : > { %8077 = vst [vmem:[#allocation30_spill] sm:$0xff] %v7346_v31  ;;  %v7351_v44 = vadd.f32 %v3855_v22, %v2478_v32  ;;  %v2476_v24 = vadd.f32 %v2435_v39, %v7113_v56 }
 0x1ed   : > { %v5408_v60 = vpop.f32.mrf.mxu1  ;;  %v3476_v40 = vpop.f32.mrf.mxu0 }
 0x1ee   : > { %v7354_v28 = vadd.f32 %v3853_v55, %v2476_v24  ;;  %v3020_v1 = vadd.f32 %v5408_v60, %v8080_v29  ;;  %v8083_v55 = vld [vmem:[#allocation4_spill] sm:$0xff]  ;;  %v8084_v29 = vld [vmem:[#allocation62_spill] sm:$0xff] }
 0x1ef   : > { %v3011_v50 = vpop.f32.mrf.mxu1  ;;  %v5446_v14 = vpop.f32.mrf.mxu0 }
 0x1f0   : > { %8079 = vst [vmem:[#allocation52_spill] sm:$0xff] %v7354_v28  ;;  %v3602_v12 = vadd.f32 %v5442_v16, %v3020_v1  ;;  %v3012_v63 = vadd.f32 %v3011_v50, %v8081_v17  ;;  %v8086_v50 = vld [vmem:[#allocation14_spill] sm:$0xff] }
 0x1f1   : > { %v5409_v3 = vpop.f32.mrf.mxu1  ;;  %v3489_v31 = vpop.f32.mrf.mxu0 }
 0x1f2   : > { %v4018_v35 = vmul.f32 %v8082_v4, %v3602_v12  ;;  %v3600_v22 = vadd.f32 %v3473_v47, %v3012_v63  ;;  %v3023_v32 = vadd.f32 %v5409_v3, %v7109_v37  ;;  %v8085_v47 = vld [vmem:[#allocation7_spill] sm:$0xff] }
 0x1f3   : > { %v3014_v56 = vpop.f32.mrf.mxu1  ;;  %v5447_v39 = vpop.f32.mrf.mxu0 }
 0x1f4   : > { %v7361_v20 = vadd.f32 %v4018_v35, %v7126_v23  ;;  %v4016_v24 = vmul.f32 %v8083_v55, %v3600_v22  ;;  %v3603_v60 = vadd.f32 %v5443_v13, %v3023_v32  ;;  %v3015_v28 = vadd.f32 %v3014_v56, %v8084_v29 }
 0x1f5   : > { %v5412_v16 = vpop.f32.mrf.mxu1  ;;  %v3492_v4 = vpop.f32.mrf.mxu0 }
 0x1f6   : > { %v4904_v37 = vpack.c.bf16 %v7361_v20, %v7361_v20  ;;  %v7375_v23 = vadd.f32 %v4016_v24, %v7135_v27  ;;  %v4019_v13 = vmul.f32 %v8085_v47, %v3603_v60  ;;  %v3601_v1 = vadd.f32 %v3476_v40, %v3015_v28  ;;  %v8087_v27 = vld [vmem:[#allocation43_spill] sm:$0xff] }
 0x1f7   : > { %v3036_v12 = vadd.f32 %v5412_v16, %v8086_v50  ;;  %v3027_v17 = vpop.f32.mrf.mxu1  ;;  %v5450_v63 = vpop.f32.mrf.mxu0 }
 0x1f8   : > { %4416 = vst.msk [vmem:[%s7370_s30 + $0x8] sm:$0xf] %vm454_vm1, %v4904_v37  ;;  %v4902_v3 = vpack.c.bf16 %v7375_v23, %v7375_v23  ;;  %v7384_v35 = vadd.f32 %v4019_v13, %v7142_v51  ;;  %v3028_v22 = vadd.f32 %v3027_v17, %v7129_v38  ;;  %v4017_v32 = vmul.f32 %v8087_v27, %v3601_v1  ;;  %v8088_v51 = vld [vmem:[#allocation53_spill] sm:$0xff] }
 0x1f9   : > { %v3606_v56 = vadd.f32 %v5446_v14, %v3036_v12  ;;  %v5413_v55 = vpop.f32.mrf.mxu1  ;;  %v3505_v40 = vpop.f32.mrf.mxu0  ;;  %v8089_v14 = vld [vmem:[#allocation48_spill] sm:$0xff] }
 0x1fa   : > { %4414 = vst.msk [vmem:[%s7370_s30] sm:$0xf] %vm454_vm1, %v4902_v3  ;;  %v4905_v28 = vpack.c.bf16 %v7384_v35, %v7384_v35  ;;  %v3604_v24 = vadd.f32 %v3489_v31, %v3028_v22  ;;  %v3039_v60 = vadd.f32 %v5413_v55, %v7138_v61  ;;  %v7394_v29 = vadd.f32 %v4017_v32, %v7151_v8 }
 0x1fb   : > { %v4022_v16 = vmul.f32 %v8088_v51, %v3606_v56  ;;  %v3030_v37 = vpop.f32.mrf.mxu1  ;;  %v5451_v38 = vpop.f32.mrf.mxu0  ;;  %v4080_v31 = vsel %vm880_vm3, %v7375_v23, 0.0  ;;  %v4083_v32 = vsel %vm880_vm3, %v7361_v20, 0.0  ;;  %v8091_v51 = vld [vmem:[#allocation3_spill] sm:$0xff] }
 0x1fc   : > { %4417 = vst.msk [vmem:[%s7370_s30 + $0xc] sm:$0xf] %vm454_vm1, %v4905_v28  ;;  %v4020_v47 = vmul.f32 %v8089_v14, %v3604_v24  ;;  %v3607_v13 = vadd.f32 %v5447_v39, %v3039_v60  ;;  %v3031_v1 = vadd.f32 %v3030_v37, %v7145_v15  ;;  %v4081_v61 = vsel %vm880_vm3, %v7394_v29, 0.0  ;;  %v8090_v15 = vld [vmem:[#allocation19_spill] sm:$0xff] }
 0x1fd   : > { %v4903_v8 = vpack.c.bf16 %v7394_v29, %v7394_v29  ;;  %v7408_v50 = vadd.f32 %v4022_v16, %v7160_v2  ;;  %v5416_v12 = vpop.f32.mrf.mxu1  ;;  %v3508_v17 = vpop.f32.mrf.mxu0  ;;  %v4082_v3 = vadd.f32 %v4081_v61, %v4080_v31 }
 0x1fe   : > { %v7411_v39 = vadd.f32 %v4020_v47, %v7167_v62  ;;  %v4023_v22 = vmul.f32 %v8090_v15, %v3607_v13  ;;  %v3605_v27 = vadd.f32 %v3492_v4, %v3031_v1  ;;  %v3052_v56 = vadd.f32 %v5416_v12, %v7154_v10 }
 0x1ff   : > { %4415 = vst.msk [vmem:[%s7370_s30 + $0x4] sm:$0xf] %vm454_vm1, %v4903_v8  ;;  %v4908_v2 = vpack.c.bf16 %v7408_v50, %v7408_v50  ;;  %v3043_v55 = vpop.f32.mrf.mxu1  ;;  %v5454_v28 = vpop.f32.mrf.mxu0  ;;  %v4084_v24 = vadd.f32 %v4083_v32, %v4082_v3  ;;  %v4085_v4 = vsel %vm880_vm3, %v7384_v35, 0.0  ;;  %v8092_v8 = vld [vmem:[#allocation8_spill] sm:$0xff] }
 0x200   : > { %v4906_v62 = vpack.c.bf16 %v7411_v39, %v7411_v39  ;;  %v7424_v60 = vadd.f32 %v4023_v22, %v7176_v25  ;;  %v4021_v16 = vmul.f32 %v8091_v51, %v3605_v27  ;;  %v3610_v37 = vadd.f32 %v5450_v63, %v3052_v56 }
 0x201   : > { %4420 = vst.msk [vmem:[%s7370_s30 + $0x18] sm:$0xf] %vm454_vm1, %v4908_v2  ;;  %v3044_v10 = vadd.f32 %v3043_v55, %v7163_v46  ;;  %v5417_v14 = vpop.f32.mrf.mxu1  ;;  %v3521_v47 = vpop.f32.mrf.mxu0  ;;  %v4086_v13 = vadd.f32 %v4085_v4, %v4084_v24  ;;  %v4087_v31 = vsel %vm880_vm3, %v7411_v39, 0.0  ;;  %v8093_v2 = vld [vmem:[#allocation11_spill] sm:$0xff]  ;;  %v4091_v51 = vsel %vm880_vm3, %v7408_v50, 0.0 }
 0x202   : > { %4418 = vst.msk [vmem:[%s7370_s30 + $0x10] sm:$0xf] %vm454_vm1, %v4906_v62  ;;  %v4909_v25 = vpack.c.bf16 %v7424_v60, %v7424_v60  ;;  %v3055_v1 = vadd.f32 %v5417_v14, %v7170_v53  ;;  %v7440_v61 = vadd.f32 %v4021_v16, %v7185_v41  ;;  %v4026_v63 = vmul.f32 %v8092_v8, %v3610_v37  ;;  %v8094_v62 = vld [vmem:[#allocation9_spill] sm:$0xff] }
 0x203   : > { %v3608_v12 = vadd.f32 %v3505_v40, %v3044_v10  ;;  %v3046_v46 = vpop.f32.mrf.mxu1  ;;  %v5455_v3 = vpop.f32.mrf.mxu0  ;;  %v4088_v15 = vadd.f32 %v4087_v31, %v4086_v13 }
 0x204   : > { %4421 = vst.msk [vmem:[%s7370_s30 + $0x1c] sm:$0xf] %vm454_vm1, %v4909_v25  ;;  %v3611_v22 = vadd.f32 %v5451_v38, %v3055_v1  ;;  %v3047_v27 = vadd.f32 %v3046_v46, %v7179_v33  ;;  %v4089_v53 = vsel %vm880_vm3, %v7440_v61, 0.0  ;;  %v4907_v32 = vpack.c.bf16 %v7440_v61, %v7440_v61 }
 0x205   : > { %v7451_v41 = vadd.f32 %v4026_v63, %v7192_v5  ;;  %v4024_v40 = vmul.f32 %v8093_v2, %v3608_v12  ;;  %v5420_v56 = vpop.f32.mrf.mxu1  ;;  %v3524_v55 = vpop.f32.mrf.mxu0  ;;  %v4090_v24 = vadd.f32 %v4089_v53, %v4088_v15  ;;  %v4093_v1 = vsel %vm880_vm3, %v7424_v60, 0.0  ;;  %v8096_v15 = vld [vmem:[#allocation22_spill] sm:$0xff] }
 0x206   : > { %v4027_v4 = vmul.f32 %v8094_v62, %v3611_v22  ;;  %v3609_v38 = vadd.f32 %v3508_v17, %v3047_v27  ;;  %v3068_v33 = vadd.f32 %v5420_v56, %v7188_v49  ;;  %4419 = vst.msk [vmem:[%s7370_s30 + $0x14] sm:$0xf] %vm454_vm1, %v4907_v32  ;;  %v8095_v17 = vld [vmem:[#allocation56_spill] sm:$0xff]  ;;  %v8097_v62 = vld [vmem:[#allocation61_spill] sm:$0xff] }
 0x207   : > { %v4912_v5 = vpack.c.bf16 %v7451_v41, %v7451_v41  ;;  %v7463_v16 = vadd.f32 %v4024_v40, %v7201_v11  ;;  %v3059_v37 = vpop.f32.mrf.mxu1  ;;  %v5458_v10 = vpop.f32.mrf.mxu0  ;;  %v4092_v14 = vadd.f32 %v4091_v51, %v4090_v24 }
 0x208   : > { %v7466_v13 = vadd.f32 %v4027_v4, %v7210_v7  ;;  %v4025_v49 = vmul.f32 %v8095_v17, %v3609_v38  ;;  %v3614_v25 = vadd.f32 %v5454_v28, %v3068_v33  ;;  %v3060_v31 = vadd.f32 %v3059_v37, %v7195_v45 }
 0x209   : > { %4424 = vst.msk [vmem:[%s7370_s30 + $0x28] sm:$0xf] %vm454_vm1, %v4912_v5  ;;  %v4910_v11 = vpack.c.bf16 %v7463_v16, %v7463_v16  ;;  %v5421_v8 = vpop.f32.mrf.mxu1  ;;  %v3537_v63 = vpop.f32.mrf.mxu0  ;;  %v4094_v12 = vadd.f32 %v4093_v1, %v4092_v14  ;;  %v4095_v28 = vsel %vm880_vm3, %v7463_v16, 0.0  ;;  %v4099_v37 = vsel %vm880_vm3, %v7451_v41, 0.0 }
 0x20a   : > { %v4913_v7 = vpack.c.bf16 %v7466_v13, %v7466_v13  ;;  %v7479_v46 = vadd.f32 %v4025_v49, %v7217_v43  ;;  %v4030_v22 = vmul.f32 %v8096_v15, %v3614_v25  ;;  %v3612_v27 = vadd.f32 %v3521_v47, %v3060_v31  ;;  %v8098_v25 = vld [vmem:[#allocation5_spill] sm:$0xff] }
 0x20b   : > { %4422 = vst.msk [vmem:[%s7370_s30 + $0x20] sm:$0xf] %vm454_vm1, %v4910_v11  ;;  %v3071_v45 = vadd.f32 %v5421_v8, %v7204_v0  ;;  %v3062_v53 = vpop.f32.mrf.mxu1  ;;  %v5459_v32 = vpop.f32.mrf.mxu0  ;;  %v4096_v2 = vadd.f32 %v4095_v28, %v4094_v12  ;;  %v4101_v11 = vsel %vm880_vm3, %v7466_v13, 0.0 }
 0x20c   : > { %4425 = vst.msk [vmem:[%s7370_s30 + $0x2c] sm:$0xf] %vm454_vm1, %v4913_v7  ;;  %v4097_v43 = vsel %vm880_vm3, %v7479_v46, 0.0  ;;  %v4911_v40 = vpack.c.bf16 %v7479_v46, %v7479_v46  ;;  %v3063_v56 = vadd.f32 %v3062_v53, %v7213_v34  ;;  %v7495_v24 = vadd.f32 %v4030_v22, %v7226_v52 }
 0x20d   : > { %v4028_v47 = vmul.f32 %v8097_v62, %v3612_v27  ;;  %v3615_v4 = vadd.f32 %v5455_v3, %v3071_v45  ;;  %v5424_v0 = vpop.f32.mrf.mxu1  ;;  %v3540_v38 = vpop.f32.mrf.mxu0  ;;  %v4098_v33 = vadd.f32 %v4097_v43, %v4096_v2  ;;  %v8100_v2 = vld [vmem:[#allocation34_spill] sm:$0xff] }
 0x20e   : > { %4423 = vst.msk [vmem:[%s7370_s30 + $0x24] sm:$0xf] %vm454_vm1, %v4911_v40  ;;  %v3613_v51 = vadd.f32 %v3524_v55, %v3063_v56  ;;  %v3084_v5 = vadd.f32 %v5424_v0, %v7220_v57  ;;  %v4916_v34 = vpack.c.bf16 %v7495_v24, %v7495_v24  ;;  %v8101_v56 = vld [vmem:[#allocation66_spill] sm:$0xff] }
 0x20f   : > { %v7506_v52 = vadd.f32 %v4028_v47, %v7235_v36  ;;  %v4031_v3 = vmul.f32 %v7133_v58, %v3615_v4  ;;  %v3075_v14 = vpop.f32.mrf.mxu1  ;;  %v5462_v17 = vpop.f32.mrf.mxu0  ;;  %v4100_v49 = vadd.f32 %v4099_v37, %v4098_v33  ;;  %v8102_v33 = vld [vmem:[#allocation38_spill] sm:$0xff] }
 0x210   : > { %v4029_v1 = vmul.f32 %v8098_v25, %v3613_v51  ;;  %v3618_v55 = vadd.f32 %v5458_v10, %v3084_v5  ;;  %v3076_v57 = vadd.f32 %v3075_v14, %v7229_v26  ;;  %4428 = vst.msk [vmem:[%s7370_s30 + $0x38] sm:$0xf] %vm454_vm1, %v4916_v34  ;;  %v4107_v5 = vsel %vm880_vm3, %v7495_v24, 0.0  ;;  %v8103_v37 = vld [vmem:[#allocation18_spill] sm:$0xff] }
 0x211   : > { %v4914_v36 = vpack.c.bf16 %v7506_v52, %v7506_v52  ;;  %v7518_v31 = vadd.f32 %v4031_v3, %v7242_v54  ;;  %v5425_v58 = vpop.f32.mrf.mxu1  ;;  %v3553_v8 = vpop.f32.mrf.mxu0  ;;  %v4102_v12 = vadd.f32 %v4101_v11, %v4100_v49  ;;  %v4103_v28 = vsel %vm880_vm3, %v7506_v52, 0.0  ;;  %v8104_v3 = vld [vmem:[#allocation41_spill] sm:$0xff] }
 0x212   : > { %v7521_v7 = vadd.f32 %v4029_v1, %v7251_v30  ;;  %v4034_v26 = vmul.f32 %v7158_v21, %v3618_v55  ;;  %v3616_v10 = vadd.f32 %v3537_v63, %v3076_v57  ;;  %v3087_v15 = vadd.f32 %v5425_v58, %v7238_v59  ;;  %v8099_v63 = vld [vmem:[#allocation39_spill] sm:$0xff] }
 0x213   : > { %4426 = vst.msk [vmem:[%s7370_s30 + $0x30] sm:$0xf] %vm454_vm1, %v4914_v36  ;;  %v4917_v54 = vpack.c.bf16 %v7518_v31, %v7518_v31  ;;  %v3078_v22 = vpop.f32.mrf.mxu1  ;;  %v5463_v27 = vpop.f32.mrf.mxu0  ;;  %v4104_v45 = vadd.f32 %v4103_v28, %v4102_v12  ;;  %v8105_v57 = vld [vmem:[#allocation23_spill] sm:$0xff]  ;;  %v4109_v36 = vsel %vm880_vm3, %v7518_v31, 0.0  ;;  %v8106_v12 = vld [vmem:[#allocation24_spill] sm:$0xff] }
 0x214   : > { %v4105_v30 = vsel %vm880_vm3, %v7521_v7, 0.0  ;;  %v4915_v21 = vpack.c.bf16 %v7521_v7, %v7521_v7  ;;  %v7536_v53 = vadd.f32 %v4034_v26, %v8099_v63  ;;  %v4032_v43 = vmul.f32 %v8100_v2, %v3616_v10  ;;  %v8107_v10 = vld [vmem:[#allocation35_spill] sm:$0xff] }
 0x215   : > { %4429 = vst.msk [vmem:[%s7370_s30 + $0x3c] sm:$0xf] %vm454_vm1, %v4917_v54  ;;  %v3619_v40 = vadd.f32 %v5459_v32, %v3087_v15  ;;  %v3079_v59 = vadd.f32 %v3078_v22, %v8101_v56  ;;  %v5428_v62 = vpop.f32.mrf.mxu1  ;;  %v3556_v47 = vpop.f32.mrf.mxu0  ;;  %v4106_v4 = vadd.f32 %v4105_v30, %v4104_v45  ;;  %v8108_v22 = vld [vmem:[#allocation60_spill] sm:$0xff] }
 0x216   : > { %4427 = vst.msk [vmem:[%s7370_s30 + $0x34] sm:$0xf] %vm454_vm1, %v4915_v21  ;;  %v4920_v0 = vpack.c.bf16 %v7536_v53, %v7536_v53  ;;  %v3100_v51 = vadd.f32 %v5428_v62, %v8102_v33  ;;  %v7550_v34 = vadd.f32 %v4032_v43, %v8103_v37  ;;  %v8109_v30 = vld [vmem:[#allocation40_spill] sm:$0xff]  ;;  %v8110_v62 = vld [vmem:[#allocation25_spill] sm:$0xff] }
 0x217   : > { %v4035_v32 = vmul.f32 %v8104_v3, %v3619_v40  ;;  %v3617_v14 = vadd.f32 %v3540_v38, %v3079_v59  ;;  %v3091_v49 = vpop.f32.mrf.mxu1  ;;  %v5466_v25 = vpop.f32.mrf.mxu0  ;;  %v4108_v1 = vadd.f32 %v4107_v5, %v4106_v4  ;;  %v8112_v5 = vld [vmem:[#allocation36_spill] sm:$0xff] }
 0x218   : > { %4432 = vst.msk [vmem:[%s7370_s30 + $0x48] sm:$0xf] %vm454_vm1, %v4920_v0  ;;  %v3622_v55 = vadd.f32 %v5462_v17, %v3100_v51  ;;  %v3092_v11 = vadd.f32 %v3091_v49, %v8105_v57  ;;  %v4918_v58 = vpack.c.bf16 %v7550_v34, %v7550_v34  ;;  %v4111_v63 = vsel %vm880_vm3, %v7550_v34, 0.0 }
 0x219   : > { %v7561_v26 = vadd.f32 %v4035_v32, %v8106_v12  ;;  %v4033_v38 = vmul.f32 %v8107_v10, %v3617_v14  ;;  %v5429_v28 = vpop.f32.mrf.mxu1  ;;  %v3569_v54 = vpop.f32.mrf.mxu0  ;;  %v4110_v15 = vadd.f32 %v4109_v36, %v4108_v1  ;;  %v8114_v36 = vld [vmem:[#allocation42_spill] sm:$0xff] }
 0x21a   : > { %v4038_v45 = vmul.f32 %v8108_v22, %v3622_v55  ;;  %v3620_v17 = vadd.f32 %v3553_v8, %v3092_v11  ;;  %v3103_v21 = vadd.f32 %v5429_v28, %v8109_v30  ;;  %4430 = vst.msk [vmem:[%s7370_s30 + $0x40] sm:$0xf] %vm454_vm1, %v4918_v58  ;;  %v8111_v8 = vld [vmem:[#allocation46_spill] sm:$0xff]  ;;  %v8113_v55 = vld [vmem:[#allocation63_spill] sm:$0xff] }
 0x21b   : > { %v4921_v2 = vpack.c.bf16 %v7561_v26, %v7561_v26  ;;  %v7573_v43 = vadd.f32 %v4033_v38, %v7281_v18  ;;  %v3094_v40 = vpop.f32.mrf.mxu1  ;;  %v5467_v56 = vpop.f32.mrf.mxu0  ;;  %v4112_v59 = vadd.f32 %v4111_v63, %v4110_v15  ;;  %v4117_v15 = vsel %vm880_vm3, %v7561_v26, 0.0 }
 0x21c   : > { %v7576_v4 = vadd.f32 %v4038_v45, %v8110_v62  ;;  %v4036_v0 = vmul.f32 %v8111_v8, %v3620_v17  ;;  %v3623_v33 = vadd.f32 %v5463_v27, %v3103_v21  ;;  %v3095_v37 = vadd.f32 %v3094_v40, %v8112_v5  ;;  %v8116_v45 = vld [vmem:[#allocation13_spill] sm:$0xff]  ;;  %v8117_v40 = vld [vmem:[#allocation26_spill] sm:$0xff] }
 0x21d   : > { %4433 = vst.msk [vmem:[%s7370_s30 + $0x4c] sm:$0xf] %vm454_vm1, %v4921_v2  ;;  %v4113_v51 = vsel %vm880_vm3, %v7573_v43, 0.0  ;;  %v4919_v18 = vpack.c.bf16 %v7573_v43, %v7573_v43  ;;  %v5432_v3 = vpop.f32.mrf.mxu1  ;;  %v3572_v32 = vpop.f32.mrf.mxu0  ;;  %v4115_v27 = vsel %vm880_vm3, %v7536_v53, 0.0 }
 0x21e   : > { %v4114_v14 = vadd.f32 %v4113_v51, %v4112_v59  ;;  %v4924_v49 = vpack.c.bf16 %v7576_v4, %v7576_v4  ;;  %v7589_v1 = vadd.f32 %v4036_v0, %v7297_v48  ;;  %v4039_v57 = vmul.f32 %v8113_v55, %v3623_v33  ;;  %v8115_v48 = vld [vmem:[#allocation33_spill] sm:$0xff]  ;;  %v8118_v0 = vld [vmem:[#allocation64_spill] sm:$0xff] }
 0x21f   : > { %4431 = vst.msk [vmem:[%s7370_s30 + $0x44] sm:$0xf] %vm454_vm1, %v4919_v18  ;;  %v3621_v11 = vadd.f32 %v3556_v47, %v3095_v37  ;;  %v3116_v58 = vadd.f32 %v5432_v3, %v8114_v36  ;;  %v3107_v12 = vpop.f32.mrf.mxu1  ;;  %v5470_v21 = vpop.f32.mrf.mxu0  ;;  %v8119_v18 = vld [vmem:[#allocation16_spill] sm:$0xff] }
 0x220   : > { %v4116_v10 = vadd.f32 %v4115_v27, %v4114_v14  ;;  %4436 = vst.msk [vmem:[%s7370_s30 + $0x58] sm:$0xf] %vm454_vm1, %v4924_v49  ;;  %v4922_v38 = vpack.c.bf16 %v7589_v1, %v7589_v1  ;;  %v3108_v28 = vadd.f32 %v3107_v12, %v8115_v48  ;;  %v7605_v22 = vadd.f32 %v4039_v57, %v7303_v6 }
 0x221   : > { %v4037_v17 = vmul.f32 %v8116_v45, %v3621_v11  ;;  %v3626_v47 = vadd.f32 %v5466_v25, %v3116_v58  ;;  %v5433_v30 = vpop.f32.mrf.mxu1  ;;  %v4119_v62 = vsel %vm880_vm3, %v7589_v1, 0.0  ;;  %v3585_v55 = vpop.f32.mrf.mxu0  ;;  %v8121_v11 = vld [vmem:[#allocation47_spill] sm:$0xff] }
 0x222   : > { %v4118_v63 = vadd.f32 %v4117_v15, %v4116_v10  ;;  %4434 = vst.msk [vmem:[%s7370_s30 + $0x50] sm:$0xf] %vm454_vm1, %v4922_v38  ;;  %v3624_v2 = vadd.f32 %v3569_v54, %v3108_v28  ;;  %v3119_v59 = vadd.f32 %v5433_v30, %v8117_v40  ;;  %v4925_v8 = vpack.c.bf16 %v7605_v22, %v7605_v22  ;;  %v8120_v54 = vld [vmem:[#allocation51_spill] sm:$0xff]  ;;  %v8123_v38 = vld [vmem:[#allocation45_spill] sm:$0xff] }
 0x223   : > { %v7616_v6 = vadd.f32 %v4037_v17, %v7310_v42  ;;  %v4042_v25 = vmul.f32 %v8118_v0, %v3626_v47  ;;  %v3110_v33 = vpop.f32.mrf.mxu1  ;;  %v4123_v10 = vsel %vm880_vm3, %v7576_v4, 0.0  ;;  %v8124_v17 = vld [vmem:[#allocation49_spill] sm:$0xff]  ;;  %v4125_v30 = vsel %vm880_vm3, %v7605_v22, 0.0  ;;  %v5471_v0 = vpop.f32.mrf.mxu0 }
 0x224   : > { %v4120_v51 = vadd.f32 %v4119_v62, %v4118_v63  ;;  %v4040_v5 = vmul.f32 %v8119_v18, %v3624_v2  ;;  %v3627_v37 = vadd.f32 %v5467_v56, %v3119_v59  ;;  %v3111_v3 = vadd.f32 %v3110_v33, %v8120_v54  ;;  %4437 = vst.msk [vmem:[%s7370_s30 + $0x5c] sm:$0xf] %vm454_vm1, %v4925_v8  ;;  %v8122_v56 = vld [vmem:[#allocation65_spill] sm:$0xff]  ;;  %v8125_v63 = vld [vmem:[#allocation15_spill] sm:$0xff] }
 0x225   : > { %v4121_v14 = vsel %vm880_vm3, %v7616_v6, 0.0  ;;  %v4923_v49 = vpack.c.bf16 %v7616_v6, %v7616_v6  ;;  %v7628_v42 = vadd.f32 %v4042_v25, %v7318_v9  ;;  %v5436_v27 = vpop.f32.mrf.mxu1  ;;  %v8126_v59 = vld [vmem:[#allocation37_spill] sm:$0xff] }
 0x226   : > { %v4122_v57 = vadd.f32 %v4121_v14, %v4120_v51  ;;  %v7631_v36 = vadd.f32 %v4040_v5, %v8121_v11  ;;  %v4043_v58 = vmul.f32 %v8122_v56, %v3627_v37  ;;  %v3625_v12 = vadd.f32 %v3572_v32, %v3111_v3  ;;  %v4010_v32 = vpop.permute.xlu0 %4009  ;;  %v8127_v51 = vld [vmem:[#allocation28_spill] sm:$0xff]  ;;  %v4014_v14 = vpop.permute.xlu1 %4013 }
 0x227   : > { %4435 = vst.msk [vmem:[%s7370_s30 + $0x54] sm:$0xf] %vm454_vm1, %v4923_v49  ;;  %v4928_v9 = vpack.c.bf16 %v7628_v42, %v7628_v42  ;;  %v3132_v48 = vadd.f32 %v5436_v27, %v8123_v38  ;;  %v3123_v28 = vpop.f32.mrf.mxu1 }
 0x228   : > { %v4124_v15 = vadd.f32 %v4123_v10, %v4122_v57  ;;  %v4926_v45 = vpack.c.bf16 %v7631_v36, %v7631_v36  ;;  %v7644_v47 = vadd.f32 %v4043_v58, %v8124_v17  ;;  %v4041_v2 = vmul.f32 %v8125_v63, %v3625_v12  ;;  %v8128_v57 = vld [vmem:[#allocation29_spill] sm:$0xff]  ;;  %v8129_v12 = vld [vmem:[#allocation44_spill] sm:$0xff]  ;;  %v8132_v63 = vld [vmem:[#allocation27_spill] sm:$0xff] }
 0x229   : > { %4440 = vst.msk [vmem:[%s7370_s30 + $0x68] sm:$0xf] %vm454_vm1, %v4928_v9  ;;  %v3630_v40 = vadd.f32 %v5470_v21, %v3132_v48  ;;  %v3124_v62 = vadd.f32 %v3123_v28, %v8126_v59  ;;  %v5437_v8 = vpop.f32.mrf.mxu1  ;;  %v4127_v5 = vsel %vm880_vm3, %v7631_v36, 0.0  ;;  %v3588_v9 = vpop.f32.mrf.mxu0 }
 0x22a   : > { %v4126_v25 = vadd.f32 %v4125_v30, %v4124_v15  ;;  %4438 = vst.msk [vmem:[%s7370_s30 + $0x60] sm:$0xf] %vm454_vm1, %v4926_v45  ;;  %v4929_v33 = vpack.c.bf16 %v7644_v47, %v7644_v47  ;;  %v3135_v18 = vadd.f32 %v5437_v8, %v8127_v51  ;;  %v7660_v37 = vadd.f32 %v4041_v2, %v7337_v19  ;;  %v8131_v45 = vld [vmem:[#allocation30_spill] sm:$0xff] }
 0x22b   : > { %v3628_v54 = vadd.f32 %v3585_v55, %v3124_v62  ;;  %v4046_v21 = vmul.f32 %v4010_v32, %v3630_v40  ;;  %v3126_v3 = vpop.f32.mrf.mxu1  ;;  %v8130_v55 = vld [vmem:[#allocation50_spill] sm:$0xff]  ;;  %v4131_v15 = vsel %vm880_vm3, %v7628_v42, 0.0  ;;  %v4133_v59 = vsel %vm880_vm3, %v7644_v47, 0.0 }
 0x22c   : > { %v4128_v49 = vadd.f32 %v4127_v5, %v4126_v25  ;;  %4441 = vst.msk [vmem:[%s7370_s30 + $0x6c] sm:$0xf] %vm454_vm1, %v4929_v33  ;;  %v3631_v27 = vadd.f32 %v5471_v0, %v3135_v18  ;;  %v3127_v11 = vadd.f32 %v3126_v3, %v8128_v57  ;;  %v4129_v56 = vsel %vm880_vm3, %v7660_v37, 0.0  ;;  %v8133_v0 = vld [vmem:[#allocation52_spill] sm:$0xff] }
 0x22d   : > { %v4927_v58 = vpack.c.bf16 %v7660_v37, %v7660_v37  ;;  %v4044_v19 = vmul.f32 %v8129_v12, %v3628_v54  ;;  %v4078_v10 = vadd.f32 %v4046_v21, %v8130_v55 }
 0x22e   : > { %v4130_v38 = vadd.f32 %v4129_v56, %v4128_v49  ;;  %v3629_v48 = vadd.f32 %v3588_v9, %v3127_v11  ;;  %v4047_v28 = vmul.f32 %v4014_v14, %v3631_v27 }
 0x22f   : > { %4439 = vst.msk [vmem:[%s7370_s30 + $0x64] sm:$0xf] %vm454_vm1, %v4927_v58  ;;  %v4076_v17 = vadd.f32 %v4044_v19, %v8131_v45  ;;  %v4932_v32 = vpack.c.bf16 %v4078_v10, %v4078_v10  ;;  %v4139_v21 = vsel %vm880_vm3, %v4078_v10, 0.0 }
 0x230   : > { %v4132_v30 = vadd.f32 %v4131_v15, %v4130_v38  ;;  %v4045_v2 = vmul.f32 %v8132_v63, %v3629_v48  ;;  %v4079_v40 = vadd.f32 %v4047_v28, %v7351_v44 }
 0x231   : > { %v4930_v62 = vpack.c.bf16 %v4076_v17, %v4076_v17  ;;  %4444 = vst.msk [vmem:[%s7370_s30 + $0x78] sm:$0xf] %vm454_vm1, %v4932_v32  ;;  %v4135_v51 = vsel %vm880_vm3, %v4076_v17, 0.0 }
 0x232   : > { %v4134_v8 = vadd.f32 %v4133_v59, %v4132_v30  ;;  %v4077_v25 = vadd.f32 %v4045_v2, %v8133_v0  ;;  %v4933_v33 = vpack.c.bf16 %v4079_v40, %v4079_v40  ;;  %v4141_v14 = vsel %vm880_vm3, %v4079_v40, 0.0 }
 0x233   : > { %4442 = vst.msk [vmem:[%s7370_s30 + $0x70] sm:$0xf] %vm454_vm1, %v4930_v62 }
 0x234   : > { %v4136_v18 = vadd.f32 %v4135_v51, %v4134_v8  ;;  %v4137_v5 = vsel %vm880_vm3, %v4077_v25, 0.0  ;;  %v4931_v54 = vpack.c.bf16 %v4077_v25, %v4077_v25  ;;  %4445 = vst.msk [vmem:[%s7370_s30 + $0x7c] sm:$0xf] %vm454_vm1, %v4933_v33 }
 0x236   : > { %v4138_v44 = vadd.f32 %v4137_v5, %v4136_v18  ;;  %4443 = vst.msk [vmem:[%s7370_s30 + $0x74] sm:$0xf] %vm454_vm1, %v4931_v54 }
 0x238   : > { %v4140_v3 = vadd.f32 %v4139_v21, %v4138_v44 }
 0x23a   : > { %v4142_v49 = vadd.f32 %v4141_v14, %v4140_v3 }
 0x23c   : > { %v4143_v27 = vrot.slane %v4142_v49, 4 }
 0x23e   : > { %v4144_v57 = vadd.f32 %v4143_v27, %v4142_v49 }
 0x240   : > { %v4145_v11 = vrot.slane %v4144_v57, 2 }
 0x242   : > { %v4146_v56 = vadd.f32 %v4145_v11, %v4144_v57 }
 0x244   : > { %v4147_v58 = vrot.slane %v4146_v56, 1 }
 0x246   : > { %v4148_v12 = vadd.f32 %v4147_v58, %v4146_v56 }
 0x248   : > { %v4149_v19 = vmul.f32 0.00390625, %v4148_v12 }
 0x24a   : > { %4183 = vst.msk [vmem:[%s7697_s10] sm:$0x1] %vm4182_vm5, %v4149_v19  ;;  %v4159_v55 = vsub.f32 %v7479_v46, %v4149_v19  ;;  %v4162_v9 = vsub.f32 %v7506_v52, %v4149_v19  ;;  %v7704_v38 = vsub.f32 %v7521_v7, %v4149_v19  ;;  %v7707_v48 = vsub.f32 %v7495_v24, %v4149_v19 }
 0x24b   : > { %v7710_v28 = vsub.f32 %v7518_v31, %v4149_v19  ;;  %v7713_v15 = vsub.f32 %v7550_v34, %v4149_v19  ;;  %v7716_v45 = vsub.f32 %v7573_v43, %v4149_v19  ;;  %v7719_v32 = vsub.f32 %v7536_v53, %v4149_v19 }
 0x24c   : > { %v7722_v46 = vsub.f32 %v7561_v26, %v4149_v19  ;;  %v7725_v52 = vsub.f32 %v7589_v1, %v4149_v19  ;;  %v7728_v24 = vsub.f32 %v7616_v6, %v4149_v19  ;;  %v7731_v31 = vsub.f32 %v7576_v4, %v4149_v19 }
 0x24d   : > { %v7734_v7 = vsub.f32 %v7605_v22, %v4149_v19  ;;  %v7737_v34 = vsub.f32 %v7631_v36, %v4149_v19  ;;  %v7740_v53 = vsub.f32 %v7660_v37, %v4149_v19  ;;  %v7743_v26 = vsub.f32 %v7628_v42, %v4149_v19 }
 0x24e   : > { %v7746_v43 = vsub.f32 %v7644_v47, %v4149_v19  ;;  %v7748_v1 = vsub.f32 %v4076_v17, %v4149_v19  ;;  %v7750_v6 = vsub.f32 %v4077_v25, %v4149_v19  ;;  %v7752_v4 = vsub.f32 %v4078_v10, %v4149_v19 }
 0x24f   : > { %v7754_v22 = vsub.f32 %v4079_v40, %v4149_v19  ;;  %v4150_v36 = vsub.f32 %v7375_v23, %v4149_v19  ;;  %v4151_v30 = vsub.f32 %v7394_v29, %v4149_v19  ;;  %v4152_v37 = vsub.f32 %v7361_v20, %v4149_v19 }
 0x250   : > { %v4153_v42 = vsub.f32 %v7384_v35, %v4149_v19  ;;  %v4154_v47 = vsub.f32 %v7411_v39, %v4149_v19  ;;  %v4155_v59 = vsub.f32 %v7440_v61, %v4149_v19  ;;  %v4156_v23 = vsub.f32 %v7408_v50, %v4149_v19 }
 0x251   : > { %v4184_v63 = vmul.f32 %v4150_v36, %v4150_v36  ;;  %v4185_v2 = vmul.f32 %v4151_v30, %v4151_v30  ;;  %v4186_v17 = vmul.f32 %v4152_v37, %v4152_v37  ;;  %v4157_v35 = vsub.f32 %v7424_v60, %v4149_v19 }
 0x252   : > { %v4187_v62 = vmul.f32 %v4153_v42, %v4153_v42  ;;  %v4188_v29 = vmul.f32 %v4154_v47, %v4154_v47  ;;  %v4189_v25 = vmul.f32 %v4155_v59, %v4155_v59  ;;  %v4158_v61 = vsub.f32 %v7463_v16, %v4149_v19 }
 0x253   : > { %v4216_v10 = vsel %vm880_vm3, %v4184_v63, 0.0  ;;  %v4217_v40 = vsel %vm880_vm3, %v4185_v2, 0.0  ;;  %v4219_v20 = vsel %vm880_vm3, %v4186_v17, 0.0  ;;  %v4190_v51 = vmul.f32 %v4156_v23, %v4156_v23 }
 0x254   : > { %v4218_v8 = vadd.f32 %v4217_v40, %v4216_v10  ;;  %v4221_v39 = vsel %vm880_vm3, %v4187_v62, 0.0  ;;  %v4223_v18 = vsel %vm880_vm3, %v4188_v29, 0.0  ;;  %v4191_v54 = vmul.f32 %v4157_v35, %v4157_v35 }
 0x255   : > { %v4225_v44 = vsel %vm880_vm3, %v4189_v25, 0.0  ;;  %v4160_v21 = vsub.f32 %v7451_v41, %v4149_v19  ;;  %v4192_v3 = vmul.f32 %v4158_v61, %v4158_v61  ;;  %v4227_v14 = vsel %vm880_vm3, %v4190_v51, 0.0 }
 0x256   : > { %v4220_v0 = vadd.f32 %v4219_v20, %v4218_v8  ;;  %v4161_v49 = vsub.f32 %v7466_v13, %v4149_v19  ;;  %v4193_v27 = vmul.f32 %v4159_v55, %v4159_v55  ;;  %v4229_v57 = vsel %vm880_vm3, %v4191_v54, 0.0 }
 0x257   : > { %v4194_v11 = vmul.f32 %v4160_v21, %v4160_v21  ;;  %v4231_v56 = vsel %vm880_vm3, %v4192_v3, 0.0  ;;  %v4196_v37 = vmul.f32 %v4162_v9, %v4162_v9  ;;  %v4197_v63 = vmul.f32 %v7704_v38, %v7704_v38 }
 0x258   : > { %v4222_v33 = vadd.f32 %v4221_v39, %v4220_v0  ;;  %v4195_v12 = vmul.f32 %v4161_v49, %v4161_v49  ;;  %v4233_v36 = vsel %vm880_vm3, %v4193_v27, 0.0  ;;  %v4198_v55 = vmul.f32 %v7707_v48, %v7707_v48 }
 0x259   : > { %v4235_v41 = vsel %vm880_vm3, %v4194_v11, 0.0  ;;  %v4239_v2 = vsel %vm880_vm3, %v4196_v37, 0.0  ;;  %v4199_v17 = vmul.f32 %v7710_v28, %v7710_v28  ;;  %v4241_v9 = vsel %vm880_vm3, %v4197_v63, 0.0 }
 0x25a   : > { %v4224_v5 = vadd.f32 %v4223_v18, %v4222_v33  ;;  %v4237_v13 = vsel %vm880_vm3, %v4195_v12, 0.0  ;;  %v4200_v62 = vmul.f32 %v7713_v15, %v7713_v15  ;;  %v4243_v38 = vsel %vm880_vm3, %v4198_v55, 0.0 }
 0x25b   : > { %v4201_v40 = vmul.f32 %v7716_v45, %v7716_v45  ;;  %v4245_v48 = vsel %vm880_vm3, %v4199_v17, 0.0  ;;  %v4202_v23 = vmul.f32 %v7719_v32, %v7719_v32  ;;  %v4203_v20 = vmul.f32 %v7722_v46, %v7722_v46 }
 0x25c   : > { %v4226_v50 = vadd.f32 %v4225_v44, %v4224_v5  ;;  %v4247_v28 = vsel %vm880_vm3, %v4200_v62, 0.0  ;;  %v4204_v35 = vmul.f32 %v7725_v52, %v7725_v52  ;;  %v4205_v39 = vmul.f32 %v7728_v24, %v7728_v24 }
 0x25d   : > { %v4249_v15 = vsel %vm880_vm3, %v4201_v40, 0.0  ;;  %v4251_v45 = vsel %vm880_vm3, %v4202_v23, 0.0  ;;  %v4253_v32 = vsel %vm880_vm3, %v4203_v20, 0.0  ;;  %v4206_v61 = vmul.f32 %v7731_v31, %v7731_v31 }
 0x25e   : > { %v4228_v60 = vadd.f32 %v4227_v14, %v4226_v50  ;;  %v4255_v46 = vsel %vm880_vm3, %v4204_v35, 0.0  ;;  %v4207_v18 = vmul.f32 %v7734_v7, %v7734_v7  ;;  %v4257_v52 = vsel %vm880_vm3, %v4205_v39, 0.0 }
 0x25f   : > { %v4208_v54 = vmul.f32 %v7737_v34, %v7737_v34  ;;  %v4259_v24 = vsel %vm880_vm3, %v4206_v61, 0.0  ;;  %v4209_v50 = vmul.f32 %v7740_v53, %v7740_v53  ;;  %v4210_v3 = vmul.f32 %v7743_v26, %v7743_v26 }
 0x260   : > { %v4230_v16 = vadd.f32 %v4229_v57, %v4228_v60  ;;  %v4261_v31 = vsel %vm880_vm3, %v4207_v18, 0.0  ;;  %v4211_v60 = vmul.f32 %v7746_v43, %v7746_v43  ;;  %v4212_v27 = vmul.f32 %v7748_v1, %v7748_v1 }
 0x261   : > { %v4263_v7 = vsel %vm880_vm3, %v4208_v54, 0.0  ;;  %v4265_v34 = vsel %vm880_vm3, %v4209_v50, 0.0  ;;  %v4267_v53 = vsel %vm880_vm3, %v4210_v3, 0.0  ;;  %v4215_v12 = vmul.f32 %v7754_v22, %v7754_v22 }
 0x262   : > { %v4232_v58 = vadd.f32 %v4231_v56, %v4230_v16  ;;  %v4213_v16 = vmul.f32 %v7750_v6, %v7750_v6  ;;  %v4269_v26 = vsel %vm880_vm3, %v4211_v60, 0.0  ;;  %v4214_v56 = vmul.f32 %v7752_v4, %v7752_v4 }
 0x263   : > { %v4271_v43 = vsel %vm880_vm3, %v4212_v27, 0.0  ;;  %v4277_v6 = vsel %vm880_vm3, %v4215_v12, 0.0 }
 0x264   : > { %v4234_v30 = vadd.f32 %v4233_v36, %v4232_v58  ;;  %v4273_v1 = vsel %vm880_vm3, %v4213_v16, 0.0 }
 0x266   : > { %v4236_v42 = vadd.f32 %v4235_v41, %v4234_v30  ;;  %v4275_v30 = vsel %vm880_vm3, %v4214_v56, 0.0 }
 0x268   : > { %v4238_v19 = vadd.f32 %v4237_v13, %v4236_v42 }
 0x26a   : > { %v4240_v47 = vadd.f32 %v4239_v2, %v4238_v19 }
 0x26c   : > { %v4242_v59 = vadd.f32 %v4241_v9, %v4240_v47 }
 0x26e   : > { %v4244_v10 = vadd.f32 %v4243_v38, %v4242_v59 }
 0x270   : > { %v4246_v8 = vadd.f32 %v4245_v48, %v4244_v10 }
 0x272   : > { %v4248_v29 = vadd.f32 %v4247_v28, %v4246_v8 }
 0x274   : > { %v4250_v0 = vadd.f32 %v4249_v15, %v4248_v29 }
 0x276   : > { %v4252_v25 = vadd.f32 %v4251_v45, %v4250_v0 }
 0x278   : > { %v4254_v33 = vadd.f32 %v4253_v32, %v4252_v25 }
 0x27a   : > { %v4256_v51 = vadd.f32 %v4255_v46, %v4254_v33 }
 0x27c   : > { %v4258_v5 = vadd.f32 %v4257_v52, %v4256_v51 }
 0x27e   : > { %v4260_v44 = vadd.f32 %v4259_v24, %v4258_v5 }
 0x280   : > { %v4262_v21 = vadd.f32 %v4261_v31, %v4260_v44 }
 0x282   : > { %v4264_v14 = vadd.f32 %v4263_v7, %v4262_v21 }
 0x284   : > { %v4266_v49 = vadd.f32 %v4265_v34, %v4264_v14 }
 0x286   : > { %v4268_v57 = vadd.f32 %v4267_v53, %v4266_v49 }
 0x288   : > { %v4270_v11 = vadd.f32 %v4269_v26, %v4268_v57 }
 0x28a   : > { %v4272_v58 = vadd.f32 %v4271_v43, %v4270_v11 }
 0x28c   : > { %v4274_v36 = vadd.f32 %v4273_v1, %v4272_v58 }
 0x28e   : > { %v4276_v37 = vadd.f32 %v4275_v30, %v4274_v36 }
 0x290   : > { %v4278_v41 = vadd.f32 %v4277_v6, %v4276_v37 }
 0x292   : > { %v4279_v42 = vrot.slane %v4278_v41, 4 }
 0x294   : > { %v4280_v63 = vadd.f32 %v4279_v42, %v4278_v41 }
 0x296   : > { %v4281_v13 = vrot.slane %v4280_v63, 2 }
 0x298   : > { %v4282_v4 = vadd.f32 %v4281_v13, %v4280_v63 }
 0x29a   : > { %v4283_v19 = vrot.slane %v4282_v4, 1 }
 0x29c   : > { %v4284_v55 = vadd.f32 %v4283_v19, %v4282_v4 }
 0x29e   : > { %4285 = vst.msk [vmem:[%s7697_s10 + $0x1] sm:$0x1] %vm4182_vm5, %v4284_v55 }
 0x29f PF: > { %s17_s21 = sadd.s32 1, %s5625_s21  }
 0x2a0   : > { %p14_p4 = scmp.ge.s32.totalorder %s17_s21, 4  }
 0x2a2   :  { %16 = sbr.rel (!%p14_p4) target bundleno = 1 (0x1), region = 90 }

</bundles_post_ra>
